<compile_context>
chip_gen: v6e
topology: v6e:2x2x1
jax: 0.10.0
libtpu: 0.0.40
codegen_flags: <defaults>
</compile_context>

<pallas_src>
import jax
import jax.numpy as jnp
from jax.experimental import pallas as pl
from jax.experimental.pallas import tpu as pltpu


def embed_nd_kernel(ids_ref, tab_ref, out_ref):
    # ids_ref: (1, TILE_S, n_axes)       position ids for this (batch, seq-tile)
    # tab_ref: (n_axes + 2, 4*Dh)        rows 0..n_axes-1: block-diag omegas
    #                                    (each omega repeated 4x along lanes),
    #                                    row n_axes: cos_mask, row n_axes+1: sin_sign
    # out_ref: (1, TILE_S, 4*Dh)         row-major flatten of (Dh, 2, 2)
    pos = ids_ref[0].astype(jnp.float32)            # (TILE_S, n_axes)
    tab = tab_ref[...]                               # (n_axes+2, 4*Dh)
    n_axes = tab.shape[0] - 2
    tile_s = pos.shape[0]
    d4 = tab.shape[1]

    # angle4[n, k] = pos[n, axis(k)] * omega4[k]; other axes contribute exact zeros.
    # 3 broadcast multiply-adds on the VPU (do NOT use the MXU for K=3).
    angle = jnp.zeros((tile_s, d4), jnp.float32)
    for i in range(n_axes):                          # n_axes is a tiny static constant
        angle = angle + pos[:, i:i + 1] * tab[i:i + 1, :]

    cos_mask = tab[n_axes:n_axes + 1, :]             # 1 on lanes k%4 in {0,3}, else 0
    sin_sign = tab[n_axes + 1:n_axes + 2, :]         # -1 / +1 on lanes k%4 == 1 / 2, else 0
    # Exact per-lane select of [cos, -sin, sin, cos]; EUP redundancy hidden under HBM.
    out_ref[0] = cos_mask * jnp.cos(angle) + sin_sign * jnp.sin(angle)


def make_tables(axes_dim, theta):
    """(n_axes+2, 4*Dh) table: block-diagonal omegas (repeated 4x) + cos/sin lane masks."""
    dh = sum(d // 2 for d in axes_dim)
    d4 = 4 * dh
    n_axes = len(axes_dim)
    omega4 = jnp.zeros((n_axes, d4), jnp.float32)
    off = 0
    for i, ad in enumerate(axes_dim):
        half = ad // 2
        scale = jnp.arange(0, ad, 2, dtype=jnp.float32) / ad
        om = 1.0 / (theta ** scale)                  # (half,)
        omega4 = omega4.at[i, 4 * off:4 * (off + half)].set(jnp.repeat(om, 4))
        off += half
    q = jnp.arange(d4) % 4
    cos_mask = jnp.where((q == 0) | (q == 3), 1.0, 0.0).astype(jnp.float32)
    sin_sign = jnp.where(q == 1, -1.0, jnp.where(q == 2, 1.0, 0.0)).astype(jnp.float32)
    return jnp.concatenate([omega4, cos_mask[None], sin_sign[None]], axis=0)


def embed_nd(ids, *, axes_dim=(16, 56, 56), theta=10000, max_tile_s=2048):
    B, N, n_axes = ids.shape
    assert n_axes == len(axes_dim)
    dh = sum(d // 2 for d in axes_dim)
    d4 = 4 * dh
    tab = make_tables(axes_dim, theta)

    # Sequence tiling: large sublane-aligned tiles; pad N to a tile multiple so the
    # grid always pipelines (and never degenerates to one whole-array block).
    tile_s = min(max_tile_s, ((N + 7) // 8) * 8)
    n_tiles = (N + tile_s - 1) // tile_s
    n_pad = n_tiles * tile_s
    ids_p = ids if n_pad == N else jnp.pad(ids, ((0, 0), (0, n_pad - N), (0, 0)))

    out = pl.pallas_call(
        embed_nd_kernel,
        out_shape=jax.ShapeDtypeStruct((B, n_pad, d4), jnp.float32),
        grid=(B, n_tiles),
        in_specs=[
            pl.BlockSpec((1, tile_s, n_axes), lambda b, s: (b, s, 0)),   # ids tile
            pl.BlockSpec((n_axes + 2, d4), lambda b, s: (0, 0)),         # constant table
        ],
        out_specs=pl.BlockSpec((1, tile_s, d4), lambda b, s: (b, s, 0)), # fused (Dh,2,2) plane
        compiler_params=pltpu.CompilerParams(
            dimension_semantics=("parallel", "parallel")),
    )(ids_p, tab)

    if n_pad != N:
        out = out[:, :N]
    # Metadata-only reshape: lane k = 4*d + 2*i + j  ->  (Dh, 2, 2) rotation matrices.
    emb = out.reshape(B, N, dh, 2, 2)
    return emb[:, None]                              # (B, 1, N, Dh, 2, 2)


# ---------------- pure-JAX reference (straight port of the PyTorch code) ----------------
def rope_ref(pos, dim, theta):
    scale = jnp.arange(0, dim, 2, dtype=jnp.float32) / dim
    omega = 1.0 / (theta ** scale)
    out = jnp.einsum('...n,d->...nd', pos.astype(jnp.float32), omega)
    out = jnp.stack([jnp.cos(out), -jnp.sin(out), jnp.sin(out), jnp.cos(out)], axis=-1)
    return out.reshape(*out.shape[:-1], 2, 2).astype(jnp.float32)


def embed_nd_ref(ids, axes_dim=(16, 56, 56), theta=10000):
    n_axes = ids.shape[-1]
    emb = jnp.concatenate(
        [rope_ref(ids[..., i], axes_dim[i], theta) for i in range(n_axes)], axis=-3)
    return emb[:, None]


if __name__ == "__main__":
    B, N = 2, 256
    axes_dim = (16, 56, 56)
    theta = 10000

    key = jax.random.PRNGKey(0)
    # position-id-like inputs (modest magnitude keeps trig range reduction benign)
    ids = jax.random.uniform(key, (B, N, len(axes_dim)), jnp.float32, 0.0, 32.0)

    out = embed_nd(ids, axes_dim=axes_dim, theta=theta)
    out = jax.block_until_ready(out)

    ref = embed_nd_ref(ids, axes_dim, theta)
    assert out.shape == (B, 1, N, sum(axes_dim) // 2, 2, 2), out.shape
    err = float(jnp.max(jnp.abs(out - ref)))
    assert jnp.allclose(out, ref, atol=1e-4, rtol=1e-4), err
    print("KERNEL_OK")
</pallas_src>

<mosaic_0001>
module attributes {stable_mosaic.version = 11 : i64} {
  func.func @embed_nd_kernel(%arg0: i32, %arg1: i32, %arg2: memref<1x256x3xf32, #tpu.memory_space<vmem>>, %arg3: memref<5x256xf32, #tpu.memory_space<vmem>>, %arg4: memref<1x256x256xf32, #tpu.memory_space<vmem>>) attributes {dimension_semantics = [#tpu.dimension_semantics<parallel>, #tpu.dimension_semantics<parallel>], iteration_bounds = array<i64: 2, 1>, scalar_prefetch = 0 : i64, scratch_operands = 0 : i64, tpu.core_type = #tpu.core_type<tc>, window_params = [{transform_indices = @transform_0, window_bounds = array<i64: 1, 256, 3>}, {pipeline_mode = #tpu.pipeline_mode<synchronous>, transform_indices = @transform_1, window_bounds = array<i64: 5, 256>}, {transform_indices = @transform_2, window_bounds = array<i64: 1, 256, 256>}]} {
    %c0 = arith.constant 0 : index
    %c0_0 = arith.constant 0 : index
    %c0_1 = arith.constant 0 : index
    %0 = vector.load %arg2[%c0, %c0_0, %c0_1] : memref<1x256x3xf32, #tpu.memory_space<vmem>>, vector<1x256x3xf32>
    %1 = vector.shape_cast %0 : vector<1x256x3xf32> to vector<256x3xf32>
    %c0_2 = arith.constant 0 : index
    %c0_3 = arith.constant 0 : index
    %2 = vector.load %arg3[%c0_2, %c0_3] : memref<5x256xf32, #tpu.memory_space<vmem>>, vector<5x256xf32>
    %cst = arith.constant 0.000000e+00 : f32
    %3 = vector.broadcast %cst : f32 to vector<256x256xf32>
    %4 = vector.extract_strided_slice %1 {offsets = [0, 0], sizes = [256, 1], strides = [1, 1]} : vector<256x3xf32> to vector<256x1xf32>
    %5 = vector.extract_strided_slice %2 {offsets = [0, 0], sizes = [1, 256], strides = [1, 1]} : vector<5x256xf32> to vector<1x256xf32>
    %6 = vector.broadcast %4 : vector<256x1xf32> to vector<256x256xf32>
    %7 = vector.broadcast %5 : vector<1x256xf32> to vector<256x256xf32>
    %8 = arith.mulf %6, %7 : vector<256x256xf32>
    %9 = arith.addf %3, %8 : vector<256x256xf32>
    %10 = vector.extract_strided_slice %1 {offsets = [0, 1], sizes = [256, 1], strides = [1, 1]} : vector<256x3xf32> to vector<256x1xf32>
    %11 = vector.extract_strided_slice %2 {offsets = [1, 0], sizes = [1, 256], strides = [1, 1]} : vector<5x256xf32> to vector<1x256xf32>
    %12 = vector.broadcast %10 : vector<256x1xf32> to vector<256x256xf32>
    %13 = vector.broadcast %11 : vector<1x256xf32> to vector<256x256xf32>
    %14 = arith.mulf %12, %13 : vector<256x256xf32>
    %15 = arith.addf %9, %14 : vector<256x256xf32>
    %16 = vector.extract_strided_slice %1 {offsets = [0, 2], sizes = [256, 1], strides = [1, 1]} : vector<256x3xf32> to vector<256x1xf32>
    %17 = vector.extract_strided_slice %2 {offsets = [2, 0], sizes = [1, 256], strides = [1, 1]} : vector<5x256xf32> to vector<1x256xf32>
    %18 = vector.broadcast %16 : vector<256x1xf32> to vector<256x256xf32>
    %19 = vector.broadcast %17 : vector<1x256xf32> to vector<256x256xf32>
    %20 = arith.mulf %18, %19 : vector<256x256xf32>
    %21 = arith.addf %15, %20 : vector<256x256xf32>
    %22 = vector.extract_strided_slice %2 {offsets = [3, 0], sizes = [1, 256], strides = [1, 1]} : vector<5x256xf32> to vector<1x256xf32>
    %23 = vector.extract_strided_slice %2 {offsets = [4, 0], sizes = [1, 256], strides = [1, 1]} : vector<5x256xf32> to vector<1x256xf32>
    %24 = math.cos %21 : vector<256x256xf32>
    %25 = vector.broadcast %22 : vector<1x256xf32> to vector<256x256xf32>
    %26 = arith.mulf %25, %24 : vector<256x256xf32>
    %27 = math.sin %21 : vector<256x256xf32>
    %28 = vector.broadcast %23 : vector<1x256xf32> to vector<256x256xf32>
    %29 = arith.mulf %28, %27 : vector<256x256xf32>
    %30 = arith.addf %26, %29 : vector<256x256xf32>
    %c0_4 = arith.constant 0 : index
    %c0_5 = arith.constant 0 : index
    %c0_6 = arith.constant 0 : index
    %31 = vector.load %arg4[%c0_4, %c0_5, %c0_6] : memref<1x256x256xf32, #tpu.memory_space<vmem>>, vector<1x256x256xf32>
    %32 = vector.shape_cast %31 : vector<1x256x256xf32> to vector<256x256xf32>
    %33 = vector.shape_cast %30 : vector<256x256xf32> to vector<1x256x256xf32>
    tpu.vector_store %arg4[%c0_4, %c0_5, %c0_6], %33 {strides = array<i32>} : memref<1x256x256xf32, #tpu.memory_space<vmem>>, vector<1x256x256xf32>,
    return
  }
  func.func @transform_0(%arg0: i32, %arg1: i32) -> (i32, i32, i32) {
    %c0_i32 = arith.constant 0 : i32
    %c0_i32_0 = arith.constant 0 : i32
    return %arg0, %arg1, %c0_i32 : i32, i32, i32
  }
  func.func @transform_1(%arg0: i32, %arg1: i32) -> (i32, i32) {
    %c0_i32 = arith.constant 0 : i32
    %c0_i32_0 = arith.constant 0 : i32
    %c0_i32_1 = arith.constant 0 : i32
    return %c0_i32, %c0_i32_0 : i32, i32
  }
  func.func @transform_2(%arg0: i32, %arg1: i32) -> (i32, i32, i32) {
    %c0_i32 = arith.constant 0 : i32
    %c0_i32_0 = arith.constant 0 : i32
    return %arg0, %arg1, %c0_i32 : i32, i32, i32
  }
}

</mosaic_0001>

<bundles_post_ra>
// kernel: tpu_custom_call.1
= control target key start
LH: loop header
LB: loop body
LE: loop exit
PB: predicated region body
PF: predicated region fallthrough
CT: control target
= control target key end

     0   :  { %7 = vsyncpa [#allocation3], 0  ;;  %s23071_s0 = inlined_call_operand.vmem [shape: f32[2,256,3], index: 0, kind: input, shape index: {}]   ;;  %s23072_s1 = inlined_call_operand.vmem [shape: f32[5,256], index: 1, kind: input, shape index: {}]   ;;  %s23073_s2 = inlined_call_operand.hbm [shape: f32[2,256,256], index: 2, kind: output, shape index: {}]  }
   0x1   :  { %9 = vsyncpa [#allocation3 + $0x1], 0  ;;  %s15863_s9 = smov 0   ;;  %s15865_s10 = smov 0  }
   0x2   :  { %s15867_s11 = smov 0   ;;  %s15869_s12 = smov 0  }
   0x3   :  { %s15871_s13 = smov 0   ;;  %s15873_s14 = smov 0  }
   0x4 LB: > { %s14647_s15 = sadd.s32 4294967295, %s15834_s14   ;;  %s14648_s16 = sadd.s32 4294967294, %s15834_s14   ;;  %s15834_s14 = sphi %s15873_s14, %s15_s14   ;;  %s15830_s13 = sphi %s15871_s13, %s23364_s13   ;;  %s15826_s12 = sphi %s15869_s12, %s23363_s12   ;;  %s15822_s11 = sphi %s15867_s11, %s23362_s11   ;;  %s15818_s10 = sphi %s15865_s10, %s23361_s10   ;;  %s15814_s9 = sphi %s15863_s9, %s23360_s9  }
   0x5   : > { %s27_s17 = sadd.s32 1, %s15830_s13  ;;  %s85_s18 = sadd.s32 1, %s15822_s11 }
   0x6   : > { %p29_p0 = scmp.ge.s32.totalorder %s27_s17, 2  ;;  %p95_p1 = scmp.ne.s32.totalorder %s15822_s11, %s15818_s10 }
   0x7   : > { %p96_p2 = scmp.eq.s32.totalorder %s14647_s15, 1  ;;  %p101_p3 = scmp.ne.s32.totalorder %s15818_s10, %s15814_s9 }
   0x8   : > { %s23366_s17 = smov (%p29_p0, %s27_s17), 0  ;;  %p102_p5 = scmp.eq.s32.totalorder %s14648_s16, 1 }
   0x9   : > { %p15903_p4 = por %p96_p2, %p95_p1  ;;  %s80_s20 = ssub.s32 %s15830_s13, %s23366_s17 }
   0xa   : > { %p14651_p6 = scmp.ge.s32.totalorder %s15834_s14, 1  ;;  %p83_p7 = scmp.eq.s32.totalorder %s80_s20, 0 }
   0xb   : > { %p15910_p8 = por %p102_p5, %p101_p3  ;;  %p136_p9 = scmp.lt.s32.totalorder %s15834_s14, 3 }
   0xc   : > { %s15916_s22 = scalar_select %p83_p7, %s15822_s11, %s85_s18  }
   0xd   : > { %p137_p10 = pnand %p14651_p6, %p136_p9 }
   0xf   : > { %140 = sbr.rel (%p137_p10) target bundleno = 2114 (0x842), region = 28 }
  0x14   : > { %p163_p11 = scmp.lt.s32.totalorder %s15826_s12, 1  ;;  %v15836_v0 = vmov 0   ;;  %v15837_v33 = vmov 1   ;;  %v367_v34 = vlaneseq  ;;  %v16087_v37 = vld [vmem:[%s23072_s1] sm:$0x1f]  ;;  %v15838_v49 = vmov 2  }
  0x15   : > { %15497 = vset.pattern.permute.xlu1 %v15836_v0  ;;  %15496 = vset.pattern.permute.xlu0 %v15836_v0  ;;  %23097 = vst [vmem:[#allocation5_spill] sm:$0xff] %v16087_v37  ;;  %v16092_v38 = vld [vmem:[%s23072_s1 + $0x8] sm:$0x1f]  ;;  %s159_s4 = sand.u32 1, %s15818_s10   ;;  %s15173_s7 = sshll.u32 %s15826_s12, 13 }
  0x16   : > { %s164_s23 = scalar_select %p163_p11, %s15826_s12, 1  ;;  %v16077_v35 = vshrl.u32 %v367_v34, 7  ;;  %23098 = vst [vmem:[#allocation6_spill] sm:$0xff] %v16092_v38 }
  0x17   : > { %s16901_s5 = sshll.u32 %s159_s4, 9  ;;  %s23019_s18 = scalar_lea.hbm %s23073_s2, %s15173_s7 }
  0x18   : > { %s15172_s24 = sshll.u32 %s164_s23, 8  ;;  %v369_v36 = vsub.s32 0, %v16077_v35  ;;  %s16934_s6 = scalar_lea.vmem [#allocation2], %s16901_s5 }
  0x19   : > { %s15923_s27 = scalar_lea.vmem %s23071_s0, %s15172_s24  ;;  %s14568_s8 = sshll.u32 %s16934_s6, 4  ;;  %s23021_s8 = int_to_ptr.vmem [resolvable:$true] %s14568_s8 }
  0x1a   : > { %v15926_v1 = vld [vmem:[%s15923_s27 + $0x10] sm:$0xff]  ;;  %v15929_v2 = vld [vmem:[%s15923_s27] sm:$0xff]  ;;  %v15934_v3 = vld [vmem:[%s15923_s27 + $0x18] sm:$0xff]  ;;  %v16095_v39 = vrot.slane %v16087_v37, %v369_v36  ;;  %v16098_v40 = vrot.slane %v16092_v38, %v369_v36  ;;  %s23026_s12 = scalar_lea.sflag [#allocation3], %s159_s4  ;;  %s15758_s20 = scalar_lea.vmem %s23021_s8, 8192 }
  0x1b   : > { %219 = vperm.xlu1 %15497, %v15926_v1   ;;  %209 = vperm.xlu0 %15496, %v15929_v2   ;;  %v15937_v4 = vld [vmem:[%s15923_s27 + $0x8] sm:$0xff]  ;;  %v15945_v6 = vld [vmem:[%s15923_s27 + $0x20] sm:$0xff]  ;;  %v15950_v7 = vld [vmem:[%s15923_s27 + $0x38] sm:$0xff]  ;;  %p15759_p12 = scmp.ne.s32.totalorder %s23021_s8, %s15758_s20  ;;  %s15845_s23 = smov [#allocation2]  }
  0x1c   : > { %v15942_v5 = vld [vmem:[%s15923_s27 + $0x28] sm:$0xff]  ;;  %v15953_v8 = vld [vmem:[%s15923_s27 + $0x30] sm:$0xff]  ;;  %v15961_v10 = vld [vmem:[%s15923_s27 + $0x40] sm:$0xff]  ;;  %23099 = vst [vmem:[#allocation7_spill] sm:$0xff] %v16095_v39  ;;  %s15762_s24 = sshll.u32 %s15845_s23, 4  ;;  %s15763_s24 = int_to_ptr.vmem [resolvable:$false] %s15762_s24 }
  0x1d   : > { %v15958_v9 = vld [vmem:[%s15923_s27 + $0x48] sm:$0xff]  ;;  %v15966_v11 = vld [vmem:[%s15923_s27 + $0x58] sm:$0xff]  ;;  %v15969_v12 = vld [vmem:[%s15923_s27 + $0x50] sm:$0xff]  ;;  %p15760_p13 = pnand %p15759_p12, %p15903_p4  ;;  %s15764_s25 = scalar_lea.vmem %s15763_s24, 16384 }
  0x1e   : > { %v15974_v13 = vld [vmem:[%s15923_s27 + $0x68] sm:$0xff]  ;;  %v15977_v14 = vld [vmem:[%s15923_s27 + $0x60] sm:$0xff]  ;;  %v15982_v15 = vld [vmem:[%s15923_s27 + $0x78] sm:$0xff]  ;;  %p15765_p1 = scmp.lt.s32.totalorder %s23021_s8, %s15763_s24  ;;  %p15766_p2 = scmp.lt.s32.totalorder %s15764_s25, %s15758_s20 }
  0x1f   : > { %224 = vperm.xlu1 %15497, %v15934_v3   ;;  %214 = vperm.xlu0 %15496, %v15937_v4   ;;  %v15985_v16 = vld [vmem:[%s15923_s27 + $0x70] sm:$0xff]  ;;  %v15990_v17 = vld [vmem:[%s15923_s27 + $0x88] sm:$0xff]  ;;  %v15993_v18 = vld [vmem:[%s15923_s27 + $0x80] sm:$0xff]  ;;  %p15761_p0 = pneg %p15760_p13 }
  0x20   : > { %v15998_v19 = vld [vmem:[%s15923_s27 + $0x98] sm:$0xff]  ;;  %v16001_v20 = vld [vmem:[%s15923_s27 + $0x90] sm:$0xff]  ;;  %v16006_v21 = vld [vmem:[%s15923_s27 + $0xa8] sm:$0xff]  ;;  %p15767_p3 = por %p15766_p2, %p15765_p1 }
  0x21   : > { %v16009_v22 = vld [vmem:[%s15923_s27 + $0xa0] sm:$0xff]  ;;  %v16014_v23 = vld [vmem:[%s15923_s27 + $0xb8] sm:$0xff]  ;;  %v16017_v24 = vld [vmem:[%s15923_s27 + $0xb0] sm:$0xff] }
  0x22   : > { %v16022_v25 = vld [vmem:[%s15923_s27 + $0xc8] sm:$0xff]  ;;  %v16025_v26 = vld [vmem:[%s15923_s27 + $0xc0] sm:$0xff]  ;;  %v16030_v27 = vld [vmem:[%s15923_s27 + $0xd8] sm:$0xff]  ;;  %p15768_p5 = pnand %p15767_p3, %p15761_p0 }
  0x23   : > { %234 = vperm.xlu1 %15497, %v15942_v5   ;;  %229 = vperm.xlu0 %15496, %v15945_v6   ;;  %v16033_v28 = vld [vmem:[%s15923_s27 + $0xd0] sm:$0xff]  ;;  %v16038_v29 = vld [vmem:[%s15923_s27 + $0xe8] sm:$0xff]  ;;  %v16041_v30 = vld [vmem:[%s15923_s27 + $0xe0] sm:$0xff] }
  0x24   : > { %v16046_v31 = vld [vmem:[%s15923_s27 + $0xf8] sm:$0xff]  ;;  %v16049_v32 = vld [vmem:[%s15923_s27 + $0xf0] sm:$0xff] }
  0x27   : > { %244 = vperm.xlu1 %15497, %v15950_v7   ;;  %239 = vperm.xlu0 %15496, %v15953_v8  }
  0x2b   : > { %254 = vperm.xlu1 %15497, %v15958_v9   ;;  %249 = vperm.xlu0 %15496, %v15961_v10  }
  0x2f   : > { %264 = vperm.xlu1 %15497, %v15966_v11   ;;  %259 = vperm.xlu0 %15496, %v15969_v12  }
  0x33   : > { %274 = vperm.xlu1 %15497, %v15974_v13   ;;  %269 = vperm.xlu0 %15496, %v15977_v14  }
  0x37   : > { %284 = vperm.xlu1 %15497, %v15982_v15   ;;  %279 = vperm.xlu0 %15496, %v15985_v16  }
  0x3b   : > { %294 = vperm.xlu1 %15497, %v15990_v17   ;;  %289 = vperm.xlu0 %15496, %v15993_v18  }
  0x3f   : > { %304 = vperm.xlu1 %15497, %v15998_v19   ;;  %299 = vperm.xlu0 %15496, %v16001_v20  }
  0x43   : > { %314 = vperm.xlu1 %15497, %v16006_v21   ;;  %309 = vperm.xlu0 %15496, %v16009_v22  }
  0x47   : > { %324 = vperm.xlu1 %15497, %v16014_v23   ;;  %319 = vperm.xlu0 %15496, %v16017_v24  }
  0x4b   : > { %334 = vperm.xlu1 %15497, %v16022_v25   ;;  %329 = vperm.xlu0 %15496, %v16025_v26  }
  0x4f   : > { %344 = vperm.xlu1 %15497, %v16030_v27   ;;  %339 = vperm.xlu0 %15496, %v16033_v28  }
  0x53   : > { %354 = vperm.xlu1 %15497, %v16038_v29   ;;  %349 = vperm.xlu0 %15496, %v16041_v30  }
  0x57   : > { %364 = vperm.xlu1 %15497, %v16046_v31   ;;  %359 = vperm.xlu0 %15496, %v16049_v32  }
  0x5b   : > { %15499 = vset.pattern.permute.xlu1 %v15837_v33  ;;  %15498 = vset.pattern.permute.xlu0 %v15837_v33 }
  0x5c   : > { %508 = vperm.xlu1 %15499, %v15937_v4   ;;  %504 = vperm.xlu0 %15498, %v15929_v2  }
  0x60   : > { %512 = vperm.xlu1 %15499, %v15926_v1   ;;  %516 = vperm.xlu0 %15498, %v15934_v3  }
  0x64   : > { %520 = vperm.xlu1 %15499, %v15945_v6   ;;  %524 = vperm.xlu0 %15498, %v15942_v5  }
  0x68   : > { %528 = vperm.xlu1 %15499, %v15953_v8   ;;  %532 = vperm.xlu0 %15498, %v15950_v7  }
  0x6c   : > { %536 = vperm.xlu1 %15499, %v15961_v10   ;;  %540 = vperm.xlu0 %15498, %v15958_v9  }
  0x70   : > { %544 = vperm.xlu1 %15499, %v15969_v12   ;;  %548 = vperm.xlu0 %15498, %v15966_v11  }
  0x74   : > { %552 = vperm.xlu1 %15499, %v15977_v14   ;;  %556 = vperm.xlu0 %15498, %v15974_v13  }
  0x78   : > { %560 = vperm.xlu1 %15499, %v15985_v16   ;;  %564 = vperm.xlu0 %15498, %v15982_v15  }
  0x7c   : > { %568 = vperm.xlu1 %15499, %v15993_v18   ;;  %572 = vperm.xlu0 %15498, %v15990_v17  }
  0x80   : > { %576 = vperm.xlu1 %15499, %v16001_v20   ;;  %580 = vperm.xlu0 %15498, %v15998_v19  }
  0x84   : > { %584 = vperm.xlu1 %15499, %v16009_v22   ;;  %588 = vperm.xlu0 %15498, %v16006_v21  }
  0x88   : > { %592 = vperm.xlu1 %15499, %v16017_v24   ;;  %596 = vperm.xlu0 %15498, %v16014_v23  }
  0x8c   : > { %600 = vperm.xlu1 %15499, %v16025_v26   ;;  %604 = vperm.xlu0 %15498, %v16022_v25  }
  0x90   : > { %608 = vperm.xlu1 %15499, %v16033_v28   ;;  %612 = vperm.xlu0 %15498, %v16030_v27  }
  0x94   : > { %616 = vperm.xlu1 %15499, %v16041_v30   ;;  %620 = vperm.xlu0 %15498, %v16038_v29  }
  0x96   : > { %v220_v41 = vpop.permute.xlu1 %219  ;;  %v16102_v42 = vpop.permute.xlu0 %209 }
  0x97   : > { %23100 = vst [vmem:[#allocation8_spill] sm:$0xff] %v16102_v42  ;;  %v16105_v43 = vmul.f32 %v16095_v39, %v220_v41  ;;  %v16108_v44 = vmul.f32 %v16098_v40, %v220_v41 }
  0x98   : > { %624 = vperm.xlu1 %15499, %v16049_v32   ;;  %628 = vperm.xlu0 %15498, %v16046_v31  }
  0x9a   : > { %v225_v45 = vpop.permute.xlu1 %224  ;;  %v16112_v46 = vpop.permute.xlu0 %214 }
  0x9b   : > { %v16115_v47 = vmul.f32 %v16095_v39, %v225_v45  ;;  %v16118_v48 = vmul.f32 %v16098_v40, %v225_v45 }
  0x9c   : > { %15500 = vset.pattern.permute.xlu1 %v15838_v49  ;;  %15501 = vset.pattern.permute.xlu0 %v15838_v49 }
  0x9d   : > { %768 = vperm.xlu1 %15500, %v15929_v2   ;;  %772 = vperm.xlu0 %15501, %v15937_v4  }
  0x9e   : > { %v235_v50 = vpop.permute.xlu1 %234  ;;  %v230_v51 = vpop.permute.xlu0 %229 }
  0x9f   : > { %v16123_v52 = vmul.f32 %v16095_v39, %v235_v50  ;;  %v16126_v53 = vmul.f32 %v16098_v40, %v235_v50  ;;  %v16129_v54 = vmul.f32 %v16095_v39, %v230_v51  ;;  %v16132_v55 = vmul.f32 %v16098_v40, %v230_v51 }
  0xa1   : > { %776 = vperm.xlu1 %15500, %v15926_v1   ;;  %784 = vperm.xlu0 %15501, %v15945_v6  }
  0xa2   : > { %v245_v56 = vpop.permute.xlu1 %244  ;;  %v240_v57 = vpop.permute.xlu0 %239 }
  0xa3   : > { %v16137_v58 = vmul.f32 %v16095_v39, %v245_v56  ;;  %v16140_v59 = vmul.f32 %v16098_v40, %v245_v56  ;;  %v16143_v60 = vmul.f32 %v16095_v39, %v240_v57  ;;  %v16146_v61 = vmul.f32 %v16098_v40, %v240_v57 }
  0xa5   : > { %780 = vperm.xlu1 %15500, %v15934_v3   ;;  %792 = vperm.xlu0 %15501, %v15953_v8  }
  0xa6   : > { %v255_v62 = vpop.permute.xlu1 %254  ;;  %v250_v63 = vpop.permute.xlu0 %249 }
  0xa7   : > { %v16151_v0 = vmul.f32 %v16095_v39, %v255_v62  ;;  %v16154_v1 = vmul.f32 %v16098_v40, %v255_v62  ;;  %v16157_v2 = vmul.f32 %v16095_v39, %v250_v63  ;;  %v16160_v4 = vmul.f32 %v16098_v40, %v250_v63 }
  0xa9   : > { %788 = vperm.xlu1 %15500, %v15942_v5   ;;  %800 = vperm.xlu0 %15501, %v15961_v10  }
  0xaa   : > { %v265_v3 = vpop.permute.xlu1 %264  ;;  %v260_v6 = vpop.permute.xlu0 %259 }
  0xab   : > { %v16165_v8 = vmul.f32 %v16095_v39, %v265_v3  ;;  %v16168_v33 = vmul.f32 %v16098_v40, %v265_v3  ;;  %v16171_v34 = vmul.f32 %v16095_v39, %v260_v6  ;;  %v16174_v36 = vmul.f32 %v16098_v40, %v260_v6 }
  0xad   : > { %796 = vperm.xlu1 %15500, %v15950_v7   ;;  %808 = vperm.xlu0 %15501, %v15969_v12  }
  0xae   : > { %v275_v5 = vpop.permute.xlu1 %274  ;;  %v270_v10 = vpop.permute.xlu0 %269 }
  0xaf   : > { %v16179_v41 = vmul.f32 %v16095_v39, %v275_v5  ;;  %v16182_v45 = vmul.f32 %v16098_v40, %v275_v5  ;;  %v16185_v49 = vmul.f32 %v16095_v39, %v270_v10  ;;  %v16188_v50 = vmul.f32 %v16098_v40, %v270_v10 }
  0xb1   : > { %804 = vperm.xlu1 %15500, %v15958_v9   ;;  %816 = vperm.xlu0 %15501, %v15977_v14  }
  0xb2   : > { %v285_v7 = vpop.permute.xlu1 %284  ;;  %v280_v12 = vpop.permute.xlu0 %279 }
  0xb3   : > { %v16193_v51 = vmul.f32 %v16095_v39, %v285_v7  ;;  %v16196_v56 = vmul.f32 %v16098_v40, %v285_v7  ;;  %v16199_v57 = vmul.f32 %v16095_v39, %v280_v12  ;;  %v16202_v62 = vmul.f32 %v16098_v40, %v280_v12 }
  0xb5   : > { %812 = vperm.xlu1 %15500, %v15966_v11   ;;  %824 = vperm.xlu0 %15501, %v15985_v16  }
  0xb6   : > { %v295_v9 = vpop.permute.xlu1 %294  ;;  %v290_v14 = vpop.permute.xlu0 %289 }
  0xb7   : > { %v16207_v63 = vmul.f32 %v16095_v39, %v295_v9  ;;  %v16210_v3 = vmul.f32 %v16098_v40, %v295_v9  ;;  %v16213_v6 = vmul.f32 %v16095_v39, %v290_v14  ;;  %v16216_v5 = vmul.f32 %v16098_v40, %v290_v14 }
  0xb9   : > { %820 = vperm.xlu1 %15500, %v15974_v13   ;;  %832 = vperm.xlu0 %15501, %v15993_v18  }
  0xba   : > { %v305_v11 = vpop.permute.xlu1 %304  ;;  %v300_v16 = vpop.permute.xlu0 %299 }
  0xbb   : > { %v16221_v10 = vmul.f32 %v16095_v39, %v305_v11  ;;  %v16224_v7 = vmul.f32 %v16098_v40, %v305_v11  ;;  %v16227_v12 = vmul.f32 %v16095_v39, %v300_v16  ;;  %v16230_v9 = vmul.f32 %v16098_v40, %v300_v16 }
  0xbd   : > { %23101 = vst [vmem:[#allocation9_spill] sm:$0xff] %v16224_v7  ;;  %828 = vperm.xlu1 %15500, %v15982_v15   ;;  %840 = vperm.xlu0 %15501, %v16001_v20  }
  0xbe   : > { %v315_v13 = vpop.permute.xlu1 %314  ;;  %v310_v18 = vpop.permute.xlu0 %309 }
  0xbf   : > { %v16235_v14 = vmul.f32 %v16095_v39, %v315_v13  ;;  %v16238_v42 = vmul.f32 %v16098_v40, %v315_v13  ;;  %v16241_v11 = vmul.f32 %v16095_v39, %v310_v18  ;;  %v16244_v7 = vmul.f32 %v16098_v40, %v310_v18 }
  0xc1   : > { %23102 = vst [vmem:[#allocation10_spill] sm:$0xff] %v16235_v14  ;;  %23103 = vst [vmem:[#allocation11_spill] sm:$0xff] %v16238_v42  ;;  %836 = vperm.xlu1 %15500, %v15990_v17   ;;  %848 = vperm.xlu0 %15501, %v16009_v22  }
  0xc2   : > { %v325_v15 = vpop.permute.xlu1 %324  ;;  %v320_v20 = vpop.permute.xlu0 %319 }
  0xc3   : > { %v16249_v16 = vmul.f32 %v16095_v39, %v325_v15  ;;  %v16252_v14 = vmul.f32 %v16098_v40, %v325_v15  ;;  %v16255_v13 = vmul.f32 %v16095_v39, %v320_v20  ;;  %v16258_v42 = vmul.f32 %v16098_v40, %v320_v20 }
  0xc5   : > { %23104 = vst [vmem:[#allocation12_spill] sm:$0xff] %v16249_v16  ;;  %23105 = vst [vmem:[#allocation13_spill] sm:$0xff] %v16252_v14  ;;  %844 = vperm.xlu1 %15500, %v15998_v19   ;;  %856 = vperm.xlu0 %15501, %v16017_v24  }
  0xc6   : > { %v335_v17 = vpop.permute.xlu1 %334  ;;  %v330_v22 = vpop.permute.xlu0 %329 }
  0xc7   : > { %v16263_v18 = vmul.f32 %v16095_v39, %v335_v17  ;;  %v16266_v16 = vmul.f32 %v16098_v40, %v335_v17  ;;  %v16269_v15 = vmul.f32 %v16095_v39, %v330_v22  ;;  %v16272_v14 = vmul.f32 %v16098_v40, %v330_v22 }
  0xc9   : > { %23106 = vst [vmem:[#allocation14_spill] sm:$0xff] %v16263_v18  ;;  %23107 = vst [vmem:[#allocation15_spill] sm:$0xff] %v16266_v16  ;;  %852 = vperm.xlu1 %15500, %v16006_v21   ;;  %864 = vperm.xlu0 %15501, %v16025_v26  }
  0xca   : > { %v345_v19 = vpop.permute.xlu1 %344  ;;  %v340_v24 = vpop.permute.xlu0 %339 }
  0xcb   : > { %v16277_v20 = vmul.f32 %v16095_v39, %v345_v19  ;;  %v16280_v18 = vmul.f32 %v16098_v40, %v345_v19  ;;  %v16283_v17 = vmul.f32 %v16095_v39, %v340_v24  ;;  %v16286_v16 = vmul.f32 %v16098_v40, %v340_v24 }
  0xcc   : > { %v633_v24 = vsub.s32 1, %v16077_v35 }
  0xcd   : > { %23108 = vst [vmem:[#allocation16_spill] sm:$0xff] %v16277_v20  ;;  %23109 = vst [vmem:[#allocation17_spill] sm:$0xff] %v16280_v18  ;;  %860 = vperm.xlu1 %15500, %v16014_v23   ;;  %872 = vperm.xlu0 %15501, %v16033_v28  }
  0xce   : > { %23110 = vst [vmem:[#allocation18_spill] sm:$0xff] %v16286_v16  ;;  %v355_v21 = vpop.permute.xlu1 %354  ;;  %v350_v26 = vpop.permute.xlu0 %349 }
  0xcf   : > { %v16291_v22 = vmul.f32 %v16095_v39, %v355_v21  ;;  %v16294_v20 = vmul.f32 %v16098_v40, %v355_v21  ;;  %v16297_v19 = vmul.f32 %v16095_v39, %v350_v26  ;;  %v16300_v18 = vmul.f32 %v16098_v40, %v350_v26 }
  0xd1   : > { %23111 = vst [vmem:[#allocation19_spill] sm:$0xff] %v16291_v22  ;;  %23112 = vst [vmem:[#allocation20_spill] sm:$0xff] %v16294_v20  ;;  %868 = vperm.xlu1 %15500, %v16022_v25   ;;  %880 = vperm.xlu0 %15501, %v16041_v30   ;;  %v16318_v22 = vrot.slane %v16087_v37, %v633_v24  ;;  %v16321_v25 = vrot.slane %v16092_v38, %v633_v24 }
  0xd2   : > { %v365_v23 = vpop.permute.xlu1 %364  ;;  %v360_v28 = vpop.permute.xlu0 %359 }
  0xd3   : > { %v16306_v16 = vmul.f32 %v16095_v39, %v365_v23  ;;  %v16309_v21 = vmul.f32 %v16098_v40, %v365_v23  ;;  %v16312_v20 = vmul.f32 %v16095_v39, %v360_v28  ;;  %v16315_v26 = vmul.f32 %v16098_v40, %v360_v28 }
  0xd4   : > { %v377_v23 = vmul.f32 %v16095_v39, %v16112_v46  ;;  %v378_v28 = vmul.f32 %v16098_v40, %v16112_v46 }
  0xd5   : > { %23113 = vst [vmem:[#allocation21_spill] sm:$0xff] %v16306_v16  ;;  %23114 = vst [vmem:[#allocation22_spill] sm:$0xff] %v16309_v21  ;;  %876 = vperm.xlu1 %15500, %v16030_v27   ;;  %888 = vperm.xlu0 %15501, %v16049_v32  }
  0xd6   : > { %23115 = vst [vmem:[#allocation23_spill] sm:$0xff] %v16312_v20  ;;  %23116 = vst [vmem:[#allocation24_spill] sm:$0xff] %v16315_v26 }
  0xd7   : > { %v509_v30 = vpop.permute.xlu1 %508  ;;  %v16325_v16 = vpop.permute.xlu0 %504 }
  0xd8   : > { %v641_v21 = vmul.f32 %v16318_v22, %v509_v30  ;;  %v642_v26 = vmul.f32 %v16321_v25, %v509_v30 }
  0xd9   : > { %884 = vperm.xlu1 %15500, %v16038_v29  }
  0xda   : > { %v16334_v24 = vadd.f32 %v641_v21, %v377_v23  ;;  %v16336_v27 = vadd.f32 %v642_v26, %v378_v28 }
  0xdb   : > { %v513_v32 = vpop.permute.xlu1 %512  ;;  %v517_v20 = vpop.permute.xlu0 %516 }
  0xdc   : > { %v643_v38 = vmul.f32 %v16318_v22, %v513_v32  ;;  %v644_v37 = vmul.f32 %v16321_v25, %v513_v32  ;;  %v645_v39 = vmul.f32 %v16318_v22, %v517_v20  ;;  %v646_v46 = vmul.f32 %v16321_v25, %v517_v20 }
  0xdd   : > { %892 = vperm.xlu1 %15500, %v16046_v31  }
  0xde   : > { %v16344_v30 = vadd.f32 %v643_v38, %v16105_v43  ;;  %v16347_v29 = vadd.f32 %v644_v37, %v16108_v44  ;;  %v16350_v21 = vadd.f32 %v645_v39, %v16115_v47  ;;  %v16353_v26 = vadd.f32 %v646_v46, %v16118_v48 }
  0xdf   : > { %v521_v23 = vpop.permute.xlu1 %520  ;;  %v525_v28 = vpop.permute.xlu0 %524 }
  0xe0   : > { %v647_v32 = vmul.f32 %v16318_v22, %v521_v23  ;;  %v648_v20 = vmul.f32 %v16321_v25, %v521_v23  ;;  %v649_v31 = vmul.f32 %v16318_v22, %v525_v28  ;;  %v650_v38 = vmul.f32 %v16321_v25, %v525_v28 }
  0xe2   : > { %v16360_v43 = vadd.f32 %v647_v32, %v16129_v54  ;;  %v16363_v37 = vadd.f32 %v648_v20, %v16132_v55  ;;  %v16366_v39 = vadd.f32 %v649_v31, %v16123_v52  ;;  %v16369_v44 = vadd.f32 %v650_v38, %v16126_v53 }
  0xe3   : > { %v529_v47 = vpop.permute.xlu1 %528  ;;  %v533_v48 = vpop.permute.xlu0 %532 }
  0xe4   : > { %v651_v46 = vmul.f32 %v16318_v22, %v529_v47  ;;  %v652_v23 = vmul.f32 %v16321_v25, %v529_v47  ;;  %v653_v28 = vmul.f32 %v16318_v22, %v533_v48  ;;  %v654_v54 = vmul.f32 %v16321_v25, %v533_v48 }
  0xe6   : > { %v16376_v32 = vadd.f32 %v651_v46, %v16143_v60  ;;  %v16379_v55 = vadd.f32 %v652_v23, %v16146_v61  ;;  %v16382_v52 = vadd.f32 %v653_v28, %v16137_v58  ;;  %v16385_v53 = vadd.f32 %v654_v54, %v16140_v59 }
  0xe7   : > { %v537_v20 = vpop.permute.xlu1 %536  ;;  %v541_v31 = vpop.permute.xlu0 %540 }
  0xe8   : > { %23117 = vst [vmem:[#allocation25_spill] sm:$0xff] %v16382_v52  ;;  %23118 = vst [vmem:[#allocation26_spill] sm:$0xff] %v16385_v53  ;;  %v655_v38 = vmul.f32 %v16318_v22, %v537_v20  ;;  %v656_v47 = vmul.f32 %v16321_v25, %v537_v20  ;;  %v657_v48 = vmul.f32 %v16318_v22, %v541_v31 }
  0xe9   : > { %v658_v60 = vmul.f32 %v16321_v25, %v541_v31 }
  0xea   : > { %v16392_v46 = vadd.f32 %v655_v38, %v16157_v2  ;;  %v16395_v61 = vadd.f32 %v656_v47, %v16160_v4  ;;  %v16398_v58 = vadd.f32 %v657_v48, %v16151_v0 }
  0xeb   : > { %v16401_v59 = vadd.f32 %v658_v60, %v16154_v1  ;;  %v545_v23 = vpop.permute.xlu1 %544  ;;  %v549_v28 = vpop.permute.xlu0 %548 }
  0xec   : > { %23119 = vst [vmem:[#allocation27_spill] sm:$0xff] %v16398_v58  ;;  %v659_v54 = vmul.f32 %v16318_v22, %v545_v23  ;;  %v660_v20 = vmul.f32 %v16321_v25, %v545_v23  ;;  %v661_v31 = vmul.f32 %v16318_v22, %v549_v28  ;;  %v662_v2 = vmul.f32 %v16321_v25, %v549_v28 }
  0xed   : > { %23120 = vst [vmem:[#allocation28_spill] sm:$0xff] %v16401_v59 }
  0xee   : > { %v16408_v38 = vadd.f32 %v659_v54, %v16171_v34  ;;  %v16411_v4 = vadd.f32 %v660_v20, %v16174_v36  ;;  %v16414_v0 = vadd.f32 %v661_v31, %v16165_v8  ;;  %v16417_v1 = vadd.f32 %v662_v2, %v16168_v33 }
  0xef   : > { %v553_v47 = vpop.permute.xlu1 %552  ;;  %v557_v48 = vpop.permute.xlu0 %556 }
  0xf0   : > { %23121 = vst [vmem:[#allocation29_spill] sm:$0xff] %v16408_v38  ;;  %23122 = vst [vmem:[#allocation30_spill] sm:$0xff] %v16411_v4  ;;  %v663_v60 = vmul.f32 %v16318_v22, %v553_v47  ;;  %v664_v23 = vmul.f32 %v16321_v25, %v553_v47  ;;  %v665_v28 = vmul.f32 %v16318_v22, %v557_v48 }
  0xf1   : > { %23123 = vst [vmem:[#allocation31_spill] sm:$0xff] %v16414_v0  ;;  %23124 = vst [vmem:[#allocation32_spill] sm:$0xff] %v16417_v1  ;;  %v666_v34 = vmul.f32 %v16321_v25, %v557_v48 }
  0xf2   : > { %v16424_v54 = vadd.f32 %v663_v60, %v16185_v49  ;;  %v16427_v36 = vadd.f32 %v664_v23, %v16188_v50  ;;  %v16430_v8 = vadd.f32 %v665_v28, %v16179_v41 }
  0xf3   : > { %v16433_v33 = vadd.f32 %v666_v34, %v16182_v45  ;;  %v561_v20 = vpop.permute.xlu1 %560  ;;  %v565_v31 = vpop.permute.xlu0 %564 }
  0xf4   : > { %23125 = vst [vmem:[#allocation33_spill] sm:$0xff] %v16424_v54  ;;  %23126 = vst [vmem:[#allocation34_spill] sm:$0xff] %v16427_v36  ;;  %v667_v2 = vmul.f32 %v16318_v22, %v561_v20  ;;  %v668_v47 = vmul.f32 %v16321_v25, %v561_v20  ;;  %v669_v48 = vmul.f32 %v16318_v22, %v565_v31 }
  0xf5   : > { %23127 = vst [vmem:[#allocation35_spill] sm:$0xff] %v16430_v8  ;;  %23128 = vst [vmem:[#allocation36_spill] sm:$0xff] %v16433_v33  ;;  %v670_v49 = vmul.f32 %v16321_v25, %v565_v31 }
  0xf6   : > { %v16440_v60 = vadd.f32 %v667_v2, %v16199_v57  ;;  %v16443_v50 = vadd.f32 %v668_v47, %v16202_v62  ;;  %v16446_v41 = vadd.f32 %v669_v48, %v16193_v51 }
  0xf7   : > { %v16449_v45 = vadd.f32 %v670_v49, %v16196_v56  ;;  %v569_v23 = vpop.permute.xlu1 %568  ;;  %v573_v28 = vpop.permute.xlu0 %572 }
  0xf8   : > { %23129 = vst [vmem:[#allocation37_spill] sm:$0xff] %v16440_v60  ;;  %23130 = vst [vmem:[#allocation38_spill] sm:$0xff] %v16443_v50  ;;  %v671_v34 = vmul.f32 %v16318_v22, %v569_v23  ;;  %v672_v20 = vmul.f32 %v16321_v25, %v569_v23  ;;  %v673_v31 = vmul.f32 %v16318_v22, %v573_v28 }
  0xf9   : > { %23131 = vst [vmem:[#allocation39_spill] sm:$0xff] %v16446_v41  ;;  %23132 = vst [vmem:[#allocation40_spill] sm:$0xff] %v16449_v45  ;;  %v674_v57 = vmul.f32 %v16321_v25, %v573_v28 }
  0xfa   : > { %v16456_v2 = vadd.f32 %v671_v34, %v16213_v6  ;;  %v16459_v62 = vadd.f32 %v672_v20, %v16216_v5  ;;  %v16462_v51 = vadd.f32 %v673_v31, %v16207_v63 }
  0xfb   : > { %v16465_v56 = vadd.f32 %v674_v57, %v16210_v3  ;;  %v577_v47 = vpop.permute.xlu1 %576  ;;  %v581_v48 = vpop.permute.xlu0 %580  ;;  %v23140_v3 = vld [vmem:[#allocation9_spill] sm:$0xff] }
  0xfc   : > { %23133 = vst [vmem:[#allocation41_spill] sm:$0xff] %v16456_v2  ;;  %23134 = vst [vmem:[#allocation42_spill] sm:$0xff] %v16459_v62  ;;  %v675_v49 = vmul.f32 %v16318_v22, %v577_v47  ;;  %v676_v23 = vmul.f32 %v16321_v25, %v577_v47  ;;  %v677_v28 = vmul.f32 %v16318_v22, %v581_v48 }
  0xfd   : > { %23135 = vst [vmem:[#allocation43_spill] sm:$0xff] %v16462_v51  ;;  %23136 = vst [vmem:[#allocation44_spill] sm:$0xff] %v16465_v56  ;;  %v678_v6 = vmul.f32 %v16321_v25, %v581_v48 }
  0xfe   : > { %v16472_v34 = vadd.f32 %v675_v49, %v16227_v12  ;;  %v16475_v5 = vadd.f32 %v676_v23, %v16230_v9  ;;  %v16478_v63 = vadd.f32 %v677_v28, %v16221_v10  ;;  %v23144_v10 = vld [vmem:[#allocation10_spill] sm:$0xff]  ;;  %v23146_v28 = vld [vmem:[#allocation11_spill] sm:$0xff] }
  0xff   : > { %v16481_v20 = vadd.f32 %v678_v6, %v23140_v3  ;;  %v585_v31 = vpop.permute.xlu1 %584  ;;  %v589_v57 = vpop.permute.xlu0 %588 }
 0x100   : > { %23137 = vst [vmem:[#allocation45_spill] sm:$0xff] %v16472_v34  ;;  %23138 = vst [vmem:[#allocation46_spill] sm:$0xff] %v16475_v5  ;;  %v679_v47 = vmul.f32 %v16318_v22, %v585_v31  ;;  %v680_v56 = vmul.f32 %v16321_v25, %v585_v31  ;;  %v681_v48 = vmul.f32 %v16318_v22, %v589_v57  ;;  %v23092_v34 = vmov 1326507024  }
 0x101   : > { %23139 = vst [vmem:[#allocation47_spill] sm:$0xff] %v16478_v63  ;;  %23141 = vst [vmem:[#allocation9_spill] sm:$0xff] %v16481_v20  ;;  %v682_v12 = vmul.f32 %v16321_v25, %v589_v57 }
 0x102   : > { %v16488_v49 = vadd.f32 %v679_v47, %v16241_v11  ;;  %v16491_v9 = vadd.f32 %v680_v56, %v16244_v7  ;;  %v16494_v23 = vadd.f32 %v681_v48, %v23144_v10  ;;  %v23150_v56 = vld [vmem:[#allocation12_spill] sm:$0xff] }
 0x103   : > { %v16497_v6 = vadd.f32 %v682_v12, %v23146_v28  ;;  %v593_v3 = vpop.permute.xlu1 %592  ;;  %v597_v20 = vpop.permute.xlu0 %596  ;;  %v23152_v12 = vld [vmem:[#allocation13_spill] sm:$0xff] }
 0x104   : > { %23142 = vst [vmem:[#allocation48_spill] sm:$0xff] %v16488_v49  ;;  %23143 = vst [vmem:[#allocation49_spill] sm:$0xff] %v16491_v9  ;;  %v683_v31 = vmul.f32 %v16318_v22, %v593_v3  ;;  %v684_v63 = vmul.f32 %v16321_v25, %v593_v3  ;;  %v685_v57 = vmul.f32 %v16318_v22, %v597_v20 }
 0x105   : > { %23145 = vst [vmem:[#allocation10_spill] sm:$0xff] %v16494_v23  ;;  %23147 = vst [vmem:[#allocation11_spill] sm:$0xff] %v16497_v6  ;;  %v686_v11 = vmul.f32 %v16321_v25, %v597_v20 }
 0x106   : > { %v16504_v47 = vadd.f32 %v683_v31, %v16255_v13  ;;  %v16507_v7 = vadd.f32 %v684_v63, %v16258_v42  ;;  %v16510_v48 = vadd.f32 %v685_v57, %v23150_v56  ;;  %v23156_v63 = vld [vmem:[#allocation14_spill] sm:$0xff] }
 0x107   : > { %v16513_v10 = vadd.f32 %v686_v11, %v23152_v12  ;;  %v601_v28 = vpop.permute.xlu1 %600  ;;  %v605_v6 = vpop.permute.xlu0 %604  ;;  %v23158_v11 = vld [vmem:[#allocation15_spill] sm:$0xff] }
 0x108   : > { %23148 = vst [vmem:[#allocation50_spill] sm:$0xff] %v16504_v47  ;;  %23149 = vst [vmem:[#allocation51_spill] sm:$0xff] %v16507_v7  ;;  %v687_v3 = vmul.f32 %v16318_v22, %v601_v28  ;;  %v688_v23 = vmul.f32 %v16321_v25, %v601_v28  ;;  %v689_v20 = vmul.f32 %v16318_v22, %v605_v6 }
 0x109   : > { %23151 = vst [vmem:[#allocation12_spill] sm:$0xff] %v16510_v48  ;;  %23153 = vst [vmem:[#allocation13_spill] sm:$0xff] %v16513_v10  ;;  %v690_v13 = vmul.f32 %v16321_v25, %v605_v6 }
 0x10a   : > { %v16520_v31 = vadd.f32 %v687_v3, %v16269_v15  ;;  %v16523_v42 = vadd.f32 %v688_v23, %v16272_v14  ;;  %v16526_v57 = vadd.f32 %v689_v20, %v23156_v63  ;;  %v23161_v14 = vld [vmem:[#allocation18_spill] sm:$0xff]  ;;  %v23163_v20 = vld [vmem:[#allocation16_spill] sm:$0xff] }
 0x10b   : > { %v16529_v56 = vadd.f32 %v690_v13, %v23158_v11  ;;  %v609_v12 = vpop.permute.xlu1 %608  ;;  %v613_v10 = vpop.permute.xlu0 %612  ;;  %v23165_v13 = vld [vmem:[#allocation17_spill] sm:$0xff] }
 0x10c   : > { %23154 = vst [vmem:[#allocation52_spill] sm:$0xff] %v16520_v31  ;;  %23155 = vst [vmem:[#allocation53_spill] sm:$0xff] %v16523_v42  ;;  %v691_v28 = vmul.f32 %v16318_v22, %v609_v12  ;;  %v692_v48 = vmul.f32 %v16321_v25, %v609_v12  ;;  %v693_v6 = vmul.f32 %v16318_v22, %v613_v10  ;;  %v23183_v31 = vld [vmem:[#allocation22_spill] sm:$0xff] }
 0x10d   : > { %23157 = vst [vmem:[#allocation14_spill] sm:$0xff] %v16526_v57  ;;  %23159 = vst [vmem:[#allocation15_spill] sm:$0xff] %v16529_v56  ;;  %v694_v15 = vmul.f32 %v16321_v25, %v613_v10 }
 0x10e   : > { %v16536_v3 = vadd.f32 %v691_v28, %v16283_v17  ;;  %v16539_v23 = vadd.f32 %v692_v48, %v23161_v14  ;;  %v16542_v63 = vadd.f32 %v693_v6, %v23163_v20  ;;  %v897_v28 = vsub.s32 2, %v16077_v35  ;;  %v23171_v20 = vld [vmem:[#allocation20_spill] sm:$0xff] }
 0x10f   : > { %v16545_v11 = vadd.f32 %v694_v15, %v23165_v13  ;;  %v617_v56 = vpop.permute.xlu1 %616  ;;  %v621_v57 = vpop.permute.xlu0 %620  ;;  %v23169_v15 = vld [vmem:[#allocation19_spill] sm:$0xff] }
 0x110   : > { %23160 = vst [vmem:[#allocation54_spill] sm:$0xff] %v16536_v3  ;;  %23162 = vst [vmem:[#allocation18_spill] sm:$0xff] %v16539_v23  ;;  %v695_v12 = vmul.f32 %v16318_v22, %v617_v56  ;;  %v696_v42 = vmul.f32 %v16321_v25, %v617_v56  ;;  %v697_v10 = vmul.f32 %v16318_v22, %v621_v57 }
 0x111   : > { %23164 = vst [vmem:[#allocation16_spill] sm:$0xff] %v16542_v63  ;;  %23166 = vst [vmem:[#allocation17_spill] sm:$0xff] %v16545_v11  ;;  %v698_v17 = vmul.f32 %v16321_v25, %v621_v57  ;;  %v639_v56 = vmul.f32 %v16318_v22, %v16325_v16 }
 0x112   : > { %v16553_v48 = vadd.f32 %v695_v12, %v16297_v19  ;;  %v16556_v6 = vadd.f32 %v696_v42, %v16300_v18  ;;  %v16559_v14 = vadd.f32 %v697_v10, %v23169_v15  ;;  %v23173_v42 = vld [vmem:[#allocation8_spill] sm:$0xff]  ;;  %v23174_v12 = vld [vmem:[#allocation7_spill] sm:$0xff]  ;;  %v23175_v15 = vld [vmem:[#allocation5_spill] sm:$0xff] }
 0x113   : > { %v16562_v13 = vadd.f32 %v698_v17, %v23171_v20  ;;  %v625_v11 = vpop.permute.xlu1 %624  ;;  %v629_v63 = vpop.permute.xlu0 %628  ;;  %v375_v10 = vmul.f32 %v23174_v12, %v23173_v42  ;;  %v640_v17 = vmul.f32 %v16321_v25, %v16325_v16  ;;  %v16575_v20 = vrot.slane %v23175_v15, %v897_v28 }
 0x114   : > { %23167 = vst [vmem:[#allocation55_spill] sm:$0xff] %v16553_v48  ;;  %23168 = vst [vmem:[#allocation56_spill] sm:$0xff] %v16556_v6  ;;  %v699_v57 = vmul.f32 %v16318_v22, %v625_v11  ;;  %v700_v23 = vmul.f32 %v16321_v25, %v625_v11  ;;  %v701_v19 = vmul.f32 %v16318_v22, %v629_v63  ;;  %v23177_v6 = vld [vmem:[#allocation23_spill] sm:$0xff]  ;;  %v23179_v11 = vld [vmem:[#allocation24_spill] sm:$0xff] }
 0x115   : > { %23170 = vst [vmem:[#allocation19_spill] sm:$0xff] %v16559_v14  ;;  %23172 = vst [vmem:[#allocation20_spill] sm:$0xff] %v16562_v13  ;;  %v702_v18 = vmul.f32 %v16321_v25, %v629_v63  ;;  %v23176_v13 = vld [vmem:[#allocation6_spill] sm:$0xff]  ;;  %v23181_v22 = vld [vmem:[#allocation21_spill] sm:$0xff]  ;;  %v376_v16 = vmul.f32 %v16098_v40, %v23173_v42  ;;  %v703_v25 = vadd.f32 %v639_v56, %v375_v10 }
 0x116   : > { %v16578_v14 = vrot.slane %v23176_v13, %v897_v28  ;;  %v16581_v48 = vadd.f32 %v699_v57, %v23177_v6  ;;  %v16584_v3 = vadd.f32 %v700_v23, %v23179_v11  ;;  %v16587_v63 = vadd.f32 %v701_v19, %v23181_v22 }
 0x117   : > { %v16590_v12 = vadd.f32 %v702_v18, %v23183_v31  ;;  %v704_v28 = vadd.f32 %v640_v17, %v376_v16 }
 0x118   : > { %23178 = vst [vmem:[#allocation8_spill] sm:$0xff] %v16581_v48  ;;  %23180 = vst [vmem:[#allocation7_spill] sm:$0xff] %v16584_v3  ;;  %v769_v7 = vpop.permute.xlu1 %768  ;;  %v773_v47 = vpop.permute.xlu0 %772 }
 0x119   : > { %23182 = vst [vmem:[#allocation5_spill] sm:$0xff] %v16587_v63  ;;  %23184 = vst [vmem:[#allocation6_spill] sm:$0xff] %v16590_v12  ;;  %v903_v9 = vmul.f32 %v16575_v20, %v769_v7  ;;  %v904_v6 = vmul.f32 %v16578_v14, %v769_v7  ;;  %v905_v23 = vmul.f32 %v16575_v20, %v773_v47 }
 0x11b   : > { %v16597_v57 = vadd.f32 %v903_v9, %v703_v25  ;;  %v16599_v19 = vadd.f32 %v904_v6, %v704_v28  ;;  %v16602_v31 = vadd.f32 %v905_v23, %v16334_v24 }
 0x11d   : > { %v23080_v18 = vand.u32 2147483647, %v16597_v57  ;;  %v1034_v40 = vand.u32 2139095040, %v16597_v57  ;;  %v23081_v56 = vand.u32 2147483647, %v16599_v19  ;;  %v1137_v42 = vand.u32 2139095040, %v16599_v19 }
 0x11e   : > { %v1240_v11 = vand.u32 2139095040, %v16602_v31  ;;  %vm1033_vm13 = vcmp.lt.s32.totalorder %v16597_v57, 0 }
 0x11f   : > { %v1035_v10 = vshrl.u32 %v1034_v40, 23  ;;  %v1038_v7 = vand.u32 8388607, %v23080_v18  ;;  %v1138_v17 = vshrl.u32 %v1137_v42, 23  ;;  %v1141_v9 = vand.u32 8388607, %v23081_v56 }
 0x120   : > { %v1241_v16 = vshrl.u32 %v1240_v11, 23  ;;  %v16614_v42 = vmul.f32 %v16578_v14, %v773_v47  ;;  %v23084_v47 = vmov 2131351028  }
 0x121   : > { %v14655_v24 = vadd.s32 4294967169, %v1035_v10  ;;  %v14659_v22 = vadd.s32 4294967169, %v1138_v17  ;;  %v1039_v28 = vor.u32 8388608, %v1038_v7  ;;  %v1142_v6 = vor.u32 8388608, %v1141_v9 }
 0x122   : > { %v14663_v12 = vadd.s32 4294967169, %v1241_v16  ;;  %v23082_v9 = vmov 683565275  }
 0x123   : > { %v1041_v25 = vadd.s32 1, %v14655_v24  ;;  %v1144_v23 = vadd.s32 1, %v14659_v22  ;;  %v16616_v56 = vshll.u32 %v1039_v28, 8  ;;  %v16618_v48 = vshll.u32 %v1142_v6, 8 }
 0x124   : > { %v16621_v17 = vadd.s32 1, %v14663_v12  ;;  %v23086_v28 = vmov 2102212464  }
 0x125   : > { %vm1042_vm0 = vcmp.gt.s32.totalorder %v1041_v25, 0  ;;  %vm1145_vm1 = vcmp.gt.s32.totalorder %v1144_v23, 0 }
 0x126   : > { %v1043_v63 = vsel %vm1042_vm0, %v1041_v25, 0  ;;  %v1146_v18 = vsel %vm1145_vm1, %v1144_v23, 0  ;;  %v23090_v23 = vmov 920167782   ;;  %vm1248_vm6 = vcmp.gt.s32.totalorder %v16621_v17, 0 }
 0x127   : > { %v1044_v40 = vshrl.u32 %v1043_v63, 5  ;;  %v1045_v3 = vand.u32 31, %v1043_v63  ;;  %v16624_v24 = vshrl.u32 %v1146_v18, 5  ;;  %v1148_v22 = vand.u32 31, %v1146_v18 }
 0x128   : > { %v23088_v63 = vmov 2475754826   ;;  %v23185_v18 = vmov 683565275  }
 0x129   : > { %v1046_v7 = vsub.s32 32, %v1045_v3  ;;  %v1048_v11 = vshll.u32 %v23082_v9, %v1045_v3  ;;  %v1051_v16 = vshll.u32 %v23088_v63, %v1045_v3  ;;  %v1054_v25 = vshll.u32 %v23084_v47, %v1045_v3 }
 0x12a   : > { %v1057_v6 = vshll.u32 %v23086_v28, %v1045_v3  ;;  %v1060_v12 = vshll.u32 %v23090_v23, %v1045_v3  ;;  %vm1063_vm2 = vcmp.lt.s32.totalorder %v1044_v40, 1  ;;  %vm1064_vm3 = vcmp.lt.s32.totalorder %v1044_v40, 2 }
 0x12b   : > { %v1049_v10 = vshrl.u32 %v23088_v63, %v1046_v7  ;;  %v1052_v49 = vshrl.u32 %v23084_v47, %v1046_v7  ;;  %v1055_v9 = vshrl.u32 %v23086_v28, %v1046_v7  ;;  %v1047_v51 = vshrl.u32 %v23185_v18, %v1046_v7 }
 0x12c   : > { %v1058_v5 = vshrl.u32 %v23090_v23, %v1046_v7  ;;  %v1061_v45 = vshrl.u32 %v23092_v34, %v1046_v7  ;;  %v1149_v33 = vsub.s32 32, %v1148_v22  ;;  %vm1065_vm4 = vcmp.lt.s32.totalorder %v1044_v40, 3 }
 0x12d   : > { %v1050_v41 = vor.u32 %v1049_v10, %v1048_v11  ;;  %v1053_v62 = vor.u32 %v1052_v49, %v1051_v16  ;;  %v1056_v2 = vor.u32 %v1055_v9, %v1054_v25  ;;  %vm1066_vm5 = vcmp.lt.s32.totalorder %v1044_v40, 4 }
 0x12e   : > { %v1059_v3 = vor.u32 %v1058_v5, %v1057_v6  ;;  %v1062_v8 = vor.u32 %v1061_v45, %v1060_v12  ;;  %v1151_v7 = vshll.u32 %v23185_v18, %v1148_v22  ;;  %v23186_v5 = vmov 2475754826  }
 0x12f   : > { %v1067_v47 = vsel %vm1063_vm2, %v1047_v51, %v1050_v41  ;;  %v1068_v28 = vsel %vm1066_vm5, %v1056_v2, 2102212464  ;;  %v1071_v63 = vsel %vm1063_vm2, %v1050_v41, %v1053_v62  ;;  %v1075_v50 = vsel %vm1063_vm2, %v1053_v62, %v1056_v2 }
 0x130   : > { %v1069_v23 = vsel %vm1065_vm4, %v1053_v62, %v1068_v28  ;;  %v1072_v60 = vsel %vm1066_vm5, %v1059_v3, 920167782  ;;  %v1076_v1 = vsel %vm1066_vm5, %v1062_v8, 1326507024  ;;  %v1152_v45 = vshrl.u32 %v23186_v5, %v1149_v33 }
 0x131   : > { %v1073_v49 = vsel %vm1065_vm4, %v1056_v2, %v1072_v60  ;;  %v1077_v10 = vsel %vm1065_vm4, %v1059_v3, %v1076_v1  ;;  %v1154_v9 = vshll.u32 %v23186_v5, %v1148_v22  ;;  %v1070_v51 = vsel %vm1064_vm3, %v1067_v47, %v1069_v23 }
 0x132   : > { %v1074_v11 = vsel %vm1064_vm3, %v1071_v63, %v1073_v49  ;;  %v1078_v41 = vsel %vm1064_vm3, %v1075_v50, %v1077_v10  ;;  %v23187_v16 = vmov 2131351028   ;;  %v1153_v1 = vor.u32 %v1152_v45, %v1151_v7 }
 0x133   : > { %v1155_v62 = vshrl.u32 %v23187_v16, %v1149_v33  ;;  %v16648_v8 = vmul.u32.u64.low %v16616_v56, %v1078_v41  ;;  %v16649_v25 = vmul.u32.u64.high %v16616_v56, %v1078_v41, %v16648_v8  ;;  %v1157_v6 = vshll.u32 %v23187_v16, %v1148_v22 }
 0x134   : > { %v16652_v28 = vmul.u32.u64.low %v16616_v56, %v1074_v11  ;;  %v16653_v60 = vmul.u32.u64.high %v16616_v56, %v1074_v11, %v16652_v28  ;;  %v23188_v47 = vmov 2102212464   ;;  %v1150_v40 = vshrl.u32 %v23185_v18, %v1149_v33 }
 0x135   : > { %v1156_v2 = vor.u32 %v1155_v62, %v1154_v9  ;;  %v1158_v23 = vshrl.u32 %v23188_v47, %v1149_v33  ;;  %v1160_v50 = vshll.u32 %v23188_v47, %v1148_v22  ;;  %v23189_v63 = vmov 920167782  }
 0x136   : > { %v1161_v12 = vshrl.u32 %v23189_v63, %v1149_v33  ;;  %v1164_v3 = vshrl.u32 %v23092_v34, %v1149_v33  ;;  %v1086_v49 = vmul.u32 %v16616_v56, %v1070_v51  ;;  %v1163_v11 = vshll.u32 %v23189_v63, %v1148_v22 }
 0x137   : > { %v1159_v10 = vor.u32 %v1158_v23, %v1157_v6  ;;  %vm1166_vm7 = vcmp.lt.s32.totalorder %v16624_v24, 1  ;;  %vm1088_vm8 = vc.u32 %v16649_v25, %v16652_v28  ;;  %v1089_v7 = vadd.s32 1, %v16653_v60 }
 0x138   : > { %v1162_v45 = vor.u32 %v1161_v12, %v1160_v50  ;;  %vm1167_vm9 = vcmp.lt.s32.totalorder %v16624_v24, 2  ;;  %v1165_v9 = vor.u32 %v1164_v3, %v1163_v11  ;;  %vm1168_vm10 = vcmp.lt.s32.totalorder %v16624_v24, 3 }
 0x139   : > { %vm1169_vm11 = vcmp.lt.s32.totalorder %v16624_v24, 4  ;;  %v1174_v33 = vsel %vm1166_vm7, %v1153_v1, %v1156_v2  ;;  %v1090_v56 = vsel %vm1088_vm8, %v1089_v7, %v16653_v60  ;;  %v1178_v41 = vsel %vm1166_vm7, %v1156_v2, %v1159_v10 }
 0x13a   : > { %v1171_v51 = vsel %vm1169_vm11, %v1159_v10, 2102212464  ;;  %v1175_v22 = vsel %vm1169_vm11, %v1162_v45, 920167782  ;;  %v1091_v62 = vadd.s32 %v1090_v56, %v1086_v49  ;;  %v1170_v8 = vsel %vm1166_vm7, %v1150_v40, %v1153_v1 }
 0x13b   : > { %v1176_v6 = vsel %vm1168_vm10, %v1159_v10, %v1175_v22  ;;  %v1179_v23 = vsel %vm1169_vm11, %v1165_v9, 1326507024  ;;  %v1172_v34 = vsel %vm1168_vm10, %v1156_v2, %v1171_v51  ;;  %v1249_v3 = vsel %vm1248_vm6, %v16621_v17, 0 }
 0x13c   : > { %v1177_v50 = vsel %vm1167_vm9, %v1174_v33, %v1176_v6  ;;  %v1180_v12 = vsel %vm1168_vm10, %v1162_v45, %v1179_v23  ;;  %v1092_v11 = vadd.s32 536870912, %v1091_v62  ;;  %v16690_v40 = vadd.f32 %v16614_v42, %v16336_v27 }
 0x13d   : > { %v1181_v60 = vsel %vm1167_vm9, %v1178_v41, %v1180_v12  ;;  %v16680_v7 = vmul.u32.u64.low %v16618_v48, %v1177_v50  ;;  %v16681_v0 = vmul.u32.u64.high %v16618_v48, %v1177_v50, %v16680_v7  ;;  %v23190_v49 = vand.u32 2147483647, %v16602_v31 }
 0x13e   : > { %v16685_v1 = vmul.u32.u64.low %v16618_v48, %v1181_v60  ;;  %v16686_v2 = vmul.u32.u64.high %v16618_v48, %v1181_v60, %v16685_v1  ;;  %v16694_v10 = vshrl.u32 %v1092_v11, 30  ;;  %v1173_v45 = vsel %vm1167_vm9, %v1170_v8, %v1172_v34 }
 0x13f   : > { %v1244_v17 = vand.u32 8388607, %v23190_v49  ;;  %v1251_v9 = vand.u32 31, %v1249_v3  ;;  %v7625_v33 = vsub.s32 3, %v16077_v35  ;;  %v14353_v56 = vsub.s32 4, %v16077_v35 }
 0x140   : > { %v1094_v51 = vshll.u32 %v16694_v10, 30  ;;  %v1192_v22 = vadd.s32 1, %v16681_v0  ;;  %v1189_v27 = vmul.u32 %v16618_v48, %v1173_v45  ;;  %vm1191_vm12 = vc.u32 %v16686_v2, %v16680_v7 }
 0x141   : > { %v1245_v42 = vor.u32 8388608, %v1244_v17  ;;  %v23094_v41 = vand.u32 2147483647, %v16690_v40  ;;  %v1252_v24 = vsub.s32 32, %v1251_v9  ;;  %v1343_v8 = vand.u32 2139095040, %v16690_v40 }
 0x142   : > { %v16706_v6 = vsub.s32 %v1091_v62, %v1094_v51  ;;  %v1193_v34 = vsel %vm1191_vm12, %v1192_v22, %v16681_v0  ;;  %v16711_v23 = vrot.slane %v23175_v15, %v7625_v33  ;;  %v16714_v50 = vrot.slane %v23176_v13, %v7625_v33 }
 0x143   : > { %v1194_v35 = vadd.s32 %v1193_v34, %v1189_v27  ;;  %v16718_v12 = vrot.slane %v23175_v15, %v14353_v56  ;;  %v16721_v62 = vrot.slane %v23176_v13, %v14353_v56  ;;  %v16725_v0 = vand.u32 8388607, %v23094_v41 }
 0x144   : > { %v1097_v48 = vsub.s32 0, %v16706_v6  ;;  %v1255_v1 = vshrl.u32 %v23186_v5, %v1252_v24  ;;  %v16729_v49 = vshll.u32 %v1245_v42, 8  ;;  %v1344_v17 = vshrl.u32 %v1343_v8, 23 }
 0x145   : > { %v1195_v11 = vadd.s32 536870912, %v1194_v35  ;;  %v1087_v45 = vadd.s32 %v16652_v28, %v16649_v25  ;;  %v1258_v13 = vshrl.u32 %v23187_v16, %v1252_v24  ;;  %v1261_v33 = vshrl.u32 %v23188_v47, %v1252_v24 }
 0x146   : > { %v14656_v60 = vmin.u32 %v1097_v48, %v16706_v6  ;;  %v16737_v51 = vshrl.u32 %v1249_v3, 5  ;;  %v1254_v22 = vshll.u32 %v23185_v18, %v1251_v9  ;;  %v1264_v27 = vshrl.u32 %v23189_v63, %v1252_v24 }
 0x147   : > { %v16733_v15 = vshrl.u32 %v1195_v11, 30  ;;  %v1257_v34 = vshll.u32 %v23186_v5, %v1251_v9  ;;  %v1260_v25 = vshll.u32 %v23187_v16, %v1251_v9  ;;  %v23191_v28 = vmov 1326507024  }
 0x148   : > { %v1099_v56 = vclz %v14656_v60  ;;  %v1267_v8 = vshrl.u32 %v23191_v28, %v1252_v24  ;;  %v1256_v11 = vor.u32 %v1255_v1, %v1254_v22  ;;  %v1263_v60 = vshll.u32 %v23188_v47, %v1251_v9 }
 0x149   : > { %v1197_v42 = vshll.u32 %v16733_v15, 30  ;;  %v14667_v3 = vadd.s32 4294967169, %v1344_v17  ;;  %v1259_v36 = vor.u32 %v1258_v13, %v1257_v34  ;;  %v1262_v54 = vor.u32 %v1261_v33, %v1260_v25 }
 0x14a   : > { %v14657_v48 = vadd.s32 4294967294, %v1099_v56  ;;  %v1266_v59 = vshll.u32 %v23189_v63, %v1251_v9  ;;  %v1265_v58 = vor.u32 %v1264_v27, %v1263_v60  ;;  %vm1269_vm15 = vcmp.lt.s32.totalorder %v16737_v51, 1 }
 0x14b   : > { %v16747_v41 = vsub.s32 %v1194_v35, %v1197_v42  ;;  %vm1270_vm0 = vcmp.lt.s32.totalorder %v16737_v51, 2  ;;  %vm1271_vm1 = vcmp.lt.s32.totalorder %v16737_v51, 3  ;;  %v1117_v35 = vsub.s32 4, %v16694_v10 }
 0x14c   : > { %vm14658_vm14 = vcmp.lt.s32.totalorder %v14657_v48, 0  ;;  %v1268_v56 = vor.u32 %v1267_v8, %v1266_v59  ;;  %vm1272_vm2 = vcmp.lt.s32.totalorder %v16737_v51, 4  ;;  %v23192_v9 = vand.u32 2147483647, %v16597_v57 }
 0x14d   : > { %v1102_v4 = vsel %vm14658_vm14, 0, %v14657_v48  ;;  %v1200_v38 = vsub.s32 0, %v16747_v41  ;;  %v1253_v22 = vshrl.u32 %v23185_v18, %v1252_v24  ;;  %v1274_v27 = vsel %vm1272_vm2, %v1262_v54, 2102212464 }
 0x14e   : > { %v1103_v1 = vsub.s32 32, %v1102_v4  ;;  %v1107_v17 = vsub.s32 4294967266, %v1102_v4  ;;  %vm16758_vm3 = vcmp.le.f32.partialorder %v23192_v9, 0.7853982  ;;  %v1277_v59 = vsel %vm1269_vm15, %v1256_v11, %v1259_v36 }
 0x14f   : > { %v14660_v33 = vmin.u32 %v1200_v38, %v16747_v41  ;;  %v1104_v42 = vshll.u32 %v16706_v6, %v1102_v4  ;;  %v1278_v8 = vsel %vm1272_vm2, %v1265_v58, 920167782  ;;  %vm1136_vm4 = vcmp.lt.s32.totalorder %v16599_v19, 0 }
 0x150   : > { %v1105_v34 = vshrl.u32 %v1087_v45, %v1103_v1  ;;  %v1108_v25 = vadd.s32 127, %v1107_v17  ;;  %v1279_v60 = vsel %vm1271_vm1, %v1262_v54, %v1278_v8  ;;  %v1281_v38 = vsel %vm1269_vm15, %v1259_v36, %v1262_v54 }
 0x151   : > { %v1202_v48 = vclz %v14660_v33  ;;  %v1282_v9 = vsel %vm1272_vm2, %v1268_v56, 1326507024  ;;  %v1118_v52 = vsel %vm1033_vm13, %v1117_v35, %v16694_v10  ;;  %v1220_v4 = vsub.s32 4, %v16733_v15 }
 0x152   : > { %v1106_v24 = vor.u32 %v1105_v34, %v1104_v42  ;;  %v1109_v53 = vshll.u32 %v1108_v25, 23  ;;  %v1273_v45 = vsel %vm1269_vm15, %v1253_v22, %v1256_v11  ;;  %v1280_v1 = vsel %vm1270_vm0, %v1277_v59, %v1279_v60 }
 0x153   : > { %v14661_v6 = vadd.s32 4294967294, %v1202_v48  ;;  %v1283_v17 = vsel %vm1271_vm1, %v1265_v58, %v1282_v9  ;;  %v1275_v33 = vsel %vm1271_vm1, %v1259_v36, %v1274_v27  ;;  %v1350_v11 = vadd.s32 1, %v14667_v3 }
 0x154   : > { %v1110_v54 = vor.u32 4788187, %v1109_v53  ;;  %v1113_v56 = vcvt.s32.f32 %v1106_v24  ;;  %v1284_v10 = vsel %vm1270_vm0, %v1281_v38, %v1283_v17  ;;  %v1190_v53 = vadd.s32 %v16680_v7, %v16686_v2 }
 0x155   : > { %vm14662_vm5 = vcmp.lt.s32.totalorder %v14661_v6, 0  ;;  %v16787_v35 = vmul.u32.u64.low %v16729_v49, %v1284_v10  ;;  %v16788_v42 = vmul.u32.u64.high %v16729_v49, %v1284_v10, %v16787_v35  ;;  %vm1351_vm6 = vcmp.gt.s32.totalorder %v1350_v11, 0 }
 0x156   : > { %v1111_v22 = vand.u32 2147483647, %v1110_v54  ;;  %v1205_v34 = vsel %vm14662_vm5, 0, %v14661_v6  ;;  %v16791_v59 = vmul.u32.u64.low %v16729_v49, %v1280_v1  ;;  %v16792_v25 = vmul.u32.u64.high %v16729_v49, %v1280_v1, %v16791_v59 }
 0x157   : > { %v1206_v58 = vsub.s32 32, %v1205_v34  ;;  %v1210_v36 = vsub.s32 4294967266, %v1205_v34  ;;  %v1120_v8 = vsel %vm16758_vm3, 0, %v1118_v52  ;;  %v1276_v3 = vsel %vm1270_vm0, %v1273_v45, %v1275_v33 }
 0x158   : > { %v1114_v27 = vmul.f32 %v1113_v56, %v1111_v22  ;;  %v1352_v48 = vsel %vm1351_vm6, %v1350_v11, 0  ;;  %v1207_v60 = vshll.u32 %v16747_v41, %v1205_v34  ;;  %vm1294_vm7 = vc.u32 %v16788_v42, %v16791_v59 }
 0x159   : > { %v1208_v38 = vshrl.u32 %v1190_v53, %v1206_v58  ;;  %v1211_v9 = vadd.s32 127, %v1210_v36  ;;  %v1221_v7 = vsel %vm1136_vm4, %v1220_v4, %v16733_v15  ;;  %v1295_v2 = vadd.s32 1, %v16792_v25 }
 0x15a   : > { %v1115_v24 = vxor.u32 2147483648, %v1114_v27  ;;  %v1354_v6 = vand.u32 31, %v1352_v48  ;;  %v23195_v52 = vand.u32 2147483647, %v16599_v19  ;;  %v1292_v1 = vmul.u32 %v16729_v49, %v1276_v3 }
 0x15b   : > { %v1209_v41 = vor.u32 %v1208_v38, %v1207_v60  ;;  %v1212_v45 = vshll.u32 %v1211_v9, 23  ;;  %v7788_v54 = vadd.s32 3, %v1120_v8  ;;  %v1296_v56 = vsel %vm1294_vm7, %v1295_v2, %v16792_v25 }
 0x15c   : > { %vm16810_vm8 = vcmp.le.f32.partialorder %v23195_v52, 0.7853982  ;;  %v1116_v17 = vsel %vm1033_vm13, %v1115_v24, %v1114_v27  ;;  %v1355_v15 = vsub.s32 32, %v1354_v6  ;;  %v1297_v35 = vadd.s32 %v1296_v56, %v1292_v1 }
 0x15d   : > { %v1119_v4 = vsel %vm16758_vm3, %v16597_v57, %v1116_v17  ;;  %v1213_v33 = vor.u32 4788187, %v1212_v45  ;;  %v1223_v10 = vsel %vm16810_vm8, 0, %v1221_v7  ;;  %v16823_v11 = vand.u32 3, %v1120_v8 }
 0x15e   : > { %15502 = vcosq.f32 %v1119_v4  ;;  %v1216_v49 = vcvt.s32.f32 %v1209_v41  ;;  %v1348_v22 = vor.u32 8388608, %v16725_v0  ;;  %v1298_v53 = vadd.s32 536870912, %v1297_v35 }
 0x15f   : > { %15504 = vsinq.f32 %v1119_v4  ;;  %v1214_v34 = vand.u32 2147483647, %v1213_v33  ;;  %v1358_v25 = vshrl.u32 %v23186_v5, %v1355_v15  ;;  %v16827_v58 = vand.u32 3, %v7788_v54 }
 0x160   : > { %v7892_v13 = vadd.s32 3, %v1223_v10  ;;  %v1361_v36 = vshrl.u32 %v23187_v16, %v1355_v15  ;;  %v1364_v27 = vshrl.u32 %v23188_v47, %v1355_v15  ;;  %v16831_v60 = vshrl.u32 %v1298_v53, 30 }
 0x161   : > { %v1217_v3 = vmul.f32 %v1216_v49, %v1214_v34  ;;  %v1357_v8 = vshll.u32 %v23185_v18, %v1354_v6  ;;  %v1367_v38 = vshrl.u32 %v23189_v63, %v1355_v15  ;;  %v1360_v0 = vshll.u32 %v23186_v5, %v1354_v6 }
 0x162   : > { %v1363_v9 = vshll.u32 %v23187_v16, %v1354_v6  ;;  %v1366_v24 = vshll.u32 %v23188_v47, %v1354_v6  ;;  %v1370_v7 = vshrl.u32 %v23191_v28, %v1355_v15  ;;  %v1300_v52 = vshll.u32 %v16831_v60, 30 }
 0x163   : > { %v1218_v2 = vxor.u32 2147483648, %v1217_v3  ;;  %v16840_v41 = vshrl.u32 %v1352_v48, 5  ;;  %v1359_v45 = vor.u32 %v1358_v25, %v1357_v8  ;;  %v1362_v1 = vor.u32 %v1361_v36, %v1360_v0 }
 0x164   : > { %v1365_v17 = vor.u32 %v1364_v27, %v1363_v9  ;;  %v1368_v54 = vor.u32 %v1367_v38, %v1366_v24  ;;  %v1369_v56 = vshll.u32 %v23189_v63, %v1354_v6  ;;  %vm1129_vm9 = vcmp.eq.s32.totalorder %v16823_v11, 2 }
 0x165   : > { %v1219_v4 = vsel %vm1136_vm4, %v1218_v2, %v1217_v3  ;;  %v16846_v33 = vand.u32 3, %v1223_v10  ;;  %vm7794_vm10 = vcmp.eq.s32.totalorder %v16827_v58, 2  ;;  %v16849_v49 = vsub.s32 %v1297_v35, %v1300_v52  ;;  %v16870_v2 = vpop.permute.xlu1 %776 }
 0x166   : > { %vm1126_vm11 = vcmp.eq.s32.totalorder %v16823_v11, 0  ;;  %v1222_v48 = vsel %vm16810_vm8, %v16599_v19, %v1219_v4  ;;  %vm7791_vm12 = vcmp.eq.s32.totalorder %v16827_v58, 0  ;;  %v16856_v6 = vand.u32 3, %v7892_v13 }
 0x167   : > { %v1356_v34 = vshrl.u32 %v23185_v18, %v1355_v15  ;;  %v1371_v53 = vor.u32 %v1370_v7, %v1369_v56  ;;  %vm1125_vm13 = vcmp.lt.s32.totalorder %v16823_v11, 2  ;;  %15506 = vcosq.f32 %v1222_v48 }
 0x168   : > { %vm7790_vm14 = vcmp.lt.s32.totalorder %v16827_v58, 2  ;;  %v1303_v10 = vsub.s32 0, %v16849_v49  ;;  %vm1372_vm15 = vcmp.lt.s32.totalorder %v16840_v41, 1  ;;  %vm1375_vm0 = vcmp.lt.s32.totalorder %v16840_v41, 4 }
 0x169   : > { %vm1123_vm1 = vweird.f32 %v16597_v57  ;;  %15508 = vsinq.f32 %v1222_v48  ;;  %v1377_v51 = vsel %vm1375_vm0, %v1365_v17, 2102212464  ;;  %v1380_v35 = vsel %vm1372_vm15, %v1359_v45, %v1362_v1 }
 0x16a   : > { %v1381_v25 = vsel %vm1375_vm0, %v1368_v54, 920167782  ;;  %v14664_v15 = vmin.u32 %v1303_v10, %v16849_v49  ;;  %vm1374_vm2 = vcmp.lt.s32.totalorder %v16840_v41, 3  ;;  %v1384_v13 = vsel %vm1372_vm15, %v1362_v1, %v1365_v17 }
 0x16b   : > { %v1388_v36 = vshll.u32 %v1348_v22, 8  ;;  %vm1373_vm3 = vcmp.lt.s32.totalorder %v16840_v41, 2  ;;  %v1376_v27 = vsel %vm1372_vm15, %v1356_v34, %v1359_v45  ;;  %v1382_v3 = vsel %vm1374_vm2, %v1365_v17, %v1381_v25  ;;  %v15503_v38 = vpop.eup %15502 }
 0x16c   : > { %v1385_v8 = vsel %vm1375_vm0, %v1371_v53, 1326507024  ;;  %v1305_v0 = vclz %v14664_v15  ;;  %v1378_v9 = vsel %vm1374_vm2, %v1362_v1, %v1377_v51  ;;  %v1383_v24 = vsel %vm1373_vm3, %v1380_v35, %v1382_v3  ;;  %v15505_v52 = vpop.eup %15504 }
 0x16d   : > { %v1386_v7 = vsel %vm1374_vm2, %v1368_v54, %v1385_v8  ;;  %v1130_v56 = vxor.u32 2147483648, %v15503_v38  ;;  %v16874_v22 = vmul.u32.u64.low %v1388_v36, %v1383_v24  ;;  %v16875_v48 = vmul.u32.u64.high %v1388_v36, %v1383_v24, %v16874_v22 }
 0x16e   : > { %v1387_v4 = vsel %vm1373_vm3, %v1384_v13, %v1386_v7  ;;  %v1127_v45 = vxor.u32 2147483648, %v15505_v52  ;;  %v14665_v17 = vadd.s32 4294967294, %v1305_v0  ;;  %vm1232_vm4 = vcmp.eq.s32.totalorder %v16846_v33, 2 }
 0x16f   : > { %v16879_v1 = vmul.u32.u64.low %v1388_v36, %v1387_v4  ;;  %v16880_v34 = vmul.u32.u64.high %v1388_v36, %v1387_v4, %v16879_v1  ;;  %v1131_v54 = vsel %vm1129_vm9, %v1130_v56, %v15505_v52  ;;  %v7796_v53 = vsel %vm7794_vm10, %v1130_v56, %v15505_v52 }
 0x170   : > { %vm1239_vm5 = vcmp.lt.s32.totalorder %v16602_v31, 0  ;;  %v1293_v10 = vadd.s32 %v16791_v59, %v16788_v42  ;;  %v907_v51 = vmul.f32 %v16575_v20, %v16870_v2  ;;  %v1128_v35 = vsel %vm1126_vm11, %v15503_v38, %v1127_v45 }
 0x171   : > { %vm1229_vm6 = vcmp.eq.s32.totalorder %v16846_v33, 0  ;;  %v7793_v25 = vsel %vm7791_vm12, %v15503_v38, %v1127_v45  ;;  %vm14666_vm7 = vcmp.lt.s32.totalorder %v14665_v17, 0  ;;  %v1379_v15 = vsel %vm1373_vm3, %v1376_v27, %v1378_v9 }
 0x172   : > { %v1132_v42 = vsel %vm1125_vm13, %v1128_v35, %v1131_v54  ;;  %vm1228_vm8 = vcmp.lt.s32.totalorder %v16846_v33, 2  ;;  %v7797_v59 = vsel %vm7790_vm14, %v7793_v25, %v7796_v53  ;;  %v1308_v13 = vsel %vm14666_vm7, 0, %v14665_v17 }
 0x173   : > { %v1398_v3 = vadd.s32 1, %v16875_v48  ;;  %v1133_v8 = vsel %vm1123_vm1, nan, %v1132_v42  ;;  %vm1226_vm9 = vweird.f32 %v16599_v19  ;;  %v7798_v41 = vsel %vm1123_vm1, nan, %v7797_v59 }
 0x174   : > { %v1309_v27 = vsub.s32 32, %v1308_v13  ;;  %v1323_v11 = vsub.s32 4, %v16831_v60  ;;  %v7631_v38 = vmul.f32 %v16711_v23, %v1133_v8  ;;  %v14359_v0 = vmul.f32 %v16718_v12, %v7798_v41  ;;  %v15507_v4 = vpop.eup %15506 }
 0x175   : > { %v23198_v58 = vand.u32 2147483647, %v16602_v31  ;;  %v1313_v24 = vsub.s32 4294967266, %v1308_v13  ;;  %v16924_v7 = vadd.f32 %v907_v51, %v16344_v30  ;;  %v1310_v57 = vshll.u32 %v16849_v49, %v1308_v13 }
 0x176   : > { %v1311_v52 = vshrl.u32 %v1293_v10, %v1309_v27  ;;  %v1395_v56 = vmul.u32 %v1388_v36, %v1379_v15  ;;  %vm1397_vm11 = vc.u32 %v16880_v34, %v16874_v22  ;;  %vm7894_vm12 = vcmp.lt.s32.totalorder %v16856_v6, 2  ;;  %v15509_v54 = vpop.eup %15508 }
 0x177   : > { %vm16919_vm10 = vcmp.le.f32.partialorder %v23198_v58, 0.7853982  ;;  %v14423_v45 = vadd.f32 %v14359_v0, %v7631_v38  ;;  %v1314_v17 = vadd.s32 127, %v1313_v24  ;;  %v1399_v1 = vsel %vm1397_vm11, %v1398_v3, %v16875_v48 }
 0x178   : > { %v1233_v53 = vxor.u32 2147483648, %v15507_v4  ;;  %vm7895_vm13 = vcmp.eq.s32.totalorder %v16856_v6, 0  ;;  %v1312_v30 = vor.u32 %v1311_v52, %v1310_v57  ;;  %v1400_v51 = vadd.s32 %v1399_v1, %v1395_v56 }
 0x179   : > { %v1230_v49 = vxor.u32 2147483648, %v15509_v54  ;;  %vm7898_vm14 = vcmp.eq.s32.totalorder %v16856_v6, 2  ;;  %14487 = vst [vmem:[%s16934_s6] sm:$0xff] %v14423_v45  ;;  %v1315_v36 = vshll.u32 %v1314_v17, 23  ;;  %v1446_v10 = vand.u32 2139095040, %v16924_v7 }
 0x17a   : > { %v1234_v35 = vsel %vm1232_vm4, %v1233_v53, %v15509_v54  ;;  %v7900_v48 = vsel %vm7898_vm14, %v1233_v53, %v15509_v54  ;;  %v1324_v25 = vsel %vm1239_vm5, %v1323_v11, %v16831_v60  ;;  %v1401_v15 = vadd.s32 536870912, %v1400_v51 }
 0x17b   : > { %v1231_v42 = vsel %vm1229_vm6, %v15507_v4, %v1230_v49  ;;  %v7897_v59 = vsel %vm7895_vm13, %v15507_v4, %v1230_v49  ;;  %v1316_v13 = vor.u32 4788187, %v1315_v36  ;;  %v1447_v3 = vshrl.u32 %v1446_v10, 23 }
 0x17c   : > { %v1235_v8 = vsel %vm1228_vm8, %v1231_v42, %v1234_v35  ;;  %v7901_v41 = vsel %vm7894_vm12, %v7897_v59, %v7900_v48  ;;  %v1319_v27 = vcvt.s32.f32 %v1312_v30  ;;  %v1402_v38 = vshrl.u32 %v1401_v15, 30 }
 0x17d   : > { %v1236_v0 = vsel %vm1226_vm9, nan, %v1235_v8  ;;  %v7902_v60 = vsel %vm1226_vm9, nan, %v7901_v41  ;;  %v1317_v11 = vand.u32 2147483647, %v1316_v13  ;;  %v14671_v58 = vadd.s32 4294967169, %v1447_v3 }
 0x17e   : > { %v7632_v24 = vmul.f32 %v16714_v50, %v1236_v0  ;;  %v14360_v57 = vmul.f32 %v16721_v62, %v7902_v60  ;;  %v1326_v33 = vsel %vm16919_vm10, 0, %v1324_v25  ;;  %v1403_v6 = vshll.u32 %v1402_v38, 30 }
 0x17f   : > { %v1320_v52 = vmul.f32 %v1319_v27, %v1317_v11  ;;  %v1453_v56 = vadd.s32 1, %v14671_v58  ;;  %v7996_v1 = vadd.s32 3, %v1326_v33  ;;  %v908_v19 = vmul.f32 %v16578_v14, %v16870_v2 }
 0x180   : > { %v14424_v4 = vadd.f32 %v14360_v57, %v7632_v24  ;;  %v16957_v45 = vsub.s32 %v1400_v51, %v1403_v6  ;;  %v1443_v53 = vand.u32 2147483647, %v16924_v7  ;;  %v16969_v10 = vand.u32 3, %v1326_v33 }
 0x181   : > { %v1321_v17 = vxor.u32 2147483648, %v1320_v52  ;;  %vm1454_vm15 = vcmp.gt.s32.totalorder %v1453_v56, 0  ;;  %vm1342_vm0 = vcmp.lt.s32.totalorder %v16690_v40, 0  ;;  %v16973_v35 = vand.u32 3, %v7996_v1 }
 0x182   : > { %14488 = vst [vmem:[%s16934_s6 + $0x8] sm:$0xff] %v14424_v4  ;;  %v1406_v54 = vsub.s32 0, %v16957_v45  ;;  %v1455_v30 = vsel %vm1454_vm15, %v1453_v56, 0  ;;  %v16976_v48 = vadd.f32 %v908_v19, %v16347_v29  ;;  %v1396_v15 = vadd.s32 %v16874_v22, %v16880_v34 }
 0x183   : > { %v1322_v49 = vsel %vm1239_vm5, %v1321_v17, %v1320_v52  ;;  %v1457_v36 = vand.u32 31, %v1455_v30  ;;  %v1450_v9 = vand.u32 8388607, %v1443_v53  ;;  %v1426_v59 = vsub.s32 4, %v1402_v38 }
 0x184   : > { %v1325_v51 = vsel %vm16919_vm10, %v16602_v31, %v1322_v49  ;;  %v14668_v2 = vmin.u32 %v1406_v54, %v16957_v45  ;;  %v16982_v13 = vshrl.u32 %v1455_v30, 5  ;;  %vm1335_vm2 = vcmp.eq.s32.totalorder %v16969_v10, 2 }
 0x185   : > { %15510 = vcosq.f32 %v1325_v51  ;;  %v1458_v25 = vsub.s32 32, %v1457_v36  ;;  %v1460_v3 = vshll.u32 %v23185_v18, %v1457_v36  ;;  %v1463_v8 = vshll.u32 %v23186_v5, %v1457_v36 }
 0x186   : > { %15512 = vsinq.f32 %v1325_v51  ;;  %v1408_v42 = vclz %v14668_v2  ;;  %v1466_v0 = vshll.u32 %v23187_v16, %v1457_v36  ;;  %v1469_v34 = vshll.u32 %v23188_v47, %v1457_v36 }
 0x187   : > { %v1461_v29 = vshrl.u32 %v23186_v5, %v1458_v25  ;;  %v1464_v27 = vshrl.u32 %v23187_v16, %v1458_v25  ;;  %v1467_v22 = vshrl.u32 %v23188_v47, %v1458_v25  ;;  %v1470_v60 = vshrl.u32 %v23189_v63, %v1458_v25 }
 0x188   : > { %v14669_v41 = vadd.s32 4294967294, %v1408_v42  ;;  %v1472_v11 = vshll.u32 %v23189_v63, %v1457_v36  ;;  %v1473_v57 = vshrl.u32 %v23191_v28, %v1458_v25  ;;  %v1451_v6 = vor.u32 8388608, %v1450_v9 }
 0x189   : > { %v1462_v58 = vor.u32 %v1461_v29, %v1460_v3  ;;  %v1465_v24 = vor.u32 %v1464_v27, %v1463_v8  ;;  %v1468_v52 = vor.u32 %v1467_v22, %v1466_v0  ;;  %v1471_v56 = vor.u32 %v1470_v60, %v1469_v34 }
 0x18a   : > { %vm14670_vm1 = vcmp.lt.s32.totalorder %v14669_v41, 0  ;;  %v1427_v1 = vsel %vm1342_vm0, %v1426_v59, %v1402_v38  ;;  %vm8002_vm3 = vcmp.eq.s32.totalorder %v16973_v35, 2  ;;  %v1474_v19 = vor.u32 %v1473_v57, %v1472_v11 }
 0x18b   : > { %v1411_v33 = vsel %vm14670_vm1, 0, %v14669_v41  ;;  %vm1332_vm4 = vcmp.eq.s32.totalorder %v16969_v10, 0  ;;  %vm7999_vm5 = vcmp.eq.s32.totalorder %v16973_v35, 0  ;;  %v1459_v30 = vshrl.u32 %v23185_v18, %v1458_v25 }
 0x18c   : > { %v1412_v4 = vsub.s32 32, %v1411_v33  ;;  %v1416_v17 = vsub.s32 4294967266, %v1411_v33  ;;  %v1413_v54 = vshll.u32 %v16957_v45, %v1411_v33  ;;  %vm1475_vm6 = vcmp.lt.s32.totalorder %v16982_v13, 1 }
 0x18d   : > { %vm1477_vm7 = vcmp.lt.s32.totalorder %v16982_v13, 3  ;;  %vm1331_vm8 = vcmp.lt.s32.totalorder %v16969_v10, 2  ;;  %v23201_v49 = vand.u32 2147483647, %v16690_v40  ;;  %vm7998_vm10 = vcmp.lt.s32.totalorder %v16973_v35, 2 }
 0x18e   : > { %v1414_v36 = vshrl.u32 %v1396_v15, %v1412_v4  ;;  %v1417_v51 = vadd.s32 127, %v1416_v17  ;;  %vm1478_vm11 = vcmp.lt.s32.totalorder %v16982_v13, 4  ;;  %v1483_v45 = vsel %vm1475_vm6, %v1462_v58, %v1465_v24 }
 0x18f   : > { %vm17007_vm9 = vcmp.le.f32.partialorder %v23201_v49, 0.7853982  ;;  %vm1329_vm12 = vweird.f32 %v16602_v31  ;;  %v1480_v2 = vsel %vm1478_vm11, %v1468_v52, 2102212464  ;;  %v1484_v25 = vsel %vm1478_vm11, %v1471_v56, 920167782 }
 0x190   : > { %v1487_v42 = vsel %vm1475_vm6, %v1465_v24, %v1468_v52  ;;  %v1488_v9 = vsel %vm1478_vm11, %v1474_v19, 1326507024  ;;  %v1415_v59 = vor.u32 %v1414_v36, %v1413_v54  ;;  %v1418_v3 = vshll.u32 %v1417_v51, 23 }
 0x191   : > { %vm1476_vm13 = vcmp.lt.s32.totalorder %v16982_v13, 2  ;;  %v1485_v15 = vsel %vm1477_vm7, %v1468_v52, %v1484_v25  ;;  %v1479_v8 = vsel %vm1475_vm6, %v1459_v30, %v1462_v58  ;;  %v1489_v29 = vsel %vm1477_vm7, %v1471_v56, %v1488_v9 }
 0x192   : > { %v1486_v41 = vsel %vm1476_vm13, %v1483_v45, %v1485_v15  ;;  %v1491_v27 = vshll.u32 %v1451_v6, 8  ;;  %v15511_v0 = vpop.eup %15510  ;;  %v1419_v22 = vor.u32 4788187, %v1418_v3  ;;  %v1481_v34 = vsel %vm1477_vm7, %v1465_v24, %v1480_v2 }
 0x193   : > { %v1490_v60 = vsel %vm1476_vm13, %v1487_v42, %v1489_v29  ;;  %v1549_v11 = vand.u32 2139095040, %v16976_v48  ;;  %v15513_v57 = vpop.eup %15512  ;;  %v1336_v33 = vxor.u32 2147483648, %v15511_v0  ;;  %v1422_v58 = vcvt.s32.f32 %v1415_v59  ;;  %v785_v59 = vpop.permute.xlu0 %784 }
 0x194   : > { %v17032_v52 = vmul.u32.u64.low %v1491_v27, %v1490_v60  ;;  %v17033_v4 = vmul.u32.u64.high %v1491_v27, %v1490_v60, %v17032_v52  ;;  %v1333_v17 = vxor.u32 2147483648, %v15513_v57  ;;  %v1420_v19 = vand.u32 2147483647, %v1419_v22 }
 0x195   : > { %v17035_v56 = vmul.u32.u64.low %v1491_v27, %v1486_v41  ;;  %v17036_v6 = vmul.u32.u64.high %v1491_v27, %v1486_v41, %v17035_v56  ;;  %v1337_v24 = vsel %vm1335_vm2, %v1336_v33, %v15513_v57  ;;  %v8004_v54 = vsel %vm8002_vm3, %v1336_v33, %v15513_v57 }
 0x196   : > { %v1546_v30 = vand.u32 2147483647, %v16976_v48  ;;  %v1550_v49 = vshrl.u32 %v1549_v11, 23  ;;  %v1334_v36 = vsel %vm1332_vm4, %v15511_v0, %v1333_v17  ;;  %v1423_v51 = vmul.f32 %v1422_v58, %v1420_v19 }
 0x197   : > { %v8001_v45 = vsel %vm7999_vm5, %v15511_v0, %v1333_v17  ;;  %v1482_v2 = vsel %vm1476_vm13, %v1479_v8, %v1481_v34  ;;  %v1338_v25 = vsel %vm1331_vm8, %v1334_v36, %v1337_v24  ;;  %v1429_v42 = vsel %vm17007_vm9, 0, %v1427_v1 }
 0x198   : > { %v8005_v9 = vsel %vm7998_vm10, %v8001_v45, %v8004_v54  ;;  %vm1500_vm14 = vc.u32 %v17033_v4, %v17035_v56  ;;  %v1339_v3 = vsel %vm1329_vm12, nan, %v1338_v25  ;;  %v1424_v15 = vxor.u32 2147483648, %v1423_v51 }
 0x199   : > { %v8006_v13 = vsel %vm1329_vm12, nan, %v8005_v9  ;;  %v1501_v10 = vadd.s32 1, %v17036_v6  ;;  %v7633_v8 = vmul.f32 %v16711_v23, %v1339_v3  ;;  %v1498_v35 = vmul.u32 %v1491_v27, %v1482_v2 }
 0x19a   : > { %v14361_v1 = vmul.f32 %v16718_v12, %v8006_v13  ;;  %v14675_v41 = vadd.s32 4294967169, %v1550_v49  ;;  %v1425_v29 = vsel %vm1342_vm0, %v1424_v15, %v1423_v51  ;;  %v8100_v0 = vadd.s32 3, %v1429_v42 }
 0x19b   : > { %v1502_v22 = vsel %vm1500_vm14, %v1501_v10, %v17036_v6  ;;  %v911_v34 = vmul.f32 %v16575_v20, %v785_v59  ;;  %v1428_v31 = vsel %vm17007_vm9, %v16690_v40, %v1425_v29  ;;  %v1553_v33 = vand.u32 8388607, %v1546_v30 }
 0x19c   : > { %v14425_v60 = vadd.f32 %v14361_v1, %v7633_v8  ;;  %v1503_v11 = vadd.s32 %v1502_v22, %v1498_v35  ;;  %v1556_v57 = vadd.s32 1, %v14675_v41  ;;  %15514 = vcosq.f32 %v1428_v31 }
 0x19d   : > { %15516 = vsinq.f32 %v1428_v31  ;;  %v17076_v52 = vadd.f32 %v911_v34, %v16360_v43  ;;  %v17078_v17 = vand.u32 3, %v1429_v42  ;;  %v17080_v19 = vand.u32 3, %v8100_v0 }
 0x19e   : > { %14489 = vst [vmem:[%s16934_s6 + $0x10] sm:$0xff] %v14425_v60  ;;  %v1504_v27 = vadd.s32 536870912, %v1503_v11  ;;  %vm1557_vm15 = vcmp.gt.s32.totalorder %v1556_v57, 0  ;;  %v1554_v49 = vor.u32 8388608, %v1553_v33  ;;  %v912_v51 = vmul.f32 %v16578_v14, %v785_v59 }
 0x19f   : > { %v1558_v58 = vsel %vm1557_vm15, %v1556_v57, 0  ;;  %v1858_v45 = vand.u32 2139095040, %v17076_v52  ;;  %vm1438_vm0 = vcmp.eq.s32.totalorder %v17078_v17, 2  ;;  %vm8106_vm1 = vcmp.eq.s32.totalorder %v17080_v19, 2 }
 0x1a0   : > { %v17082_v38 = vshrl.u32 %v1504_v27, 30  ;;  %v1560_v6 = vand.u32 31, %v1558_v58  ;;  %v17085_v36 = vshrl.u32 %v1558_v58, 5  ;;  %vm1435_vm2 = vcmp.eq.s32.totalorder %v17078_v17, 0 }
 0x1a1   : > { %vm8103_vm3 = vcmp.eq.s32.totalorder %v17080_v19, 0  ;;  %vm1434_vm4 = vcmp.lt.s32.totalorder %v17078_v17, 2  ;;  %vm8102_vm5 = vcmp.lt.s32.totalorder %v17080_v19, 2  ;;  %v1499_v13 = vadd.s32 %v17035_v56, %v17033_v4 }
 0x1a2   : > { %v1506_v24 = vshll.u32 %v17082_v38, 30  ;;  %v1561_v54 = vsub.s32 32, %v1560_v6  ;;  %v1563_v2 = vshll.u32 %v23185_v18, %v1560_v6  ;;  %v1569_v42 = vshll.u32 %v23187_v16, %v1560_v6 }
 0x1a3   : > { %v1572_v3 = vshll.u32 %v23188_v47, %v1560_v6  ;;  %v1566_v8 = vshll.u32 %v23186_v5, %v1560_v6  ;;  %vm1432_vm6 = vweird.f32 %v16690_v40  ;;  %v1575_v0 = vshll.u32 %v23189_v63, %v1560_v6 }
 0x1a4   : > { %v17091_v43 = vsub.s32 %v1503_v11, %v1506_v24  ;;  %v1564_v25 = vshrl.u32 %v23186_v5, %v1561_v54  ;;  %v1567_v9 = vshrl.u32 %v23187_v16, %v1561_v54  ;;  %v1570_v59 = vshrl.u32 %v23188_v47, %v1561_v54 }
 0x1a5   : > { %v1573_v15 = vshrl.u32 %v23189_v63, %v1561_v54  ;;  %v1576_v1 = vshrl.u32 %v23191_v28, %v1561_v54  ;;  %v17112_v31 = vshll.u32 %v1554_v49, 8  ;;  %v17115_v4 = vadd.f32 %v912_v51, %v16363_v37 }
 0x1a6   : > { %v1509_v10 = vsub.s32 0, %v17091_v43  ;;  %v1565_v35 = vor.u32 %v1564_v25, %v1563_v2  ;;  %v1571_v41 = vor.u32 %v1570_v59, %v1569_v42  ;;  %v1568_v34 = vor.u32 %v1567_v9, %v1566_v8 }
 0x1a7   : > { %v1574_v29 = vor.u32 %v1573_v15, %v1572_v3  ;;  %v1562_v56 = vshrl.u32 %v23185_v18, %v1561_v54  ;;  %v1577_v60 = vor.u32 %v1576_v1, %v1575_v0  ;;  %vm1578_vm7 = vcmp.lt.s32.totalorder %v17085_v36, 1 }
 0x1a8   : > { %v14672_v22 = vmin.u32 %v1509_v10, %v17091_v43  ;;  %v1859_v11 = vshrl.u32 %v1858_v45, 23  ;;  %vm1579_vm8 = vcmp.lt.s32.totalorder %v17085_v36, 2  ;;  %vm1580_vm9 = vcmp.lt.s32.totalorder %v17085_v36, 3 }
 0x1a9   : > { %v15515_v57 = vpop.eup %15514  ;;  %vm1581_vm10 = vcmp.lt.s32.totalorder %v17085_v36, 4  ;;  %v1582_v6 = vsel %vm1578_vm7, %v1562_v56, %v1565_v35  ;;  %v1586_v54 = vsel %vm1578_vm7, %v1565_v35, %v1568_v34  ;;  %v1590_v2 = vsel %vm1578_vm7, %v1568_v34, %v1571_v41 }
 0x1aa   : > { %v1511_v27 = vclz %v14672_v22  ;;  %v15517_v33 = vpop.eup %15516  ;;  %v1439_v58 = vxor.u32 2147483648, %v15515_v57  ;;  %v1583_v24 = vsel %vm1581_vm10, %v1571_v41, 2102212464  ;;  %v1587_v37 = vsel %vm1581_vm10, %v1574_v29, 920167782 }
 0x1ab   : > { %v1436_v49 = vxor.u32 2147483648, %v15517_v33  ;;  %v1588_v42 = vsel %vm1580_vm9, %v1571_v41, %v1587_v37  ;;  %v1591_v9 = vsel %vm1581_vm10, %v1577_v60, 1326507024  ;;  %v1584_v60 = vsel %vm1580_vm9, %v1568_v34, %v1583_v24 }
 0x1ac   : > { %v14673_v51 = vadd.s32 4294967294, %v1511_v27  ;;  %v1440_v45 = vsel %vm1438_vm0, %v1439_v58, %v15517_v33  ;;  %v8108_v25 = vsel %vm8106_vm1, %v1439_v58, %v15517_v33  ;;  %v1592_v15 = vsel %vm1580_vm9, %v1574_v29, %v1591_v9 }
 0x1ad   : > { %v1437_v59 = vsel %vm1435_vm2, %v15515_v57, %v1436_v49  ;;  %v8105_v3 = vsel %vm8103_vm3, %v15515_v57, %v1436_v49  ;;  %v1593_v35 = vsel %vm1579_vm8, %v1590_v2, %v1592_v15  ;;  %v1589_v29 = vsel %vm1579_vm8, %v1586_v54, %v1588_v42 }
 0x1ae   : > { %vm14674_vm11 = vcmp.lt.s32.totalorder %v14673_v51, 0  ;;  %v1441_v10 = vsel %vm1434_vm4, %v1437_v59, %v1440_v45  ;;  %v8109_v8 = vsel %vm8102_vm5, %v8105_v3, %v8108_v25  ;;  %v14687_v54 = vadd.s32 4294967169, %v1859_v11 }
 0x1af   : > { %v1514_v1 = vsel %vm14674_vm11, 0, %v14673_v51  ;;  %v1442_v41 = vsel %vm1432_vm6, nan, %v1441_v10  ;;  %v8110_v0 = vsel %vm1432_vm6, nan, %v8109_v8  ;;  %v1529_v34 = vsub.s32 4, %v17082_v38 }
 0x1b0   : > { %v1515_v22 = vsub.s32 32, %v1514_v1  ;;  %v7634_v17 = vmul.f32 %v16714_v50, %v1442_v41  ;;  %v14362_v19 = vmul.f32 %v16721_v62, %v8110_v0  ;;  %v1519_v56 = vsub.s32 4294967266, %v1514_v1 }
 0x1b1   : > { %v1516_v57 = vshll.u32 %v17091_v43, %v1514_v1  ;;  %v17152_v33 = vmul.u32.u64.low %v17112_v31, %v1593_v35  ;;  %v17153_v58 = vmul.u32.u64.high %v17112_v31, %v1593_v35, %v17152_v33  ;;  %v1585_v43 = vsel %vm1579_vm8, %v1582_v6, %v1584_v60 }
 0x1b2   : > { %v1517_v27 = vshrl.u32 %v1499_v13, %v1515_v22  ;;  %v14426_v40 = vadd.f32 %v14362_v19, %v7634_v17  ;;  %v1520_v37 = vadd.s32 127, %v1519_v56  ;;  %v1961_v25 = vand.u32 2139095040, %v17115_v4 }
 0x1b3   : > { %v17156_v49 = vmul.u32.u64.low %v17112_v31, %v1589_v29  ;;  %v17157_v51 = vmul.u32.u64.high %v17112_v31, %v1589_v29, %v17156_v49  ;;  %vm1445_vm13 = vcmp.lt.s32.totalorder %v16924_v7, 0  ;;  %v1601_v11 = vmul.u32 %v17112_v31, %v1585_v43 }
 0x1b4   : > { %14490 = vst [vmem:[%s16934_s6 + $0x18] sm:$0xff] %v14426_v40  ;;  %v1518_v2 = vor.u32 %v1517_v27, %v1516_v57  ;;  %v1521_v45 = vshll.u32 %v1520_v37, 23  ;;  %v1865_v42 = vadd.s32 1, %v14687_v54  ;;  %v1530_v36 = vsel %vm1445_vm13, %v1529_v34, %v17082_v38  ;;  %v17195_v34 = vpop.permute.xlu1 %780 }
 0x1b5   : > { %vm1603_vm12 = vc.u32 %v17153_v58, %v17156_v49  ;;  %v1604_v24 = vadd.s32 1, %v17157_v51  ;;  %v1855_v15 = vand.u32 2147483647, %v17076_v52  ;;  %vm1444_vm15 = vcmp.le.f32.partialorder %v1443_v53, 0.7853982 }
 0x1b6   : > { %v1522_v13 = vor.u32 4788187, %v1521_v45  ;;  %v1525_v59 = vcvt.s32.f32 %v1518_v2  ;;  %vm1866_vm14 = vcmp.gt.s32.totalorder %v1865_v42, 0  ;;  %v1962_v1 = vshrl.u32 %v1961_v25, 23 }
 0x1b7   : > { %v1605_v6 = vsel %vm1603_vm12, %v1604_v24, %v17157_v51  ;;  %v1867_v8 = vsel %vm1866_vm14, %v1865_v42, 0  ;;  %v1532_v31 = vsel %vm1444_vm15, 0, %v1530_v36  ;;  %v1862_v38 = vand.u32 8388607, %v1855_v15 }
 0x1b8   : > { %v1523_v9 = vand.u32 2147483647, %v1522_v13  ;;  %v1606_v3 = vadd.s32 %v1605_v6, %v1601_v11  ;;  %v1869_v41 = vand.u32 31, %v1867_v8  ;;  %v8204_v19 = vadd.s32 3, %v1532_v31 }
 0x1b9   : > { %v14691_v53 = vadd.s32 4294967169, %v1962_v1  ;;  %v17197_v43 = vand.u32 3, %v1532_v31  ;;  %v1868_v24 = vshrl.u32 %v1867_v8, 5  ;;  %vm1548_vm0 = vcmp.lt.s32.totalorder %v16976_v48, 0 }
 0x1ba   : > { %v1526_v10 = vmul.f32 %v1525_v59, %v1523_v9  ;;  %v1607_v35 = vadd.s32 536870912, %v1606_v3  ;;  %v1870_v29 = vsub.s32 32, %v1869_v41  ;;  %v1872_v56 = vshll.u32 %v23185_v18, %v1869_v41 }
 0x1bb   : > { %v1875_v27 = vshll.u32 %v23186_v5, %v1869_v41  ;;  %v1878_v33 = vshll.u32 %v23187_v16, %v1869_v41  ;;  %v1881_v2 = vshll.u32 %v23188_v47, %v1869_v41  ;;  %v17199_v13 = vand.u32 3, %v8204_v19 }
 0x1bc   : > { %v1527_v0 = vxor.u32 2147483648, %v1526_v10  ;;  %v17177_v22 = vshrl.u32 %v1607_v35, 30  ;;  %v1873_v40 = vshrl.u32 %v23186_v5, %v1870_v29  ;;  %v1876_v37 = vshrl.u32 %v23187_v16, %v1870_v29 }
 0x1bd   : > { %v1879_v51 = vshrl.u32 %v23188_v47, %v1870_v29  ;;  %v1882_v45 = vshrl.u32 %v23189_v63, %v1870_v29  ;;  %v1863_v36 = vor.u32 8388608, %v1862_v38  ;;  %v1884_v6 = vshll.u32 %v23189_v63, %v1869_v41 }
 0x1be   : > { %v1528_v17 = vsel %vm1445_vm13, %v1527_v0, %v1526_v10  ;;  %v1609_v57 = vshll.u32 %v17177_v22, 30  ;;  %v1874_v25 = vor.u32 %v1873_v40, %v1872_v56  ;;  %v1877_v42 = vor.u32 %v1876_v37, %v1875_v27 }
 0x1bf   : > { %v1531_v60 = vsel %vm1444_vm15, %v16924_v7, %v1528_v17  ;;  %v1880_v9 = vor.u32 %v1879_v51, %v1878_v33  ;;  %v1883_v59 = vor.u32 %v1882_v45, %v1881_v2  ;;  %v17207_v10 = vmul.f32 %v16575_v20, %v17195_v34 }
 0x1c0   : > { %15518 = vcosq.f32 %v1531_v60  ;;  %v17191_v54 = vsub.s32 %v1606_v3, %v1609_v57  ;;  %v1885_v3 = vshrl.u32 %v23191_v28, %v1870_v29  ;;  %v1602_v8 = vadd.s32 %v17156_v49, %v17153_v58 }
 0x1c1   : > { %15520 = vsinq.f32 %v1531_v60  ;;  %v1958_v31 = vand.u32 2147483647, %v17115_v4  ;;  %v1968_v35 = vadd.s32 1, %v14691_v53  ;;  %v1871_v0 = vshrl.u32 %v23185_v18, %v1870_v29 }
 0x1c2   : > { %v1612_v11 = vsub.s32 0, %v17191_v54  ;;  %v1886_v17 = vor.u32 %v1885_v3, %v1884_v6  ;;  %vm1887_vm1 = vcmp.lt.s32.totalorder %v1868_v24, 1  ;;  %vm1890_vm2 = vcmp.lt.s32.totalorder %v1868_v24, 4 }
 0x1c3   : > { %vm1541_vm3 = vcmp.eq.s32.totalorder %v17197_v43, 2  ;;  %vm8210_vm4 = vcmp.eq.s32.totalorder %v17199_v13, 2  ;;  %v1892_v38 = vsel %vm1890_vm2, %v1880_v9, 2102212464  ;;  %v1895_v19 = vsel %vm1887_vm1, %v1874_v25, %v1877_v42 }
 0x1c4   : > { %v14676_v1 = vmin.u32 %v1612_v11, %v17191_v54  ;;  %v1896_v58 = vsel %vm1890_vm2, %v1883_v59, 920167782  ;;  %vm1538_vm5 = vcmp.eq.s32.totalorder %v17197_v43, 0  ;;  %v1632_v49 = vsub.s32 4, %v17177_v22 }
 0x1c5   : > { %vm8207_vm6 = vcmp.eq.s32.totalorder %v17199_v13, 0  ;;  %vm1888_vm7 = vcmp.lt.s32.totalorder %v1868_v24, 2  ;;  %vm1889_vm8 = vcmp.lt.s32.totalorder %v1868_v24, 3  ;;  %v1903_v29 = vshll.u32 %v1863_v36, 8 }
 0x1c6   : > { %v1614_v41 = vclz %v14676_v1  ;;  %vm1537_vm9 = vcmp.lt.s32.totalorder %v17197_v43, 2  ;;  %vm8206_vm10 = vcmp.lt.s32.totalorder %v17199_v13, 2  ;;  %v1891_v53 = vsel %vm1887_vm1, %v1871_v0, %v1874_v25 }
 0x1c7   : > { %v1897_v60 = vsel %vm1889_vm8, %v1880_v9, %v1896_v58  ;;  %v1899_v57 = vsel %vm1887_vm1, %v1877_v42, %v1880_v9  ;;  %vm1535_vm11 = vweird.f32 %v16924_v7  ;;  %v1893_v27 = vsel %vm1889_vm8, %v1877_v42, %v1892_v38 }
 0x1c8   : > { %v14677_v56 = vadd.s32 4294967294, %v1614_v41  ;;  %v1898_v33 = vsel %vm1888_vm7, %v1895_v19, %v1897_v60  ;;  %v1900_v40 = vsel %vm1890_vm2, %v1886_v17, 1326507024  ;;  %vm1969_vm12 = vcmp.gt.s32.totalorder %v1968_v35, 0 }
 0x1c9   : > { %vm17231_vm13 = vcmp.le.f32.partialorder %v1546_v30, 0.7853982  ;;  %v1901_v51 = vsel %vm1889_vm8, %v1883_v59, %v1900_v40  ;;  %v17235_v2 = vmul.u32.u64.low %v1903_v29, %v1898_v33  ;;  %v17236_v45 = vmul.u32.u64.high %v1903_v29, %v1898_v33, %v17235_v2 }
 0x1ca   : > { %vm14678_vm14 = vcmp.lt.s32.totalorder %v14677_v56, 0  ;;  %v1902_v11 = vsel %vm1888_vm7, %v1899_v57, %v1901_v51  ;;  %v17242_v42 = vand.u32 8388607, %v1958_v31  ;;  %v1970_v9 = vsel %vm1969_vm12, %v1968_v35, 0 }
 0x1cb   : > { %v1617_v25 = vsel %vm14678_vm14, 0, %v14677_v56  ;;  %v1633_v3 = vsel %vm1548_vm0, %v1632_v49, %v17177_v22  ;;  %v1894_v59 = vsel %vm1888_vm7, %v1891_v53, %v1893_v27  ;;  %v1972_v38 = vand.u32 31, %v1970_v9 }
 0x1cc   : > { %v1618_v6 = vsub.s32 32, %v1617_v25  ;;  %v1622_v30 = vsub.s32 4294967266, %v1617_v25  ;;  %v17248_v17 = vmul.u32.u64.low %v1903_v29, %v1902_v11  ;;  %v17249_v41 = vmul.u32.u64.high %v1903_v29, %v1902_v11, %v17248_v17 }
 0x1cd   : > { %v15519_v36 = vpop.eup %15518  ;;  %v1619_v58 = vshll.u32 %v17191_v54, %v1617_v25  ;;  %v1913_v22 = vadd.s32 1, %v17236_v45  ;;  %v1973_v24 = vsub.s32 32, %v1972_v38  ;;  %v17269_v40 = vadd.f32 %v17207_v10, %v16350_v21 }
 0x1ce   : > { %v15521_v1 = vpop.eup %15520  ;;  %v1542_v0 = vxor.u32 2147483648, %v15519_v36  ;;  %v1620_v56 = vshrl.u32 %v1602_v8, %v1618_v6  ;;  %v1623_v35 = vadd.s32 127, %v1622_v30  ;;  %vm1912_vm15 = vc.u32 %v17249_v41, %v17235_v2 }
 0x1cf   : > { %v1539_v19 = vxor.u32 2147483648, %v15521_v1  ;;  %v1635_v43 = vsel %vm17231_vm13, 0, %v1633_v3  ;;  %v1914_v30 = vsel %vm1912_vm15, %v1913_v22, %v17236_v45  ;;  %v1975_v7 = vshll.u32 %v23185_v18, %v1972_v38 }
 0x1d0   : > { %v1543_v60 = vsel %vm1541_vm3, %v1542_v0, %v15521_v1  ;;  %v8212_v57 = vsel %vm8210_vm4, %v1542_v0, %v15521_v1  ;;  %v1621_v53 = vor.u32 %v1620_v56, %v1619_v58  ;;  %v1624_v27 = vshll.u32 %v1623_v35, 23 }
 0x1d1   : > { %v1540_v49 = vsel %vm1538_vm5, %v15519_v36, %v1539_v19  ;;  %v8209_v33 = vsel %vm8207_vm6, %v15519_v36, %v1539_v19  ;;  %v1910_v36 = vmul.u32 %v1903_v29, %v1894_v59  ;;  %v1976_v0 = vshrl.u32 %v23186_v5, %v1973_v24 }
 0x1d2   : > { %v1544_v54 = vsel %vm1537_vm9, %v1540_v49, %v1543_v60  ;;  %v8213_v8 = vsel %vm8206_vm10, %v8209_v33, %v8212_v57  ;;  %v1625_v25 = vor.u32 4788187, %v1624_v27  ;;  %v1628_v10 = vcvt.s32.f32 %v1621_v53 }
 0x1d3   : > { %v1545_v51 = vsel %vm1535_vm11, nan, %v1544_v54  ;;  %v8214_v11 = vsel %vm1535_vm11, nan, %v8213_v8  ;;  %v1915_v1 = vadd.s32 %v1914_v30, %v1910_v36  ;;  %v17281_v19 = vshrl.u32 %v1970_v9, 5 }
 0x1d4   : > { %v7635_v13 = vmul.f32 %v16711_v23, %v1545_v51  ;;  %v14363_v6 = vmul.f32 %v16718_v12, %v8214_v11  ;;  %v1626_v21 = vand.u32 2147483647, %v1625_v25  ;;  %v1979_v29 = vshrl.u32 %v23187_v16, %v1973_v24 }
 0x1d5   : > { %v1916_v59 = vadd.s32 536870912, %v1915_v1  ;;  %v1978_v58 = vshll.u32 %v23186_v5, %v1972_v38  ;;  %v1982_v56 = vshrl.u32 %v23188_v47, %v1973_v24  ;;  %v1977_v45 = vor.u32 %v1976_v0, %v1975_v7 }
 0x1d6   : > { %v14427_v17 = vadd.f32 %v14363_v6, %v7635_v13  ;;  %v1629_v3 = vmul.f32 %v1628_v10, %v1626_v21  ;;  %v1981_v35 = vshll.u32 %v23187_v16, %v1972_v38  ;;  %v1984_v60 = vshll.u32 %v23188_v47, %v1972_v38 }
 0x1d7   : > { %v1985_v57 = vshrl.u32 %v23189_v63, %v1973_v24  ;;  %v17291_v22 = vshrl.u32 %v1916_v59, 30  ;;  %v1980_v49 = vor.u32 %v1979_v29, %v1978_v58  ;;  %v1988_v53 = vshrl.u32 %v23191_v28, %v1973_v24 }
 0x1d8   : > { %14491 = vst [vmem:[%s16934_s6 + $0x20] sm:$0xff] %v14427_v17  ;;  %v1630_v9 = vxor.u32 2147483648, %v1629_v3  ;;  %v1966_v27 = vor.u32 8388608, %v17242_v42  ;;  %v1987_v54 = vshll.u32 %v23189_v63, %v1972_v38  ;;  %v910_v8 = vmul.f32 %v16578_v14, %v17195_v34 }
 0x1d9   : > { %v1986_v33 = vor.u32 %v1985_v57, %v1984_v60  ;;  %v8308_v25 = vadd.s32 3, %v1635_v43  ;;  %v1918_v11 = vshll.u32 %v17291_v22, 30  ;;  %v1983_v36 = vor.u32 %v1982_v56, %v1981_v35 }
 0x1da   : > { %v1631_v51 = vsel %vm1548_vm0, %v1630_v9, %v1629_v3  ;;  %v1989_v6 = vor.u32 %v1988_v53, %v1987_v54  ;;  %vm1990_vm1 = vcmp.lt.s32.totalorder %v17281_v19, 1  ;;  %v1652_v42 = vand.u32 2139095040, %v17269_v40 }
 0x1db   : > { %v1634_v13 = vsel %vm17231_vm13, %v16976_v48, %v1631_v51  ;;  %v17306_v38 = vsub.s32 %v1915_v1, %v1918_v11  ;;  %vm1993_vm2 = vcmp.lt.s32.totalorder %v17281_v19, 4  ;;  %v1998_v34 = vsel %vm1990_vm1, %v1977_v45, %v1980_v49 }
 0x1dc   : > { %15522 = vcosq.f32 %v1634_v13  ;;  %v1974_v30 = vshrl.u32 %v23185_v18, %v1973_v24  ;;  %vm1992_vm0 = vcmp.lt.s32.totalorder %v17281_v19, 3  ;;  %v1999_v37 = vsel %vm1993_vm2, %v1986_v33, 920167782 }
 0x1dd   : > { %15524 = vsinq.f32 %v1634_v13  ;;  %v1921_v21 = vsub.s32 0, %v17306_v38  ;;  %vm1991_vm3 = vcmp.lt.s32.totalorder %v17281_v19, 2  ;;  %v1995_v10 = vsel %vm1993_vm2, %v1983_v36, 2102212464 }
 0x1de   : > { %v2000_v0 = vsel %vm1992_vm0, %v1983_v36, %v1999_v37  ;;  %v2002_v17 = vsel %vm1990_vm1, %v1980_v49, %v1983_v36  ;;  %v2003_v7 = vsel %vm1993_vm2, %v1989_v6, 1326507024  ;;  %v2006_v29 = vshll.u32 %v1966_v27, 8 }
 0x1df   : > { %v2001_v1 = vsel %vm1991_vm3, %v1998_v34, %v2000_v0  ;;  %v1639_v3 = vand.u32 3, %v1635_v43  ;;  %vm1857_vm4 = vcmp.lt.s32.totalorder %v17076_v52, 0  ;;  %v14688_v24 = vmin.u32 %v1921_v21, %v17306_v38 }
 0x1e0   : > { %v1994_v59 = vsel %vm1990_vm1, %v1974_v30, %v1977_v45  ;;  %v1996_v58 = vsel %vm1992_vm0, %v1980_v49, %v1995_v10  ;;  %v2004_v56 = vsel %vm1992_vm0, %v1986_v33, %v2003_v7  ;;  %v8309_v57 = vand.u32 3, %v8308_v25 }
 0x1e1   : > { %v17323_v35 = vmul.u32.u64.low %v2006_v29, %v2001_v1  ;;  %v17324_v60 = vmul.u32.u64.high %v2006_v29, %v2001_v1, %v17323_v35  ;;  %vm17329_vm5 = vcmp.le.f32.partialorder %v1855_v15, 0.7853982  ;;  %v1923_v43 = vclz %v14688_v24 }
 0x1e2   : > { %v2005_v53 = vsel %vm1991_vm3, %v2002_v17, %v2004_v56  ;;  %v1653_v27 = vshrl.u32 %v1652_v42, 23  ;;  %v17339_v49 = vadd.f32 %v910_v8, %v16353_v26  ;;  %v1649_v33 = vand.u32 2147483647, %v17269_v40 }
 0x1e3   : > { %v17335_v54 = vmul.u32.u64.low %v2006_v29, %v2005_v53  ;;  %v17336_v45 = vmul.u32.u64.high %v2006_v29, %v2005_v53, %v17335_v54  ;;  %v14689_v51 = vadd.s32 4294967294, %v1923_v43  ;;  %v1941_v25 = vsub.s32 4, %v17291_v22 }
 0x1e4   : > { %v1997_v15 = vsel %vm1991_vm3, %v1994_v59, %v1996_v58  ;;  %v14679_v11 = vadd.s32 4294967169, %v1653_v27  ;;  %vm1640_vm6 = vcmp.lt.s32.totalorder %v1639_v3, 2  ;;  %vm1641_vm7 = vcmp.eq.s32.totalorder %v1639_v3, 0 }
 0x1e5   : > { %vm1644_vm8 = vcmp.eq.s32.totalorder %v1639_v3, 2  ;;  %v2016_v36 = vadd.s32 1, %v17324_v60  ;;  %vm1638_vm9 = vweird.f32 %v16976_v48  ;;  %vm8310_vm10 = vcmp.lt.s32.totalorder %v8309_v57, 2 }
 0x1e6   : > { %vm8311_vm11 = vcmp.eq.s32.totalorder %v8309_v57, 0  ;;  %vm14690_vm12 = vcmp.lt.s32.totalorder %v14689_v51, 0  ;;  %v1659_v26 = vadd.s32 1, %v14679_v11  ;;  %v1911_v8 = vadd.s32 %v17235_v2, %v17249_v41 }
 0x1e7   : > { %v1926_v13 = vsel %vm14690_vm12, 0, %v14689_v51  ;;  %v2013_v6 = vmul.u32 %v2006_v29, %v1997_v15  ;;  %vm2015_vm13 = vc.u32 %v17336_v45, %v17323_v35  ;;  %v1942_v34 = vsel %vm1857_vm4, %v1941_v25, %v17291_v22 }
 0x1e8   : > { %v1927_v19 = vsub.s32 32, %v1926_v13  ;;  %v1931_v42 = vsub.s32 4294967266, %v1926_v13  ;;  %v2017_v30 = vsel %vm2015_vm13, %v2016_v36, %v17324_v60  ;;  %vm8314_vm14 = vcmp.eq.s32.totalorder %v8309_v57, 2 }
 0x1e9   : > { %v15523_v37 = vpop.eup %15522  ;;  %v1928_v21 = vshll.u32 %v17306_v38, %v1926_v13  ;;  %v2018_v10 = vadd.s32 %v2017_v30, %v2013_v6  ;;  %vm1660_vm15 = vcmp.gt.s32.totalorder %v1659_v26, 0  ;;  %v1944_v29 = vsel %vm17329_vm5, 0, %v1942_v34 }
 0x1ea   : > { %v15525_v2 = vpop.eup %15524  ;;  %v1645_v41 = vxor.u32 2147483648, %v15523_v37  ;;  %v1929_v0 = vshrl.u32 %v1911_v8, %v1927_v19  ;;  %v1932_v1 = vadd.s32 127, %v1931_v42  ;;  %v1661_v17 = vsel %vm1660_vm15, %v1659_v26, 0 }
 0x1eb   : > { %v1642_v7 = vxor.u32 2147483648, %v15525_v2  ;;  %v2019_v24 = vadd.s32 536870912, %v2018_v10  ;;  %v1663_v59 = vand.u32 31, %v1661_v17  ;;  %v1656_v27 = vand.u32 8388607, %v1649_v33 }
 0x1ec   : > { %v1646_v22 = vsel %vm1644_vm8, %v1645_v41, %v15525_v2  ;;  %v8316_v58 = vsel %vm8314_vm14, %v1645_v41, %v15525_v2  ;;  %v1930_v56 = vor.u32 %v1929_v0, %v1928_v21  ;;  %v1933_v60 = vshll.u32 %v1932_v1, 23 }
 0x1ed   : > { %v1643_v38 = vsel %vm1641_vm7, %v15523_v37, %v1642_v7  ;;  %v8313_v43 = vsel %vm8311_vm11, %v15523_v37, %v1642_v7  ;;  %v17361_v53 = vshrl.u32 %v2019_v24, 30  ;;  %v1664_v15 = vsub.s32 32, %v1663_v59 }
 0x1ee   : > { %v1647_v54 = vsel %vm1640_vm6, %v1643_v38, %v1646_v22  ;;  %v8317_v51 = vsel %vm8310_vm10, %v8313_v43, %v8316_v58  ;;  %v1934_v25 = vor.u32 4788187, %v1933_v60  ;;  %v8620_v8 = vadd.s32 3, %v1944_v29 }
 0x1ef   : > { %v1648_v11 = vsel %vm1638_vm9, nan, %v1647_v54  ;;  %v8318_v36 = vsel %vm1638_vm9, nan, %v8317_v51  ;;  %v2021_v26 = vshll.u32 %v17361_v53, 30  ;;  %v1937_v19 = vcvt.s32.f32 %v1930_v56 }
 0x1f0   : > { %v7636_v13 = vmul.f32 %v16714_v50, %v1648_v11  ;;  %v14364_v6 = vmul.f32 %v16721_v62, %v8318_v36  ;;  %v1935_v3 = vand.u32 2147483647, %v1934_v25  ;;  %v1657_v42 = vor.u32 8388608, %v1656_v27 }
 0x1f1   : > { %v17374_v57 = vsub.s32 %v2018_v10, %v2021_v26  ;;  %v17376_v37 = vand.u32 3, %v1944_v29  ;;  %v1667_v48 = vshrl.u32 %v23186_v5, %v1664_v15  ;;  %v17380_v2 = vand.u32 3, %v8620_v8 }
 0x1f2   : > { %v14428_v34 = vadd.f32 %v14364_v6, %v7636_v13  ;;  %v1938_v30 = vmul.f32 %v1937_v19, %v1935_v3  ;;  %v1666_v41 = vshll.u32 %v23185_v18, %v1663_v59  ;;  %v1755_v0 = vand.u32 2139095040, %v17339_v49 }
 0x1f3   : > { %v2024_v21 = vsub.s32 0, %v17374_v57  ;;  %v1669_v10 = vshll.u32 %v23186_v5, %v1663_v59  ;;  %v1670_v7 = vshrl.u32 %v23187_v16, %v1664_v15  ;;  %v1673_v24 = vshrl.u32 %v23188_v47, %v1664_v15 }
 0x1f4   : > { %14492 = vst [vmem:[%s16934_s6 + $0x28] sm:$0xff] %v14428_v34  ;;  %v1939_v1 = vxor.u32 2147483648, %v1938_v30  ;;  %v2014_v29 = vadd.s32 %v17323_v35, %v17336_v45  ;;  %v1662_v58 = vshrl.u32 %v1661_v17, 5  ;;  %v17391_v56 = vshll.u32 %v1657_v42, 8 }
 0x1f5   : > { %v14692_v22 = vmin.u32 %v2024_v21, %v17374_v57  ;;  %v1668_v38 = vor.u32 %v1667_v48, %v1666_v41  ;;  %v1671_v43 = vor.u32 %v1670_v7, %v1669_v10  ;;  %v1672_v27 = vshll.u32 %v23187_v16, %v1663_v59 }
 0x1f6   : > { %v1940_v60 = vsel %vm1857_vm4, %v1939_v1, %v1938_v30  ;;  %v1675_v25 = vshll.u32 %v23188_v47, %v1663_v59  ;;  %v1676_v35 = vshrl.u32 %v23189_v63, %v1664_v15  ;;  %v2044_v45 = vsub.s32 4, %v17361_v53 }
 0x1f7   : > { %v1943_v54 = vsel %vm17329_vm5, %v17076_v52, %v1940_v60  ;;  %v2026_v51 = vclz %v14692_v22  ;;  %v1674_v17 = vor.u32 %v1673_v24, %v1672_v27  ;;  %v1756_v11 = vshrl.u32 %v1755_v0, 23 }
 0x1f8   : > { %15526 = vcosq.f32 %v1943_v54  ;;  %v1665_v26 = vshrl.u32 %v23185_v18, %v1664_v15  ;;  %v1677_v8 = vor.u32 %v1676_v35, %v1675_v25  ;;  %vm1960_vm1 = vcmp.lt.s32.totalorder %v17115_v4, 0 }
 0x1f9   : > { %15528 = vsinq.f32 %v1943_v54  ;;  %v14693_v36 = vadd.s32 4294967294, %v2026_v51  ;;  %v1678_v9 = vshll.u32 %v23189_v63, %v1663_v59  ;;  %v1679_v13 = vshrl.u32 %v23191_v28, %v1664_v15 }
 0x1fa   : > { %vm1681_vm2 = vcmp.lt.s32.totalorder %v1662_v58, 1  ;;  %vm1682_vm0 = vcmp.lt.s32.totalorder %v1662_v58, 2  ;;  %vm1683_vm4 = vcmp.lt.s32.totalorder %v1662_v58, 3  ;;  %vm1684_vm5 = vcmp.lt.s32.totalorder %v1662_v58, 4 }
 0x1fb   : > { %vm14694_vm3 = vcmp.lt.s32.totalorder %v14693_v36, 0  ;;  %v1689_v6 = vsel %vm1681_vm2, %v1668_v38, %v1671_v43  ;;  %v1680_v19 = vor.u32 %v1679_v13, %v1678_v9  ;;  %v1686_v42 = vsel %vm1684_vm5, %v1674_v17, 2102212464 }
 0x1fc   : > { %v2029_v3 = vsel %vm14694_vm3, 0, %v14693_v36  ;;  %v1690_v34 = vsel %vm1684_vm5, %v1677_v8, 920167782  ;;  %v1685_v41 = vsel %vm1681_vm2, %v1665_v26, %v1668_v38  ;;  %v1687_v59 = vsel %vm1683_vm4, %v1671_v43, %v1686_v42 }
 0x1fd   : > { %v2030_v30 = vsub.s32 32, %v2029_v3  ;;  %v2031_v48 = vshll.u32 %v17374_v57, %v2029_v3  ;;  %v2034_v21 = vsub.s32 4294967266, %v2029_v3  ;;  %v1691_v15 = vsel %vm1683_vm4, %v1674_v17, %v1690_v34 }
 0x1fe   : > { %v1693_v0 = vsel %vm1681_vm2, %v1671_v43, %v1674_v17  ;;  %v1694_v1 = vsel %vm1684_vm5, %v1680_v19, 1326507024  ;;  %v1692_v24 = vsel %vm1682_vm0, %v1689_v6, %v1691_v15  ;;  %vm17416_vm6 = vcmp.le.f32.partialorder %v1958_v31, 0.7853982 }
 0x1ff   : > { %v2032_v10 = vshrl.u32 %v2014_v29, %v2030_v30  ;;  %v2035_v7 = vadd.s32 127, %v2034_v21  ;;  %v1695_v22 = vsel %vm1683_vm4, %v1677_v8, %v1694_v1  ;;  %vm1947_vm7 = vweird.f32 %v17076_v52 }
 0x200   : > { %v1696_v60 = vsel %vm1682_vm0, %v1693_v0, %v1695_v22  ;;  %v17422_v38 = vmul.u32.u64.low %v17391_v56, %v1692_v24  ;;  %v17423_v27 = vmul.u32.u64.high %v17391_v56, %v1692_v24, %v17422_v38  ;;  %vm1949_vm8 = vcmp.lt.s32.totalorder %v17376_v37, 2 }
 0x201   : > { %v2033_v43 = vor.u32 %v2032_v10, %v2031_v48  ;;  %v2036_v29 = vshll.u32 %v2035_v7, 23  ;;  %v17427_v54 = vmul.u32.u64.low %v17391_v56, %v1696_v60  ;;  %v17428_v51 = vmul.u32.u64.high %v17391_v56, %v1696_v60, %v17427_v54 }
 0x202   : > { %vm1950_vm9 = vcmp.eq.s32.totalorder %v17376_v37, 0  ;;  %v1688_v31 = vsel %vm1682_vm0, %v1685_v41, %v1687_v59  ;;  %v14683_v25 = vadd.s32 4294967169, %v1756_v11  ;;  %vm1953_vm10 = vcmp.eq.s32.totalorder %v17376_v37, 2 }
 0x203   : > { %v2037_v35 = vor.u32 4788187, %v2036_v29  ;;  %v2045_v17 = vsel %vm1960_vm1, %v2044_v45, %v17361_v53  ;;  %vm8622_vm11 = vcmp.lt.s32.totalorder %v17380_v2, 2  ;;  %vm8623_vm12 = vcmp.eq.s32.totalorder %v17380_v2, 0 }
 0x204   : > { %vm8626_vm13 = vcmp.eq.s32.totalorder %v17380_v2, 2  ;;  %v1707_v36 = vadd.s32 1, %v17423_v27  ;;  %v1762_v26 = vadd.s32 1, %v14683_v25  ;;  %v2040_v9 = vcvt.s32.f32 %v2033_v43 }
 0x205   : > { %v15527_v8 = vpop.eup %15526  ;;  %v2038_v58 = vand.u32 2147483647, %v2037_v35  ;;  %v1704_v11 = vmul.u32 %v17391_v56, %v1688_v31  ;;  %vm1706_vm14 = vc.u32 %v17428_v51, %v17422_v38  ;;  %v2047_v53 = vsel %vm17416_vm6, 0, %v2045_v17 }
 0x206   : > { %v15529_v13 = vpop.eup %15528  ;;  %v1954_v6 = vxor.u32 2147483648, %v15527_v8  ;;  %v1708_v45 = vsel %vm1706_vm14, %v1707_v36, %v17423_v27  ;;  %vm1763_vm15 = vcmp.gt.s32.totalorder %v1762_v26, 0  ;;  %v1752_v48 = vand.u32 2147483647, %v17339_v49 }
 0x207   : > { %v1951_v3 = vxor.u32 2147483648, %v15529_v13  ;;  %v2041_v19 = vmul.f32 %v2040_v9, %v2038_v58  ;;  %v1709_v42 = vadd.s32 %v1708_v45, %v1704_v11  ;;  %v1764_v34 = vsel %vm1763_vm15, %v1762_v26, 0 }
 0x208   : > { %v1955_v30 = vsel %vm1953_vm10, %v1954_v6, %v15529_v13  ;;  %v8628_v56 = vsel %vm8626_vm13, %v1954_v6, %v15529_v13  ;;  %v1766_v21 = vand.u32 31, %v1764_v34  ;;  %v8724_v7 = vadd.s32 3, %v2047_v53  ;;  %v793_v6 = vpop.permute.xlu0 %792 }
 0x209   : > { %v1952_v41 = vsel %vm1950_vm9, %v15527_v8, %v1951_v3  ;;  %v2042_v59 = vxor.u32 2147483648, %v2041_v19  ;;  %v8625_v15 = vsel %vm8623_vm12, %v15527_v8, %v1951_v3  ;;  %v1710_v0 = vadd.s32 536870912, %v1709_v42 }
 0x20a   : > { %v1956_v1 = vsel %vm1949_vm8, %v1952_v41, %v1955_v30  ;;  %v8629_v10 = vsel %vm8622_vm11, %v8625_v15, %v8628_v56  ;;  %v1767_v24 = vsub.s32 32, %v1766_v21  ;;  %v1759_v54 = vand.u32 8388607, %v1752_v48 }
 0x20b   : > { %v1957_v22 = vsel %vm1947_vm7, nan, %v1956_v1  ;;  %v2043_v60 = vsel %vm1960_vm1, %v2042_v59, %v2041_v19  ;;  %v8630_v27 = vsel %vm1947_vm7, nan, %v8629_v10  ;;  %v17467_v43 = vshrl.u32 %v1710_v0, 30 }
 0x20c   : > { %v2046_v37 = vsel %vm17416_vm6, %v17115_v4, %v2043_v60  ;;  %v7639_v2 = vmul.f32 %v16711_v23, %v1957_v22  ;;  %v14367_v29 = vmul.f32 %v16718_v12, %v8630_v27  ;;  %v1770_v52 = vshrl.u32 %v23186_v5, %v1767_v24 }
 0x20d   : > { %15530 = vcosq.f32 %v2046_v37  ;;  %v1712_v31 = vshll.u32 %v17467_v43, 30  ;;  %v17478_v25 = vand.u32 3, %v2047_v53  ;;  %v1773_v57 = vshrl.u32 %v23187_v16, %v1767_v24 }
 0x20e   : > { %15532 = vsinq.f32 %v2046_v37  ;;  %v14431_v35 = vadd.f32 %v14367_v29, %v7639_v2  ;;  %v17481_v17 = vand.u32 3, %v8724_v7  ;;  %v1769_v26 = vshll.u32 %v23185_v18, %v1766_v21 }
 0x20f   : > { %v17483_v36 = vsub.s32 %v1709_v42, %v1712_v31  ;;  %v1772_v8 = vshll.u32 %v23186_v5, %v1766_v21  ;;  %v1760_v58 = vor.u32 8388608, %v1759_v54  ;;  %v17488_v9 = vshrl.u32 %v1764_v34, 5 }
 0x210   : > { %14495 = vst [vmem:[%s16934_s6 + $0x40] sm:$0xff] %v14431_v35  ;;  %v1775_v11 = vshll.u32 %v23187_v16, %v1766_v21  ;;  %v1776_v13 = vshrl.u32 %v23188_v47, %v1767_v24  ;;  %v1771_v45 = vor.u32 %v1770_v52, %v1769_v26  ;;  %v1779_v19 = vshrl.u32 %v23189_v63, %v1767_v24 }
 0x211   : > { %v1715_v53 = vsub.s32 0, %v17483_v36  ;;  %v1774_v3 = vor.u32 %v1773_v57, %v1772_v8  ;;  %v1778_v30 = vshll.u32 %v23188_v47, %v1766_v21  ;;  %v1781_v56 = vshll.u32 %v23189_v63, %v1766_v21 }
 0x212   : > { %v1777_v42 = vor.u32 %v1776_v13, %v1775_v11  ;;  %v1782_v41 = vshrl.u32 %v23191_v28, %v1767_v24  ;;  %v915_v59 = vmul.f32 %v16575_v20, %v793_v6  ;;  %vm2056_vm1 = vcmp.eq.s32.totalorder %v17478_v25, 2 }
 0x213   : > { %v14680_v34 = vmin.u32 %v1715_v53, %v17483_v36  ;;  %vm8730_vm2 = vcmp.eq.s32.totalorder %v17481_v17, 2  ;;  %v1780_v15 = vor.u32 %v1779_v19, %v1778_v30  ;;  %vm1784_vm0 = vcmp.lt.s32.totalorder %v17488_v9, 1 }
 0x214   : > { %v1783_v0 = vor.u32 %v1782_v41, %v1781_v56  ;;  %v916_v1 = vmul.f32 %v16578_v14, %v793_v6  ;;  %vm2053_vm3 = vcmp.eq.s32.totalorder %v17478_v25, 0  ;;  %vm8727_vm4 = vcmp.eq.s32.totalorder %v17481_v17, 0 }
 0x215   : > { %v1717_v21 = vclz %v14680_v34  ;;  %vm1787_vm5 = vcmp.lt.s32.totalorder %v17488_v9, 4  ;;  %v1792_v10 = vsel %vm1784_vm0, %v1771_v45, %v1774_v3  ;;  %v17508_v7 = vshll.u32 %v1760_v58, 8 }
 0x216   : > { %vm2052_vm6 = vcmp.lt.s32.totalorder %v17478_v25, 2  ;;  %vm8726_vm7 = vcmp.lt.s32.totalorder %v17481_v17, 2  ;;  %vm1786_vm8 = vcmp.lt.s32.totalorder %v17488_v9, 3  ;;  %v1793_v22 = vsel %vm1787_vm5, %v1780_v15, 920167782 }
 0x217   : > { %v1796_v60 = vsel %vm1784_vm0, %v1774_v3, %v1777_v42  ;;  %v1797_v27 = vsel %vm1787_vm5, %v1783_v0, 1326507024  ;;  %vm2050_vm9 = vweird.f32 %v17115_v4  ;;  %v14681_v37 = vadd.s32 4294967294, %v1717_v21 }
 0x218   : > { %vm1785_vm10 = vcmp.lt.s32.totalorder %v17488_v9, 2  ;;  %v1794_v2 = vsel %vm1786_vm8, %v1777_v42, %v1793_v22  ;;  %v1798_v29 = vsel %vm1786_vm8, %v1780_v15, %v1797_v27  ;;  %v1768_v54 = vshrl.u32 %v23185_v18, %v1767_v24 }
 0x219   : > { %v1789_v31 = vsel %vm1787_vm5, %v1777_v42, 2102212464  ;;  %v1795_v52 = vsel %vm1785_vm10, %v1792_v10, %v1794_v2  ;;  %v1799_v35 = vsel %vm1785_vm10, %v1796_v60, %v1798_v29  ;;  %vm1651_vm11 = vcmp.lt.s32.totalorder %v17269_v40, 0 }
 0x21a   : > { %v1705_v57 = vadd.s32 %v17422_v38, %v17428_v51  ;;  %vm14682_vm12 = vcmp.lt.s32.totalorder %v14681_v37, 0  ;;  %v17530_v26 = vmul.u32.u64.low %v17508_v7, %v1799_v35  ;;  %v17531_v8 = vmul.u32.u64.high %v17508_v7, %v1799_v35, %v17530_v26  ;;  %v15531_v58 = vpop.eup %15530 }
 0x21b   : > { %v1720_v11 = vsel %vm14682_vm12, 0, %v14681_v37  ;;  %v1788_v24 = vsel %vm1784_vm0, %v1768_v54, %v1771_v45  ;;  %v17536_v13 = vmul.u32.u64.low %v17508_v7, %v1795_v52  ;;  %v17537_v6 = vmul.u32.u64.high %v17508_v7, %v1795_v52, %v17536_v13  ;;  %v15533_v53 = vpop.eup %15532 }
 0x21c   : > { %v2057_v19 = vxor.u32 2147483648, %v15531_v58  ;;  %v1721_v42 = vsub.s32 32, %v1720_v11  ;;  %v1725_v30 = vsub.s32 4294967266, %v1720_v11  ;;  %v1790_v38 = vsel %vm1786_vm8, %v1774_v3, %v1789_v31 }
 0x21d   : > { %v2054_v51 = vxor.u32 2147483648, %v15533_v53  ;;  %v1722_v56 = vshll.u32 %v17483_v36, %v1720_v11  ;;  %v1735_v41 = vsub.s32 4, %v17467_v43  ;;  %v17545_v34 = vadd.f32 %v915_v59, %v16376_v32 }
 0x21e   : > { %v2058_v45 = vsel %vm2056_vm1, %v2057_v19, %v15533_v53  ;;  %v8732_v15 = vsel %vm8730_vm2, %v2057_v19, %v15533_v53  ;;  %v1723_v0 = vshrl.u32 %v1705_v57, %v1721_v42  ;;  %v1726_v21 = vadd.s32 127, %v1725_v30 }
 0x21f   : > { %v2055_v10 = vsel %vm2053_vm3, %v15531_v58, %v2054_v51  ;;  %v8729_v3 = vsel %vm8727_vm4, %v15531_v58, %v2054_v51  ;;  %v1791_v36 = vsel %vm1785_vm10, %v1788_v24, %v1790_v38  ;;  %vm1809_vm13 = vc.u32 %v17531_v8, %v17536_v13 }
 0x220   : > { %v2059_v32 = vsel %vm2052_vm6, %v2055_v10, %v2058_v45  ;;  %v8733_v59 = vsel %vm8726_vm7, %v8729_v3, %v8732_v15  ;;  %v1724_v22 = vor.u32 %v1723_v0, %v1722_v56  ;;  %v1727_v60 = vshll.u32 %v1726_v21, 23  ;;  %v17590_v0 = vpop.permute.xlu1 %788 }
 0x221   : > { %v2060_v27 = vsel %vm2050_vm9, nan, %v2059_v32  ;;  %v8734_v37 = vsel %vm2050_vm9, nan, %v8733_v59  ;;  %v1810_v9 = vadd.s32 1, %v17537_v6  ;;  %v17569_v2 = vadd.f32 %v916_v1, %v16379_v55 }
 0x222   : > { %v7640_v25 = vmul.f32 %v16714_v50, %v2060_v27  ;;  %v14368_v29 = vmul.f32 %v16721_v62, %v8734_v37  ;;  %v1728_v17 = vor.u32 4788187, %v1727_v60  ;;  %v1807_v54 = vmul.u32 %v17508_v7, %v1791_v36 }
 0x223   : > { %v1736_v31 = vsel %vm1651_vm11, %v1735_v41, %v17467_v43  ;;  %v1811_v4 = vsel %vm1809_vm13, %v1810_v9, %v17537_v6  ;;  %v2267_v52 = vand.u32 2147483647, %v17545_v34  ;;  %v2270_v35 = vand.u32 2139095040, %v17545_v34 }
 0x224   : > { %v14432_v57 = vadd.f32 %v14368_v29, %v7640_v25  ;;  %v1729_v55 = vand.u32 2147483647, %v1728_v17  ;;  %v1731_v1 = vcvt.s32.f32 %v1724_v22  ;;  %v1812_v26 = vadd.s32 %v1811_v4, %v1807_v54 }
 0x225   : > { %v2271_v58 = vshrl.u32 %v2270_v35, 23  ;;  %vm1650_vm14 = vcmp.le.f32.partialorder %v1649_v33, 0.7853982  ;;  %v2274_v43 = vand.u32 8388607, %v2267_v52  ;;  %v2373_v6 = vand.u32 2139095040, %v17569_v2 }
 0x226   : > { %14496 = vst [vmem:[%s16934_s6 + $0x48] sm:$0xff] %v14432_v57  ;;  %v1732_v7 = vmul.f32 %v1731_v1, %v1729_v55  ;;  %v1813_v11 = vadd.s32 536870912, %v1812_v26  ;;  %v1738_v24 = vsel %vm1650_vm14, 0, %v1736_v31  ;;  %v2370_v41 = vand.u32 2147483647, %v17569_v2 }
 0x227   : > { %v14703_v53 = vadd.s32 4294967169, %v2271_v58  ;;  %v8412_v56 = vadd.s32 3, %v1738_v24  ;;  %v2275_v45 = vor.u32 8388608, %v2274_v43  ;;  %v2374_v15 = vshrl.u32 %v2373_v6, 23 }
 0x228   : > { %v1733_v19 = vxor.u32 2147483648, %v1732_v7  ;;  %v1814_v42 = vshrl.u32 %v1813_v11, 30  ;;  %vm17596_vm1 = vcmp.le.f32.partialorder %v1752_v48, 0.7853982  ;;  %vm1754_vm2 = vcmp.lt.s32.totalorder %v17339_v49, 0 }
 0x229   : > { %v2277_v30 = vadd.s32 1, %v14703_v53  ;;  %v17601_v59 = vand.u32 3, %v1738_v24  ;;  %v17604_v60 = vand.u32 3, %v8412_v56  ;;  %v17608_v27 = vmul.f32 %v16575_v20, %v17590_v0 }
 0x22a   : > { %v1734_v38 = vsel %vm1651_vm11, %v1733_v19, %v1732_v7  ;;  %v1815_v51 = vshll.u32 %v1814_v42, 30  ;;  %v1838_v10 = vsub.s32 4, %v1814_v42  ;;  %v1808_v37 = vadd.s32 %v17536_v13, %v17531_v8 }
 0x22b   : > { %v1737_v33 = vsel %vm1650_vm14, %v17269_v40, %v1734_v38  ;;  %vm2278_vm15 = vcmp.gt.s32.totalorder %v2277_v30, 0  ;;  %v14707_v9 = vadd.s32 4294967169, %v2374_v15  ;;  %v17614_v25 = vand.u32 8388607, %v2370_v41 }
 0x22c   : > { %15534 = vcosq.f32 %v1737_v33  ;;  %v17592_v21 = vsub.s32 %v1812_v26, %v1815_v51  ;;  %v2279_v3 = vsel %vm2278_vm15, %v2277_v30, 0  ;;  %v1839_v17 = vsel %vm1754_vm2, %v1838_v10, %v1814_v42 }
 0x22d   : > { %15536 = vsinq.f32 %v1737_v33  ;;  %v2281_v32 = vand.u32 31, %v2279_v3  ;;  %v17619_v54 = vshrl.u32 %v2279_v3, 5  ;;  %v17621_v31 = vshll.u32 %v2275_v45, 8 }
 0x22e   : > { %v1818_v22 = vsub.s32 0, %v17592_v21  ;;  %vm1747_vm0 = vcmp.eq.s32.totalorder %v17601_v59, 2  ;;  %v17633_v58 = vsel %vm17596_vm1, 0, %v1839_v17  ;;  %vm8418_vm3 = vcmp.eq.s32.totalorder %v17604_v60, 2 }
 0x22f   : > { %v2282_v48 = vsub.s32 32, %v2281_v32  ;;  %v2284_v4 = vshll.u32 %v23185_v18, %v2281_v32  ;;  %v2287_v8 = vshll.u32 %v23186_v5, %v2281_v32  ;;  %v2290_v55 = vshll.u32 %v23187_v16, %v2281_v32 }
 0x230   : > { %v14684_v29 = vmin.u32 %v1818_v22, %v17592_v21  ;;  %v2293_v11 = vshll.u32 %v23188_v47, %v2281_v32  ;;  %v2380_v24 = vadd.s32 1, %v14707_v9  ;;  %vm1744_vm4 = vcmp.eq.s32.totalorder %v17601_v59, 0 }
 0x231   : > { %v2285_v35 = vshrl.u32 %v23186_v5, %v2282_v48  ;;  %v2288_v13 = vshrl.u32 %v23187_v16, %v2282_v48  ;;  %v2291_v1 = vshrl.u32 %v23188_v47, %v2282_v48  ;;  %v2294_v26 = vshrl.u32 %v23189_v63, %v2282_v48 }
 0x232   : > { %v1820_v57 = vclz %v14684_v29  ;;  %vm8415_vm5 = vcmp.eq.s32.totalorder %v17604_v60, 0  ;;  %v2283_v43 = vshrl.u32 %v23185_v18, %v2282_v48  ;;  %vm1743_vm6 = vcmp.lt.s32.totalorder %v17601_v59, 2 }
 0x233   : > { %v2286_v7 = vor.u32 %v2285_v35, %v2284_v4  ;;  %v2289_v6 = vor.u32 %v2288_v13, %v2287_v8  ;;  %v2292_v19 = vor.u32 %v2291_v1, %v2290_v55  ;;  %vm8414_vm7 = vcmp.lt.s32.totalorder %v17604_v60, 2 }
 0x234   : > { %v14685_v53 = vadd.s32 4294967294, %v1820_v57  ;;  %v2295_v42 = vor.u32 %v2294_v26, %v2293_v11  ;;  %v2296_v30 = vshll.u32 %v23189_v63, %v2281_v32  ;;  %v2297_v38 = vshrl.u32 %v23191_v28, %v2282_v48 }
 0x235   : > { %vm2299_vm8 = vcmp.lt.s32.totalorder %v17619_v54, 1  ;;  %vm1741_vm9 = vweird.f32 %v17269_v40  ;;  %vm2300_vm11 = vcmp.lt.s32.totalorder %v17619_v54, 2  ;;  %vm2301_vm12 = vcmp.lt.s32.totalorder %v17619_v54, 3 }
 0x236   : > { %vm14686_vm10 = vcmp.lt.s32.totalorder %v14685_v53, 0  ;;  %vm2302_vm13 = vcmp.lt.s32.totalorder %v17619_v54, 4  ;;  %v2298_v56 = vor.u32 %v2297_v38, %v2296_v30  ;;  %v2303_v33 = vsel %vm2299_vm8, %v2283_v43, %v2286_v7 }
 0x237   : > { %v1823_v51 = vsel %vm14686_vm10, 0, %v14685_v53  ;;  %v2304_v45 = vsel %vm2302_vm13, %v2292_v19, 2102212464  ;;  %v2307_v32 = vsel %vm2299_vm8, %v2286_v7, %v2289_v6  ;;  %v2308_v9 = vsel %vm2302_vm13, %v2295_v42, 920167782 }
 0x238   : > { %v1824_v15 = vsub.s32 32, %v1823_v51  ;;  %v1828_v10 = vsub.s32 4294967266, %v1823_v51  ;;  %v2305_v3 = vsel %vm2301_vm12, %v2289_v6, %v2304_v45  ;;  %v1825_v48 = vshll.u32 %v17592_v21, %v1823_v51 }
 0x239   : > { %v15535_v22 = vpop.eup %15534  ;;  %v2311_v29 = vsel %vm2299_vm8, %v2289_v6, %v2292_v19  ;;  %v2312_v17 = vsel %vm2302_vm13, %v2298_v56, 1326507024  ;;  %v2309_v57 = vsel %vm2301_vm12, %v2292_v19, %v2308_v9  ;;  %v2306_v1 = vsel %vm2300_vm11, %v2303_v33, %v2305_v3 }
 0x23a   : > { %v15537_v4 = vpop.eup %15536  ;;  %v1748_v35 = vxor.u32 2147483648, %v15535_v22  ;;  %v1826_v8 = vshrl.u32 %v1808_v37, %v1824_v15  ;;  %v1829_v13 = vadd.s32 127, %v1828_v10  ;;  %v2313_v26 = vsel %vm2301_vm12, %v2295_v42, %v2312_v17 }
 0x23b   : > { %v1745_v55 = vxor.u32 2147483648, %v15537_v4  ;;  %vm2381_vm14 = vcmp.gt.s32.totalorder %v2380_v24, 0  ;;  %v2310_v6 = vsel %vm2300_vm11, %v2307_v32, %v2309_v57  ;;  %v2314_v19 = vsel %vm2300_vm11, %v2311_v29, %v2313_v26 }
 0x23c   : > { %v1749_v21 = vsel %vm1747_vm0, %v1748_v35, %v15537_v4  ;;  %v1827_v7 = vor.u32 %v1826_v8, %v1825_v48  ;;  %v1830_v11 = vshll.u32 %v1829_v13, 23  ;;  %v8420_v37 = vsel %vm8418_vm3, %v1748_v35, %v15537_v4 }
 0x23d   : > { %v1746_v53 = vsel %vm1744_vm4, %v15535_v22, %v1745_v55  ;;  %v8417_v43 = vsel %vm8415_vm5, %v15535_v22, %v1745_v55  ;;  %v2382_v51 = vsel %vm2381_vm14, %v2380_v24, 0  ;;  %v2378_v48 = vor.u32 8388608, %v17614_v25 }
 0x23e   : > { %v1750_v42 = vsel %vm1743_vm6, %v1746_v53, %v1749_v21  ;;  %v1831_v30 = vor.u32 4788187, %v1830_v11  ;;  %v8421_v38 = vsel %vm8414_vm7, %v8417_v43, %v8420_v37  ;;  %v1834_v10 = vcvt.s32.f32 %v1827_v7 }
 0x23f   : > { %v1751_v56 = vsel %vm1741_vm9, nan, %v1750_v42  ;;  %v8422_v33 = vsel %vm1741_vm9, nan, %v8421_v38  ;;  %v17685_v45 = vmul.u32.u64.low %v17621_v31, %v2314_v19  ;;  %v17686_v15 = vmul.u32.u64.high %v17621_v31, %v2314_v19, %v17685_v45 }
 0x240   : > { %v1832_v54 = vand.u32 2147483647, %v1831_v30  ;;  %v7637_v59 = vmul.f32 %v16711_v23, %v1751_v56  ;;  %v14365_v3 = vmul.f32 %v16718_v12, %v8422_v33  ;;  %v2384_v32 = vand.u32 31, %v2382_v51 }
 0x241   : > { %v17691_v60 = vmul.u32.u64.low %v17621_v31, %v2310_v6  ;;  %v17692_v24 = vmul.u32.u64.high %v17621_v31, %v2310_v6, %v17691_v60  ;;  %v17698_v9 = vadd.f32 %v17608_v27, %v16366_v39  ;;  %v8516_v29 = vadd.s32 3, %v17633_v58 }
 0x242   : > { %v1835_v22 = vmul.f32 %v1834_v10, %v1832_v54  ;;  %v14429_v40 = vadd.f32 %v14365_v3, %v7637_v59  ;;  %v2322_v17 = vmul.u32 %v17621_v31, %v2306_v1  ;;  %v2383_v4 = vshrl.u32 %v2382_v51, 5 }
 0x243   : > { %v2385_v35 = vsub.s32 32, %v2384_v32  ;;  %vm2324_vm15 = vc.u32 %v17686_v15, %v17691_v60  ;;  %v2387_v13 = vshll.u32 %v23185_v18, %v2384_v32  ;;  %v2390_v57 = vshll.u32 %v23186_v5, %v2384_v32 }
 0x244   : > { %v1836_v8 = vxor.u32 2147483648, %v1835_v22  ;;  %14493 = vst [vmem:[%s16934_s6 + $0x30] sm:$0xff] %v14429_v40  ;;  %v2325_v25 = vadd.s32 1, %v17692_v24  ;;  %v2393_v55 = vshll.u32 %v23187_v16, %v2384_v32  ;;  %v2396_v26 = vshll.u32 %v23188_v47, %v2384_v32 }
 0x245   : > { %v2388_v39 = vshrl.u32 %v23186_v5, %v2385_v35  ;;  %v2391_v27 = vshrl.u32 %v23187_v16, %v2385_v35  ;;  %v2394_v1 = vshrl.u32 %v23188_v47, %v2385_v35  ;;  %v2397_v21 = vshrl.u32 %v23189_v63, %v2385_v35 }
 0x246   : > { %v1837_v31 = vsel %vm1754_vm2, %v1836_v8, %v1835_v22  ;;  %v2326_v11 = vsel %vm2324_vm15, %v2325_v25, %v17692_v24  ;;  %v2399_v42 = vshll.u32 %v23189_v63, %v2384_v32  ;;  %v2400_v30 = vshrl.u32 %v23191_v28, %v2385_v35 }
 0x247   : > { %v1840_v7 = vsel %vm17596_vm1, %v17339_v49, %v1837_v31  ;;  %v2389_v37 = vor.u32 %v2388_v39, %v2387_v13  ;;  %v2392_v53 = vor.u32 %v2391_v27, %v2390_v57  ;;  %v2327_v43 = vadd.s32 %v2326_v11, %v2322_v17 }
 0x248   : > { %15538 = vcosq.f32 %v1840_v7  ;;  %v2395_v6 = vor.u32 %v2394_v1, %v2393_v55  ;;  %v2398_v19 = vor.u32 %v2397_v21, %v2396_v26  ;;  %vm2402_vm2 = vcmp.lt.s32.totalorder %v2383_v4, 1 }
 0x249   : > { %15540 = vsinq.f32 %v1840_v7  ;;  %v2328_v38 = vadd.s32 536870912, %v2327_v43  ;;  %vm2403_vm0 = vcmp.lt.s32.totalorder %v2383_v4, 2  ;;  %vm2405_vm3 = vcmp.lt.s32.totalorder %v2383_v4, 4 }
 0x24a   : > { %v2410_v36 = vsel %vm2402_vm2, %v2389_v37, %v2392_v53  ;;  %v2386_v51 = vshrl.u32 %v23185_v18, %v2385_v35  ;;  %v2401_v56 = vor.u32 %v2400_v30, %v2399_v42  ;;  %vm2404_vm1 = vcmp.lt.s32.totalorder %v2383_v4, 3 }
 0x24b   : > { %v2411_v33 = vsel %vm2405_vm3, %v2398_v19, 920167782  ;;  %v17724_v45 = vshrl.u32 %v2328_v38, 30  ;;  %v2407_v54 = vsel %vm2405_vm3, %v2395_v6, 2102212464  ;;  %v2414_v59 = vsel %vm2402_vm2, %v2392_v53, %v2395_v6 }
 0x24c   : > { %v2412_v10 = vsel %vm2404_vm1, %v2395_v6, %v2411_v33  ;;  %v1845_v3 = vand.u32 3, %v17633_v58  ;;  %v2415_v32 = vsel %vm2405_vm3, %v2401_v56, 1326507024  ;;  %v2418_v22 = vshll.u32 %v2378_v48, 8 }
 0x24d   : > { %v2413_v24 = vsel %vm2403_vm0, %v2410_v36, %v2412_v10  ;;  %v2330_v40 = vshll.u32 %v17724_v45, 30  ;;  %v2406_v17 = vsel %vm2402_vm2, %v2386_v51, %v2389_v37  ;;  %v2416_v35 = vsel %vm2404_vm1, %v2398_v19, %v2415_v32 }
 0x24e   : > { %v2064_v8 = vand.u32 2139095040, %v17698_v9  ;;  %v2408_v13 = vsel %vm2404_vm1, %v2392_v53, %v2407_v54  ;;  %v2417_v57 = vsel %vm2403_vm0, %v2414_v59, %v2416_v35  ;;  %v8517_v27 = vand.u32 3, %v8516_v29 }
 0x24f   : > { %v17733_v25 = vmul.u32.u64.low %v2418_v22, %v2413_v24  ;;  %v17734_v39 = vmul.u32.u64.high %v2418_v22, %v2413_v24, %v17733_v25  ;;  %v17737_v58 = vsub.s32 %v2327_v43, %v2330_v40  ;;  %vm1844_vm4 = vweird.f32 %v17339_v49 }
 0x250   : > { %v17739_v55 = vmul.u32.u64.low %v2418_v22, %v2417_v57  ;;  %v17740_v31 = vmul.u32.u64.high %v2418_v22, %v2417_v57, %v17739_v55  ;;  %v2065_v48 = vshrl.u32 %v2064_v8, 23  ;;  %v2409_v26 = vsel %vm2403_vm0, %v2406_v17, %v2408_v13 }
 0x251   : > { %v2333_v1 = vsub.s32 0, %v17737_v58  ;;  %vm1846_vm5 = vcmp.lt.s32.totalorder %v1845_v3, 2  ;;  %vm1847_vm6 = vcmp.eq.s32.totalorder %v1845_v3, 0  ;;  %vm2269_vm7 = vcmp.lt.s32.totalorder %v17545_v34, 0 }
 0x252   : > { %v2428_v21 = vadd.s32 1, %v17734_v39  ;;  %v14695_v7 = vadd.s32 4294967169, %v2065_v48  ;;  %vm1850_vm8 = vcmp.eq.s32.totalorder %v1845_v3, 2  ;;  %vm8518_vm9 = vcmp.lt.s32.totalorder %v8517_v27, 2 }
 0x253   : > { %v14704_v29 = vmin.u32 %v2333_v1, %v17737_v58  ;;  %v2061_v11 = vand.u32 2147483647, %v17698_v9  ;;  %vm8519_vm10 = vcmp.eq.s32.totalorder %v8517_v27, 0  ;;  %v2425_v53 = vmul.u32 %v2418_v22, %v2409_v26 }
 0x254   : > { %vm2427_vm11 = vc.u32 %v17740_v31, %v17733_v25  ;;  %v2071_v4 = vadd.s32 1, %v14695_v7  ;;  %vm8522_vm12 = vcmp.eq.s32.totalorder %v8517_v27, 2  ;;  %vm17753_vm13 = vcmp.le.f32.partialorder %v2267_v52, 0.7853982 }
 0x255   : > { %v15539_v37 = vpop.eup %15538  ;;  %v2335_v42 = vclz %v14704_v29  ;;  %v2429_v30 = vsel %vm2427_vm11, %v2428_v21, %v17734_v39  ;;  %v2323_v36 = vadd.s32 %v17691_v60, %v17686_v15  ;;  %v2353_v51 = vsub.s32 4, %v17724_v45 }
 0x256   : > { %v15541_v43 = vpop.eup %15540  ;;  %v1851_v6 = vxor.u32 2147483648, %v15539_v37  ;;  %v2430_v56 = vadd.s32 %v2429_v30, %v2425_v53  ;;  %v2068_v52 = vand.u32 8388607, %v2061_v11  ;;  %vm2072_vm14 = vcmp.gt.s32.totalorder %v2071_v4, 0 }
 0x257   : > { %v1848_v38 = vxor.u32 2147483648, %v15541_v43  ;;  %v14705_v10 = vadd.s32 4294967294, %v2335_v42  ;;  %v2073_v60 = vsel %vm2072_vm14, %v2071_v4, 0  ;;  %v2354_v39 = vsel %vm2269_vm7, %v2353_v51, %v17724_v45 }
 0x258   : > { %v1852_v33 = vsel %vm1850_vm8, %v1851_v6, %v15541_v43  ;;  %v8524_v54 = vsel %vm8522_vm12, %v1851_v6, %v15541_v43  ;;  %v2431_v32 = vadd.s32 536870912, %v2430_v56  ;;  %v914_v49 = vmul.f32 %v16578_v14, %v17590_v0 }
 0x259   : > { %v1849_v59 = vsel %vm1847_vm6, %v15539_v37, %v1848_v38  ;;  %v8521_v24 = vsel %vm8519_vm10, %v15539_v37, %v1848_v38  ;;  %vm14706_vm15 = vcmp.lt.s32.totalorder %v14705_v10, 0  ;;  %v2069_v48 = vor.u32 8388608, %v2068_v52 }
 0x25a   : > { %v1853_v22 = vsel %vm1846_vm5, %v1849_v59, %v1852_v33  ;;  %v8525_v15 = vsel %vm8518_vm9, %v8521_v24, %v8524_v54  ;;  %v2338_v35 = vsel %vm14706_vm15, 0, %v14705_v10  ;;  %v17772_v8 = vshrl.u32 %v2431_v32, 30 }
 0x25b   : > { %v1854_v40 = vsel %vm1844_vm4, nan, %v1853_v22  ;;  %v8526_v17 = vsel %vm1844_vm4, nan, %v8525_v15  ;;  %v2339_v3 = vsub.s32 32, %v2338_v35  ;;  %v2343_v27 = vsub.s32 4294967266, %v2338_v35 }
 0x25c   : > { %v7638_v13 = vmul.f32 %v16714_v50, %v1854_v40  ;;  %v14366_v57 = vmul.f32 %v16721_v62, %v8526_v17  ;;  %v2433_v55 = vshll.u32 %v17772_v8, 30  ;;  %v2340_v26 = vshll.u32 %v17737_v58, %v2338_v35 }
 0x25d   : > { %v2341_v21 = vshrl.u32 %v2323_v36, %v2339_v3  ;;  %v2075_v7 = vand.u32 31, %v2073_v60  ;;  %v2344_v29 = vadd.s32 127, %v2343_v27  ;;  %v17785_v37 = vsel %vm17753_vm13, 0, %v2354_v39 }
 0x25e   : > { %v14430_v1 = vadd.f32 %v14366_v57, %v7638_v13  ;;  %v2434_v53 = vsub.s32 %v2430_v56, %v2433_v55  ;;  %v17789_v42 = vadd.s32 3, %v17785_v37  ;;  %v17792_v0 = vadd.f32 %v914_v49, %v16369_v44 }
 0x25f   : > { %v2342_v45 = vor.u32 %v2341_v21, %v2340_v26  ;;  %v2076_v4 = vsub.s32 32, %v2075_v7  ;;  %v2345_v43 = vshll.u32 %v2344_v29, 23  ;;  %v17794_v58 = vshrl.u32 %v2073_v60, 5 }
 0x260   : > { %14494 = vst [vmem:[%s16934_s6 + $0x38] sm:$0xff] %v14430_v1  ;;  %v2436_v6 = vsub.s32 0, %v2434_v53  ;;  %v17796_v30 = vshll.u32 %v2069_v48, 8  ;;  %v2426_v36 = vadd.s32 %v17733_v25, %v17740_v31  ;;  %v2456_v54 = vsub.s32 4, %v17772_v8 }
 0x261   : > { %v2346_v38 = vor.u32 4788187, %v2345_v43  ;;  %v2079_v56 = vshrl.u32 %v23186_v5, %v2076_v4  ;;  %v2349_v33 = vcvt.s32.f32 %v2342_v45  ;;  %v2078_v10 = vshll.u32 %v23185_v18, %v2075_v7 }
 0x262   : > { %v14708_v51 = vmin.u32 %v2436_v6, %v2434_v53  ;;  %v2082_v52 = vshrl.u32 %v23187_v16, %v2076_v4  ;;  %v2081_v24 = vshll.u32 %v23186_v5, %v2075_v7  ;;  %v2085_v32 = vshrl.u32 %v23188_v47, %v2076_v4 }
 0x263   : > { %v2347_v44 = vand.u32 2147483647, %v2346_v38  ;;  %v2077_v22 = vshrl.u32 %v23185_v18, %v2076_v4  ;;  %v2084_v25 = vshll.u32 %v23187_v16, %v2075_v7  ;;  %vm2093_vm2 = vcmp.lt.s32.totalorder %v17794_v58, 1 }
 0x264   : > { %v2438_v59 = vclz %v14708_v51  ;;  %v2167_v31 = vand.u32 2139095040, %v17792_v0  ;;  %v2080_v40 = vor.u32 %v2079_v56, %v2078_v10  ;;  %v2083_v17 = vor.u32 %v2082_v52, %v2081_v24 }
 0x265   : > { %v2350_v15 = vmul.f32 %v2349_v33, %v2347_v44  ;;  %v2086_v35 = vor.u32 %v2085_v32, %v2084_v25  ;;  %v2087_v13 = vshll.u32 %v23188_v47, %v2075_v7  ;;  %v2088_v57 = vshrl.u32 %v23189_v63, %v2076_v4 }
 0x266   : > { %v14709_v60 = vadd.s32 4294967294, %v2438_v59  ;;  %v2091_v3 = vshrl.u32 %v23191_v28, %v2076_v4  ;;  %vm2372_vm0 = vcmp.lt.s32.totalorder %v17569_v2, 0  ;;  %v2090_v27 = vshll.u32 %v23189_v63, %v2075_v7 }
 0x267   : > { %v2351_v39 = vxor.u32 2147483648, %v2350_v15  ;;  %vm2094_vm1 = vcmp.lt.s32.totalorder %v17794_v58, 2  ;;  %v2089_v49 = vor.u32 %v2088_v57, %v2087_v13  ;;  %vm2095_vm4 = vcmp.lt.s32.totalorder %v17794_v58, 3 }
 0x268   : > { %vm14710_vm3 = vcmp.lt.s32.totalorder %v14709_v60, 0  ;;  %vm2096_vm5 = vcmp.lt.s32.totalorder %v17794_v58, 4  ;;  %v2092_v21 = vor.u32 %v2091_v3, %v2090_v27  ;;  %v2101_v7 = vsel %vm2093_vm2, %v2080_v40, %v2083_v17 }
 0x269   : > { %v2441_v55 = vsel %vm14710_vm3, 0, %v14709_v60  ;;  %v2352_v48 = vsel %vm2269_vm7, %v2351_v39, %v2350_v15  ;;  %v2102_v4 = vsel %vm2096_vm5, %v2089_v49, 920167782  ;;  %v2098_v38 = vsel %vm2096_vm5, %v2086_v35, 2102212464  ;;  %v801_v60 = vpop.permute.xlu0 %800 }
 0x26a   : > { %v2442_v1 = vsub.s32 32, %v2441_v55  ;;  %v2446_v26 = vsub.s32 4294967266, %v2441_v55  ;;  %v2355_v29 = vsel %vm17753_vm13, %v17545_v34, %v2352_v48  ;;  %v2443_v45 = vshll.u32 %v2434_v53, %v2441_v55 }
 0x26b   : > { %15542 = vcosq.f32 %v2355_v29  ;;  %v2097_v51 = vsel %vm2093_vm2, %v2077_v22, %v2080_v40  ;;  %v2103_v19 = vsel %vm2095_vm4, %v2086_v35, %v2102_v4  ;;  %v2105_v53 = vsel %vm2093_vm2, %v2083_v17, %v2086_v35 }
 0x26c   : > { %v2444_v43 = vshrl.u32 %v2426_v36, %v2442_v1  ;;  %v2447_v6 = vadd.s32 127, %v2446_v26  ;;  %15544 = vsinq.f32 %v2355_v29  ;;  %v2104_v10 = vsel %vm2094_vm1, %v2101_v7, %v2103_v19 }
 0x26d   : > { %v2106_v36 = vsel %vm2096_vm5, %v2092_v21, 1326507024  ;;  %v2099_v52 = vsel %vm2095_vm4, %v2083_v17, %v2098_v38  ;;  %v17844_v59 = vmul.u32.u64.low %v17796_v30, %v2104_v10  ;;  %v17845_v24 = vmul.u32.u64.high %v17796_v30, %v2104_v10, %v17844_v59 }
 0x26e   : > { %v2445_v56 = vor.u32 %v2444_v43, %v2443_v45  ;;  %v2448_v33 = vshll.u32 %v2447_v6, 23  ;;  %v2107_v44 = vsel %vm2095_vm4, %v2089_v49, %v2106_v36  ;;  %v17849_v32 = vand.u32 3, %v17785_v37 }
 0x26f   : > { %v2108_v25 = vsel %vm2094_vm1, %v2105_v53, %v2107_v44  ;;  %v2168_v15 = vshrl.u32 %v2167_v31, 23  ;;  %v2457_v40 = vsel %vm2372_vm0, %v2456_v54, %v17772_v8  ;;  %v9037_v17 = vand.u32 3, %v17789_v42 }
 0x270   : > { %v2449_v22 = vor.u32 4788187, %v2448_v33  ;;  %v17858_v35 = vmul.u32.u64.low %v17796_v30, %v2108_v25  ;;  %v17859_v13 = vmul.u32.u64.high %v17796_v30, %v2108_v25, %v17858_v35  ;;  %v2452_v3 = vcvt.s32.f32 %v2445_v56 }
 0x271   : > { %v2100_v37 = vsel %vm2094_vm1, %v2097_v51, %v2099_v52  ;;  %v14699_v39 = vadd.s32 4294967169, %v2168_v15  ;;  %vm17865_vm6 = vcmp.le.f32.partialorder %v2370_v41, 0.7853982  ;;  %v2119_v8 = vadd.s32 1, %v17845_v24 }
 0x272   : > { %v2450_v57 = vand.u32 2147483647, %v2449_v22  ;;  %v919_v42 = vmul.f32 %v16575_v20, %v801_v60  ;;  %v2459_v27 = vsel %vm17865_vm6, 0, %v2457_v40  ;;  %v2164_v55 = vand.u32 2147483647, %v17792_v0 }
 0x273   : > { %v2174_v49 = vadd.s32 1, %v14699_v39  ;;  %vm2361_vm7 = vcmp.lt.s32.totalorder %v17849_v32, 2  ;;  %vm2362_vm8 = vcmp.eq.s32.totalorder %v17849_v32, 0  ;;  %vm2365_vm9 = vcmp.eq.s32.totalorder %v17849_v32, 2 }
 0x274   : > { %v2453_v54 = vmul.f32 %v2452_v3, %v2450_v57  ;;  %v2116_v41 = vmul.u32 %v17796_v30, %v2100_v37  ;;  %vm2118_vm10 = vc.u32 %v17859_v13, %v17844_v59  ;;  %vm2359_vm11 = vweird.f32 %v17545_v34 }
 0x275   : > { %vm9038_vm12 = vcmp.lt.s32.totalorder %v9037_v17, 2  ;;  %v2120_v48 = vsel %vm2118_vm10, %v2119_v8, %v17845_v24  ;;  %vm2175_vm13 = vcmp.gt.s32.totalorder %v2174_v49, 0  ;;  %vm9039_vm14 = vcmp.eq.s32.totalorder %v9037_v17, 0 }
 0x276   : > { %v2454_v58 = vxor.u32 2147483648, %v2453_v54  ;;  %v9140_v1 = vadd.s32 3, %v2459_v27  ;;  %v2121_v26 = vadd.s32 %v2120_v48, %v2116_v41  ;;  %v2176_v21 = vsel %vm2175_vm13, %v2174_v49, 0 }
 0x277   : > { %v2171_v30 = vand.u32 8388607, %v2164_v55  ;;  %v2178_v45 = vand.u32 31, %v2176_v21  ;;  %v920_v7 = vmul.f32 %v16578_v14, %v801_v60  ;;  %vm9042_vm15 = vcmp.eq.s32.totalorder %v9037_v17, 2 }
 0x278   : > { %v2455_v29 = vsel %vm2372_vm0, %v2454_v58, %v2453_v54  ;;  %v15543_v4 = vpop.eup %15542  ;;  %v2122_v6 = vadd.s32 536870912, %v2121_v26  ;;  %v17891_v38 = vadd.f32 %v919_v42, %v16392_v46  ;;  %v17893_v53 = vand.u32 3, %v2459_v27 }
 0x279   : > { %v2458_v43 = vsel %vm17865_vm6, %v17569_v2, %v2455_v29  ;;  %v15545_v51 = vpop.eup %15544  ;;  %v2366_v19 = vxor.u32 2147483648, %v15543_v4  ;;  %v2179_v56 = vsub.s32 32, %v2178_v45  ;;  %v17895_v10 = vand.u32 3, %v9140_v1 }
 0x27a   : > { %15546 = vcosq.f32 %v2458_v43  ;;  %v2363_v33 = vxor.u32 2147483648, %v15545_v51  ;;  %v17897_v36 = vshrl.u32 %v2122_v6, 30  ;;  %v2172_v24 = vor.u32 8388608, %v2171_v30 }
 0x27b   : > { %15548 = vsinq.f32 %v2458_v43  ;;  %v2367_v52 = vsel %vm2365_vm9, %v2366_v19, %v15545_v51  ;;  %v9044_v44 = vsel %vm9042_vm15, %v2366_v19, %v15545_v51  ;;  %v17902_v46 = vadd.f32 %v920_v7, %v16395_v61 }
 0x27c   : > { %v2364_v22 = vsel %vm2362_vm8, %v15543_v4, %v2363_v33  ;;  %v9041_v25 = vsel %vm9039_vm14, %v15543_v4, %v2363_v33  ;;  %v2124_v15 = vshll.u32 %v17897_v36, 30  ;;  %v2679_v60 = vand.u32 2147483647, %v17891_v38 }
 0x27d   : > { %v2368_v40 = vsel %vm2361_vm7, %v2364_v22, %v2367_v52  ;;  %v9045_v35 = vsel %vm9038_vm12, %v9041_v25, %v9044_v44  ;;  %v17914_v57 = vadd.s32 %v17844_v59, %v17859_v13  ;;  %v2182_v61 = vshrl.u32 %v23186_v5, %v2179_v56 }
 0x27e   : > { %v2369_v3 = vsel %vm2359_vm11, nan, %v2368_v40  ;;  %v9046_v37 = vsel %vm2359_vm11, nan, %v9045_v35  ;;  %v17921_v39 = vsub.s32 %v2121_v26, %v2124_v15  ;;  %v2185_v31 = vshrl.u32 %v23187_v16, %v2179_v56 }
 0x27f   : > { %v7643_v32 = vmul.f32 %v16711_v23, %v2369_v3  ;;  %v14371_v17 = vmul.f32 %v16718_v12, %v9046_v37  ;;  %v17926_v8 = vshrl.u32 %v2176_v21, 5  ;;  %v2682_v59 = vand.u32 2139095040, %v17891_v38 }
 0x280   : > { %vm2468_vm2 = vcmp.eq.s32.totalorder %v17893_v53, 2  ;;  %vm9146_vm0 = vcmp.eq.s32.totalorder %v17895_v10, 2  ;;  %v2127_v13 = vsub.s32 0, %v17921_v39  ;;  %v2181_v34 = vshll.u32 %v23185_v18, %v2178_v45 }
 0x281   : > { %v2184_v42 = vshll.u32 %v23186_v5, %v2178_v45  ;;  %v2188_v54 = vshrl.u32 %v23188_v47, %v2179_v56  ;;  %vm2465_vm3 = vcmp.eq.s32.totalorder %v17893_v53, 0  ;;  %vm9143_vm1 = vcmp.eq.s32.totalorder %v17895_v10, 0 }
 0x282   : > { %v14435_v27 = vadd.f32 %v14371_v17, %v7643_v32  ;;  %v2187_v49 = vshll.u32 %v23187_v16, %v2178_v45  ;;  %v2190_v41 = vshll.u32 %v23188_v47, %v2178_v45  ;;  %v2191_v58 = vshrl.u32 %v23189_v63, %v2179_v56 }
 0x283   : > { %vm2464_vm4 = vcmp.lt.s32.totalorder %v17893_v53, 2  ;;  %vm9142_vm5 = vcmp.lt.s32.totalorder %v17895_v10, 2  ;;  %v14696_v48 = vmin.u32 %v2127_v13, %v17921_v39  ;;  %v2183_v1 = vor.u32 %v2182_v61, %v2181_v34 }
 0x284   : > { %v2186_v26 = vor.u32 %v2185_v31, %v2184_v42  ;;  %v17943_v21 = vshll.u32 %v2172_v24, 8  ;;  %vm2462_vm6 = vweird.f32 %v17569_v2  ;;  %14499 = vst [vmem:[%s16934_s6 + $0x60] sm:$0xff] %v14435_v27  ;;  %v2189_v29 = vor.u32 %v2188_v54, %v2187_v49 }
 0x285   : > { %v2192_v30 = vor.u32 %v2191_v58, %v2190_v41  ;;  %v2193_v7 = vshll.u32 %v23189_v63, %v2178_v45  ;;  %v2194_v4 = vshrl.u32 %v23191_v28, %v2179_v56  ;;  %v2129_v43 = vclz %v14696_v48 }
 0x286   : > { %v2147_v6 = vsub.s32 4, %v17897_v36  ;;  %v2180_v51 = vshrl.u32 %v23185_v18, %v2179_v56  ;;  %v2683_v19 = vshrl.u32 %v2682_v59, 23  ;;  %vm2196_vm7 = vcmp.lt.s32.totalorder %v17926_v8, 1 }
 0x287   : > { %v2195_v33 = vor.u32 %v2194_v4, %v2193_v7  ;;  %vm2197_vm8 = vcmp.lt.s32.totalorder %v17926_v8, 2  ;;  %vm2199_vm9 = vcmp.lt.s32.totalorder %v17926_v8, 4  ;;  %v15547_v52 = vpop.eup %15546  ;;  %v14697_v44 = vadd.s32 4294967294, %v2129_v43 }
 0x288   : > { %vm2198_vm10 = vcmp.lt.s32.totalorder %v17926_v8, 3  ;;  %v2200_v45 = vsel %vm2196_vm7, %v2180_v51, %v2183_v1  ;;  %v2205_v24 = vsel %vm2199_vm9, %v2192_v30, 920167782  ;;  %v15549_v22 = vpop.eup %15548  ;;  %v2469_v25 = vxor.u32 2147483648, %v15547_v52 }
 0x289   : > { %v2204_v15 = vsel %vm2196_vm7, %v2183_v1, %v2186_v26  ;;  %v2206_v56 = vsel %vm2198_vm10, %v2189_v29, %v2205_v24  ;;  %v2209_v40 = vsel %vm2199_vm9, %v2195_v33, 1326507024  ;;  %v2466_v35 = vxor.u32 2147483648, %v15549_v22 }
 0x28a   : > { %vm14698_vm11 = vcmp.lt.s32.totalorder %v14697_v44, 0  ;;  %v2208_v61 = vsel %vm2196_vm7, %v2186_v26, %v2189_v29  ;;  %v2210_v3 = vsel %vm2198_vm10, %v2192_v30, %v2209_v40  ;;  %v2470_v37 = vsel %vm2468_vm2, %v2469_v25, %v15549_v22 }
 0x28b   : > { %v9148_v31 = vsel %vm9146_vm0, %v2469_v25, %v15549_v22  ;;  %v2132_v32 = vsel %vm14698_vm11, 0, %v14697_v44  ;;  %v2201_v17 = vsel %vm2199_vm9, %v2189_v29, 2102212464  ;;  %v2467_v59 = vsel %vm2465_vm3, %v15547_v52, %v2466_v35 }
 0x28c   : > { %v9145_v13 = vsel %vm9143_vm1, %v15547_v52, %v2466_v35  ;;  %v2133_v34 = vsub.s32 32, %v2132_v32  ;;  %v2207_v42 = vsel %vm2197_vm8, %v2204_v15, %v2206_v56  ;;  %v2471_v54 = vsel %vm2464_vm4, %v2467_v59, %v2470_v37 }
 0x28d   : > { %v9149_v27 = vsel %vm9142_vm5, %v9145_v13, %v9148_v31  ;;  %v2137_v49 = vsub.s32 4294967266, %v2132_v32  ;;  %v2211_v41 = vsel %vm2197_vm8, %v2208_v61, %v2210_v3  ;;  %v2472_v58 = vsel %vm2462_vm6, nan, %v2471_v54 }
 0x28e   : > { %v9150_v48 = vsel %vm2462_vm6, nan, %v9149_v27  ;;  %v2134_v1 = vshll.u32 %v17921_v39, %v2132_v32  ;;  %v2135_v29 = vshrl.u32 %v17914_v57, %v2133_v34  ;;  %v7644_v53 = vmul.f32 %v16714_v50, %v2472_v58 }
 0x28f   : > { %v14372_v10 = vmul.f32 %v16721_v62, %v9150_v48  ;;  %v2138_v30 = vadd.s32 127, %v2137_v49  ;;  %v14719_v7 = vadd.s32 4294967169, %v2683_v19  ;;  %v2202_v43 = vsel %vm2198_vm10, %v2186_v26, %v2201_v17 }
 0x290   : > { %v2136_v4 = vor.u32 %v2135_v29, %v2134_v1  ;;  %v17992_v51 = vmul.u32.u64.low %v17943_v21, %v2211_v41  ;;  %v17993_v33 = vmul.u32.u64.high %v17943_v21, %v2211_v41, %v17992_v51  ;;  %vm2063_vm12 = vcmp.lt.s32.totalorder %v17698_v9, 0 }
 0x291   : > { %v14436_v2 = vadd.f32 %v14372_v10, %v7644_v53  ;;  %v2139_v52 = vshll.u32 %v2138_v30, 23  ;;  %v17996_v39 = vmul.u32.u64.low %v17943_v21, %v2207_v42  ;;  %v17997_v44 = vmul.u32.u64.high %v17943_v21, %v2207_v42, %v17996_v39 }
 0x292   : > { %v2148_v19 = vsel %vm2063_vm12, %v2147_v6, %v17897_v36  ;;  %v2203_v26 = vsel %vm2197_vm8, %v2200_v45, %v2202_v43  ;;  %v2689_v24 = vadd.s32 1, %v14719_v7  ;;  %vm18009_vm13 = vcmp.le.f32.partialorder %v2061_v11, 0.7853982 }
 0x293   : > { %14500 = vst [vmem:[%s16934_s6 + $0x68] sm:$0xff] %v14436_v2  ;;  %v2140_v57 = vor.u32 4788187, %v2139_v52  ;;  %v2143_v25 = vcvt.s32.f32 %v2136_v4  ;;  %vm2221_vm14 = vc.u32 %v17993_v33, %v17996_v39  ;;  %v2686_v15 = vand.u32 8388607, %v2679_v60 }
 0x294   : > { %v2222_v36 = vadd.s32 1, %v17997_v44  ;;  %vm2690_vm15 = vcmp.gt.s32.totalorder %v2689_v24, 0  ;;  %v2785_v8 = vand.u32 2139095040, %v17902_v46  ;;  %v2150_v6 = vsel %vm18009_vm13, 0, %v2148_v19 }
 0x295   : > { %v2141_v56 = vand.u32 2147483647, %v2140_v57  ;;  %v2219_v11 = vmul.u32 %v17943_v21, %v2203_v26  ;;  %v2691_v45 = vsel %vm2690_vm15, %v2689_v24, 0  ;;  %v2687_v37 = vor.u32 8388608, %v2686_v15 }
 0x296   : > { %v2223_v35 = vsel %vm2221_vm14, %v2222_v36, %v17997_v44  ;;  %v2693_v61 = vand.u32 31, %v2691_v45  ;;  %v8828_v32 = vadd.s32 3, %v2150_v6  ;;  %v2786_v59 = vshrl.u32 %v2785_v8, 23 }
 0x297   : > { %v2144_v40 = vmul.f32 %v2143_v25, %v2141_v56  ;;  %v2224_v3 = vadd.s32 %v2223_v35, %v2219_v11  ;;  %v2692_v34 = vshrl.u32 %v2691_v45, 5  ;;  %v18041_v44 = vand.u32 3, %v2150_v6 }
 0x298   : > { %v2694_v17 = vsub.s32 32, %v2693_v61  ;;  %v2696_v42 = vshll.u32 %v23185_v18, %v2693_v61  ;;  %v2699_v54 = vshll.u32 %v23186_v5, %v2693_v61  ;;  %v2702_v41 = vshll.u32 %v23187_v16, %v2693_v61 }
 0x299   : > { %v2145_v31 = vxor.u32 2147483648, %v2144_v40  ;;  %v2225_v13 = vadd.s32 536870912, %v2224_v3  ;;  %v2705_v53 = vshll.u32 %v23188_v47, %v2693_v61  ;;  %v2708_v10 = vshll.u32 %v23189_v63, %v2693_v61 }
 0x29a   : > { %v2697_v27 = vshrl.u32 %v23186_v5, %v2694_v17  ;;  %v2700_v49 = vshrl.u32 %v23187_v16, %v2694_v17  ;;  %v2703_v1 = vshrl.u32 %v23188_v47, %v2694_v17  ;;  %v2706_v29 = vshrl.u32 %v23189_v63, %v2694_v17 }
 0x29b   : > { %v2146_v21 = vsel %vm2063_vm12, %v2145_v31, %v2144_v40  ;;  %v18033_v48 = vshrl.u32 %v2225_v13, 30  ;;  %v2709_v30 = vshrl.u32 %v23191_v28, %v2694_v17  ;;  %v18045_v19 = vand.u32 3, %v8828_v32 }
 0x29c   : > { %v2149_v58 = vsel %vm18009_vm13, %v17698_v9, %v2146_v21  ;;  %v2704_v4 = vor.u32 %v2703_v1, %v2702_v41  ;;  %v2698_v43 = vor.u32 %v2697_v27, %v2696_v42  ;;  %v2701_v51 = vor.u32 %v2700_v49, %v2699_v54 }
 0x29d   : > { %15550 = vcosq.f32 %v2149_v58  ;;  %v2227_v7 = vshll.u32 %v18033_v48, 30  ;;  %v2707_v2 = vor.u32 %v2706_v29, %v2705_v53  ;;  %v2710_v52 = vor.u32 %v2709_v30, %v2708_v10 }
 0x29e   : > { %15552 = vsinq.f32 %v2149_v58  ;;  %vm2714_vm2 = vcmp.lt.s32.totalorder %v2692_v34, 4  ;;  %v18047_v26 = vshll.u32 %v2687_v37, 8  ;;  %v14723_v24 = vadd.s32 4294967169, %v2786_v59 }
 0x29f   : > { %v18043_v57 = vsub.s32 %v2224_v3, %v2227_v7  ;;  %vm2166_vm0 = vcmp.lt.s32.totalorder %v17792_v0, 0  ;;  %v2695_v25 = vshrl.u32 %v23185_v18, %v2694_v17  ;;  %vm2711_vm3 = vcmp.lt.s32.totalorder %v2692_v34, 1 }
 0x2a0   : > { %v2716_v15 = vsel %vm2714_vm2, %v2704_v4, 2102212464  ;;  %v2719_v56 = vsel %vm2711_vm3, %v2698_v43, %v2701_v51  ;;  %v2720_v36 = vsel %vm2714_vm2, %v2707_v2, 920167782  ;;  %v2723_v8 = vsel %vm2711_vm3, %v2701_v51, %v2704_v4 }
 0x2a1   : > { %v2230_v22 = vsub.s32 0, %v18043_v57  ;;  %v2724_v6 = vsel %vm2714_vm2, %v2710_v52, 1326507024  ;;  %vm2712_vm1 = vcmp.lt.s32.totalorder %v2692_v34, 2  ;;  %vm2713_vm4 = vcmp.lt.s32.totalorder %v2692_v34, 3 }
 0x2a2   : > { %v2782_v45 = vand.u32 2147483647, %v17902_v46  ;;  %vm2156_vm5 = vcmp.eq.s32.totalorder %v18041_v44, 0  ;;  %v2715_v40 = vsel %vm2711_vm3, %v2695_v25, %v2698_v43  ;;  %v2717_v35 = vsel %vm2713_vm4, %v2701_v51, %v2716_v15 }
 0x2a3   : > { %v14700_v11 = vmin.u32 %v2230_v22, %v18043_v57  ;;  %v2721_v61 = vsel %vm2713_vm4, %v2704_v4, %v2720_v36  ;;  %v2725_v3 = vsel %vm2713_vm4, %v2707_v2, %v2724_v6  ;;  %vm2155_vm6 = vcmp.lt.s32.totalorder %v18041_v44, 2  ;;  %v18098_v36 = vpop.permute.xlu1 %796 }
 0x2a4   : > { %v2722_v31 = vsel %vm2712_vm1, %v2719_v56, %v2721_v61  ;;  %v2726_v32 = vsel %vm2712_vm1, %v2723_v8, %v2725_v3  ;;  %v2792_v17 = vadd.s32 1, %v14723_v24  ;;  %vm2153_vm7 = vweird.f32 %v17698_v9 }
 0x2a5   : > { %v2232_v37 = vclz %v14700_v11  ;;  %vm2159_vm8 = vcmp.eq.s32.totalorder %v18041_v44, 2  ;;  %v2250_v59 = vsub.s32 4, %v18033_v48  ;;  %vm8830_vm9 = vcmp.lt.s32.totalorder %v18045_v19, 2 }
 0x2a6   : > { %vm8831_vm10 = vcmp.eq.s32.totalorder %v18045_v19, 0  ;;  %v18064_v42 = vmul.u32.u64.low %v18047_v26, %v2726_v32  ;;  %v18065_v54 = vmul.u32.u64.high %v18047_v26, %v2726_v32, %v18064_v42  ;;  %vm2793_vm11 = vcmp.gt.s32.totalorder %v2792_v17, 0 }
 0x2a7   : > { %v14701_v13 = vadd.s32 4294967294, %v2232_v37  ;;  %v2718_v21 = vsel %vm2712_vm1, %v2715_v40, %v2717_v35  ;;  %v18069_v27 = vmul.u32.u64.low %v18047_v26, %v2722_v31  ;;  %v18070_v49 = vmul.u32.u64.high %v18047_v26, %v2722_v31, %v18069_v27 }
 0x2a8   : > { %v2794_v41 = vsel %vm2793_vm11, %v2792_v17, 0  ;;  %v2220_v1 = vadd.s32 %v17996_v39, %v17993_v33  ;;  %vm8834_vm13 = vcmp.eq.s32.totalorder %v18045_v19, 2  ;;  %v18078_v29 = vand.u32 8388607, %v2782_v45 }
 0x2a9   : > { %vm14702_vm12 = vcmp.lt.s32.totalorder %v14701_v13, 0  ;;  %v2251_v30 = vsel %vm2166_vm0, %v2250_v59, %v18033_v48  ;;  %v2796_v7 = vand.u32 31, %v2794_v41  ;;  %v2734_v33 = vmul.u32 %v18047_v26, %v2718_v21 }
 0x2aa   : > { %v15551_v58 = vpop.eup %15550  ;;  %v2235_v10 = vsel %vm14702_vm12, 0, %v14701_v13  ;;  %vm2736_vm14 = vc.u32 %v18065_v54, %v18069_v27  ;;  %vm18106_vm15 = vcmp.le.f32.partialorder %v2164_v55, 0.7853982  ;;  %v2790_v9 = vor.u32 8388608, %v18078_v29 }
 0x2ab   : > { %v15553_v53 = vpop.eup %15552  ;;  %v2160_v34 = vxor.u32 2147483648, %v15551_v58  ;;  %v2236_v43 = vsub.s32 32, %v2235_v10  ;;  %v2240_v51 = vsub.s32 4294967266, %v2235_v10  ;;  %v2237_v2 = vshll.u32 %v18043_v57, %v2235_v10 }
 0x2ac   : > { %v2157_v4 = vxor.u32 2147483648, %v15553_v53  ;;  %v2737_v57 = vadd.s32 1, %v18070_v49  ;;  %v2797_v56 = vsub.s32 32, %v2796_v7  ;;  %v917_v55 = vmul.f32 %v16575_v20, %v18098_v36 }
 0x2ad   : > { %v2161_v39 = vsel %vm2159_vm8, %v2160_v34, %v15553_v53  ;;  %v8836_v52 = vsel %vm8834_vm13, %v2160_v34, %v15553_v53  ;;  %v2238_v22 = vshrl.u32 %v2220_v1, %v2236_v43  ;;  %v2241_v48 = vadd.s32 127, %v2240_v51 }
 0x2ae   : > { %v2158_v24 = vsel %vm2156_vm5, %v15551_v58, %v2157_v4  ;;  %v8833_v25 = vsel %vm8831_vm10, %v15551_v58, %v2157_v4  ;;  %v2738_v61 = vsel %vm2736_vm14, %v2737_v57, %v18070_v49  ;;  %v2253_v32 = vsel %vm18106_vm15, 0, %v2251_v30 }
 0x2af   : > { %v2162_v26 = vsel %vm2155_vm6, %v2158_v24, %v2161_v39  ;;  %v8837_v15 = vsel %vm8830_vm9, %v8833_v25, %v8836_v52  ;;  %v2239_v6 = vor.u32 %v2238_v22, %v2237_v2  ;;  %v2242_v11 = vshll.u32 %v2241_v48, 23 }
 0x2b0   : > { %v2163_v8 = vsel %vm2153_vm7, nan, %v2162_v26  ;;  %v8838_v40 = vsel %vm2153_vm7, nan, %v8837_v15  ;;  %v2739_v37 = vadd.s32 %v2738_v61, %v2734_v33  ;;  %v2800_v59 = vshrl.u32 %v23186_v5, %v2797_v56  ;;  %v23220_v26 = vld [vmem:[#allocation25_spill] sm:$0xff] }
 0x2b1   : > { %v7641_v19 = vmul.f32 %v16711_v23, %v2163_v8  ;;  %v14369_v35 = vmul.f32 %v16718_v12, %v8838_v40  ;;  %v2243_v3 = vor.u32 4788187, %v2242_v11  ;;  %v2246_v31 = vcvt.s32.f32 %v2239_v6 }
 0x2b2   : > { %v2740_v42 = vadd.s32 536870912, %v2739_v37  ;;  %v2803_v21 = vshrl.u32 %v23187_v16, %v2797_v56  ;;  %v2806_v49 = vshrl.u32 %v23188_v47, %v2797_v56  ;;  %v2795_v58 = vshrl.u32 %v2794_v41, 5 }
 0x2b3   : > { %v14433_v17 = vadd.f32 %v14369_v35, %v7641_v19  ;;  %v2244_v13 = vand.u32 2147483647, %v2243_v3  ;;  %v2799_v1 = vshll.u32 %v23185_v18, %v2796_v7  ;;  %v2808_v29 = vshll.u32 %v23188_v47, %v2796_v7 }
 0x2b4   : > { %v2809_v53 = vshrl.u32 %v23189_v63, %v2797_v56  ;;  %v18128_v10 = vshrl.u32 %v2740_v42, 30  ;;  %v2802_v30 = vshll.u32 %v23186_v5, %v2796_v7  ;;  %v2805_v4 = vshll.u32 %v23187_v16, %v2796_v7 }
 0x2b5   : > { %14497 = vst [vmem:[%s16934_s6 + $0x50] sm:$0xff] %v14433_v17  ;;  %v2247_v34 = vmul.f32 %v2246_v31, %v2244_v13  ;;  %v2801_v43 = vor.u32 %v2800_v59, %v2799_v1  ;;  %v2811_v33 = vshll.u32 %v23189_v63, %v2796_v7  ;;  %v2812_v39 = vshrl.u32 %v23191_v28, %v2797_v56 }
 0x2b6   : > { %v2810_v51 = vor.u32 %v2809_v53, %v2808_v29  ;;  %v2742_v2 = vshll.u32 %v18128_v10, 30  ;;  %v2804_v52 = vor.u32 %v2803_v21, %v2802_v30  ;;  %v2807_v24 = vor.u32 %v2806_v49, %v2805_v4 }
 0x2b7   : > { %v2248_v41 = vxor.u32 2147483648, %v2247_v34  ;;  %v18135_v22 = vand.u32 3, %v2253_v32  ;;  %v8932_v48 = vadd.s32 3, %v2253_v32  ;;  %v2813_v25 = vor.u32 %v2812_v39, %v2811_v33 }
 0x2b8   : > { %v18138_v15 = vadd.f32 %v917_v55, %v23220_v26  ;;  %v18142_v8 = vsub.s32 %v2739_v37, %v2742_v2  ;;  %v2798_v7 = vshrl.u32 %v23185_v18, %v2797_v56  ;;  %vm2817_vm2 = vcmp.lt.s32.totalorder %v2795_v58, 4 }
 0x2b9   : > { %v2249_v57 = vsel %vm2166_vm0, %v2248_v41, %v2247_v34  ;;  %vm2814_vm3 = vcmp.lt.s32.totalorder %v2795_v58, 1  ;;  %vm2816_vm1 = vcmp.lt.s32.totalorder %v2795_v58, 3  ;;  %v2823_v11 = vsel %vm2817_vm2, %v2810_v51, 920167782 }
 0x2ba   : > { %v2252_v6 = vsel %vm18106_vm15, %v17792_v0, %v2249_v57  ;;  %v2745_v40 = vsub.s32 0, %v18142_v8  ;;  %v2819_v19 = vsel %vm2817_vm2, %v2807_v24, 2102212464  ;;  %v2822_v35 = vsel %vm2814_vm3, %v2801_v43, %v2804_v52 }
 0x2bb   : > { %15554 = vcosq.f32 %v2252_v6  ;;  %v2824_v61 = vsel %vm2816_vm1, %v2807_v24, %v2823_v11  ;;  %v2826_v3 = vsel %vm2814_vm3, %v2804_v52, %v2807_v24  ;;  %v2827_v37 = vsel %vm2817_vm2, %v2813_v25, 1326507024 }
 0x2bc   : > { %15556 = vsinq.f32 %v2252_v6  ;;  %v14720_v56 = vmin.u32 %v2745_v40, %v18142_v8  ;;  %vm2815_vm0 = vcmp.lt.s32.totalorder %v2795_v58, 2  ;;  %v2830_v55 = vshll.u32 %v2790_v9, 8 }
 0x2bd   : > { %v2476_v44 = vand.u32 2139095040, %v18138_v15  ;;  %v2818_v31 = vsel %vm2814_vm3, %v2798_v7, %v2801_v43  ;;  %v2820_v32 = vsel %vm2816_vm1, %v2804_v52, %v2819_v19  ;;  %v2825_v17 = vsel %vm2815_vm0, %v2822_v35, %v2824_v61 }
 0x2be   : > { %v2828_v59 = vsel %vm2816_vm1, %v2810_v51, %v2827_v37  ;;  %v2747_v13 = vclz %v14720_v56  ;;  %v18154_v21 = vmul.u32.u64.low %v2830_v55, %v2825_v17  ;;  %v18155_v49 = vmul.u32.u64.high %v2830_v55, %v2825_v17, %v18154_v21 }
 0x2bf   : > { %v2829_v42 = vsel %vm2815_vm0, %v2826_v3, %v2828_v59  ;;  %v8933_v1 = vand.u32 3, %v8932_v48  ;;  %v2821_v9 = vsel %vm2815_vm0, %v2818_v31, %v2820_v32  ;;  %v2477_v30 = vshrl.u32 %v2476_v44, 23 }
 0x2c0   : > { %v18158_v29 = vmul.u32.u64.low %v2830_v55, %v2829_v42  ;;  %v18159_v53 = vmul.u32.u64.high %v2830_v55, %v2829_v42, %v18158_v29  ;;  %v14721_v34 = vadd.s32 4294967294, %v2747_v13  ;;  %vm2262_vm4 = vcmp.eq.s32.totalorder %v18135_v22, 2 }
 0x2c1   : > { %vm18164_vm5 = vcmp.le.f32.partialorder %v2679_v60, 0.7853982  ;;  %vm2681_vm6 = vcmp.lt.s32.totalorder %v17891_v38, 0  ;;  %v918_v4 = vmul.f32 %v16578_v14, %v18098_v36  ;;  %vm2259_vm7 = vcmp.eq.s32.totalorder %v18135_v22, 0 }
 0x2c2   : > { %vm14722_vm8 = vcmp.lt.s32.totalorder %v14721_v34, 0  ;;  %v2765_v43 = vsub.s32 4, %v18128_v10  ;;  %v2840_v51 = vadd.s32 1, %v18155_v49  ;;  %v14711_v33 = vadd.s32 4294967169, %v2477_v30 }
 0x2c3   : > { %vm2258_vm9 = vcmp.lt.s32.totalorder %v18135_v22, 2  ;;  %vm8934_vm10 = vcmp.lt.s32.totalorder %v8933_v1, 2  ;;  %v2750_v60 = vsel %vm14722_vm8, 0, %v14721_v34  ;;  %v2837_v39 = vmul.u32 %v2830_v55, %v2821_v9 }
 0x2c4   : > { %vm2839_vm11 = vc.u32 %v18159_v53, %v18154_v21  ;;  %vm2256_vm12 = vweird.f32 %v17792_v0  ;;  %v2735_v36 = vadd.s32 %v18069_v27, %v18065_v54  ;;  %v2751_v41 = vsub.s32 32, %v2750_v60  ;;  %v23223_v27 = vld [vmem:[#allocation26_spill] sm:$0xff] }
 0x2c5   : > { %v2755_v2 = vsub.s32 4294967266, %v2750_v60  ;;  %v2841_v52 = vsel %vm2839_vm11, %v2840_v51, %v18155_v49  ;;  %vm8935_vm13 = vcmp.eq.s32.totalorder %v8933_v1, 0  ;;  %v2473_v48 = vand.u32 2147483647, %v18138_v15 }
 0x2c6   : > { %v2842_v24 = vadd.s32 %v2841_v52, %v2837_v39  ;;  %v2483_v25 = vadd.s32 1, %v14711_v33  ;;  %v2752_v26 = vshll.u32 %v18142_v8, %v2750_v60  ;;  %v2753_v57 = vshrl.u32 %v2735_v36, %v2751_v41 }
 0x2c7   : > { %v2756_v7 = vadd.s32 127, %v2755_v2  ;;  %v2766_v6 = vsel %vm2681_vm6, %v2765_v43, %v18128_v10  ;;  %vm8938_vm14 = vcmp.eq.s32.totalorder %v8933_v1, 2  ;;  %v18187_v40 = vadd.f32 %v918_v4, %v23223_v27 }
 0x2c8   : > { %v15555_v11 = vpop.eup %15554  ;;  %v2843_v54 = vadd.s32 536870912, %v2842_v24  ;;  %vm2484_vm15 = vcmp.gt.s32.totalorder %v2483_v25, 0  ;;  %v2754_v61 = vor.u32 %v2753_v57, %v2752_v26  ;;  %v2768_v8 = vsel %vm18164_vm5, 0, %v2766_v6 }
 0x2c9   : > { %v15557_v19 = vpop.eup %15556  ;;  %v2263_v35 = vxor.u32 2147483648, %v15555_v11  ;;  %v2757_v3 = vshll.u32 %v2756_v7, 23  ;;  %v2485_v37 = vsel %vm2484_vm15, %v2483_v25, 0  ;;  %v2480_v17 = vand.u32 8388607, %v2473_v48 }
 0x2ca   : > { %v2260_v56 = vxor.u32 2147483648, %v15557_v19  ;;  %v18191_v55 = vshrl.u32 %v2843_v54, 30  ;;  %v2487_v44 = vand.u32 31, %v2485_v37  ;;  %v2761_v42 = vcvt.s32.f32 %v2754_v61 }
 0x2cb   : > { %v2264_v10 = vsel %vm2262_vm4, %v2263_v35, %v15557_v19  ;;  %v8940_v31 = vsel %vm8938_vm14, %v2263_v35, %v15557_v19  ;;  %v2758_v32 = vor.u32 4788187, %v2757_v3  ;;  %v9452_v33 = vadd.s32 3, %v2768_v8 }
 0x2cc   : > { %v2261_v59 = vsel %vm2259_vm7, %v15555_v11, %v2260_v56  ;;  %v8937_v13 = vsel %vm8935_vm13, %v15555_v11, %v2260_v56  ;;  %v2845_v49 = vshll.u32 %v18191_v55, 30  ;;  %v2488_v30 = vsub.s32 32, %v2487_v44 }
 0x2cd   : > { %v2265_v29 = vsel %vm2258_vm9, %v2261_v59, %v2264_v10  ;;  %v8941_v34 = vsel %vm8934_vm10, %v8937_v13, %v8940_v31  ;;  %v2759_v9 = vand.u32 2147483647, %v2758_v32  ;;  %v2481_v36 = vor.u32 8388608, %v2480_v17 }
 0x2ce   : > { %v2266_v4 = vsel %vm2256_vm12, nan, %v2265_v29  ;;  %v8942_v43 = vsel %vm2256_vm12, nan, %v8941_v34  ;;  %v18208_v51 = vsub.s32 %v2842_v24, %v2845_v49  ;;  %v2491_v52 = vshrl.u32 %v23186_v5, %v2488_v30 }
 0x2cf   : > { %v7642_v60 = vmul.f32 %v16714_v50, %v2266_v4  ;;  %v14370_v39 = vmul.f32 %v16721_v62, %v8942_v43  ;;  %v2762_v22 = vmul.f32 %v2761_v42, %v2759_v9  ;;  %v18214_v25 = vand.u32 3, %v2768_v8 }
 0x2d0   : > { %v2848_v1 = vsub.s32 0, %v18208_v51  ;;  %v2838_v0 = vadd.s32 %v18154_v21, %v18159_v53  ;;  %v18219_v26 = vand.u32 3, %v9452_v33  ;;  %v2490_v7 = vshll.u32 %v23185_v18, %v2487_v44 }
 0x2d1   : > { %v14434_v41 = vadd.f32 %v14370_v39, %v7642_v60  ;;  %v2763_v2 = vxor.u32 2147483648, %v2762_v22  ;;  %v18225_v6 = vshll.u32 %v2481_v36, 8  ;;  %v2579_v11 = vand.u32 2139095040, %v18187_v40 }
 0x2d2   : > { %v14724_v24 = vmin.u32 %v2848_v1, %v18208_v51  ;;  %v2493_v21 = vshll.u32 %v23186_v5, %v2487_v44  ;;  %v2494_v53 = vshrl.u32 %v23187_v16, %v2488_v30  ;;  %v2486_v19 = vshrl.u32 %v2485_v37, 5 }
 0x2d3   : > { %14498 = vst [vmem:[%s16934_s6 + $0x58] sm:$0xff] %v14434_v41  ;;  %v2764_v57 = vsel %vm2681_vm6, %v2763_v2, %v2762_v22  ;;  %v2492_v35 = vor.u32 %v2491_v52, %v2490_v7  ;;  %v2496_v61 = vshll.u32 %v23187_v16, %v2487_v44  ;;  %v2497_v8 = vshrl.u32 %v23188_v47, %v2488_v30 }
 0x2d4   : > { %v2767_v54 = vsel %vm18164_vm5, %v17891_v38, %v2764_v57  ;;  %v2850_v27 = vclz %v14724_v24  ;;  %v2495_v56 = vor.u32 %v2494_v53, %v2493_v21  ;;  %vm2784_vm2 = vcmp.lt.s32.totalorder %v17902_v46, 0 }
 0x2d5   : > { %15558 = vcosq.f32 %v2767_v54  ;;  %v2499_v58 = vshll.u32 %v23188_v47, %v2487_v44  ;;  %v2500_v10 = vshrl.u32 %v23189_v63, %v2488_v30  ;;  %v2502_v31 = vshll.u32 %v23189_v63, %v2487_v44 }
 0x2d6   : > { %15560 = vsinq.f32 %v2767_v54  ;;  %v14725_v3 = vadd.s32 4294967294, %v2850_v27  ;;  %v2503_v32 = vshrl.u32 %v23191_v28, %v2488_v30  ;;  %v2868_v37 = vsub.s32 4, %v18191_v55 }
 0x2d7   : > { %v2489_v17 = vshrl.u32 %v23185_v18, %v2488_v30  ;;  %v2498_v59 = vor.u32 %v2497_v8, %v2496_v61  ;;  %v2501_v42 = vor.u32 %v2500_v10, %v2499_v58  ;;  %vm2505_vm1 = vcmp.lt.s32.totalorder %v2486_v19, 1 }
 0x2d8   : > { %vm14726_vm3 = vcmp.lt.s32.totalorder %v14725_v3, 0  ;;  %v2504_v49 = vor.u32 %v2503_v32, %v2502_v31  ;;  %vm18244_vm0 = vcmp.le.f32.partialorder %v2782_v45, 0.7853982  ;;  %vm2506_vm4 = vcmp.lt.s32.totalorder %v2486_v19, 2 }
 0x2d9   : > { %v2853_v13 = vsel %vm14726_vm3, 0, %v14725_v3  ;;  %vm2508_vm5 = vcmp.lt.s32.totalorder %v2486_v19, 4  ;;  %vm2507_vm6 = vcmp.lt.s32.totalorder %v2486_v19, 3  ;;  %v2513_v4 = vsel %vm2505_vm1, %v2492_v35, %v2495_v56 }
 0x2da   : > { %v2854_v34 = vsub.s32 32, %v2853_v13  ;;  %v2858_v44 = vsub.s32 4294967266, %v2853_v13  ;;  %v2510_v9 = vsel %vm2508_vm5, %v2498_v59, 2102212464  ;;  %v2514_v30 = vsel %vm2508_vm5, %v2501_v42, 920167782 }
 0x2db   : > { %vm2777_vm7 = vcmp.eq.s32.totalorder %v18214_v25, 2  ;;  %v2855_v43 = vshll.u32 %v18208_v51, %v2853_v13  ;;  %v2515_v45 = vsel %vm2507_vm6, %v2498_v59, %v2514_v30  ;;  %vm2774_vm8 = vcmp.eq.s32.totalorder %v18214_v25, 0 }
 0x2dc   : > { %v2856_v33 = vshrl.u32 %v2838_v0, %v2854_v34  ;;  %v2859_v60 = vadd.s32 127, %v2858_v44  ;;  %v2509_v39 = vsel %vm2505_vm1, %v2489_v17, %v2492_v35  ;;  %v2516_v22 = vsel %vm2506_vm4, %v2513_v4, %v2515_v45 }
 0x2dd   : > { %v2517_v36 = vsel %vm2505_vm1, %v2495_v56, %v2498_v59  ;;  %v2518_v1 = vsel %vm2508_vm5, %v2504_v49, 1326507024  ;;  %vm2773_vm9 = vcmp.lt.s32.totalorder %v18214_v25, 2  ;;  %v2511_v52 = vsel %vm2507_vm6, %v2495_v56, %v2510_v9 }
 0x2de   : > { %v2857_v41 = vor.u32 %v2856_v33, %v2855_v43  ;;  %v2860_v2 = vshll.u32 %v2859_v60, 23  ;;  %v2519_v51 = vsel %vm2507_vm6, %v2501_v42, %v2518_v1  ;;  %vm2771_vm10 = vweird.f32 %v17891_v38 }
 0x2df   : > { %v2520_v0 = vsel %vm2506_vm4, %v2517_v36, %v2519_v51  ;;  %v18262_v24 = vmul.u32.u64.low %v18225_v6, %v2516_v22  ;;  %v18263_v57 = vmul.u32.u64.high %v18225_v6, %v2516_v22, %v18262_v24  ;;  %v2580_v7 = vshrl.u32 %v2579_v11, 23  ;;  %v809_v22 = vpop.permute.xlu0 %808 }
 0x2e0   : > { %v2861_v54 = vor.u32 4788187, %v2860_v2  ;;  %v2869_v27 = vsel %vm2784_vm2, %v2868_v37, %v18191_v55  ;;  %v18270_v21 = vmul.u32.u64.low %v18225_v6, %v2520_v0  ;;  %v18271_v53 = vmul.u32.u64.high %v18225_v6, %v2520_v0, %v18270_v21 }
 0x2e1   : > { %vm9454_vm11 = vcmp.lt.s32.totalorder %v18219_v26, 2  ;;  %vm9455_vm12 = vcmp.eq.s32.totalorder %v18219_v26, 0  ;;  %v2512_v35 = vsel %vm2506_vm4, %v2509_v39, %v2511_v52  ;;  %v14715_v61 = vadd.s32 4294967169, %v2580_v7 }
 0x2e2   : > { %v15559_v3 = vpop.eup %15558  ;;  %v2862_v56 = vand.u32 2147483647, %v2861_v54  ;;  %v2864_v8 = vcvt.s32.f32 %v2857_v41  ;;  %vm9458_vm13 = vcmp.eq.s32.totalorder %v18219_v26, 2  ;;  %v2576_v11 = vand.u32 2147483647, %v18187_v40 }
 0x2e3   : > { %v15561_v58 = vpop.eup %15560  ;;  %v2778_v55 = vxor.u32 2147483648, %v15559_v3  ;;  %v2871_v10 = vsel %vm18244_vm0, 0, %v2869_v27  ;;  %v2531_v31 = vadd.s32 1, %v18263_v57  ;;  %v2586_v32 = vadd.s32 1, %v14715_v61 }
 0x2e4   : > { %v2775_v37 = vxor.u32 2147483648, %v15561_v58  ;;  %v2865_v17 = vmul.f32 %v2864_v8, %v2862_v56  ;;  %v2528_v19 = vmul.u32 %v18225_v6, %v2512_v35  ;;  %vm2530_vm14 = vc.u32 %v18271_v53, %v18262_v24 }
 0x2e5   : > { %v2779_v59 = vsel %vm2777_vm7, %v2778_v55, %v15561_v58  ;;  %v9460_v13 = vsel %vm9458_vm13, %v2778_v55, %v15561_v58  ;;  %v2532_v42 = vsel %vm2530_vm14, %v2531_v31, %v18263_v57  ;;  %vm2587_vm15 = vcmp.gt.s32.totalorder %v2586_v32, 0 }
 0x2e6   : > { %v2776_v49 = vsel %vm2774_vm8, %v15559_v3, %v2775_v37  ;;  %v2866_v34 = vxor.u32 2147483648, %v2865_v17  ;;  %v9457_v44 = vsel %vm9455_vm12, %v15559_v3, %v2775_v37  ;;  %v2533_v9 = vadd.s32 %v2532_v42, %v2528_v19 }
 0x2e7   : > { %v2780_v6 = vsel %vm2773_vm9, %v2776_v49, %v2779_v59  ;;  %v9461_v4 = vsel %vm9454_vm11, %v9457_v44, %v9460_v13  ;;  %v9556_v30 = vadd.s32 3, %v2871_v10  ;;  %v2588_v43 = vsel %vm2587_vm15, %v2586_v32, 0 }
 0x2e8   : > { %v2781_v33 = vsel %vm2771_vm10, nan, %v2780_v6  ;;  %v2867_v60 = vsel %vm2784_vm2, %v2866_v34, %v2865_v17  ;;  %v9462_v45 = vsel %vm2771_vm10, nan, %v9461_v4  ;;  %v2534_v39 = vadd.s32 536870912, %v2533_v9 }
 0x2e9   : > { %v2870_v25 = vsel %vm18244_vm0, %v17902_v46, %v2867_v60  ;;  %v7647_v26 = vmul.f32 %v16711_v23, %v2781_v33  ;;  %v14375_v36 = vmul.f32 %v16718_v12, %v9462_v45  ;;  %v2583_v1 = vand.u32 8388607, %v2576_v11 }
 0x2ea   : > { %15562 = vcosq.f32 %v2870_v25  ;;  %v18308_v41 = vshrl.u32 %v2534_v39, 30  ;;  %v2590_v2 = vand.u32 31, %v2588_v43  ;;  %v923_v52 = vmul.f32 %v16575_v20, %v809_v22 }
 0x2eb   : > { %15564 = vsinq.f32 %v2870_v25  ;;  %v14439_v38 = vadd.f32 %v14375_v36, %v7647_v26  ;;  %v18311_v51 = vand.u32 3, %v2871_v10  ;;  %v18313_v0 = vand.u32 3, %v9556_v30  ;;  %v23226_v36 = vld [vmem:[#allocation29_spill] sm:$0xff] }
 0x2ec   : > { %v2536_v29 = vshll.u32 %v18308_v41, 30  ;;  %v2591_v57 = vsub.s32 32, %v2590_v2  ;;  %v2584_v7 = vor.u32 8388608, %v2583_v1  ;;  %v2589_v54 = vshrl.u32 %v2588_v43, 5 }
 0x2ed   : > { %14503 = vst [vmem:[%s16934_s6 + $0x80] sm:$0xff] %v14439_v38  ;;  %v2593_v27 = vshll.u32 %v23185_v18, %v2590_v2  ;;  %v924_v21 = vmul.f32 %v16578_v14, %v809_v22  ;;  %v2596_v3 = vshll.u32 %v23186_v5, %v2590_v2  ;;  %v2599_v56 = vshll.u32 %v23187_v16, %v2590_v2 }
 0x2ee   : > { %v18319_v35 = vsub.s32 %v2533_v9, %v2536_v29  ;;  %v2594_v61 = vshrl.u32 %v23186_v5, %v2591_v57  ;;  %v2597_v8 = vshrl.u32 %v23187_v16, %v2591_v57  ;;  %v2600_v58 = vshrl.u32 %v23188_v47, %v2591_v57 }
 0x2ef   : > { %v2602_v55 = vshll.u32 %v23188_v47, %v2590_v2  ;;  %v2603_v10 = vshrl.u32 %v23189_v63, %v2591_v57  ;;  %v2605_v37 = vshll.u32 %v23189_v63, %v2590_v2  ;;  %v2606_v17 = vshrl.u32 %v23191_v28, %v2591_v57 }
 0x2f0   : > { %v2539_v31 = vsub.s32 0, %v18319_v35  ;;  %v2595_v32 = vor.u32 %v2594_v61, %v2593_v27  ;;  %vm2880_vm2 = vcmp.eq.s32.totalorder %v18311_v51, 2  ;;  %vm9562_vm3 = vcmp.eq.s32.totalorder %v18313_v0, 2 }
 0x2f1   : > { %v2592_v19 = vshrl.u32 %v23185_v18, %v2591_v57  ;;  %v2598_v59 = vor.u32 %v2597_v8, %v2596_v3  ;;  %v2601_v13 = vor.u32 %v2600_v58, %v2599_v56  ;;  %v2604_v42 = vor.u32 %v2603_v10, %v2602_v55 }
 0x2f2   : > { %vm2877_vm1 = vcmp.eq.s32.totalorder %v18311_v51, 0  ;;  %vm9559_vm0 = vcmp.eq.s32.totalorder %v18313_v0, 0  ;;  %v14712_v49 = vmin.u32 %v2539_v31, %v18319_v35  ;;  %vm2608_vm4 = vcmp.lt.s32.totalorder %v2589_v54, 1 }
 0x2f3   : > { %vm2610_vm5 = vcmp.lt.s32.totalorder %v2589_v54, 3  ;;  %v2624_v34 = vshll.u32 %v2584_v7, 8  ;;  %vm2876_vm6 = vcmp.lt.s32.totalorder %v18311_v51, 2  ;;  %vm9558_vm7 = vcmp.lt.s32.totalorder %v18313_v0, 2 }
 0x2f4   : > { %v2607_v44 = vor.u32 %v2606_v17, %v2605_v37  ;;  %vm2611_vm8 = vcmp.lt.s32.totalorder %v2589_v54, 4  ;;  %v2612_v9 = vsel %vm2608_vm4, %v2592_v19, %v2595_v32  ;;  %v2616_v6 = vsel %vm2608_vm4, %v2595_v32, %v2598_v59 }
 0x2f5   : > { %vm2874_vm9 = vweird.f32 %v17902_v46  ;;  %v2541_v4 = vclz %v14712_v49  ;;  %v2613_v30 = vsel %vm2611_vm8, %v2601_v13, 2102212464  ;;  %v2617_v43 = vsel %vm2611_vm8, %v2604_v42, 920167782 }
 0x2f6   : > { %v2620_v33 = vsel %vm2608_vm4, %v2598_v59, %v2601_v13  ;;  %vm2609_vm10 = vcmp.lt.s32.totalorder %v2589_v54, 2  ;;  %v2614_v60 = vsel %vm2610_vm5, %v2598_v59, %v2613_v30  ;;  %v2618_v45 = vsel %vm2610_vm5, %v2601_v13, %v2617_v43 }
 0x2f7   : > { %v2621_v39 = vsel %vm2611_vm8, %v2607_v44, 1326507024  ;;  %v14713_v22 = vadd.s32 4294967294, %v2541_v4  ;;  %v2619_v25 = vsel %vm2609_vm10, %v2616_v6, %v2618_v45  ;;  %v18344_v1 = vadd.f32 %v923_v52, %v23226_v36  ;;  %v15563_v2 = vpop.eup %15562  ;;  %v23227_v52 = vld [vmem:[#allocation30_spill] sm:$0xff] }
 0x2f8   : > { %v2622_v26 = vsel %vm2610_vm5, %v2604_v42, %v2621_v39  ;;  %v2615_v38 = vsel %vm2609_vm10, %v2612_v9, %v2614_v60  ;;  %v18346_v57 = vmul.u32.u64.low %v2624_v34, %v2619_v25  ;;  %v18347_v7 = vmul.u32.u64.high %v2624_v34, %v2619_v25, %v18346_v57  ;;  %v15565_v27 = vpop.eup %15564 }
 0x2f9   : > { %v2623_v29 = vsel %vm2609_vm10, %v2620_v33, %v2622_v26  ;;  %v2881_v61 = vxor.u32 2147483648, %v15563_v2  ;;  %vm14714_vm11 = vcmp.lt.s32.totalorder %v14713_v22, 0  ;;  %v2878_v8 = vxor.u32 2147483648, %v15565_v27 }
 0x2fa   : > { %v18350_v3 = vmul.u32.u64.low %v2624_v34, %v2623_v29  ;;  %v18351_v56 = vmul.u32.u64.high %v2624_v34, %v2623_v29, %v18350_v3  ;;  %v2529_v54 = vadd.s32 %v18262_v24, %v18271_v53  ;;  %v2544_v58 = vsel %vm14714_vm11, 0, %v14713_v22 }
 0x2fb   : > { %v18356_v55 = vadd.f32 %v924_v21, %v23227_v52  ;;  %v2882_v10 = vsel %vm2880_vm2, %v2881_v61, %v15565_v27  ;;  %v9564_v31 = vsel %vm9562_vm3, %v2881_v61, %v15565_v27  ;;  %v2545_v32 = vsub.s32 32, %v2544_v58  ;;  %v18403_v52 = vpop.permute.xlu1 %804 }
 0x2fc   : > { %v2631_v37 = vmul.u32 %v2624_v34, %v2615_v38  ;;  %v2879_v17 = vsel %vm2877_vm1, %v15563_v2, %v2878_v8  ;;  %v9561_v19 = vsel %vm9559_vm0, %v15563_v2, %v2878_v8  ;;  %v2549_v59 = vsub.s32 4294967266, %v2544_v58 }
 0x2fd   : > { %v2634_v24 = vadd.s32 1, %v18347_v7  ;;  %v2883_v53 = vsel %vm2876_vm6, %v2879_v17, %v2882_v10  ;;  %v9565_v21 = vsel %vm9558_vm7, %v9561_v19, %v9564_v31  ;;  %v2546_v13 = vshll.u32 %v18319_v35, %v2544_v58 }
 0x2fe   : > { %v2547_v42 = vshrl.u32 %v2529_v54, %v2545_v32  ;;  %v2884_v49 = vsel %vm2874_vm9, nan, %v2883_v53  ;;  %v9566_v34 = vsel %vm2874_vm9, nan, %v9565_v21  ;;  %v2550_v44 = vadd.s32 127, %v2549_v59 }
 0x2ff   : > { %vm2633_vm12 = vc.u32 %v18351_v56, %v18346_v57  ;;  %v7648_v51 = vmul.f32 %v16714_v50, %v2884_v49  ;;  %v14376_v9 = vmul.f32 %v16721_v62, %v9566_v34  ;;  %v2559_v0 = vsub.s32 4, %v18308_v41 }
 0x300   : > { %v2635_v35 = vsel %vm2633_vm12, %v2634_v24, %v18347_v7  ;;  %v2548_v6 = vor.u32 %v2547_v42, %v2546_v13  ;;  %v2551_v4 = vshll.u32 %v2550_v44, 23  ;;  %vm2475_vm13 = vcmp.lt.s32.totalorder %v18138_v15, 0 }
 0x301   : > { %v2636_v30 = vadd.s32 %v2635_v35, %v2631_v37  ;;  %v14440_v43 = vadd.f32 %v14376_v9, %v7648_v51  ;;  %v3094_v60 = vand.u32 2139095040, %v18344_v1  ;;  %v2560_v45 = vsel %vm2475_vm13, %v2559_v0, %v18308_v41 }
 0x302   : > { %v2552_v46 = vor.u32 4788187, %v2551_v4  ;;  %v3091_v39 = vand.u32 2147483647, %v18344_v1  ;;  %v3194_v22 = vand.u32 2147483647, %v18356_v55  ;;  %v2555_v36 = vcvt.s32.f32 %v2548_v6 }
 0x303   : > { %v2637_v33 = vadd.s32 536870912, %v2636_v30  ;;  %14504 = vst [vmem:[%s16934_s6 + $0x88] sm:$0xff] %v14440_v43  ;;  %v3197_v25 = vand.u32 2139095040, %v18356_v55  ;;  %v3095_v38 = vshrl.u32 %v3094_v60, 23  ;;  %vm18393_vm14 = vcmp.le.f32.partialorder %v2473_v48, 0.7853982 }
 0x304   : > { %v2553_v26 = vand.u32 2147483647, %v2552_v46  ;;  %v2562_v3 = vsel %vm18393_vm14, 0, %v2560_v45  ;;  %v3098_v8 = vand.u32 8388607, %v3091_v39  ;;  %vm2578_vm15 = vcmp.lt.s32.totalorder %v18187_v40, 0 }
 0x305   : > { %v2638_v2 = vshrl.u32 %v2637_v33, 30  ;;  %v3198_v29 = vshrl.u32 %v3197_v25, 23  ;;  %v14735_v41 = vadd.s32 4294967169, %v3095_v38  ;;  %v3201_v58 = vand.u32 8388607, %v3194_v22  ;;  %v23232_v43 = vld [vmem:[#allocation27_spill] sm:$0xff] }
 0x306   : > { %v2556_v27 = vmul.f32 %v2555_v36, %v2553_v26  ;;  %v9244_v59 = vadd.s32 3, %v2562_v3  ;;  %v921_v24 = vmul.f32 %v16575_v20, %v18403_v52  ;;  %v3099_v21 = vor.u32 8388608, %v3098_v8 }
 0x307   : > { %v2639_v61 = vshll.u32 %v2638_v2, 30  ;;  %v14739_v54 = vadd.s32 4294967169, %v3198_v29  ;;  %v2662_v31 = vsub.s32 4, %v2638_v2  ;;  %v3101_v32 = vadd.s32 1, %v14735_v41 }
 0x308   : > { %v2557_v10 = vxor.u32 2147483648, %v2556_v27  ;;  %v3202_v13 = vor.u32 8388608, %v3201_v58  ;;  %vm18418_vm3 = vcmp.le.f32.partialorder %v2576_v11, 0.7853982  ;;  %v18425_v44 = vand.u32 3, %v2562_v3 }
 0x309   : > { %v18405_v48 = vsub.s32 %v2636_v30, %v2639_v61  ;;  %v3204_v37 = vadd.s32 1, %v14739_v54  ;;  %vm3102_vm2 = vcmp.gt.s32.totalorder %v3101_v32, 0  ;;  %v2663_v34 = vsel %vm2578_vm15, %v2662_v31, %v2638_v2 }
 0x30a   : > { %v2558_v17 = vsel %vm2475_vm13, %v2557_v10, %v2556_v27  ;;  %v3103_v51 = vsel %vm3102_vm2, %v3101_v32, 0  ;;  %v2632_v9 = vadd.s32 %v18346_v57, %v18351_v56  ;;  %v18429_v35 = vand.u32 3, %v9244_v59 }
 0x30b   : > { %v2642_v19 = vsub.s32 0, %v18405_v48  ;;  %v2561_v53 = vsel %vm18393_vm14, %v18138_v15, %v2558_v17  ;;  %vm3205_vm1 = vcmp.gt.s32.totalorder %v3204_v37, 0  ;;  %v3105_v11 = vand.u32 31, %v3103_v51 }
 0x30c   : > { %15566 = vcosq.f32 %v2561_v53  ;;  %v18433_v6 = vsel %vm18418_vm3, 0, %v2663_v34  ;;  %v18435_v4 = vshll.u32 %v3099_v21, 8  ;;  %v18437_v30 = vshll.u32 %v3202_v13, 8 }
 0x30d   : > { %v14716_v49 = vmin.u32 %v2642_v19, %v18405_v48  ;;  %15568 = vsinq.f32 %v2561_v53  ;;  %v18440_v46 = vadd.f32 %v921_v24, %v23232_v43  ;;  %v18442_v60 = vshrl.u32 %v3103_v51, 5 }
 0x30e   : > { %v3106_v45 = vsub.s32 32, %v3105_v11  ;;  %v18444_v57 = vsel %vm3205_vm1, %v3204_v37, 0  ;;  %v3108_v56 = vshll.u32 %v23185_v18, %v3105_v11  ;;  %v3111_v25 = vshll.u32 %v23186_v5, %v3105_v11 }
 0x30f   : > { %v2644_v0 = vclz %v14716_v49  ;;  %v3114_v26 = vshll.u32 %v23187_v16, %v3105_v11  ;;  %v3117_v36 = vshll.u32 %v23188_v47, %v3105_v11  ;;  %v3120_v29 = vshll.u32 %v23189_v63, %v3105_v11 }
 0x310   : > { %v3109_v2 = vshrl.u32 %v23186_v5, %v3106_v45  ;;  %v3112_v38 = vshrl.u32 %v23187_v16, %v3106_v45  ;;  %vm2571_vm4 = vcmp.eq.s32.totalorder %v18425_v44, 2  ;;  %vm9250_vm5 = vcmp.eq.s32.totalorder %v18429_v35, 2 }
 0x311   : > { %v14717_v33 = vadd.s32 4294967294, %v2644_v0  ;;  %v3115_v27 = vshrl.u32 %v23188_v47, %v3106_v45  ;;  %v3118_v61 = vshrl.u32 %v23189_v63, %v3106_v45  ;;  %v3121_v41 = vshrl.u32 %v23191_v28, %v3106_v45 }
 0x312   : > { %vm2568_vm6 = vcmp.eq.s32.totalorder %v18425_v44, 0  ;;  %vm9247_vm7 = vcmp.eq.s32.totalorder %v18429_v35, 0  ;;  %v3110_v54 = vor.u32 %v3109_v2, %v3108_v56  ;;  %vm3123_vm8 = vcmp.lt.s32.totalorder %v18442_v60, 1 }
 0x313   : > { %vm14718_vm0 = vcmp.lt.s32.totalorder %v14717_v33, 0  ;;  %vm2567_vm9 = vcmp.lt.s32.totalorder %v18425_v44, 2  ;;  %vm9246_vm10 = vcmp.lt.s32.totalorder %v18429_v35, 2  ;;  %v3113_v58 = vor.u32 %v3112_v38, %v3111_v25 }
 0x314   : > { %v2647_v7 = vsel %vm14718_vm0, 0, %v14717_v33  ;;  %v3116_v10 = vor.u32 %v3115_v27, %v3114_v26  ;;  %v3119_v31 = vor.u32 %v3118_v61, %v3117_v36  ;;  %v3122_v32 = vor.u32 %v3121_v41, %v3120_v29 }
 0x315   : > { %v2648_v3 = vsub.s32 32, %v2647_v7  ;;  %v2652_v8 = vsub.s32 4294967266, %v2647_v7  ;;  %vm2565_vm11 = vweird.f32 %v18138_v15  ;;  %v2649_v37 = vshll.u32 %v18405_v48, %v2647_v7 }
 0x316   : > { %v3107_v59 = vshrl.u32 %v23185_v18, %v3106_v45  ;;  %vm3124_vm12 = vcmp.lt.s32.totalorder %v18442_v60, 2  ;;  %vm3125_vm13 = vcmp.lt.s32.totalorder %v18442_v60, 3  ;;  %vm3126_vm14 = vcmp.lt.s32.totalorder %v18442_v60, 4 }
 0x317   : > { %v2650_v17 = vshrl.u32 %v2632_v9, %v2648_v3  ;;  %v2653_v19 = vadd.s32 127, %v2652_v8  ;;  %v3131_v24 = vsel %vm3123_vm8, %v3110_v54, %v3113_v58  ;;  %v3128_v13 = vsel %vm3126_vm14, %v3116_v10, 2102212464 }
 0x318   : > { %v3132_v49 = vsel %vm3126_vm14, %v3119_v31, 920167782  ;;  %v3127_v48 = vsel %vm3123_vm8, %v3107_v59, %v3110_v54  ;;  %v3135_v9 = vsel %vm3123_vm8, %v3113_v58, %v3116_v10  ;;  %v3136_v0 = vsel %vm3126_vm14, %v3122_v32, 1326507024 }
 0x319   : > { %v2651_v53 = vor.u32 %v2650_v17, %v2649_v37  ;;  %v2654_v21 = vshll.u32 %v2653_v19, 23  ;;  %v15567_v34 = vpop.eup %15566  ;;  %v3133_v51 = vsel %vm3125_vm13, %v3116_v10, %v3132_v49  ;;  %v3129_v45 = vsel %vm3125_vm13, %v3113_v58, %v3128_v13 }
 0x31a   : > { %v15569_v11 = vpop.eup %15568  ;;  %v2572_v43 = vxor.u32 2147483648, %v15567_v34  ;;  %v3208_v56 = vand.u32 31, %v18444_v57  ;;  %v3134_v36 = vsel %vm3124_vm12, %v3131_v24, %v3133_v51  ;;  %v3137_v2 = vsel %vm3125_vm13, %v3119_v31, %v3136_v0 }
 0x31b   : > { %v2655_v33 = vor.u32 4788187, %v2654_v21  ;;  %v2569_v25 = vxor.u32 2147483648, %v15569_v11  ;;  %v2658_v26 = vcvt.s32.f32 %v2651_v53  ;;  %v3138_v27 = vsel %vm3124_vm12, %v3135_v9, %v3137_v2 }
 0x31c   : > { %v2573_v38 = vsel %vm2571_vm4, %v2572_v43, %v15569_v11  ;;  %v9252_v7 = vsel %vm9250_vm5, %v2572_v43, %v15569_v11  ;;  %v18495_v3 = vmul.u32.u64.low %v18435_v4, %v3138_v27  ;;  %v18496_v8 = vmul.u32.u64.high %v18435_v4, %v3138_v27, %v18495_v3 }
 0x31d   : > { %v2656_v29 = vand.u32 2147483647, %v2655_v33  ;;  %v2570_v61 = vsel %vm2568_vm6, %v15567_v34, %v2569_v25  ;;  %v9249_v41 = vsel %vm9247_vm7, %v15567_v34, %v2569_v25  ;;  %v3209_v31 = vsub.s32 32, %v3208_v56 }
 0x31e   : > { %v2574_v54 = vsel %vm2567_vm9, %v2570_v61, %v2573_v38  ;;  %v9253_v10 = vsel %vm9246_vm10, %v9249_v41, %v9252_v7  ;;  %v18507_v17 = vmul.u32.u64.low %v18435_v4, %v3134_v36  ;;  %v18508_v19 = vmul.u32.u64.high %v18435_v4, %v3134_v36, %v18507_v17 }
 0x31f   : > { %v2659_v58 = vmul.f32 %v2658_v26, %v2656_v29  ;;  %v2575_v32 = vsel %vm2565_vm11, nan, %v2574_v54  ;;  %v9254_v37 = vsel %vm2565_vm11, nan, %v9253_v10  ;;  %v3130_v35 = vsel %vm3124_vm12, %v3127_v48, %v3129_v45 }
 0x320   : > { %v7645_v44 = vmul.f32 %v16711_v23, %v2575_v32  ;;  %v14373_v24 = vmul.f32 %v16718_v12, %v9254_v37  ;;  %vm3148_vm2 = vc.u32 %v18496_v8, %v18507_v17  ;;  %v3207_v15 = vshrl.u32 %v18444_v57, 5 }
 0x321   : > { %v2660_v59 = vxor.u32 2147483648, %v2659_v58  ;;  %v3211_v53 = vshll.u32 %v23185_v18, %v3208_v56  ;;  %v3212_v21 = vshrl.u32 %v23186_v5, %v3209_v31  ;;  %v3214_v34 = vshll.u32 %v23186_v5, %v3208_v56 }
 0x322   : > { %v14437_v49 = vadd.f32 %v14373_v24, %v7645_v44  ;;  %v3215_v51 = vshrl.u32 %v23187_v16, %v3209_v31  ;;  %v3146_v48 = vmul.u32 %v18435_v4, %v3130_v35  ;;  %v3149_v57 = vadd.s32 1, %v18508_v19 }
 0x323   : > { %v2661_v13 = vsel %vm2578_vm15, %v2660_v59, %v2659_v58  ;;  %v3213_v9 = vor.u32 %v3212_v21, %v3211_v53  ;;  %v3217_v11 = vshll.u32 %v23187_v16, %v3208_v56  ;;  %v3218_v43 = vshrl.u32 %v23188_v47, %v3209_v31 }
 0x324   : > { %v2664_v60 = vsel %vm18418_vm3, %v18187_v40, %v2661_v13  ;;  %14501 = vst [vmem:[%s16934_s6 + $0x70] sm:$0xff] %v14437_v49  ;;  %v3216_v0 = vor.u32 %v3215_v51, %v3214_v34  ;;  %v3150_v33 = vsel %vm3148_vm2, %v3149_v57, %v18508_v19  ;;  %v3220_v42 = vshll.u32 %v23188_v47, %v3208_v56 }
 0x325   : > { %15570 = vcosq.f32 %v2664_v60  ;;  %v3221_v4 = vshrl.u32 %v23189_v63, %v3209_v31  ;;  %v3151_v45 = vadd.s32 %v3150_v33, %v3146_v48  ;;  %v3219_v25 = vor.u32 %v3218_v43, %v3217_v11 }
 0x326   : > { %15572 = vsinq.f32 %v2664_v60  ;;  %v3223_v26 = vshll.u32 %v23189_v63, %v3208_v56  ;;  %v3224_v36 = vshrl.u32 %v23191_v28, %v3209_v31  ;;  %v9348_v2 = vadd.s32 3, %v18433_v6 }
 0x327   : > { %v3210_v38 = vshrl.u32 %v23185_v18, %v3209_v31  ;;  %v3222_v29 = vor.u32 %v3221_v4, %v3220_v42  ;;  %vm3226_vm15 = vcmp.lt.s32.totalorder %v3207_v15, 1  ;;  %v3152_v7 = vadd.s32 536870912, %v3151_v45 }
 0x328   : > { %v3225_v27 = vor.u32 %v3224_v36, %v3223_v26  ;;  %vm3228_vm3 = vcmp.lt.s32.totalorder %v3207_v15, 3  ;;  %vm3229_vm1 = vcmp.lt.s32.totalorder %v3207_v15, 4  ;;  %v3234_v41 = vsel %vm3226_vm15, %v3213_v9, %v3216_v0 }
 0x329   : > { %v3231_v61 = vsel %vm3229_vm1, %v3219_v25, 2102212464  ;;  %v3235_v3 = vsel %vm3229_vm1, %v3222_v29, 920167782  ;;  %v3238_v54 = vsel %vm3226_vm15, %v3216_v0, %v3219_v25  ;;  %v3153_v58 = vshrl.u32 %v3152_v7, 30 }
 0x32a   : > { %vm3227_vm0 = vcmp.lt.s32.totalorder %v3207_v15, 2  ;;  %v3236_v56 = vsel %vm3228_vm3, %v3219_v25, %v3235_v3  ;;  %v3239_v10 = vsel %vm3229_vm1, %v3225_v27, 1326507024  ;;  %v2669_v32 = vand.u32 3, %v18433_v6 }
 0x32b   : > { %v9349_v31 = vand.u32 3, %v9348_v2  ;;  %v3237_v37 = vsel %vm3227_vm0, %v3234_v41, %v3236_v56  ;;  %v3240_v19 = vsel %vm3228_vm3, %v3222_v29, %v3239_v10  ;;  %v3154_v59 = vshll.u32 %v3153_v58, 30 }
 0x32c   : > { %v3230_v44 = vsel %vm3226_vm15, %v3210_v38, %v3213_v9  ;;  %v3232_v24 = vsel %vm3228_vm3, %v3216_v0, %v3231_v61  ;;  %v3241_v35 = vsel %vm3227_vm0, %v3238_v54, %v3240_v19  ;;  %vm2668_vm4 = vweird.f32 %v18187_v40 }
 0x32d   : > { %v18550_v53 = vmul.u32.u64.low %v18437_v30, %v3241_v35  ;;  %v18551_v21 = vmul.u32.u64.high %v18437_v30, %v3241_v35, %v18550_v53  ;;  %v18554_v13 = vmul.u32.u64.low %v18437_v30, %v3237_v37  ;;  %v18555_v49 = vmul.u32.u64.high %v18437_v30, %v3237_v37, %v18554_v13 }
 0x32e   : > { %v18558_v6 = vsub.s32 %v3151_v45, %v3154_v59  ;;  %v3233_v34 = vsel %vm3227_vm0, %v3230_v44, %v3232_v24  ;;  %v922_v51 = vmul.f32 %v16578_v14, %v18403_v52  ;;  %v2888_v15 = vand.u32 2139095040, %v18440_v46 }
 0x32f   : > { %vm2671_vm5 = vcmp.eq.s32.totalorder %v2669_v32, 0  ;;  %vm3093_vm6 = vcmp.lt.s32.totalorder %v18344_v1, 0  ;;  %v2885_v48 = vand.u32 2147483647, %v18440_v46  ;;  %vm2674_vm7 = vcmp.eq.s32.totalorder %v2669_v32, 2 }
 0x330   : > { %v3157_v60 = vsub.s32 0, %v18558_v6  ;;  %vm9351_vm8 = vcmp.eq.s32.totalorder %v9349_v31, 0  ;;  %vm18569_vm9 = vcmp.le.f32.partialorder %v3091_v39, 0.7853982  ;;  %vm3251_vm10 = vc.u32 %v18551_v21, %v18554_v13 }
 0x331   : > { %v3252_v52 = vadd.s32 1, %v18555_v49  ;;  %vm9354_vm11 = vcmp.eq.s32.totalorder %v9349_v31, 2  ;;  %v3249_v33 = vmul.u32 %v18437_v30, %v3233_v34  ;;  %v3177_v4 = vsub.s32 4, %v3153_v58 }
 0x332   : > { %v15571_v57 = vpop.eup %15570  ;;  %v14736_v43 = vmin.u32 %v3157_v60, %v18558_v6  ;;  %v2889_v39 = vshrl.u32 %v2888_v15, 23  ;;  %vm2670_vm12 = vcmp.lt.s32.totalorder %v2669_v32, 2  ;;  %vm9350_vm13 = vcmp.lt.s32.totalorder %v9349_v31, 2 }
 0x333   : > { %v15573_v0 = vpop.eup %15572  ;;  %v2675_v11 = vxor.u32 2147483648, %v15571_v57  ;;  %v3253_v45 = vsel %vm3251_vm10, %v3252_v52, %v18555_v49  ;;  %v3178_v54 = vsel %vm3093_vm6, %v3177_v4, %v3153_v58  ;;  %v3147_v37 = vadd.s32 %v18507_v17, %v18496_v8  ;;  %v23235_v49 = vld [vmem:[#allocation28_spill] sm:$0xff] }
 0x334   : > { %v2672_v42 = vxor.u32 2147483648, %v15573_v0  ;;  %v3159_v36 = vclz %v14736_v43  ;;  %v3254_v2 = vadd.s32 %v3253_v45, %v3249_v33  ;;  %v14727_v56 = vadd.s32 4294967169, %v2889_v39 }
 0x335   : > { %v2676_v25 = vsel %vm2674_vm7, %v2675_v11, %v15573_v0  ;;  %v9356_v26 = vsel %vm9354_vm11, %v2675_v11, %v15573_v0  ;;  %v2892_v59 = vand.u32 8388607, %v2885_v48  ;;  %v3180_v58 = vsel %vm18569_vm9, 0, %v3178_v54 }
 0x336   : > { %v2673_v38 = vsel %vm2671_vm5, %v15571_v57, %v2672_v42  ;;  %v9353_v29 = vsel %vm9351_vm8, %v15571_v57, %v2672_v42  ;;  %v14737_v61 = vadd.s32 4294967294, %v3159_v36  ;;  %v3255_v41 = vadd.s32 536870912, %v3254_v2 }
 0x337   : > { %v2677_v7 = vsel %vm2670_vm12, %v2673_v38, %v2676_v25  ;;  %v9357_v27 = vsel %vm9350_vm13, %v9353_v29, %v9356_v26  ;;  %v2895_v40 = vadd.s32 1, %v14727_v56  ;;  %v18596_v34 = vadd.f32 %v922_v51, %v23235_v49 }
 0x338   : > { %v2678_v30 = vsel %vm2668_vm4, nan, %v2677_v7  ;;  %v9358_v3 = vsel %vm2668_vm4, nan, %v9357_v27  ;;  %vm14738_vm14 = vcmp.lt.s32.totalorder %v14737_v61, 0  ;;  %v3256_v31 = vshrl.u32 %v3255_v41, 30 }
 0x339   : > { %v7646_v10 = vmul.f32 %v16714_v50, %v2678_v30  ;;  %v14374_v32 = vmul.f32 %v16721_v62, %v9358_v3  ;;  %v3162_v19 = vsel %vm14738_vm14, 0, %v14737_v61  ;;  %vm2896_vm2 = vcmp.gt.s32.totalorder %v2895_v40, 0 }
 0x33a   : > { %v3163_v24 = vsub.s32 32, %v3162_v19  ;;  %v3167_v35 = vsub.s32 4294967266, %v3162_v19  ;;  %v3257_v53 = vshll.u32 %v3256_v31, 30  ;;  %v3164_v15 = vshll.u32 %v18558_v6, %v3162_v19 }
 0x33b   : > { %v14438_v44 = vadd.f32 %v14374_v32, %v7646_v10  ;;  %v2897_v60 = vsel %vm2896_vm2, %v2895_v40, 0  ;;  %v9868_v52 = vadd.s32 3, %v3180_v58  ;;  %v2893_v33 = vor.u32 8388608, %v2892_v59 }
 0x33c   : > { %v3165_v8 = vshrl.u32 %v3147_v37, %v3163_v24  ;;  %v3168_v17 = vadd.s32 127, %v3167_v35  ;;  %v18600_v57 = vsub.s32 %v3254_v2, %v3257_v53  ;;  %v2899_v0 = vand.u32 31, %v2897_v60 }
 0x33d   : > { %14502 = vst [vmem:[%s16934_s6 + $0x78] sm:$0xff] %v14438_v44  ;;  %v3280_v4 = vsub.s32 4, %v3256_v31  ;;  %vm3196_vm15 = vcmp.lt.s32.totalorder %v18356_v55, 0  ;;  %v2988_v39 = vand.u32 2147483647, %v18596_v34  ;;  %v2991_v6 = vand.u32 2139095040, %v18596_v34 }
 0x33e   : > { %v3166_v11 = vor.u32 %v3165_v8, %v3164_v15  ;;  %v3169_v43 = vshll.u32 %v3168_v17, 23  ;;  %v3260_v42 = vsub.s32 0, %v18600_v57  ;;  %v2900_v45 = vsub.s32 32, %v2899_v0 }
 0x33f   : > { %v18606_v25 = vand.u32 3, %v3180_v58  ;;  %v3250_v26 = vadd.s32 %v18554_v13, %v18551_v21  ;;  %v18611_v2 = vand.u32 3, %v9868_v52  ;;  %v18614_v27 = vshll.u32 %v2893_v33, 8 }
 0x340   : > { %v3170_v51 = vor.u32 4788187, %v3169_v43  ;;  %v14740_v36 = vmin.u32 %v3260_v42, %v18600_v57  ;;  %v3173_v29 = vcvt.s32.f32 %v3166_v11  ;;  %v2903_v7 = vshrl.u32 %v23186_v5, %v2900_v45 }
 0x341   : > { %v3281_v41 = vsel %vm3196_vm15, %v3280_v4, %v3256_v31  ;;  %v2906_v30 = vshrl.u32 %v23187_v16, %v2900_v45  ;;  %v2909_v3 = vshrl.u32 %v23188_v47, %v2900_v45  ;;  %v2898_v21 = vshrl.u32 %v2897_v60, 5 }
 0x342   : > { %v3171_v38 = vand.u32 2147483647, %v3170_v51  ;;  %v3262_v61 = vclz %v14740_v36  ;;  %v2902_v13 = vshll.u32 %v23185_v18, %v2899_v0  ;;  %v2992_v56 = vshrl.u32 %v2991_v6, 23 }
 0x343   : > { %vm18623_vm3 = vcmp.le.f32.partialorder %v3194_v22, 0.7853982  ;;  %v2901_v37 = vshrl.u32 %v23185_v18, %v2900_v45  ;;  %v2905_v31 = vshll.u32 %v23186_v5, %v2899_v0  ;;  %v2908_v19 = vshll.u32 %v23187_v16, %v2899_v0 }
 0x344   : > { %v3174_v54 = vmul.f32 %v3173_v29, %v3171_v38  ;;  %v14741_v32 = vadd.s32 4294967294, %v3262_v61  ;;  %v2904_v40 = vor.u32 %v2903_v7, %v2902_v13  ;;  %v2911_v44 = vshll.u32 %v23188_v47, %v2899_v0 }
 0x345   : > { %v2912_v24 = vshrl.u32 %v23189_v63, %v2900_v45  ;;  %v2907_v35 = vor.u32 %v2906_v30, %v2905_v31  ;;  %v2910_v58 = vor.u32 %v2909_v3, %v2908_v19  ;;  %v2915_v22 = vshrl.u32 %v23191_v28, %v2900_v45 }
 0x346   : > { %v3175_v59 = vxor.u32 2147483648, %v3174_v54  ;;  %vm14742_vm1 = vcmp.lt.s32.totalorder %v14741_v32, 0  ;;  %v2914_v8 = vshll.u32 %v23189_v63, %v2899_v0  ;;  %vm2917_vm0 = vcmp.lt.s32.totalorder %v2898_v21, 1 }
 0x347   : > { %v3265_v49 = vsel %vm14742_vm1, 0, %v14741_v32  ;;  %v2913_v15 = vor.u32 %v2912_v24, %v2911_v44  ;;  %vm2918_vm4 = vcmp.lt.s32.totalorder %v2898_v21, 2  ;;  %vm2920_vm5 = vcmp.lt.s32.totalorder %v2898_v21, 4 }
 0x348   : > { %v3176_v53 = vsel %vm3093_vm6, %v3175_v59, %v3174_v54  ;;  %v3266_v60 = vsub.s32 32, %v3265_v49  ;;  %v3270_v52 = vsub.s32 4294967266, %v3265_v49  ;;  %v3267_v11 = vshll.u32 %v18600_v57, %v3265_v49 }
 0x349   : > { %v3179_v17 = vsel %vm18569_vm9, %v18344_v1, %v3176_v53  ;;  %v2916_v43 = vor.u32 %v2915_v22, %v2914_v8  ;;  %vm2919_vm6 = vcmp.lt.s32.totalorder %v2898_v21, 3  ;;  %v2922_v4 = vsel %vm2920_vm5, %v2910_v58, 2102212464 }
 0x34a   : > { %15574 = vcosq.f32 %v3179_v17  ;;  %v3268_v33 = vshrl.u32 %v3250_v26, %v3266_v60  ;;  %v3271_v42 = vadd.s32 127, %v3270_v52  ;;  %v2925_v0 = vsel %vm2917_vm0, %v2904_v40, %v2907_v35 }
 0x34b   : > { %15576 = vsinq.f32 %v3179_v17  ;;  %v2926_v45 = vsel %vm2920_vm5, %v2913_v15, 920167782  ;;  %v2929_v36 = vsel %vm2917_vm0, %v2907_v35, %v2910_v58  ;;  %v3283_v38 = vsel %vm18623_vm3, 0, %v3281_v41 }
 0x34c   : > { %v3269_v51 = vor.u32 %v3268_v33, %v3267_v11  ;;  %v3272_v9 = vshll.u32 %v3271_v42, 23  ;;  %v2927_v6 = vsel %vm2919_vm6, %v2910_v58, %v2926_v45  ;;  %v2930_v29 = vsel %vm2920_vm5, %v2916_v43, 1326507024 }
 0x34d   : > { %v2928_v57 = vsel %vm2918_vm4, %v2925_v0, %v2927_v6  ;;  %v14731_v7 = vadd.s32 4294967169, %v2992_v56  ;;  %v2921_v61 = vsel %vm2917_vm0, %v2901_v37, %v2904_v40  ;;  %v2923_v30 = vsel %vm2919_vm6, %v2907_v35, %v2922_v4 }
 0x34e   : > { %v3273_v26 = vor.u32 4788187, %v3272_v9  ;;  %v2931_v3 = vsel %vm2919_vm6, %v2913_v15, %v2930_v29  ;;  %v18648_v13 = vmul.u32.u64.low %v18614_v27, %v2928_v57  ;;  %v18649_v32 = vmul.u32.u64.high %v18614_v27, %v2928_v57, %v18648_v13 }
 0x34f   : > { %v2932_v54 = vsel %vm2918_vm4, %v2929_v36, %v2931_v3  ;;  %v2998_v31 = vadd.s32 1, %v14731_v7  ;;  %v3276_v59 = vcvt.s32.f32 %v3269_v51  ;;  %vm3186_vm7 = vcmp.eq.s32.totalorder %v18606_v25, 0 }
 0x350   : > { %v3274_v19 = vand.u32 2147483647, %v3273_v26  ;;  %v18653_v41 = vmul.u32.u64.low %v18614_v27, %v2932_v54  ;;  %v18654_v44 = vmul.u32.u64.high %v18614_v27, %v2932_v54, %v18653_v41  ;;  %v9972_v56 = vadd.s32 3, %v3283_v38 }
 0x351   : > { %v2924_v37 = vsel %vm2918_vm4, %v2921_v61, %v2923_v30  ;;  %vm2999_vm8 = vcmp.gt.s32.totalorder %v2998_v31, 0  ;;  %vm3185_vm9 = vcmp.lt.s32.totalorder %v18606_v25, 2  ;;  %vm3189_vm10 = vcmp.eq.s32.totalorder %v18606_v25, 2 }
 0x352   : > { %v3277_v40 = vmul.f32 %v3276_v59, %v3274_v19  ;;  %v18662_v24 = vand.u32 8388607, %v2988_v39  ;;  %v3000_v35 = vsel %vm2999_vm8, %v2998_v31, 0  ;;  %vm3183_vm11 = vweird.f32 %v18344_v1  ;;  %v817_v59 = vpop.permute.xlu0 %816 }
 0x353   : > { %vm9870_vm12 = vcmp.lt.s32.totalorder %v18611_v2, 2  ;;  %vm9871_vm13 = vcmp.eq.s32.totalorder %v18611_v2, 0  ;;  %v2943_v21 = vadd.s32 1, %v18649_v32  ;;  %v3002_v58 = vand.u32 31, %v3000_v35 }
 0x354   : > { %v3278_v22 = vxor.u32 2147483648, %v3277_v40  ;;  %vm9874_vm14 = vcmp.eq.s32.totalorder %v18611_v2, 2  ;;  %v2940_v53 = vmul.u32 %v18614_v27, %v2924_v37  ;;  %vm2942_vm2 = vc.u32 %v18654_v44, %v18648_v13 }
 0x355   : > { %v18672_v49 = vand.u32 3, %v3283_v38  ;;  %v18674_v15 = vand.u32 3, %v9972_v56  ;;  %v2944_v8 = vsel %vm2942_vm2, %v2943_v21, %v18649_v32  ;;  %v18677_v17 = vsub.s32 32, %v3002_v58 }
 0x356   : > { %v3279_v52 = vsel %vm3196_vm15, %v3278_v22, %v3277_v40  ;;  %v2945_v11 = vadd.s32 %v2944_v8, %v2940_v53  ;;  %v2996_v43 = vor.u32 8388608, %v18662_v24  ;;  %v18682_v33 = vshrl.u32 %v3000_v35, 5 }
 0x357   : > { %v15575_v60 = vpop.eup %15574  ;;  %v3282_v4 = vsel %vm18623_vm3, %v18356_v55, %v3279_v52  ;;  %v3005_v0 = vshll.u32 %v23185_v18, %v3002_v58  ;;  %v3008_v45 = vshll.u32 %v23186_v5, %v3002_v58  ;;  %v3006_v6 = vshrl.u32 %v23186_v5, %v18677_v17 }
 0x358   : > { %v15577_v27 = vpop.eup %15576  ;;  %v3190_v42 = vxor.u32 2147483648, %v15575_v60  ;;  %15578 = vcosq.f32 %v3282_v4  ;;  %v2946_v9 = vadd.s32 536870912, %v2945_v11  ;;  %v3009_v10 = vshrl.u32 %v23187_v16, %v18677_v17 }
 0x359   : > { %v3187_v51 = vxor.u32 2147483648, %v15577_v27  ;;  %15580 = vsinq.f32 %v3282_v4  ;;  %v3011_v26 = vshll.u32 %v23187_v16, %v3002_v58  ;;  %v3012_v3 = vshrl.u32 %v23188_v47, %v18677_v17 }
 0x35a   : > { %v3191_v36 = vsel %vm3189_vm10, %v3190_v42, %v15577_v27  ;;  %v9876_v38 = vsel %vm9874_vm14, %v3190_v42, %v15577_v27  ;;  %v18701_v7 = vshrl.u32 %v2946_v9, 30  ;;  %v3015_v54 = vshrl.u32 %v23189_v63, %v18677_v17 }
 0x35b   : > { %v3188_v57 = vsel %vm3186_vm7, %v15575_v60, %v3187_v51  ;;  %v9873_v29 = vsel %vm9871_vm13, %v15575_v60, %v3187_v51  ;;  %v3014_v25 = vshll.u32 %v23188_v47, %v3002_v58  ;;  %v3007_v56 = vor.u32 %v3006_v6, %v3005_v0 }
 0x35c   : > { %v3192_v61 = vsel %vm3185_vm9, %v3188_v57, %v3191_v36  ;;  %v9877_v30 = vsel %vm9870_vm12, %v9873_v29, %v9876_v38  ;;  %v2948_v19 = vshll.u32 %v18701_v7, 30  ;;  %v3010_v37 = vor.u32 %v3009_v10, %v3008_v45 }
 0x35d   : > { %v3193_v32 = vsel %vm3183_vm11, nan, %v3192_v61  ;;  %v9878_v31 = vsel %vm3183_vm11, nan, %v9877_v30  ;;  %v3013_v24 = vor.u32 %v3012_v3, %v3011_v26  ;;  %v3017_v35 = vshll.u32 %v23189_v63, %v3002_v58 }
 0x35e   : > { %v7651_v2 = vmul.f32 %v16711_v23, %v3193_v32  ;;  %v14379_v41 = vmul.f32 %v16718_v12, %v9878_v31  ;;  %v18720_v40 = vsub.s32 %v2945_v11, %v2948_v19  ;;  %v3018_v1 = vshrl.u32 %v23191_v28, %v18677_v17 }
 0x35f   : > { %v3016_v22 = vor.u32 %v3015_v54, %v3014_v25  ;;  %v927_v53 = vmul.f32 %v16575_v20, %v817_v59  ;;  %vm3289_vm15 = vcmp.eq.s32.totalorder %v18672_v49, 0  ;;  %vm3292_vm3 = vcmp.eq.s32.totalorder %v18672_v49, 2 }
 0x360   : > { %v14443_v21 = vadd.f32 %v14379_v41, %v7651_v2  ;;  %v2951_v8 = vsub.s32 0, %v18720_v40  ;;  %v3019_v60 = vor.u32 %v3018_v1, %v3017_v35  ;;  %vm3288_vm1 = vcmp.lt.s32.totalorder %v18672_v49, 2 }
 0x361   : > { %vm9974_vm0 = vcmp.lt.s32.totalorder %v18674_v15, 2  ;;  %vm9975_vm4 = vcmp.eq.s32.totalorder %v18674_v15, 0  ;;  %vm9978_vm5 = vcmp.eq.s32.totalorder %v18674_v15, 2  ;;  %vm3020_vm6 = vcmp.lt.s32.totalorder %v18682_v33, 1 }
 0x362   : > { %14507 = vst [vmem:[%s16934_s6 + $0xa0] sm:$0xff] %v14443_v21  ;;  %v3036_v58 = vshll.u32 %v2996_v43, 8  ;;  %vm3286_vm7 = vweird.f32 %v18356_v55  ;;  %v14728_v52 = vmin.u32 %v2951_v8, %v18720_v40  ;;  %vm3023_vm8 = vcmp.lt.s32.totalorder %v18682_v33, 4 }
 0x363   : > { %v3028_v11 = vsel %vm3020_vm6, %v3007_v56, %v3010_v37  ;;  %v3032_v27 = vsel %vm3020_vm6, %v3010_v37, %v3013_v24  ;;  %vm3022_vm9 = vcmp.lt.s32.totalorder %v18682_v33, 3  ;;  %v3029_v42 = vsel %vm3023_vm8, %v3016_v22, 920167782 }
 0x364   : > { %v3033_v4 = vsel %vm3023_vm8, %v3019_v60, 1326507024  ;;  %v928_v0 = vmul.f32 %v16578_v14, %v817_v59  ;;  %v2953_v45 = vclz %v14728_v52  ;;  %vm3021_vm10 = vcmp.lt.s32.totalorder %v18682_v33, 2  ;;  %v23239_v33 = vld [vmem:[#allocation34_spill] sm:$0xff] }
 0x365   : > { %v3030_v43 = vsel %vm3022_vm9, %v3013_v24, %v3029_v42  ;;  %v3034_v51 = vsel %vm3022_vm9, %v3016_v22, %v3033_v4  ;;  %v15579_v9 = vpop.eup %15578  ;;  %v3004_v6 = vshrl.u32 %v23185_v18, %v18677_v17  ;;  %v3025_v36 = vsel %vm3023_vm8, %v3013_v24, 2102212464 }
 0x366   : > { %v3031_v38 = vsel %vm3021_vm10, %v3028_v11, %v3030_v43  ;;  %v3035_v10 = vsel %vm3021_vm10, %v3032_v27, %v3034_v51  ;;  %v15581_v57 = vpop.eup %15580  ;;  %v3293_v29 = vxor.u32 2147483648, %v15579_v9  ;;  %v14729_v26 = vadd.s32 4294967294, %v2953_v45 }
 0x367   : > { %v18755_v61 = vmul.u32.u64.low %v3036_v58, %v3035_v10  ;;  %v18756_v30 = vmul.u32.u64.high %v3036_v58, %v3035_v10, %v18755_v61  ;;  %v3290_v3 = vxor.u32 2147483648, %v15581_v57  ;;  %v3024_v54 = vsel %vm3020_vm6, %v3004_v6, %v3007_v56  ;;  %v23238_v56 = vld [vmem:[#allocation33_spill] sm:$0xff] }
 0x368   : > { %v18760_v32 = vmul.u32.u64.low %v3036_v58, %v3031_v38  ;;  %v18761_v31 = vmul.u32.u64.high %v3036_v58, %v3031_v38, %v18760_v32  ;;  %v3294_v17 = vsel %vm3292_vm3, %v3293_v29, %v15581_v57  ;;  %v9980_v19 = vsel %vm9978_vm5, %v3293_v29, %v15581_v57 }
 0x369   : > { %vm14730_vm11 = vcmp.lt.s32.totalorder %v14729_v26, 0  ;;  %v3026_v25 = vsel %vm3022_vm9, %v3010_v37, %v3025_v36  ;;  %v3291_v59 = vsel %vm3289_vm15, %v15579_v9, %v3290_v3  ;;  %v9977_v2 = vsel %vm9975_vm4, %v15579_v9, %v3290_v3 }
 0x36a   : > { %v2956_v41 = vsel %vm14730_vm11, 0, %v14729_v26  ;;  %v18775_v24 = vadd.f32 %v927_v53, %v23238_v56  ;;  %v3295_v35 = vsel %vm3288_vm1, %v3291_v59, %v3294_v17  ;;  %v9981_v1 = vsel %vm9974_vm0, %v9977_v2, %v9980_v19  ;;  %v813_v17 = vpop.permute.xlu1 %812 }
 0x36b   : > { %v2941_v21 = vadd.s32 %v18648_v13, %v18654_v44  ;;  %v2957_v37 = vsub.s32 32, %v2956_v41  ;;  %v3296_v22 = vsel %vm3286_vm7, nan, %v3295_v35  ;;  %v9982_v8 = vsel %vm3286_vm7, nan, %v9981_v1 }
 0x36c   : > { %v2961_v60 = vsub.s32 4294967266, %v2956_v41  ;;  %v3027_v53 = vsel %vm3021_vm10, %v3024_v54, %v3026_v25  ;;  %v7652_v49 = vmul.f32 %v16714_v50, %v3296_v22  ;;  %v14380_v15 = vmul.f32 %v16721_v62, %v9982_v8 }
 0x36d   : > { %v2959_v52 = vshrl.u32 %v2941_v21, %v2957_v37  ;;  %vm3045_vm12 = vc.u32 %v18756_v30, %v18760_v32  ;;  %v2958_v13 = vshll.u32 %v18720_v40, %v2956_v41  ;;  %v3046_v11 = vadd.s32 1, %v18761_v31 }
 0x36e   : > { %v2962_v44 = vadd.s32 127, %v2961_v60  ;;  %v14444_v55 = vadd.f32 %v14380_v15, %v7652_v49  ;;  %v2971_v27 = vsub.s32 4, %v18701_v7  ;;  %v3043_v42 = vmul.u32 %v3036_v58, %v3027_v53 }
 0x36f   : > { %v18797_v4 = vadd.f32 %v928_v0, %v23239_v33  ;;  %v2960_v45 = vor.u32 %v2959_v52, %v2958_v13  ;;  %v3047_v51 = vsel %vm3045_vm12, %v3046_v11, %v18761_v31  ;;  %v3506_v9 = vand.u32 2139095040, %v18775_v24 }
 0x370   : > { %v2963_v43 = vshll.u32 %v2962_v44, 23  ;;  %14508 = vst [vmem:[%s16934_s6 + $0xa8] sm:$0xff] %v14444_v55  ;;  %v3048_v6 = vadd.s32 %v3047_v51, %v3043_v42  ;;  %vm2887_vm13 = vcmp.lt.s32.totalorder %v18440_v46, 0  ;;  %v3503_v0 = vand.u32 2147483647, %v18775_v24 }
 0x371   : > { %v3507_v36 = vshrl.u32 %v3506_v9, 23  ;;  %v2972_v38 = vsel %vm2887_vm13, %v2971_v27, %v18701_v7  ;;  %v2967_v57 = vcvt.s32.f32 %v2960_v45  ;;  %v3609_v26 = vand.u32 2139095040, %v18797_v4 }
 0x372   : > { %v2964_v40 = vor.u32 4788187, %v2963_v43  ;;  %v3049_v58 = vadd.s32 536870912, %v3048_v6  ;;  %vm18810_vm14 = vcmp.le.f32.partialorder %v2885_v48, 0.7853982  ;;  %vm2990_vm2 = vcmp.lt.s32.totalorder %v18596_v34, 0 }
 0x373   : > { %v14751_v29 = vadd.s32 4294967169, %v3507_v36  ;;  %v2974_v31 = vsel %vm18810_vm14, 0, %v2972_v38  ;;  %v3510_v25 = vand.u32 8388607, %v3503_v0  ;;  %v3606_v59 = vand.u32 2147483647, %v18797_v4 }
 0x374   : > { %v2965_v10 = vand.u32 2147483647, %v2964_v40  ;;  %v3050_v3 = vshrl.u32 %v3049_v58, 30  ;;  %v3610_v48 = vshrl.u32 %v3609_v26, 23  ;;  %v9660_v56 = vadd.s32 3, %v2974_v31 }
 0x375   : > { %v3513_v7 = vadd.s32 1, %v14751_v29  ;;  %v18823_v1 = vmul.f32 %v16575_v20, %v813_v17  ;;  %v18827_v37 = vand.u32 3, %v2974_v31  ;;  %v18830_v8 = vmul.f32 %v16578_v14, %v813_v17 }
 0x376   : > { %v2968_v54 = vmul.f32 %v2967_v57, %v2965_v10  ;;  %v3051_v19 = vshll.u32 %v3050_v3, 30  ;;  %v3511_v49 = vor.u32 8388608, %v3510_v25  ;;  %v18838_v15 = vand.u32 8388607, %v3606_v59  ;;  %v23244_v25 = vld [vmem:[#allocation31_spill] sm:$0xff] }
 0x377   : > { %vm3514_vm15 = vcmp.gt.s32.totalorder %v3513_v7, 0  ;;  %v3074_v52 = vsub.s32 4, %v3050_v3  ;;  %v14755_v44 = vadd.s32 4294967169, %v3610_v48  ;;  %v3044_v11 = vadd.s32 %v18760_v32, %v18756_v30 }
 0x378   : > { %v2969_v2 = vxor.u32 2147483648, %v2968_v54  ;;  %v18820_v41 = vsub.s32 %v3048_v6, %v3051_v19  ;;  %v3515_v35 = vsel %vm3514_vm15, %v3513_v7, 0  ;;  %v18843_v27 = vand.u32 3, %v9660_v56 }
 0x379   : > { %v3517_v22 = vand.u32 31, %v3515_v35  ;;  %v18845_v42 = vshrl.u32 %v3515_v35, 5  ;;  %v18855_v30 = vsel %vm2990_vm2, %v3074_v52, %v3050_v3  ;;  %v18857_v32 = vshll.u32 %v3511_v49, 8 }
 0x37a   : > { %v2970_v21 = vsel %vm2887_vm13, %v2969_v2, %v2968_v54  ;;  %v3054_v53 = vsub.s32 0, %v18820_v41  ;;  %v3614_v36 = vor.u32 8388608, %v18838_v15  ;;  %v3616_v38 = vadd.s32 1, %v14755_v44 }
 0x37b   : > { %v2973_v60 = vsel %vm18810_vm14, %v18440_v46, %v2970_v21  ;;  %v3518_v13 = vsub.s32 32, %v3517_v22  ;;  %v3520_v33 = vshll.u32 %v23185_v18, %v3517_v22  ;;  %v3523_v43 = vshll.u32 %v23186_v5, %v3517_v22 }
 0x37c   : > { %15582 = vcosq.f32 %v2973_v60  ;;  %v14732_v55 = vmin.u32 %v3054_v53, %v18820_v41  ;;  %v3526_v6 = vshll.u32 %v23187_v16, %v3517_v22  ;;  %v3529_v26 = vshll.u32 %v23188_v47, %v3517_v22 }
 0x37d   : > { %15584 = vsinq.f32 %v2973_v60  ;;  %v3521_v45 = vshrl.u32 %v23186_v5, %v3518_v13  ;;  %v3524_v9 = vshrl.u32 %v23187_v16, %v3518_v13  ;;  %v3527_v40 = vshrl.u32 %v23188_v47, %v3518_v13 }
 0x37e   : > { %v3056_v51 = vclz %v14732_v55  ;;  %v3530_v61 = vshrl.u32 %v23189_v63, %v3518_v13  ;;  %v3532_v54 = vshll.u32 %v23189_v63, %v3517_v22  ;;  %v3533_v31 = vshrl.u32 %v23191_v28, %v3518_v13 }
 0x37f   : > { %v3522_v10 = vor.u32 %v3521_v45, %v3520_v33  ;;  %v3525_v57 = vor.u32 %v3524_v9, %v3523_v43  ;;  %v3528_v29 = vor.u32 %v3527_v40, %v3526_v6  ;;  %vm2983_vm3 = vcmp.eq.s32.totalorder %v18827_v37, 2 }
 0x380   : > { %v14733_v58 = vadd.s32 4294967294, %v3056_v51  ;;  %vm9666_vm0 = vcmp.eq.s32.totalorder %v18843_v27, 2  ;;  %v3519_v3 = vshrl.u32 %v23185_v18, %v3518_v13  ;;  %vm3535_vm4 = vcmp.lt.s32.totalorder %v18845_v42, 1 }
 0x381   : > { %vm3536_vm5 = vcmp.lt.s32.totalorder %v18845_v42, 2  ;;  %vm2980_vm6 = vcmp.eq.s32.totalorder %v18827_v37, 0  ;;  %vm9663_vm7 = vcmp.eq.s32.totalorder %v18843_v27, 0  ;;  %v3531_v17 = vor.u32 %v3530_v61, %v3529_v26 }
 0x382   : > { %vm14734_vm1 = vcmp.lt.s32.totalorder %v14733_v58, 0  ;;  %v3534_v19 = vor.u32 %v3533_v31, %v3532_v54  ;;  %vm3538_vm8 = vcmp.lt.s32.totalorder %v18845_v42, 4  ;;  %vm2979_vm9 = vcmp.lt.s32.totalorder %v18827_v37, 2 }
 0x383   : > { %v3059_v7 = vsel %vm14734_vm1, 0, %v14733_v58  ;;  %vm18875_vm10 = vcmp.le.f32.partialorder %v2988_v39, 0.7853982  ;;  %vm9662_vm11 = vcmp.lt.s32.totalorder %v18843_v27, 2  ;;  %vm3537_vm12 = vcmp.lt.s32.totalorder %v18845_v42, 3 }
 0x384   : > { %v3060_v2 = vsub.s32 32, %v3059_v7  ;;  %v3064_v48 = vsub.s32 4294967266, %v3059_v7  ;;  %v3540_v56 = vsel %vm3538_vm8, %v3528_v29, 2102212464  ;;  %vm2977_vm13 = vweird.f32 %v18440_v46 }
 0x385   : > { %v3061_v35 = vshll.u32 %v18820_v41, %v3059_v7  ;;  %v3539_v21 = vsel %vm3535_vm4, %v3519_v3, %v3522_v10  ;;  %v3543_v39 = vsel %vm3535_vm4, %v3522_v10, %v3525_v57  ;;  %v3544_v22 = vsel %vm3538_vm8, %v3531_v17, 920167782 }
 0x386   : > { %v3062_v60 = vshrl.u32 %v3044_v11, %v3060_v2  ;;  %v3065_v53 = vadd.s32 127, %v3064_v48  ;;  %v3545_v49 = vsel %vm3537_vm12, %v3528_v29, %v3544_v22  ;;  %v3547_v52 = vsel %vm3535_vm4, %v3525_v57, %v3528_v29 }
 0x387   : > { %v3541_v41 = vsel %vm3537_vm12, %v3525_v57, %v3540_v56  ;;  %v3546_v13 = vsel %vm3536_vm5, %v3543_v39, %v3545_v49  ;;  %v3548_v44 = vsel %vm3538_vm8, %v3534_v19, 1326507024  ;;  %vm3617_vm14 = vcmp.gt.s32.totalorder %v3616_v38, 0 }
 0x388   : > { %v3063_v33 = vor.u32 %v3062_v60, %v3061_v35  ;;  %v3066_v11 = vshll.u32 %v3065_v53, 23  ;;  %v3549_v45 = vsel %vm3537_vm12, %v3531_v17, %v3548_v44  ;;  %v3618_v43 = vsel %vm3617_vm14, %v3616_v38, 0 }
 0x389   : > { %v15583_v55 = vpop.eup %15582  ;;  %v3550_v6 = vsel %vm3536_vm5, %v3547_v52, %v3549_v45  ;;  %v18906_v40 = vmul.u32.u64.low %v18857_v32, %v3546_v13  ;;  %v18907_v58 = vmul.u32.u64.high %v18857_v32, %v3546_v13, %v18906_v40  ;;  %v3542_v26 = vsel %vm3536_vm5, %v3539_v21, %v3541_v41 }
 0x38a   : > { %v15585_v51 = vpop.eup %15584  ;;  %v2984_v9 = vxor.u32 2147483648, %v15583_v55  ;;  %v3067_v57 = vor.u32 4788187, %v3066_v11  ;;  %v3070_v29 = vcvt.s32.f32 %v3063_v33  ;;  %v3620_v19 = vand.u32 31, %v3618_v43 }
 0x38b   : > { %v2981_v10 = vxor.u32 2147483648, %v15585_v51  ;;  %v18917_v54 = vmul.u32.u64.low %v18857_v32, %v3550_v6  ;;  %v18918_v31 = vmul.u32.u64.high %v18857_v32, %v3550_v6, %v18917_v54  ;;  %v3077_v2 = vsel %vm18875_vm10, 0, %v18855_v30 }
 0x38c   : > { %v2985_v61 = vsel %vm2983_vm3, %v2984_v9, %v15585_v51  ;;  %v9668_v38 = vsel %vm9666_vm0, %v2984_v9, %v15585_v51  ;;  %v3068_v7 = vand.u32 2147483647, %v3067_v57  ;;  %v3561_v56 = vadd.s32 1, %v18907_v58 }
 0x38d   : > { %v2982_v3 = vsel %vm2980_vm6, %v15583_v55, %v2981_v10  ;;  %v9665_v17 = vsel %vm9663_vm7, %v15583_v55, %v2981_v10  ;;  %v3621_v22 = vsub.s32 32, %v3620_v19  ;;  %v3558_v30 = vmul.u32 %v18857_v32, %v3542_v26 }
 0x38e   : > { %v2986_v42 = vsel %vm2979_vm9, %v2982_v3, %v2985_v61  ;;  %v9669_v48 = vsel %vm9662_vm11, %v9665_v17, %v9668_v38  ;;  %v3071_v21 = vmul.f32 %v3070_v29, %v3068_v7  ;;  %vm3560_vm15 = vc.u32 %v18918_v31, %v18906_v40 }
 0x38f   : > { %v2987_v35 = vsel %vm2977_vm13, nan, %v2986_v42  ;;  %v9670_v39 = vsel %vm2977_vm13, nan, %v9669_v48  ;;  %v3562_v53 = vsel %vm3560_vm15, %v3561_v56, %v18907_v58  ;;  %v18942_v49 = vshrl.u32 %v3618_v43, 5 }
 0x390   : > { %v7649_v37 = vmul.f32 %v16711_v23, %v2987_v35  ;;  %v14377_v60 = vmul.f32 %v16718_v12, %v9670_v39  ;;  %v3072_v27 = vxor.u32 2147483648, %v3071_v21  ;;  %v3623_v52 = vshll.u32 %v23185_v18, %v3620_v19 }
 0x391   : > { %v3563_v41 = vadd.s32 %v3562_v53, %v3558_v30  ;;  %v3624_v13 = vshrl.u32 %v23186_v5, %v3621_v22  ;;  %v3626_v44 = vshll.u32 %v23186_v5, %v3620_v19  ;;  %v3627_v32 = vshrl.u32 %v23187_v16, %v3621_v22 }
 0x392   : > { %v14441_v46 = vadd.f32 %v14377_v60, %v7649_v37  ;;  %v3073_v55 = vsel %vm2990_vm2, %v3072_v27, %v3071_v21  ;;  %v3629_v33 = vshll.u32 %v23187_v16, %v3620_v19  ;;  %v3630_v11 = vshrl.u32 %v23188_v47, %v3621_v22 }
 0x393   : > { %v3076_v45 = vsel %vm18875_vm10, %v18596_v34, %v3073_v55  ;;  %v3564_v43 = vadd.s32 536870912, %v3563_v41  ;;  %v3625_v51 = vor.u32 %v3624_v13, %v3623_v52  ;;  %v3632_v9 = vshll.u32 %v23188_v47, %v3620_v19 }
 0x394   : > { %14505 = vst [vmem:[%s16934_s6 + $0x90] sm:$0xff] %v14441_v46  ;;  %15586 = vcosq.f32 %v3076_v45  ;;  %v3628_v6 = vor.u32 %v3627_v32, %v3626_v44  ;;  %v3631_v58 = vor.u32 %v3630_v11, %v3629_v33  ;;  %v3633_v10 = vshrl.u32 %v23189_v63, %v3621_v22 }
 0x395   : > { %15588 = vsinq.f32 %v3076_v45  ;;  %v3565_v57 = vshrl.u32 %v3564_v43, 30  ;;  %v3635_v29 = vshll.u32 %v23189_v63, %v3620_v19  ;;  %v3636_v26 = vshrl.u32 %v23191_v28, %v3621_v22 }
 0x396   : > { %v9764_v61 = vadd.s32 3, %v3077_v2  ;;  %v3634_v38 = vor.u32 %v3633_v10, %v3632_v9  ;;  %vm3638_vm2 = vcmp.lt.s32.totalorder %v18942_v49, 1  ;;  %v18963_v54 = vadd.f32 %v18823_v1, %v23244_v25 }
 0x397   : > { %v3566_v3 = vshll.u32 %v3565_v57, 30  ;;  %v3622_v7 = vshrl.u32 %v23185_v18, %v3621_v22  ;;  %v3637_v17 = vor.u32 %v3636_v26, %v3635_v29  ;;  %vm3641_vm3 = vcmp.lt.s32.totalorder %v18942_v49, 4 }
 0x398   : > { %vm3639_vm1 = vcmp.lt.s32.totalorder %v18942_v49, 2  ;;  %vm3640_vm0 = vcmp.lt.s32.totalorder %v18942_v49, 3  ;;  %v3646_v19 = vsel %vm3638_vm2, %v3625_v51, %v3628_v6  ;;  %v3647_v42 = vsel %vm3641_vm3, %v3634_v38, 920167782 }
 0x399   : > { %v18971_v48 = vsub.s32 %v3563_v41, %v3566_v3  ;;  %v3643_v56 = vsel %vm3641_vm3, %v3631_v58, 2102212464  ;;  %v3648_v35 = vsel %vm3640_vm0, %v3631_v58, %v3647_v42  ;;  %v3650_v1 = vsel %vm3638_vm2, %v3628_v6, %v3631_v58 }
 0x39a   : > { %v3081_v21 = vand.u32 3, %v3077_v2  ;;  %v3649_v39 = vsel %vm3639_vm1, %v3646_v19, %v3648_v35  ;;  %v3651_v22 = vsel %vm3641_vm3, %v3637_v17, 1326507024  ;;  %v3654_v37 = vshll.u32 %v3614_v36, 8  ;;  %v23245_v36 = vld [vmem:[#allocation32_spill] sm:$0xff] }
 0x39b   : > { %v9765_v60 = vand.u32 3, %v9764_v61  ;;  %v3569_v30 = vsub.s32 0, %v18971_v48  ;;  %v3642_v27 = vsel %vm3638_vm2, %v3622_v7, %v3625_v51  ;;  %v3652_v53 = vsel %vm3640_vm0, %v3634_v38, %v3651_v22 }
 0x39c   : > { %v3644_v52 = vsel %vm3640_vm0, %v3628_v6, %v3643_v56  ;;  %v3653_v46 = vsel %vm3639_vm1, %v3650_v1, %v3652_v53  ;;  %v18984_v41 = vmul.u32.u64.low %v3654_v37, %v3649_v39  ;;  %v18985_v2 = vmul.u32.u64.high %v3654_v37, %v3649_v39, %v18984_v41 }
 0x39d   : > { %vm3505_vm4 = vcmp.lt.s32.totalorder %v18775_v24, 0  ;;  %v14752_v15 = vmin.u32 %v3569_v30, %v18971_v48  ;;  %v18992_v13 = vadd.f32 %v18830_v8, %v23245_v36  ;;  %v3297_v44 = vand.u32 2147483647, %v18963_v54 }
 0x39e   : > { %vm3080_vm5 = vweird.f32 %v18596_v34  ;;  %v3589_v55 = vsub.s32 4, %v3565_v57  ;;  %v18996_v32 = vmul.u32.u64.low %v3654_v37, %v3653_v46  ;;  %v18997_v33 = vmul.u32.u64.high %v3654_v37, %v3653_v46, %v18996_v32 }
 0x39f   : > { %v3300_v11 = vand.u32 2139095040, %v18963_v54  ;;  %vm3082_vm6 = vcmp.lt.s32.totalorder %v3081_v21, 2  ;;  %vm3083_vm7 = vcmp.eq.s32.totalorder %v3081_v21, 0  ;;  %v3571_v45 = vclz %v14752_v15 }
 0x3a0   : > { %v3645_v43 = vsel %vm3639_vm1, %v3642_v27, %v3644_v52  ;;  %vm3086_vm8 = vcmp.eq.s32.totalorder %v3081_v21, 2  ;;  %vm9766_vm9 = vcmp.lt.s32.totalorder %v9765_v60, 2  ;;  %vm9767_vm10 = vcmp.eq.s32.totalorder %v9765_v60, 0 }
 0x3a1   : > { %v3664_v8 = vadd.s32 1, %v18985_v2  ;;  %v15587_v51 = vpop.eup %15586  ;;  %vm9770_vm11 = vcmp.eq.s32.totalorder %v9765_v60, 2  ;;  %v3559_v9 = vadd.s32 %v18906_v40, %v18918_v31  ;;  %v14753_v6 = vadd.s32 4294967294, %v3571_v45 }
 0x3a2   : > { %v3301_v58 = vshrl.u32 %v3300_v11, 23  ;;  %v15589_v10 = vpop.eup %15588  ;;  %v3087_v29 = vxor.u32 2147483648, %v15587_v51  ;;  %v3590_v26 = vsel %vm3505_vm4, %v3589_v55, %v3565_v57  ;;  %v3661_v61 = vmul.u32 %v3654_v37, %v3645_v43 }
 0x3a3   : > { %vm3663_vm12 = vc.u32 %v18997_v33, %v18984_v41  ;;  %v3084_v49 = vxor.u32 2147483648, %v15589_v10  ;;  %vm14754_vm13 = vcmp.lt.s32.totalorder %v14753_v6, 0  ;;  %vm19024_vm14 = vcmp.le.f32.partialorder %v3503_v0, 0.7853982 }
 0x3a4   : > { %v3665_v38 = vsel %vm3663_vm12, %v3664_v8, %v18985_v2  ;;  %v14743_v25 = vadd.s32 4294967169, %v3301_v58  ;;  %v3088_v3 = vsel %vm3086_vm8, %v3087_v29, %v15589_v10  ;;  %v9772_v7 = vsel %vm9770_vm11, %v3087_v29, %v15589_v10 }
 0x3a5   : > { %v3574_v40 = vsel %vm14754_vm13, 0, %v14753_v6  ;;  %v3666_v31 = vadd.s32 %v3665_v38, %v3661_v61  ;;  %v3085_v17 = vsel %vm3083_vm7, %v15587_v51, %v3084_v49  ;;  %v9769_v19 = vsel %vm9767_vm10, %v15587_v51, %v3084_v49 }
 0x3a6   : > { %v3575_v42 = vsub.s32 32, %v3574_v40  ;;  %v3576_v57 = vshll.u32 %v18971_v48, %v3574_v40  ;;  %v3089_v56 = vsel %vm3082_vm6, %v3085_v17, %v3088_v3  ;;  %v9773_v35 = vsel %vm9766_vm9, %v9769_v19, %v9772_v7 }
 0x3a7   : > { %v3579_v1 = vsub.s32 4294967266, %v3574_v40  ;;  %v3667_v39 = vadd.s32 536870912, %v3666_v31  ;;  %v3090_v22 = vsel %vm3080_vm5, nan, %v3089_v56  ;;  %v9774_v37 = vsel %vm3080_vm5, nan, %v9773_v35 }
 0x3a8   : > { %v3577_v30 = vshrl.u32 %v3559_v9, %v3575_v42  ;;  %v3307_v27 = vadd.s32 1, %v14743_v25  ;;  %v7650_v53 = vmul.f32 %v16714_v50, %v3090_v22  ;;  %v14378_v52 = vmul.f32 %v16721_v62, %v9774_v37 }
 0x3a9   : > { %v3580_v48 = vadd.s32 127, %v3579_v1  ;;  %v3668_v21 = vshrl.u32 %v3667_v39, 30  ;;  %v3304_v46 = vand.u32 8388607, %v3297_v44  ;;  %v3592_v55 = vsel %vm19024_vm14, 0, %v3590_v26 }
 0x3aa   : > { %vm3308_vm15 = vcmp.gt.s32.totalorder %v3307_v27, 0  ;;  %v14442_v34 = vadd.f32 %v14378_v52, %v7650_v53  ;;  %v3578_v2 = vor.u32 %v3577_v30, %v3576_v57  ;;  %v3403_v11 = vand.u32 2139095040, %v18992_v13 }
 0x3ab   : > { %v3581_v15 = vshll.u32 %v3580_v48, 23  ;;  %v3669_v36 = vshll.u32 %v3668_v21, 30  ;;  %v3309_v32 = vsel %vm3308_vm15, %v3307_v27, 0  ;;  %vm3608_vm2 = vcmp.lt.s32.totalorder %v18797_v4, 0 }
 0x3ac   : > { %14506 = vst [vmem:[%s16934_s6 + $0x98] sm:$0xff] %v14442_v34  ;;  %v3305_v43 = vor.u32 8388608, %v3304_v46  ;;  %v3311_v8 = vand.u32 31, %v3309_v32  ;;  %v3585_v9 = vcvt.s32.f32 %v3578_v2  ;;  %v19035_v6 = vand.u32 3, %v3592_v55 }
 0x3ad   : > { %v3582_v45 = vor.u32 4788187, %v3581_v15  ;;  %v3670_v0 = vsub.s32 %v3666_v31, %v3669_v36  ;;  %v3692_v10 = vsub.s32 4, %v3668_v21  ;;  %v10284_v29 = vadd.s32 3, %v3592_v55 }
 0x3ae   : > { %v3312_v61 = vsub.s32 32, %v3311_v8  ;;  %v3404_v49 = vshrl.u32 %v3403_v11, 23  ;;  %v3662_v38 = vadd.s32 %v18984_v41, %v18997_v33  ;;  %v3400_v3 = vand.u32 2147483647, %v18992_v13 }
 0x3af   : > { %v3583_v51 = vand.u32 2147483647, %v3582_v45  ;;  %v3672_v58 = vsub.s32 0, %v3670_v0  ;;  %v3314_v7 = vshll.u32 %v23185_v18, %v3311_v8  ;;  %v3317_v31 = vshll.u32 %v23186_v5, %v3311_v8 }
 0x3b0   : > { %v3315_v40 = vshrl.u32 %v23186_v5, %v3312_v61  ;;  %v19043_v17 = vshll.u32 %v3305_v43, 8  ;;  %v3318_v57 = vshrl.u32 %v23187_v16, %v3312_v61  ;;  %v3321_v56 = vshrl.u32 %v23188_v47, %v3312_v61 }
 0x3b1   : > { %v3586_v26 = vmul.f32 %v3585_v9, %v3583_v51  ;;  %v14756_v25 = vmin.u32 %v3672_v58, %v3670_v0  ;;  %v3693_v41 = vsel %vm3608_vm2, %v3692_v10, %v3668_v21  ;;  %v3310_v33 = vshrl.u32 %v3309_v32, 5 }
 0x3b2   : > { %v3320_v35 = vshll.u32 %v23187_v16, %v3311_v8  ;;  %v14747_v1 = vadd.s32 4294967169, %v3404_v49  ;;  %v3316_v37 = vor.u32 %v3315_v40, %v3314_v7  ;;  %v3319_v30 = vor.u32 %v3318_v57, %v3317_v31 }
 0x3b3   : > { %v3587_v19 = vxor.u32 2147483648, %v3586_v26  ;;  %v3674_v42 = vclz %v14756_v25  ;;  %v3323_v52 = vshll.u32 %v23188_v47, %v3311_v8  ;;  %v3324_v48 = vshrl.u32 %v23189_v63, %v3312_v61 }
 0x3b4   : > { %v3322_v53 = vor.u32 %v3321_v56, %v3320_v35  ;;  %vm19059_vm3 = vcmp.le.f32.partialorder %v3606_v59, 0.7853982  ;;  %v3326_v46 = vshll.u32 %v23189_v63, %v3311_v8  ;;  %v3327_v34 = vshrl.u32 %v23191_v28, %v3312_v61 }
 0x3b5   : > { %v3588_v39 = vsel %vm3505_vm4, %v3587_v19, %v3586_v26  ;;  %v14757_v22 = vadd.s32 4294967294, %v3674_v42  ;;  %v3313_v2 = vshrl.u32 %v23185_v18, %v3312_v61  ;;  %v3325_v15 = vor.u32 %v3324_v48, %v3323_v52 }
 0x3b6   : > { %v3591_v27 = vsel %vm19024_vm14, %v18775_v24, %v3588_v39  ;;  %v3328_v32 = vor.u32 %v3327_v34, %v3326_v46  ;;  %vm3329_vm0 = vcmp.lt.s32.totalorder %v3310_v33, 1  ;;  %vm3331_vm4 = vcmp.lt.s32.totalorder %v3310_v33, 3 }
 0x3b7   : > { %15590 = vcosq.f32 %v3591_v27  ;;  %vm14758_vm1 = vcmp.lt.s32.totalorder %v14757_v22, 0  ;;  %vm3332_vm5 = vcmp.lt.s32.totalorder %v3310_v33, 4  ;;  %v3337_v59 = vsel %vm3329_vm0, %v3316_v37, %v3319_v30 }
 0x3b8   : > { %15592 = vsinq.f32 %v3591_v27  ;;  %v3677_v60 = vsel %vm14758_vm1, 0, %v14757_v22  ;;  %v3334_v51 = vsel %vm3332_vm5, %v3322_v53, 2102212464  ;;  %v3338_v9 = vsel %vm3332_vm5, %v3325_v15, 920167782 }
 0x3b9   : > { %v3678_v36 = vsub.s32 32, %v3677_v60  ;;  %v3682_v55 = vsub.s32 4294967266, %v3677_v60  ;;  %v3679_v11 = vshll.u32 %v3670_v0, %v3677_v60  ;;  %vm3330_vm6 = vcmp.lt.s32.totalorder %v3310_v33, 2 }
 0x3ba   : > { %v3339_v8 = vsel %vm3331_vm4, %v3322_v53, %v3338_v9  ;;  %v3341_v58 = vsel %vm3329_vm0, %v3319_v30, %v3322_v53  ;;  %v3342_v10 = vsel %vm3332_vm5, %v3328_v32, 1326507024  ;;  %v3333_v26 = vsel %vm3329_vm0, %v3313_v2, %v3316_v37 }
 0x3bb   : > { %v3680_v45 = vshrl.u32 %v3662_v38, %v3678_v36  ;;  %v3683_v43 = vadd.s32 127, %v3682_v55  ;;  %v3340_v25 = vsel %vm3330_vm6, %v3337_v59, %v3339_v8  ;;  %v3335_v7 = vsel %vm3331_vm4, %v3319_v30, %v3334_v51 }
 0x3bc   : > { %v3343_v0 = vsel %vm3331_vm4, %v3325_v15, %v3342_v10  ;;  %v19071_v40 = vmul.u32.u64.low %v19043_v17, %v3340_v25  ;;  %v19072_v38 = vmul.u32.u64.high %v19043_v17, %v3340_v25, %v19071_v40  ;;  %v10285_v19 = vand.u32 3, %v10284_v29 }
 0x3bd   : > { %v3681_v49 = vor.u32 %v3680_v45, %v3679_v11  ;;  %v3684_v61 = vshll.u32 %v3683_v43, 23  ;;  %v3344_v42 = vsel %vm3330_vm6, %v3341_v58, %v3343_v0  ;;  %v3410_v57 = vadd.s32 1, %v14747_v1 }
 0x3be   : > { %vm3597_vm7 = vcmp.lt.s32.totalorder %v19035_v6, 2  ;;  %vm3598_vm8 = vcmp.eq.s32.totalorder %v19035_v6, 0  ;;  %v3695_v56 = vsel %vm19059_vm3, 0, %v3693_v41  ;;  %vm3595_vm9 = vweird.f32 %v18775_v24 }
 0x3bf   : > { %v3685_v31 = vor.u32 4788187, %v3684_v61  ;;  %v19081_v35 = vmul.u32.u64.low %v19043_v17, %v3344_v42  ;;  %v19082_v39 = vmul.u32.u64.high %v19043_v17, %v3344_v42, %v19081_v35  ;;  %v3688_v37 = vcvt.s32.f32 %v3681_v49 }
 0x3c0   : > { %v3336_v29 = vsel %vm3330_vm6, %v3333_v26, %v3335_v7  ;;  %vm3411_vm10 = vcmp.gt.s32.totalorder %v3410_v57, 0  ;;  %vm3601_vm11 = vcmp.eq.s32.totalorder %v19035_v6, 2  ;;  %v3355_v1 = vadd.s32 1, %v19072_v38 }
 0x3c1   : > { %v3686_v22 = vand.u32 2147483647, %v3685_v31  ;;  %v19090_v30 = vand.u32 8388607, %v3400_v3  ;;  %v3412_v41 = vsel %vm3411_vm10, %v3410_v57, 0  ;;  %vm10286_vm12 = vcmp.lt.s32.totalorder %v10285_v19, 2 }
 0x3c2   : > { %v10388_v53 = vadd.s32 3, %v3695_v56  ;;  %v3414_v52 = vand.u32 31, %v3412_v41  ;;  %vm10287_vm13 = vcmp.eq.s32.totalorder %v10285_v19, 0  ;;  %vm10290_vm14 = vcmp.eq.s32.totalorder %v10285_v19, 2 }
 0x3c3   : > { %v3689_v27 = vmul.f32 %v3688_v37, %v3686_v22  ;;  %v3352_v33 = vmul.u32 %v19043_v17, %v3336_v29  ;;  %vm3354_vm15 = vc.u32 %v19082_v39, %v19071_v40  ;;  %v19096_v55 = vand.u32 3, %v3695_v56  ;;  %v19133_v37 = vpop.permute.xlu0 %824 }
 0x3c4   : > { %v15591_v48 = vpop.eup %15590  ;;  %v3356_v2 = vsel %vm3354_vm15, %v3355_v1, %v19072_v38  ;;  %v3415_v15 = vsub.s32 32, %v3414_v52  ;;  %v3408_v11 = vor.u32 8388608, %v19090_v30  ;;  %v19103_v43 = vand.u32 3, %v10388_v53 }
 0x3c5   : > { %v15593_v46 = vpop.eup %15592  ;;  %v3602_v34 = vxor.u32 2147483648, %v15591_v48  ;;  %v3690_v60 = vxor.u32 2147483648, %v3689_v27  ;;  %v3357_v32 = vadd.s32 %v3356_v2, %v3352_v33  ;;  %v19123_v0 = vshrl.u32 %v3412_v41, 5 }
 0x3c6   : > { %v3599_v36 = vxor.u32 2147483648, %v15593_v46  ;;  %v3418_v61 = vshrl.u32 %v23186_v5, %v3415_v15  ;;  %v3421_v38 = vshrl.u32 %v23187_v16, %v3415_v15  ;;  %v3417_v19 = vshll.u32 %v23185_v18, %v3414_v52 }
 0x3c7   : > { %v3603_v59 = vsel %vm3601_vm11, %v3602_v34, %v15593_v46  ;;  %v3691_v17 = vsel %vm3608_vm2, %v3690_v60, %v3689_v27  ;;  %v10292_v45 = vsel %vm10290_vm14, %v3602_v34, %v15593_v46  ;;  %v3358_v58 = vadd.s32 536870912, %v3357_v32 }
 0x3c8   : > { %v3600_v51 = vsel %vm3598_vm8, %v15591_v48, %v3599_v36  ;;  %v3694_v9 = vsel %vm19059_vm3, %v18797_v4, %v3691_v17  ;;  %v10289_v8 = vsel %vm10287_vm13, %v15591_v48, %v3599_v36  ;;  %v3420_v42 = vshll.u32 %v23186_v5, %v3414_v52 }
 0x3c9   : > { %v3604_v10 = vsel %vm3597_vm7, %v3600_v51, %v3603_v59  ;;  %15594 = vcosq.f32 %v3694_v9  ;;  %v10293_v49 = vsel %vm10286_vm12, %v10289_v8, %v10292_v45  ;;  %v19119_v21 = vshrl.u32 %v3358_v58, 30 }
 0x3ca   : > { %v3605_v26 = vsel %vm3595_vm9, nan, %v3604_v10  ;;  %15596 = vsinq.f32 %v3694_v9  ;;  %v10294_v25 = vsel %vm3595_vm9, nan, %v10293_v49  ;;  %v3424_v24 = vshrl.u32 %v23188_v47, %v3415_v15  ;;  %v23250_v10 = vld [vmem:[#allocation37_spill] sm:$0xff] }
 0x3cb   : > { %v7655_v7 = vmul.f32 %v16711_v23, %v3605_v26  ;;  %v14383_v6 = vmul.f32 %v16718_v12, %v10294_v25  ;;  %v3360_v31 = vshll.u32 %v19119_v21, 30  ;;  %v3423_v56 = vshll.u32 %v23187_v16, %v3414_v52 }
 0x3cc   : > { %v3426_v35 = vshll.u32 %v23188_v47, %v3414_v52  ;;  %v3427_v22 = vshrl.u32 %v23189_v63, %v3415_v15  ;;  %v3419_v1 = vor.u32 %v3418_v61, %v3417_v19  ;;  %v3422_v30 = vor.u32 %v3421_v38, %v3420_v42 }
 0x3cd   : > { %v14447_v57 = vadd.f32 %v14383_v6, %v7655_v7  ;;  %v19135_v29 = vsub.s32 %v3357_v32, %v3360_v31  ;;  %v3425_v41 = vor.u32 %v3424_v24, %v3423_v56  ;;  %v3429_v53 = vshll.u32 %v23189_v63, %v3414_v52 }
 0x3ce   : > { %v3428_v27 = vor.u32 %v3427_v22, %v3426_v35  ;;  %v3430_v48 = vshrl.u32 %v23191_v28, %v3415_v15  ;;  %vm3704_vm2 = vcmp.eq.s32.totalorder %v19096_v55, 2  ;;  %v931_v46 = vmul.f32 %v16575_v20, %v19133_v37 }
 0x3cf   : > { %14511 = vst [vmem:[%s16934_s6 + $0xc0] sm:$0xff] %v14447_v57  ;;  %v3363_v33 = vsub.s32 0, %v19135_v29  ;;  %vm3701_vm3 = vcmp.eq.s32.totalorder %v19096_v55, 0  ;;  %vm10391_vm1 = vcmp.eq.s32.totalorder %v19103_v43, 0  ;;  %v3416_v34 = vshrl.u32 %v23185_v18, %v3415_v15 }
 0x3d0   : > { %v3431_v60 = vor.u32 %v3430_v48, %v3429_v53  ;;  %vm3432_vm0 = vcmp.lt.s32.totalorder %v19123_v0, 1  ;;  %v19148_v2 = vshll.u32 %v3408_v11, 8  ;;  %vm3700_vm4 = vcmp.lt.s32.totalorder %v19096_v55, 2 }
 0x3d1   : > { %vm10390_vm5 = vcmp.lt.s32.totalorder %v19103_v43, 2  ;;  %v14744_v52 = vmin.u32 %v3363_v33, %v19135_v29  ;;  %vm3434_vm6 = vcmp.lt.s32.totalorder %v19123_v0, 3  ;;  %vm3435_vm7 = vcmp.lt.s32.totalorder %v19123_v0, 4 }
 0x3d2   : > { %v3440_v36 = vsel %vm3432_vm0, %v3419_v1, %v3422_v30  ;;  %vm3698_vm8 = vweird.f32 %v18797_v4  ;;  %v3437_v15 = vsel %vm3435_vm7, %v3425_v41, 2102212464  ;;  %v3441_v32 = vsel %vm3435_vm7, %v3428_v27, 920167782 }
 0x3d3   : > { %v3444_v11 = vsel %vm3432_vm0, %v3422_v30, %v3425_v41  ;;  %v3445_v59 = vsel %vm3435_vm7, %v3431_v60, 1326507024  ;;  %v3365_v17 = vclz %v14744_v52  ;;  %vm3433_vm9 = vcmp.lt.s32.totalorder %v19123_v0, 2 }
 0x3d4   : > { %v3442_v45 = vsel %vm3434_vm6, %v3425_v41, %v3441_v32  ;;  %v3446_v51 = vsel %vm3434_vm6, %v3428_v27, %v3445_v59  ;;  %vm3299_vm10 = vcmp.lt.s32.totalorder %v18963_v54, 0  ;;  %v3436_v9 = vsel %vm3432_vm0, %v3416_v34, %v3419_v1 }
 0x3d5   : > { %v3443_v8 = vsel %vm3433_vm9, %v3440_v36, %v3442_v45  ;;  %v3447_v58 = vsel %vm3433_vm9, %v3444_v11, %v3446_v51  ;;  %v19173_v49 = vadd.f32 %v931_v46, %v23250_v10  ;;  %v14745_v26 = vadd.s32 4294967294, %v3365_v17  ;;  %v23253_v10 = vld [vmem:[#allocation38_spill] sm:$0xff] }
 0x3d6   : > { %v15595_v61 = vpop.eup %15594  ;;  %v3438_v25 = vsel %vm3434_vm6, %v3422_v30, %v3437_v15  ;;  %v19178_v7 = vmul.u32.u64.low %v19148_v2, %v3447_v58  ;;  %v19179_v6 = vmul.u32.u64.high %v19148_v2, %v3447_v58, %v19178_v7  ;;  %vm10394_vm11 = vcmp.eq.s32.totalorder %v19103_v43, 2 }
 0x3d7   : > { %v15597_v38 = vpop.eup %15596  ;;  %v3705_v31 = vxor.u32 2147483648, %v15595_v61  ;;  %v19183_v19 = vmul.u32.u64.low %v19148_v2, %v3443_v8  ;;  %v19184_v42 = vmul.u32.u64.high %v19148_v2, %v3443_v8, %v19183_v19  ;;  %v3353_v57 = vadd.s32 %v19071_v40, %v19082_v39 }
 0x3d8   : > { %v3702_v24 = vxor.u32 2147483648, %v15597_v38  ;;  %vm14746_vm12 = vcmp.lt.s32.totalorder %v14745_v26, 0  ;;  %v3383_v56 = vsub.s32 4, %v19119_v21  ;;  %v3439_v30 = vsel %vm3433_vm9, %v3436_v9, %v3438_v25 }
 0x3d9   : > { %v3706_v35 = vsel %vm3704_vm2, %v3705_v31, %v15597_v38  ;;  %v10396_v22 = vsel %vm10394_vm11, %v3705_v31, %v15597_v38  ;;  %v3368_v1 = vsel %vm14746_vm12, 0, %v14745_v26  ;;  %v3918_v40 = vand.u32 2139095040, %v19173_v49 }
 0x3da   : > { %v3703_v41 = vsel %vm3701_vm3, %v15595_v61, %v3702_v24  ;;  %v10393_v27 = vsel %vm10391_vm1, %v15595_v61, %v3702_v24  ;;  %v3369_v53 = vsub.s32 32, %v3368_v1  ;;  %v3370_v33 = vshll.u32 %v19135_v29, %v3368_v1 }
 0x3db   : > { %v3707_v39 = vsel %vm3700_vm4, %v3703_v41, %v3706_v35  ;;  %v10397_v48 = vsel %vm10390_vm5, %v10393_v27, %v10396_v22  ;;  %v3373_v46 = vsub.s32 4294967266, %v3368_v1  ;;  %vm3457_vm13 = vc.u32 %v19179_v6, %v19183_v19  ;;  %v19236_v22 = vpop.permute.xlu1 %820 }
 0x3dc   : > { %v3708_v0 = vsel %vm3698_vm8, nan, %v3707_v39  ;;  %v10398_v34 = vsel %vm3698_vm8, nan, %v10397_v48  ;;  %v3371_v60 = vshrl.u32 %v3353_v57, %v3369_v53  ;;  %v3458_v36 = vadd.s32 1, %v19184_v42 }
 0x3dd   : > { %v7656_v55 = vmul.f32 %v16714_v50, %v3708_v0  ;;  %v14384_v52 = vmul.f32 %v16721_v62, %v10398_v34  ;;  %v3374_v43 = vadd.s32 127, %v3373_v46  ;;  %v3384_v29 = vsel %vm3299_vm10, %v3383_v56, %v19119_v21 }
 0x3de   : > { %v3455_v15 = vmul.u32 %v19148_v2, %v3439_v30  ;;  %v932_v4 = vmul.f32 %v16578_v14, %v19133_v37  ;;  %v3919_v32 = vshrl.u32 %v3918_v40, 23  ;;  %v3372_v59 = vor.u32 %v3371_v60, %v3370_v33 }
 0x3df   : > { %v14448_v11 = vadd.f32 %v14384_v52, %v7656_v55  ;;  %v3375_v17 = vshll.u32 %v3374_v43, 23  ;;  %v3459_v45 = vsel %vm3457_vm13, %v3458_v36, %v19184_v42  ;;  %v3915_v9 = vand.u32 2147483647, %v19173_v49 }
 0x3e0   : > { %v3460_v51 = vadd.s32 %v3459_v45, %v3455_v15  ;;  %v14767_v8 = vadd.s32 4294967169, %v3919_v32  ;;  %vm19224_vm14 = vcmp.le.f32.partialorder %v3297_v44, 0.7853982  ;;  %v19231_v61 = vadd.f32 %v932_v4, %v23253_v10 }
 0x3e1   : > { %14512 = vst [vmem:[%s16934_s6 + $0xc8] sm:$0xff] %v14448_v11  ;;  %v3376_v2 = vor.u32 4788187, %v3375_v17  ;;  %v3386_v37 = vsel %vm19224_vm14, 0, %v3384_v29  ;;  %v3379_v7 = vcvt.s32.f32 %v3372_v59  ;;  %v3922_v31 = vand.u32 8388607, %v3915_v9 }
 0x3e2   : > { %v3461_v58 = vadd.s32 536870912, %v3460_v51  ;;  %v3925_v26 = vadd.s32 1, %v14767_v8  ;;  %v10076_v42 = vadd.s32 3, %v3386_v37  ;;  %v4021_v35 = vand.u32 2139095040, %v19231_v61 }
 0x3e3   : > { %v3377_v25 = vand.u32 2147483647, %v3376_v2  ;;  %vm3402_vm2 = vcmp.lt.s32.totalorder %v18992_v13, 0  ;;  %v3923_v41 = vor.u32 8388608, %v3922_v31  ;;  %v19243_v40 = vand.u32 3, %v3386_v37 }
 0x3e4   : > { %v3462_v38 = vshrl.u32 %v3461_v58, 30  ;;  %vm3926_vm15 = vcmp.gt.s32.totalorder %v3925_v26, 0  ;;  %v19245_v39 = vand.u32 3, %v10076_v42  ;;  %v19249_v48 = vmul.f32 %v16575_v20, %v19236_v22 }
 0x3e5   : > { %v3380_v44 = vmul.f32 %v3379_v7, %v3377_v25  ;;  %v3927_v24 = vsel %vm3926_vm15, %v3925_v26, 0  ;;  %v3456_v46 = vadd.s32 %v19183_v19, %v19179_v6  ;;  %v4022_v34 = vshrl.u32 %v4021_v35, 23 }
 0x3e6   : > { %v3463_v57 = vshll.u32 %v3462_v38, 30  ;;  %v3929_v56 = vand.u32 31, %v3927_v24  ;;  %v3486_v36 = vsub.s32 4, %v3462_v38  ;;  %v19261_v29 = vshll.u32 %v3923_v41, 8 }
 0x3e7   : > { %v3381_v1 = vxor.u32 2147483648, %v3380_v44  ;;  %v3928_v15 = vshrl.u32 %v3927_v24, 5  ;;  %v14771_v21 = vadd.s32 4294967169, %v4022_v34  ;;  %vm19273_vm3 = vcmp.le.f32.partialorder %v3400_v3, 0.7853982 }
 0x3e8   : > { %v19239_v30 = vsub.s32 %v3460_v51, %v3463_v57  ;;  %v3930_v27 = vsub.s32 32, %v3929_v56  ;;  %v3932_v60 = vshll.u32 %v23185_v18, %v3929_v56  ;;  %v3935_v6 = vshll.u32 %v23186_v5, %v3929_v56 }
 0x3e9   : > { %v3382_v53 = vsel %vm3299_vm10, %v3381_v1, %v3380_v44  ;;  %v3938_v19 = vshll.u32 %v23187_v16, %v3929_v56  ;;  %v3941_v59 = vshll.u32 %v23188_v47, %v3929_v56  ;;  %v3944_v8 = vshll.u32 %v23189_v63, %v3929_v56 }
 0x3ea   : > { %v3385_v33 = vsel %vm19224_vm14, %v18963_v54, %v3382_v53  ;;  %v3466_v0 = vsub.s32 0, %v19239_v30  ;;  %v3933_v55 = vshrl.u32 %v23186_v5, %v3930_v27  ;;  %v3936_v52 = vshrl.u32 %v23187_v16, %v3930_v27 }
 0x3eb   : > { %15598 = vcosq.f32 %v3385_v33  ;;  %v3939_v11 = vshrl.u32 %v23188_v47, %v3930_v27  ;;  %v3942_v17 = vshrl.u32 %v23189_v63, %v3930_v27  ;;  %v3931_v45 = vshrl.u32 %v23185_v18, %v3930_v27 }
 0x3ec   : > { %15600 = vsinq.f32 %v3385_v33  ;;  %v14748_v43 = vmin.u32 %v3466_v0, %v19239_v30  ;;  %v3934_v4 = vor.u32 %v3933_v55, %v3932_v60  ;;  %v3937_v51 = vor.u32 %v3936_v52, %v3935_v6 }
 0x3ed   : > { %v3940_v37 = vor.u32 %v3939_v11, %v3938_v19  ;;  %v3943_v58 = vor.u32 %v3942_v17, %v3941_v59  ;;  %v3945_v10 = vshrl.u32 %v23191_v28, %v3930_v27  ;;  %v3487_v25 = vsel %vm3402_vm2, %v3486_v36, %v3462_v38 }
 0x3ee   : > { %v3468_v32 = vclz %v14748_v43  ;;  %vm3947_vm1 = vcmp.lt.s32.totalorder %v3928_v15, 1  ;;  %vm3949_vm0 = vcmp.lt.s32.totalorder %v3928_v15, 3  ;;  %vm3950_vm4 = vcmp.lt.s32.totalorder %v3928_v15, 4 }
 0x3ef   : > { %vm3395_vm5 = vcmp.eq.s32.totalorder %v19243_v40, 2  ;;  %vm10082_vm7 = vcmp.eq.s32.totalorder %v19245_v39, 2  ;;  %v3946_v7 = vor.u32 %v3945_v10, %v3944_v8  ;;  %v3951_v31 = vsel %vm3947_vm1, %v3931_v45, %v3934_v4 }
 0x3f0   : > { %v14749_v2 = vadd.s32 4294967294, %v3468_v32  ;;  %v3952_v44 = vsel %vm3950_vm4, %v3940_v37, 2102212464  ;;  %vm3392_vm8 = vcmp.eq.s32.totalorder %v19243_v40, 0  ;;  %vm10079_vm9 = vcmp.eq.s32.totalorder %v19245_v39, 0 }
 0x3f1   : > { %v3953_v38 = vsel %vm3949_vm0, %v3937_v51, %v3952_v44  ;;  %v3955_v42 = vsel %vm3947_vm1, %v3934_v4, %v3937_v51  ;;  %v3956_v24 = vsel %vm3950_vm4, %v3943_v58, 920167782  ;;  %vm3391_vm10 = vcmp.lt.s32.totalorder %v19243_v40, 2 }
 0x3f2   : > { %vm14750_vm6 = vcmp.lt.s32.totalorder %v14749_v2, 0  ;;  %vm10078_vm11 = vcmp.lt.s32.totalorder %v19245_v39, 2  ;;  %vm3948_vm12 = vcmp.lt.s32.totalorder %v3928_v15, 2  ;;  %vm3389_vm13 = vweird.f32 %v18963_v54  ;;  %v23256_v15 = vld [vmem:[#allocation35_spill] sm:$0xff] }
 0x3f3   : > { %v3471_v3 = vsel %vm14750_vm6, 0, %v14749_v2  ;;  %v3954_v1 = vsel %vm3948_vm12, %v3951_v31, %v3953_v38  ;;  %v3957_v41 = vsel %vm3949_vm0, %v3940_v37, %v3956_v24  ;;  %v3959_v27 = vsel %vm3947_vm1, %v3937_v51, %v3940_v37 }
 0x3f4   : > { %v3472_v57 = vsub.s32 32, %v3471_v3  ;;  %v3473_v56 = vshll.u32 %v19239_v30, %v3471_v3  ;;  %v3476_v35 = vsub.s32 4294967266, %v3471_v3  ;;  %v3960_v53 = vsel %vm3950_vm4, %v3946_v7, 1326507024 }
 0x3f5   : > { %v3958_v34 = vsel %vm3948_vm12, %v3955_v42, %v3957_v41  ;;  %v3961_v60 = vsel %vm3949_vm0, %v3943_v58, %v3960_v53  ;;  %v4028_v43 = vadd.s32 1, %v14771_v21  ;;  %v4018_v59 = vand.u32 2147483647, %v19231_v61 }
 0x3f6   : > { %v3474_v33 = vshrl.u32 %v3456_v46, %v3472_v57  ;;  %v3477_v0 = vadd.s32 127, %v3476_v35  ;;  %v3962_v55 = vsel %vm3948_vm12, %v3959_v27, %v3961_v60  ;;  %v19308_v17 = vadd.f32 %v19249_v48, %v23256_v15 }
 0x3f7   : > { %v19297_v30 = vmul.u32.u64.low %v19261_v29, %v3958_v34  ;;  %v19298_v52 = vmul.u32.u64.high %v19261_v29, %v3958_v34, %v19297_v30  ;;  %v19302_v19 = vmul.u32.u64.low %v19261_v29, %v3962_v55  ;;  %v19303_v32 = vmul.u32.u64.high %v19261_v29, %v3962_v55, %v19302_v19 }
 0x3f8   : > { %v15599_v36 = vpop.eup %15598  ;;  %v3475_v4 = vor.u32 %v3474_v33, %v3473_v56  ;;  %v3478_v6 = vshll.u32 %v3477_v0, 23  ;;  %vm4029_vm14 = vcmp.gt.s32.totalorder %v4028_v43, 0  ;;  %v3489_v8 = vsel %vm19273_vm3, 0, %v3487_v25 }
 0x3f9   : > { %v15601_v11 = vpop.eup %15600  ;;  %v3396_v46 = vxor.u32 2147483648, %v15599_v36  ;;  %v4030_v21 = vsel %vm4029_vm14, %v4028_v43, 0  ;;  %v3970_v58 = vmul.u32 %v19261_v29, %v3954_v1  ;;  %v3973_v10 = vadd.s32 1, %v19298_v52 }
 0x3fa   : > { %v3393_v45 = vxor.u32 2147483648, %v15601_v11  ;;  %v3479_v51 = vor.u32 4788187, %v3478_v6  ;;  %v3482_v31 = vcvt.s32.f32 %v3475_v4  ;;  %vm3972_vm15 = vc.u32 %v19303_v32, %v19297_v30 }
 0x3fb   : > { %v3397_v2 = vsel %vm3395_vm5, %v3396_v46, %v15601_v11  ;;  %v10084_v37 = vsel %vm10082_vm7, %v3396_v46, %v15601_v11  ;;  %v4032_v29 = vand.u32 31, %v4030_v21  ;;  %v3974_v57 = vsel %vm3972_vm15, %v3973_v10, %v19298_v52 }
 0x3fc   : > { %v3394_v48 = vsel %vm3392_vm8, %v15599_v36, %v3393_v45  ;;  %v3480_v7 = vand.u32 2147483647, %v3479_v51  ;;  %v10081_v44 = vsel %vm10079_vm9, %v15599_v36, %v3393_v45  ;;  %v3975_v39 = vadd.s32 %v3974_v57, %v3970_v58 }
 0x3fd   : > { %v3398_v25 = vsel %vm3391_vm10, %v3394_v48, %v3397_v2  ;;  %v10085_v3 = vsel %vm10078_vm11, %v10081_v44, %v10084_v37  ;;  %v4033_v35 = vsub.s32 32, %v4032_v29  ;;  %v10180_v41 = vadd.s32 3, %v3489_v8 }
 0x3fe   : > { %v3399_v38 = vsel %vm3389_vm13, nan, %v3398_v25  ;;  %v3483_v42 = vmul.f32 %v3482_v31, %v3480_v7  ;;  %v10086_v24 = vsel %vm3389_vm13, nan, %v10085_v3  ;;  %v4025_v27 = vand.u32 8388607, %v4018_v59 }
 0x3ff   : > { %v7653_v56 = vmul.f32 %v16711_v23, %v3399_v38  ;;  %v14381_v40 = vmul.f32 %v16718_v12, %v10086_v24  ;;  %v4035_v53 = vshll.u32 %v23185_v18, %v4032_v29  ;;  %v3976_v0 = vadd.s32 536870912, %v3975_v39 }
 0x400   : > { %v3484_v1 = vxor.u32 2147483648, %v3483_v42  ;;  %v4036_v54 = vshrl.u32 %v23186_v5, %v4033_v35  ;;  %v4038_v34 = vshll.u32 %v23186_v5, %v4032_v29  ;;  %v4039_v55 = vshrl.u32 %v23187_v16, %v4033_v35 }
 0x401   : > { %v14445_v33 = vadd.f32 %v14381_v40, %v7653_v56  ;;  %v4041_v52 = vshll.u32 %v23187_v16, %v4032_v29  ;;  %v4042_v43 = vshrl.u32 %v23188_v47, %v4033_v35  ;;  %v3977_v4 = vshrl.u32 %v3976_v0, 30 }
 0x402   : > { %v3485_v60 = vsel %vm3402_vm2, %v3484_v1, %v3483_v42  ;;  %v4044_v6 = vshll.u32 %v23188_v47, %v4032_v29  ;;  %v4045_v19 = vshrl.u32 %v23189_v63, %v4033_v35  ;;  %v4031_v11 = vshrl.u32 %v4030_v21, 5 }
 0x403   : > { %v3488_v36 = vsel %vm19273_vm3, %v18992_v13, %v3485_v60  ;;  %14509 = vst [vmem:[%s16934_s6 + $0xb0] sm:$0xff] %v14445_v33  ;;  %v4037_v46 = vor.u32 %v4036_v54, %v4035_v53  ;;  %v4040_v15 = vor.u32 %v4039_v55, %v4038_v34  ;;  %v3978_v45 = vshll.u32 %v3977_v4, 30 }
 0x404   : > { %15602 = vcosq.f32 %v3488_v36  ;;  %v4043_v51 = vor.u32 %v4042_v43, %v4041_v52  ;;  %v4046_v2 = vor.u32 %v4045_v19, %v4044_v6  ;;  %v4047_v37 = vshll.u32 %v23189_v63, %v4032_v29 }
 0x405   : > { %15604 = vsinq.f32 %v3488_v36  ;;  %v4048_v58 = vshrl.u32 %v23191_v28, %v4033_v35  ;;  %v3709_v26 = vand.u32 2147483647, %v19308_v17  ;;  %v19354_v10 = vand.u32 3, %v3489_v8 }
 0x406   : > { %v19356_v48 = vand.u32 3, %v10180_v41  ;;  %v19358_v7 = vsub.s32 %v3975_v39, %v3978_v45  ;;  %v4026_v31 = vor.u32 8388608, %v4025_v27  ;;  %vm3917_vm2 = vcmp.lt.s32.totalorder %v19173_v49, 0 }
 0x407   : > { %v4049_v21 = vor.u32 %v4048_v58, %v4047_v37  ;;  %vm4050_vm3 = vcmp.lt.s32.totalorder %v4031_v11, 1  ;;  %vm4052_vm1 = vcmp.lt.s32.totalorder %v4031_v11, 3  ;;  %vm4053_vm0 = vcmp.lt.s32.totalorder %v4031_v11, 4 }
 0x408   : > { %v3981_v44 = vsub.s32 0, %v19358_v7  ;;  %v4055_v25 = vsel %vm4053_vm0, %v4043_v51, 2102212464  ;;  %v4058_v3 = vsel %vm4050_vm3, %v4037_v46, %v4040_v15  ;;  %v4059_v29 = vsel %vm4053_vm0, %v4046_v2, 920167782 }
 0x409   : > { %v4034_v38 = vshrl.u32 %v23185_v18, %v4033_v35  ;;  %v4060_v8 = vsel %vm4052_vm1, %v4043_v51, %v4059_v29  ;;  %v4062_v42 = vsel %vm4050_vm3, %v4040_v15, %v4043_v51  ;;  %v4063_v24 = vsel %vm4053_vm0, %v4049_v21, 1326507024 }
 0x40a   : > { %v14768_v57 = vmin.u32 %v3981_v44, %v19358_v7  ;;  %v4001_v56 = vsub.s32 4, %v3977_v4  ;;  %vm4051_vm4 = vcmp.lt.s32.totalorder %v4031_v11, 2  ;;  %v4066_v40 = vshll.u32 %v4026_v31, 8 }
 0x40b   : > { %v4054_v39 = vsel %vm4050_vm3, %v4034_v38, %v4037_v46  ;;  %v4056_v1 = vsel %vm4052_vm1, %v4040_v15, %v4055_v25  ;;  %v4061_v41 = vsel %vm4051_vm4, %v4058_v3, %v4060_v8  ;;  %v4064_v27 = vsel %vm4052_vm1, %v4046_v2, %v4063_v24 }
 0x40c   : > { %v3983_v53 = vclz %v14768_v57  ;;  %v4065_v33 = vsel %vm4051_vm4, %v4062_v42, %v4064_v27  ;;  %v19369_v35 = vmul.u32.u64.low %v4066_v40, %v4061_v41  ;;  %v19370_v0 = vmul.u32.u64.high %v4066_v40, %v4061_v41, %v19369_v35 }
 0x40d   : > { %vm3492_vm5 = vweird.f32 %v18992_v13  ;;  %vm3494_vm6 = vcmp.lt.s32.totalorder %v19354_v10, 2  ;;  %v19375_v54 = vmul.u32.u64.low %v4066_v40, %v4065_v33  ;;  %v19376_v34 = vmul.u32.u64.high %v4066_v40, %v4065_v33, %v19375_v54 }
 0x40e   : > { %v3712_v60 = vand.u32 2139095040, %v19308_v17  ;;  %vm3495_vm7 = vcmp.eq.s32.totalorder %v19354_v10, 0  ;;  %vm3498_vm8 = vcmp.eq.s32.totalorder %v19354_v10, 2  ;;  %v14769_v55 = vadd.s32 4294967294, %v3983_v53 }
 0x40f   : > { %v4057_v52 = vsel %vm4051_vm4, %v4054_v39, %v4056_v1  ;;  %vm10182_vm9 = vcmp.lt.s32.totalorder %v19356_v48, 2  ;;  %vm10183_vm10 = vcmp.eq.s32.totalorder %v19356_v48, 0  ;;  %vm10186_vm11 = vcmp.eq.s32.totalorder %v19356_v48, 2 }
 0x410   : > { %v3713_v43 = vshrl.u32 %v3712_v60, 23  ;;  %v3971_v6 = vadd.s32 %v19297_v30, %v19303_v32  ;;  %vm14770_vm12 = vcmp.lt.s32.totalorder %v14769_v55, 0  ;;  %v4002_v19 = vsel %vm3917_vm2, %v4001_v56, %v3977_v4 }
 0x411   : > { %v15603_v36 = vpop.eup %15602  ;;  %v4076_v46 = vadd.s32 1, %v19370_v0  ;;  %v3986_v45 = vsel %vm14770_vm12, 0, %v14769_v55  ;;  %v4073_v51 = vmul.u32 %v4066_v40, %v4057_v52  ;;  %vm4075_vm13 = vc.u32 %v19376_v34, %v19369_v35 }
 0x412   : > { %v15605_v15 = vpop.eup %15604  ;;  %v3499_v11 = vxor.u32 2147483648, %v15603_v36  ;;  %v3987_v37 = vsub.s32 32, %v3986_v45  ;;  %v3988_v58 = vshll.u32 %v19358_v7, %v3986_v45  ;;  %v3991_v31 = vsub.s32 4294967266, %v3986_v45 }
 0x413   : > { %v3496_v2 = vxor.u32 2147483648, %v15605_v15  ;;  %v4077_v4 = vsel %vm4075_vm13, %v4076_v46, %v19370_v0  ;;  %v14759_v21 = vadd.s32 4294967169, %v3713_v43  ;;  %v930_v48 = vmul.f32 %v16578_v14, %v19236_v22 }
 0x414   : > { %v3500_v30 = vsel %vm3498_vm8, %v3499_v11, %v15605_v15  ;;  %v10188_v32 = vsel %vm10186_vm11, %v3499_v11, %v15605_v15  ;;  %v3989_v3 = vshrl.u32 %v3971_v6, %v3987_v37  ;;  %v3992_v29 = vadd.s32 127, %v3991_v31 }
 0x415   : > { %v3497_v44 = vsel %vm3495_vm7, %v15603_v36, %v3496_v2  ;;  %v10185_v25 = vsel %vm10183_vm10, %v15603_v36, %v3496_v2  ;;  %v4078_v8 = vadd.s32 %v4077_v4, %v4073_v51  ;;  %v3719_v42 = vadd.s32 1, %v14759_v21 }
 0x416   : > { %v3501_v7 = vsel %vm3494_vm6, %v3497_v44, %v3500_v30  ;;  %v10189_v38 = vsel %vm10182_vm9, %v10185_v25, %v10188_v32  ;;  %v3990_v56 = vor.u32 %v3989_v3, %v3988_v58  ;;  %v3993_v40 = vshll.u32 %v3992_v29, 23 }
 0x417   : > { %v3502_v24 = vsel %vm3492_vm5, nan, %v3501_v7  ;;  %v10190_v57 = vsel %vm3492_vm5, nan, %v10189_v38  ;;  %v4079_v10 = vadd.s32 536870912, %v4078_v8  ;;  %vm3720_vm14 = vcmp.gt.s32.totalorder %v3719_v42, 0 }
 0x418   : > { %v7654_v39 = vmul.f32 %v16714_v50, %v3502_v24  ;;  %v14382_v1 = vmul.f32 %v16721_v62, %v10190_v57  ;;  %v3994_v41 = vor.u32 4788187, %v3993_v40  ;;  %v3721_v27 = vsel %vm3720_vm14, %v3719_v42, 0 }
 0x419   : > { %vm19416_vm15 = vcmp.le.f32.partialorder %v3915_v9, 0.7853982  ;;  %v19420_v33 = vshrl.u32 %v4079_v10, 30  ;;  %v3723_v0 = vand.u32 31, %v3721_v27  ;;  %v3997_v60 = vcvt.s32.f32 %v3990_v56  ;;  %v23259_v9 = vld [vmem:[#allocation36_spill] sm:$0xff] }
 0x41a   : > { %v14446_v53 = vadd.f32 %v14382_v1, %v7654_v39  ;;  %v3995_v54 = vand.u32 2147483647, %v3994_v41  ;;  %v4004_v55 = vsel %vm19416_vm15, 0, %v4002_v19  ;;  %v3716_v52 = vand.u32 8388607, %v3709_v26 }
 0x41b   : > { %v4081_v22 = vshll.u32 %v19420_v33, 30  ;;  %v3724_v43 = vsub.s32 32, %v3723_v0  ;;  %v19429_v6 = vadd.f32 %v930_v48, %v23259_v9  ;;  %v19431_v46 = vand.u32 3, %v4004_v55 }
 0x41c   : > { %14510 = vst [vmem:[%s16934_s6 + $0xb8] sm:$0xff] %v14446_v53  ;;  %v3998_v36 = vmul.f32 %v3997_v60, %v3995_v54  ;;  %v10700_v11 = vadd.s32 3, %v4004_v55  ;;  %v3717_v19 = vor.u32 8388608, %v3716_v52  ;;  %v3722_v31 = vshrl.u32 %v3721_v27, 5 }
 0x41d   : > { %v19433_v15 = vsub.s32 %v4078_v8, %v4081_v22  ;;  %v3727_v45 = vshrl.u32 %v23186_v5, %v3724_v43  ;;  %v3730_v2 = vshrl.u32 %v23187_v16, %v3724_v43  ;;  %v3733_v37 = vshrl.u32 %v23188_v47, %v3724_v43 }
 0x41e   : > { %v3999_v51 = vxor.u32 2147483648, %v3998_v36  ;;  %v3726_v30 = vshll.u32 %v23185_v18, %v3723_v0  ;;  %v3729_v32 = vshll.u32 %v23186_v5, %v3723_v0  ;;  %v3732_v21 = vshll.u32 %v23187_v16, %v3723_v0 }
 0x41f   : > { %v4084_v58 = vsub.s32 0, %v19433_v15  ;;  %v3735_v44 = vshll.u32 %v23188_v47, %v3723_v0  ;;  %v3736_v25 = vshrl.u32 %v23189_v63, %v3724_v43  ;;  %v3815_v38 = vand.u32 2139095040, %v19429_v6 }
 0x420   : > { %v4000_v4 = vsel %vm3917_vm2, %v3999_v51, %v3998_v36  ;;  %v3728_v7 = vor.u32 %v3727_v45, %v3726_v30  ;;  %v3731_v8 = vor.u32 %v3730_v2, %v3729_v32  ;;  %v3734_v42 = vor.u32 %v3733_v37, %v3732_v21 }
 0x421   : > { %v4003_v3 = vsel %vm19416_vm15, %v19173_v49, %v4000_v4  ;;  %v14772_v29 = vmin.u32 %v4084_v58, %v19433_v15  ;;  %v3737_v24 = vor.u32 %v3736_v25, %v3735_v44  ;;  %v3738_v56 = vshll.u32 %v23189_v63, %v3723_v0 }
 0x422   : > { %15606 = vcosq.f32 %v4003_v3  ;;  %v3739_v40 = vshrl.u32 %v23191_v28, %v3724_v43  ;;  %v4074_v39 = vadd.s32 %v19369_v35, %v19376_v34  ;;  %v19455_v1 = vand.u32 3, %v10700_v11 }
 0x423   : > { %15608 = vsinq.f32 %v4003_v3  ;;  %v4086_v57 = vclz %v14772_v29  ;;  %v19457_v10 = vshll.u32 %v3717_v19, 8  ;;  %v3812_v41 = vand.u32 2147483647, %v19429_v6 }
 0x424   : > { %v4104_v27 = vsub.s32 4, %v19420_v33  ;;  %v3740_v53 = vor.u32 %v3739_v40, %v3738_v56  ;;  %vm3741_vm2 = vcmp.lt.s32.totalorder %v3722_v31, 1  ;;  %vm4020_vm3 = vcmp.lt.s32.totalorder %v19231_v61, 0 }
 0x425   : > { %v14773_v48 = vadd.s32 4294967294, %v4086_v57  ;;  %v3725_v13 = vshrl.u32 %v23185_v18, %v3724_v43  ;;  %vm3743_vm1 = vcmp.lt.s32.totalorder %v3722_v31, 3  ;;  %vm3744_vm0 = vcmp.lt.s32.totalorder %v3722_v31, 4 }
 0x426   : > { %v3749_v0 = vsel %vm3741_vm2, %v3728_v7, %v3731_v8  ;;  %v3746_v35 = vsel %vm3744_vm0, %v3734_v42, 2102212464  ;;  %v3750_v34 = vsel %vm3744_vm0, %v3737_v24, 920167782  ;;  %v3816_v54 = vshrl.u32 %v3815_v38, 23 }
 0x427   : > { %vm14774_vm4 = vcmp.lt.s32.totalorder %v14773_v48, 0  ;;  %v3751_v55 = vsel %vm3743_vm1, %v3734_v42, %v3750_v34  ;;  %v3753_v52 = vsel %vm3741_vm2, %v3731_v8, %v3734_v42  ;;  %v3754_v22 = vsel %vm3744_vm0, %v3740_v53, 1326507024 }
 0x428   : > { %v4089_v60 = vsel %vm14774_vm4, 0, %v14773_v48  ;;  %vm19468_vm5 = vcmp.le.f32.partialorder %v4018_v59, 0.7853982  ;;  %vm3742_vm6 = vcmp.lt.s32.totalorder %v3722_v31, 2  ;;  %v3745_v11 = vsel %vm3741_vm2, %v3725_v13, %v3728_v7 }
 0x429   : > { %v4090_v43 = vsub.s32 32, %v4089_v60  ;;  %v4094_v9 = vsub.s32 4294967266, %v4089_v60  ;;  %vm4010_vm7 = vcmp.eq.s32.totalorder %v19431_v46, 0  ;;  %v3747_v45 = vsel %vm3743_vm1, %v3731_v8, %v3746_v35 }
 0x42a   : > { %v3752_v51 = vsel %vm3742_vm6, %v3749_v0, %v3751_v55  ;;  %v3755_v19 = vsel %vm3743_vm1, %v3737_v24, %v3754_v22  ;;  %v14763_v2 = vadd.s32 4294967169, %v3816_v54  ;;  %vm4009_vm8 = vcmp.lt.s32.totalorder %v19431_v46, 2 }
 0x42b   : > { %v4091_v59 = vshll.u32 %v19433_v15, %v4089_v60  ;;  %v4092_v37 = vshrl.u32 %v4074_v39, %v4090_v43  ;;  %v4095_v58 = vadd.s32 127, %v4094_v9  ;;  %v3756_v30 = vsel %vm3742_vm6, %v3753_v52, %v3755_v19 }
 0x42c   : > { %v19481_v32 = vmul.u32.u64.low %v19457_v10, %v3756_v30  ;;  %v19482_v4 = vmul.u32.u64.high %v19457_v10, %v3756_v30, %v19481_v32  ;;  %v19485_v21 = vmul.u32.u64.low %v19457_v10, %v3752_v51  ;;  %v19486_v44 = vmul.u32.u64.high %v19457_v10, %v3752_v51, %v19485_v21 }
 0x42d   : > { %v4093_v25 = vor.u32 %v4092_v37, %v4091_v59  ;;  %v4096_v3 = vshll.u32 %v4095_v58, 23  ;;  %v3748_v29 = vsel %vm3742_vm6, %v3745_v11, %v3747_v45  ;;  %v3822_v7 = vadd.s32 1, %v14763_v2 }
 0x42e   : > { %vm4013_vm9 = vcmp.eq.s32.totalorder %v19431_v46, 2  ;;  %vm10702_vm10 = vcmp.lt.s32.totalorder %v19455_v1, 2  ;;  %vm10703_vm11 = vcmp.eq.s32.totalorder %v19455_v1, 0  ;;  %vm10706_vm12 = vcmp.eq.s32.totalorder %v19455_v1, 2 }
 0x42f   : > { %v15607_v15 = vpop.eup %15606  ;;  %v4097_v38 = vor.u32 4788187, %v4096_v3  ;;  %v4105_v8 = vsel %vm4020_vm3, %v4104_v27, %v19420_v33  ;;  %v19499_v42 = vand.u32 8388607, %v3812_v41  ;;  %vm3823_vm13 = vcmp.gt.s32.totalorder %v3822_v7, 0 }
 0x430   : > { %v15609_v31 = vpop.eup %15608  ;;  %v4014_v24 = vxor.u32 2147483648, %v15607_v15  ;;  %v3764_v57 = vmul.u32 %v19457_v10, %v3748_v29  ;;  %vm3766_vm14 = vc.u32 %v19482_v4, %v19485_v21  ;;  %v3767_v56 = vadd.s32 1, %v19486_v44 }
 0x431   : > { %v4011_v40 = vxor.u32 2147483648, %v15609_v31  ;;  %v4098_v39 = vand.u32 2147483647, %v4097_v38  ;;  %v4100_v48 = vcvt.s32.f32 %v4093_v25  ;;  %v3824_v53 = vsel %vm3823_vm13, %v3822_v7, 0 }
 0x432   : > { %v4015_v33 = vsel %vm4013_vm9, %v4014_v24, %v15609_v31  ;;  %v4107_v27 = vsel %vm19468_vm5, 0, %v4105_v8  ;;  %v10708_v13 = vsel %vm10706_vm12, %v4014_v24, %v15609_v31  ;;  %v3768_v10 = vsel %vm3766_vm14, %v3767_v56, %v19486_v44 }
 0x433   : > { %v4012_v0 = vsel %vm4010_vm7, %v15607_v15, %v4011_v40  ;;  %v4101_v35 = vmul.f32 %v4100_v48, %v4098_v39  ;;  %v10705_v34 = vsel %vm10703_vm11, %v15607_v15, %v4011_v40  ;;  %v3769_v54 = vadd.s32 %v3768_v10, %v3764_v57 }
 0x434   : > { %vm4007_vm15 = vweird.f32 %v19173_v49  ;;  %v4016_v60 = vsel %vm4009_vm8, %v4012_v0, %v4015_v33  ;;  %v10709_v55 = vsel %vm10702_vm10, %v10705_v34, %v10708_v13  ;;  %v3826_v52 = vand.u32 31, %v3824_v53  ;;  %v833_v0 = vpop.permute.xlu0 %832 }
 0x435   : > { %v4017_v22 = vsel %vm4007_vm15, nan, %v4016_v60  ;;  %v4102_v43 = vxor.u32 2147483648, %v4101_v35  ;;  %v10710_v9 = vsel %vm4007_vm15, nan, %v10709_v55  ;;  %v3770_v11 = vadd.s32 536870912, %v3769_v54 }
 0x436   : > { %v19521_v45 = vand.u32 3, %v4107_v27  ;;  %v7659_v51 = vmul.f32 %v16711_v23, %v4017_v22  ;;  %v14387_v19 = vmul.f32 %v16718_v12, %v10710_v9  ;;  %v3827_v2 = vsub.s32 32, %v3826_v52 }
 0x437   : > { %v4103_v49 = vsel %vm4020_vm3, %v4102_v43, %v4101_v35  ;;  %v10804_v46 = vadd.s32 3, %v4107_v27  ;;  %v19527_v59 = vshrl.u32 %v3770_v11, 30  ;;  %v3820_v1 = vor.u32 8388608, %v19499_v42 }
 0x438   : > { %v4106_v37 = vsel %vm19468_vm5, %v19231_v61, %v4103_v49  ;;  %v14451_v58 = vadd.f32 %v14387_v19, %v7659_v51  ;;  %v3825_v30 = vshrl.u32 %v3824_v53, 5  ;;  %v3830_v32 = vshrl.u32 %v23186_v5, %v3827_v2 }
 0x439   : > { %15610 = vcosq.f32 %v4106_v37  ;;  %v3772_v44 = vshll.u32 %v19527_v59, 30  ;;  %v3829_v25 = vshll.u32 %v23185_v18, %v3826_v52  ;;  %v3833_v3 = vshrl.u32 %v23187_v16, %v3827_v2 }
 0x43a   : > { %15612 = vsinq.f32 %v4106_v37  ;;  %14515 = vst [vmem:[%s16934_s6 + $0xe0] sm:$0xff] %v14451_v58  ;;  %v3832_v29 = vshll.u32 %v23186_v5, %v3826_v52  ;;  %v3835_v7 = vshll.u32 %v23187_v16, %v3826_v52  ;;  %v3836_v36 = vshrl.u32 %v23188_v47, %v3827_v2 }
 0x43b   : > { %v19541_v15 = vsub.s32 %v3769_v54, %v3772_v44  ;;  %v3831_v38 = vor.u32 %v3830_v32, %v3829_v25  ;;  %v3838_v8 = vshll.u32 %v23188_v47, %v3826_v52  ;;  %v3839_v42 = vshrl.u32 %v23189_v63, %v3827_v2 }
 0x43c   : > { %v3834_v31 = vor.u32 %v3833_v3, %v3832_v29  ;;  %v3837_v24 = vor.u32 %v3836_v36, %v3835_v7  ;;  %v3841_v57 = vshll.u32 %v23189_v63, %v3826_v52  ;;  %v3842_v56 = vshrl.u32 %v23191_v28, %v3827_v2  ;;  %v23262_v7 = vld [vmem:[#allocation41_spill] sm:$0xff] }
 0x43d   : > { %v19547_v40 = vand.u32 3, %v10804_v46  ;;  %v3775_v39 = vsub.s32 0, %v19541_v15  ;;  %v3828_v48 = vshrl.u32 %v23185_v18, %v3827_v2  ;;  %v3840_v53 = vor.u32 %v3839_v42, %v3838_v8 }
 0x43e   : > { %v3843_v33 = vor.u32 %v3842_v56, %v3841_v57  ;;  %vm3844_vm2 = vcmp.lt.s32.totalorder %v3825_v30, 1  ;;  %vm3845_vm3 = vcmp.lt.s32.totalorder %v3825_v30, 2  ;;  %v3860_v27 = vshll.u32 %v3820_v1, 8 }
 0x43f   : > { %v14760_v13 = vmin.u32 %v3775_v39, %v19541_v15  ;;  %vm3846_vm1 = vcmp.lt.s32.totalorder %v3825_v30, 3  ;;  %vm3847_vm0 = vcmp.lt.s32.totalorder %v3825_v30, 4  ;;  %v3848_v10 = vsel %vm3844_vm2, %v3828_v48, %v3831_v38 }
 0x440   : > { %v3849_v35 = vsel %vm3847_vm0, %v3837_v24, 2102212464  ;;  %v3852_v34 = vsel %vm3844_vm2, %v3831_v38, %v3834_v31  ;;  %v3853_v54 = vsel %vm3847_vm0, %v3840_v53, 920167782  ;;  %v3856_v60 = vsel %vm3844_vm2, %v3834_v31, %v3837_v24 }
 0x441   : > { %vm4113_vm4 = vcmp.eq.s32.totalorder %v19521_v45, 0  ;;  %v3777_v55 = vclz %v14760_v13  ;;  %v3850_v52 = vsel %vm3846_vm1, %v3834_v31, %v3849_v35  ;;  %v3854_v22 = vsel %vm3846_vm1, %v3837_v24, %v3853_v54 }
 0x442   : > { %v3857_v43 = vsel %vm3847_vm0, %v3843_v33, 1326507024  ;;  %vm4112_vm5 = vcmp.lt.s32.totalorder %v19521_v45, 2  ;;  %vm4116_vm6 = vcmp.eq.s32.totalorder %v19521_v45, 2  ;;  %v3855_v9 = vsel %vm3845_vm3, %v3852_v34, %v3854_v22 }
 0x443   : > { %v3858_v11 = vsel %vm3846_vm1, %v3840_v53, %v3857_v43  ;;  %v935_v51 = vmul.f32 %v16575_v20, %v833_v0  ;;  %vm4110_vm7 = vweird.f32 %v19231_v61  ;;  %v14761_v19 = vadd.s32 4294967294, %v3777_v55 }
 0x444   : > { %v3859_v2 = vsel %vm3845_vm3, %v3856_v60, %v3858_v11  ;;  %v19562_v49 = vmul.u32.u64.low %v3860_v27, %v3855_v9  ;;  %v19563_v46 = vmul.u32.u64.high %v3860_v27, %v3855_v9, %v19562_v49  ;;  %vm10806_vm8 = vcmp.lt.s32.totalorder %v19547_v40, 2 }
 0x445   : > { %v3851_v1 = vsel %vm3845_vm3, %v3848_v10, %v3850_v52  ;;  %v19568_v37 = vmul.u32.u64.low %v3860_v27, %v3859_v2  ;;  %v19569_v58 = vmul.u32.u64.high %v3860_v27, %v3859_v2, %v19568_v37  ;;  %vm10807_vm9 = vcmp.eq.s32.totalorder %v19547_v40, 0 }
 0x446   : > { %vm10810_vm10 = vcmp.eq.s32.totalorder %v19547_v40, 2  ;;  %vm14762_vm11 = vcmp.lt.s32.totalorder %v14761_v19, 0  ;;  %v936_v32 = vmul.f32 %v16578_v14, %v833_v0  ;;  %v15611_v44 = vpop.eup %15610  ;;  %v3765_v25 = vadd.s32 %v19485_v21, %v19482_v4 }
 0x447   : > { %v3780_v3 = vsel %vm14762_vm11, 0, %v14761_v19  ;;  %v3795_v29 = vsub.s32 4, %v19527_v59  ;;  %v19578_v30 = vadd.f32 %v935_v51, %v23262_v7  ;;  %v15613_v36 = vpop.eup %15612  ;;  %v4117_v38 = vxor.u32 2147483648, %v15611_v44 }
 0x448   : > { %v3781_v8 = vsub.s32 32, %v3780_v3  ;;  %v3785_v42 = vsub.s32 4294967266, %v3780_v3  ;;  %v3867_v31 = vmul.u32 %v3860_v27, %v3851_v1  ;;  %v4114_v24 = vxor.u32 2147483648, %v15613_v36  ;;  %v23263_v27 = vld [vmem:[#allocation42_spill] sm:$0xff] }
 0x449   : > { %v3782_v57 = vshll.u32 %v19541_v15, %v3780_v3  ;;  %vm3869_vm12 = vc.u32 %v19569_v58, %v19562_v49  ;;  %v3870_v56 = vadd.s32 1, %v19563_v46  ;;  %v4118_v4 = vsel %vm4116_vm6, %v4117_v38, %v15613_v36 }
 0x44a   : > { %v10812_v21 = vsel %vm10810_vm10, %v4117_v38, %v15613_v36  ;;  %v3783_v39 = vshrl.u32 %v3765_v25, %v3781_v8  ;;  %v3786_v48 = vadd.s32 127, %v3785_v42  ;;  %v4115_v53 = vsel %vm4113_vm4, %v15611_v44, %v4114_v24 }
 0x44b   : > { %v10809_v33 = vsel %vm10807_vm9, %v15611_v44, %v4114_v24  ;;  %v3871_v15 = vsel %vm3869_vm12, %v3870_v56, %v19563_v46  ;;  %v19594_v13 = vadd.f32 %v936_v32, %v23263_v27  ;;  %v4119_v10 = vsel %vm4112_vm5, %v4115_v53, %v4118_v4 }
 0x44c   : > { %v10813_v0 = vsel %vm10806_vm8, %v10809_v33, %v10812_v21  ;;  %v3784_v35 = vor.u32 %v3783_v39, %v3782_v57  ;;  %v3787_v34 = vshll.u32 %v3786_v48, 23  ;;  %v4120_v54 = vsel %vm4110_vm7, nan, %v4119_v10 }
 0x44d   : > { %v10814_v60 = vsel %vm4110_vm7, nan, %v10813_v0  ;;  %v3872_v55 = vadd.s32 %v3871_v15, %v3867_v31  ;;  %v4330_v52 = vand.u32 2139095040, %v19578_v30  ;;  %v7660_v22 = vmul.f32 %v16714_v50, %v4120_v54 }
 0x44e   : > { %v14388_v45 = vmul.f32 %v16721_v62, %v10814_v60  ;;  %vm3711_vm13 = vcmp.lt.s32.totalorder %v19308_v17, 0  ;;  %v3788_v40 = vor.u32 4788187, %v3787_v34  ;;  %v4327_v11 = vand.u32 2147483647, %v19578_v30 }
 0x44f   : > { %v3796_v43 = vsel %vm3711_vm13, %v3795_v29, %v19527_v59  ;;  %v3873_v9 = vadd.s32 536870912, %v3872_v55  ;;  %v4331_v61 = vshrl.u32 %v4330_v52, 23  ;;  %v3791_v2 = vcvt.s32.f32 %v3784_v35 }
 0x450   : > { %v14452_v51 = vadd.f32 %v14388_v45, %v7660_v22  ;;  %v3789_v19 = vand.u32 2147483647, %v3788_v40  ;;  %vm19614_vm14 = vcmp.le.f32.partialorder %v3709_v26, 0.7853982  ;;  %v4433_v32 = vand.u32 2139095040, %v19594_v13 }
 0x451   : > { %v19618_v1 = vshrl.u32 %v3873_v9, 30  ;;  %v14783_v37 = vadd.s32 4294967169, %v4331_v61  ;;  %v3798_v44 = vsel %vm19614_vm14, 0, %v3796_v43  ;;  %v4334_v3 = vand.u32 8388607, %v4327_v11 }
 0x452   : > { %14516 = vst [vmem:[%s16934_s6 + $0xe8] sm:$0xff] %v14452_v51  ;;  %v3792_v59 = vmul.f32 %v3791_v2, %v3789_v19  ;;  %v4434_v7 = vshrl.u32 %v4433_v32, 23  ;;  %v10492_v38 = vadd.s32 3, %v3798_v44  ;;  %v4430_v31 = vand.u32 2147483647, %v19594_v13 }
 0x453   : > { %v3875_v25 = vshll.u32 %v19618_v1, 30  ;;  %v4337_v29 = vadd.s32 1, %v14783_v37  ;;  %v4335_v56 = vor.u32 8388608, %v4334_v3  ;;  %v19636_v39 = vand.u32 3, %v3798_v44 }
 0x454   : > { %v3793_v26 = vxor.u32 2147483648, %v3792_v59  ;;  %v14787_v4 = vadd.s32 4294967169, %v4434_v7  ;;  %v19639_v53 = vand.u32 3, %v10492_v38  ;;  %v3868_v33 = vadd.s32 %v19562_v49, %v19569_v58 }
 0x455   : > { %v19627_v36 = vsub.s32 %v3872_v55, %v3875_v25  ;;  %vm4338_vm15 = vcmp.gt.s32.totalorder %v4337_v29, 0  ;;  %v3898_v15 = vsub.s32 4, %v19618_v1  ;;  %v19646_v10 = vand.u32 8388607, %v4430_v31 }
 0x456   : > { %v3794_v8 = vsel %vm3711_vm13, %v3793_v26, %v3792_v59  ;;  %v4339_v42 = vsel %vm4338_vm15, %v4337_v29, 0  ;;  %v19648_v34 = vshll.u32 %v4335_v56, 8  ;;  %v19650_v54 = vadd.s32 1, %v14787_v4 }
 0x457   : > { %v3797_v24 = vsel %vm19614_vm14, %v19308_v17, %v3794_v8  ;;  %v3878_v57 = vsub.s32 0, %v19627_v36  ;;  %v4341_v21 = vand.u32 31, %v4339_v42  ;;  %v4340_v35 = vshrl.u32 %v4339_v42, 5 }
 0x458   : > { %15614 = vcosq.f32 %v3797_v24  ;;  %vm3807_vm2 = vcmp.eq.s32.totalorder %v19636_v39, 2  ;;  %vm10498_vm1 = vcmp.eq.s32.totalorder %v19639_v53, 2  ;;  %vm3804_vm0 = vcmp.eq.s32.totalorder %v19636_v39, 0 }
 0x459   : > { %15616 = vsinq.f32 %v3797_v24  ;;  %v14764_v48 = vmin.u32 %v3878_v57, %v19627_v36  ;;  %v4342_v27 = vsub.s32 32, %v4341_v21  ;;  %v4344_v60 = vshll.u32 %v23185_v18, %v4341_v21 }
 0x45a   : > { %v4347_v55 = vshll.u32 %v23186_v5, %v4341_v21  ;;  %v4350_v52 = vshll.u32 %v23187_v16, %v4341_v21  ;;  %v4353_v49 = vshll.u32 %v23188_v47, %v4341_v21  ;;  %v4356_v61 = vshll.u32 %v23189_v63, %v4341_v21 }
 0x45b   : > { %v3880_v0 = vclz %v14764_v48  ;;  %v4345_v22 = vshrl.u32 %v23186_v5, %v4342_v27  ;;  %v4348_v45 = vshrl.u32 %v23187_v16, %v4342_v27  ;;  %v4351_v40 = vshrl.u32 %v23188_v47, %v4342_v27 }
 0x45c   : > { %v4343_v43 = vshrl.u32 %v23185_v18, %v4342_v27  ;;  %v4354_v9 = vshrl.u32 %v23189_v63, %v4342_v27  ;;  %v4357_v51 = vshrl.u32 %v23191_v28, %v4342_v27  ;;  %vm10495_vm4 = vcmp.eq.s32.totalorder %v19639_v53, 0 }
 0x45d   : > { %v14765_v58 = vadd.s32 4294967294, %v3880_v0  ;;  %v4346_v19 = vor.u32 %v4345_v22, %v4344_v60  ;;  %v4349_v2 = vor.u32 %v4348_v45, %v4347_v55  ;;  %v4352_v46 = vor.u32 %v4351_v40, %v4350_v52 }
 0x45e   : > { %v4355_v32 = vor.u32 %v4354_v9, %v4353_v49  ;;  %v4358_v59 = vor.u32 %v4357_v51, %v4356_v61  ;;  %vm4359_vm5 = vcmp.lt.s32.totalorder %v4340_v35, 1  ;;  %vm3803_vm6 = vcmp.lt.s32.totalorder %v19636_v39, 2 }
 0x45f   : > { %vm14766_vm3 = vcmp.lt.s32.totalorder %v14765_v58, 0  ;;  %vm10494_vm7 = vcmp.lt.s32.totalorder %v19639_v53, 2  ;;  %vm4360_vm8 = vcmp.lt.s32.totalorder %v4340_v35, 2  ;;  %vm3801_vm9 = vweird.f32 %v19308_v17 }
 0x460   : > { %v3883_v37 = vsel %vm14766_vm3, 0, %v14765_v58  ;;  %vm3814_vm10 = vcmp.lt.s32.totalorder %v19429_v6, 0  ;;  %vm4361_vm11 = vcmp.lt.s32.totalorder %v4340_v35, 3  ;;  %vm4362_vm12 = vcmp.lt.s32.totalorder %v4340_v35, 4 }
 0x461   : > { %v3884_v44 = vsub.s32 32, %v3883_v37  ;;  %v3885_v25 = vshll.u32 %v19627_v36, %v3883_v37  ;;  %v3888_v3 = vsub.s32 4294967266, %v3883_v37  ;;  %v4363_v29 = vsel %vm4359_vm5, %v4343_v43, %v4346_v19 }
 0x462   : > { %v4367_v26 = vsel %vm4359_vm5, %v4346_v19, %v4349_v2  ;;  %v4364_v8 = vsel %vm4362_vm12, %v4352_v46, 2102212464  ;;  %v4368_v42 = vsel %vm4362_vm12, %v4355_v32, 920167782  ;;  %v4371_v57 = vsel %vm4359_vm5, %v4349_v2, %v4352_v46 }
 0x463   : > { %v3886_v7 = vshrl.u32 %v3868_v33, %v3884_v44  ;;  %v3889_v38 = vadd.s32 127, %v3888_v3  ;;  %v4365_v36 = vsel %vm4361_vm11, %v4349_v2, %v4364_v8  ;;  %v4369_v24 = vsel %vm4361_vm11, %v4352_v46, %v4368_v42  ;;  %v829_v44 = vpop.permute.xlu1 %828 }
 0x464   : > { %v4372_v56 = vsel %vm4362_vm12, %v4358_v59, 1326507024  ;;  %vm19679_vm13 = vcmp.le.f32.partialorder %v3812_v41, 0.7853982  ;;  %v4370_v33 = vsel %vm4360_vm8, %v4367_v26, %v4369_v24  ;;  %vm4441_vm14 = vcmp.gt.s32.totalorder %v19650_v54, 0 }
 0x465   : > { %v15615_v4 = vpop.eup %15614  ;;  %v3887_v48 = vor.u32 %v3886_v7, %v3885_v25  ;;  %v3890_v27 = vshll.u32 %v3889_v38, 23  ;;  %v4373_v55 = vsel %vm4361_vm11, %v4355_v32, %v4372_v56  ;;  %v4366_v22 = vsel %vm4360_vm8, %v4363_v29, %v4365_v36 }
 0x466   : > { %v15617_v0 = vpop.eup %15616  ;;  %v3808_v60 = vxor.u32 2147483648, %v15615_v4  ;;  %v19687_v52 = vmul.u32.u64.low %v19648_v34, %v4370_v33  ;;  %v19688_v49 = vmul.u32.u64.high %v19648_v34, %v4370_v33, %v19687_v52  ;;  %v4374_v45 = vsel %vm4360_vm8, %v4371_v57, %v4373_v55 }
 0x467   : > { %v3805_v58 = vxor.u32 2147483648, %v15617_v0  ;;  %v3891_v41 = vor.u32 4788187, %v3890_v27  ;;  %v19698_v9 = vmul.u32.u64.low %v19648_v34, %v4374_v45  ;;  %v19699_v61 = vmul.u32.u64.high %v19648_v34, %v4374_v45, %v19698_v9 }
 0x468   : > { %v3809_v40 = vsel %vm3807_vm2, %v3808_v60, %v15617_v0  ;;  %v10500_v43 = vsel %vm10498_vm1, %v3808_v60, %v15617_v0  ;;  %v3894_v2 = vcvt.s32.f32 %v3887_v48  ;;  %v4385_v32 = vadd.s32 1, %v19688_v49 }
 0x469   : > { %v3806_v51 = vsel %vm3804_vm0, %v15615_v4, %v3805_v58  ;;  %v3892_v19 = vand.u32 2147483647, %v3891_v41  ;;  %v10497_v46 = vsel %vm10495_vm4, %v15615_v4, %v3805_v58  ;;  %v4442_v59 = vsel %vm4441_vm14, %v19650_v54, 0 }
 0x46a   : > { %v3810_v35 = vsel %vm3803_vm6, %v3806_v51, %v3809_v40  ;;  %v10501_v37 = vsel %vm10494_vm7, %v10497_v46, %v10500_v43  ;;  %v3899_v39 = vsel %vm3814_vm10, %v3898_v15, %v19618_v1  ;;  %v4382_v54 = vmul.u32 %v19648_v34, %v4366_v22 }
 0x46b   : > { %v3811_v25 = vsel %vm3801_vm9, nan, %v3810_v35  ;;  %v3895_v3 = vmul.f32 %v3894_v2, %v3892_v19  ;;  %v10502_v53 = vsel %vm3801_vm9, nan, %v10501_v37  ;;  %vm4384_vm15 = vc.u32 %v19699_v61, %v19687_v52 }
 0x46c   : > { %v7657_v29 = vmul.f32 %v16711_v23, %v3811_v25  ;;  %v14385_v26 = vmul.f32 %v16718_v12, %v10502_v53  ;;  %v4386_v38 = vsel %vm4384_vm15, %v4385_v32, %v19688_v49  ;;  %v4444_v8 = vand.u32 31, %v4442_v59 }
 0x46d   : > { %v3896_v7 = vxor.u32 2147483648, %v3895_v3  ;;  %v933_v42 = vmul.f32 %v16575_v20, %v829_v44  ;;  %v3901_v17 = vsel %vm19679_vm13, 0, %v3899_v39  ;;  %v4387_v15 = vadd.s32 %v4386_v38, %v4382_v54 }
 0x46e   : > { %v14449_v1 = vadd.f32 %v14385_v26, %v7657_v29  ;;  %v4438_v36 = vor.u32 8388608, %v19646_v10  ;;  %v4443_v34 = vshrl.u32 %v4442_v59, 5  ;;  %v4445_v57 = vsub.s32 32, %v4444_v8 }
 0x46f   : > { %v3897_v24 = vsel %vm3814_vm10, %v3896_v7, %v3895_v3  ;;  %v4447_v56 = vshll.u32 %v23185_v18, %v4444_v8  ;;  %v4388_v48 = vadd.s32 536870912, %v4387_v15  ;;  %v4450_v27 = vshll.u32 %v23186_v5, %v4444_v8  ;;  %v23268_v7 = vld [vmem:[#allocation39_spill] sm:$0xff] }
 0x470   : > { %v3900_v4 = vsel %vm19679_vm13, %v19429_v6, %v3897_v24  ;;  %14513 = vst [vmem:[%s16934_s6 + $0xd0] sm:$0xff] %v14449_v1  ;;  %v4453_v33 = vshll.u32 %v23187_v16, %v4444_v8  ;;  %v4448_v10 = vshrl.u32 %v23186_v5, %v4445_v57  ;;  %v4451_v0 = vshrl.u32 %v23187_v16, %v4445_v57 }
 0x471   : > { %15618 = vcosq.f32 %v3900_v4  ;;  %v4456_v60 = vshll.u32 %v23188_v47, %v4444_v8  ;;  %v4389_v55 = vshrl.u32 %v4388_v48, 30  ;;  %v4454_v49 = vshrl.u32 %v23188_v47, %v4445_v57 }
 0x472   : > { %15620 = vsinq.f32 %v3900_v4  ;;  %v4457_v21 = vshrl.u32 %v23189_v63, %v4445_v57  ;;  %v4449_v58 = vor.u32 %v4448_v10, %v4447_v56  ;;  %v4452_v41 = vor.u32 %v4451_v0, %v4450_v27 }
 0x473   : > { %v4459_v22 = vshll.u32 %v23189_v63, %v4444_v8  ;;  %v4460_v45 = vshrl.u32 %v23191_v28, %v4445_v57  ;;  %v4390_v40 = vshll.u32 %v4389_v55, 30  ;;  %v4455_v43 = vor.u32 %v4454_v49, %v4453_v33 }
 0x474   : > { %v4458_v9 = vor.u32 %v4457_v21, %v4456_v60  ;;  %vm4462_vm2 = vcmp.lt.s32.totalorder %v4443_v34, 1  ;;  %v19748_v51 = vand.u32 3, %v3901_v17  ;;  %vm4465_vm3 = vcmp.lt.s32.totalorder %v4443_v34, 4 }
 0x475   : > { %v4461_v19 = vor.u32 %v4460_v45, %v4459_v22  ;;  %v4470_v2 = vsel %vm4462_vm2, %v4449_v58, %v4452_v41  ;;  %v10596_v46 = vadd.s32 3, %v3901_v17  ;;  %v19751_v35 = vsub.s32 %v4387_v15, %v4390_v40 }
 0x476   : > { %vm4464_vm1 = vcmp.lt.s32.totalorder %v4443_v34, 3  ;;  %v4471_v37 = vsel %vm4465_vm3, %v4458_v9, 920167782  ;;  %vm4463_vm0 = vcmp.lt.s32.totalorder %v4443_v34, 2  ;;  %v4467_v32 = vsel %vm4465_vm3, %v4455_v43, 2102212464 }
 0x477   : > { %v4472_v59 = vsel %vm4464_vm1, %v4455_v43, %v4471_v37  ;;  %v19755_v25 = vmul.f32 %v16578_v14, %v829_v44  ;;  %vm4329_vm4 = vcmp.lt.s32.totalorder %v19578_v30, 0  ;;  %v4393_v3 = vsub.s32 0, %v19751_v35 }
 0x478   : > { %v4446_v39 = vshrl.u32 %v23185_v18, %v4445_v57  ;;  %v4473_v53 = vsel %vm4463_vm0, %v4470_v2, %v4472_v59  ;;  %v4474_v29 = vsel %vm4462_vm2, %v4452_v41, %v4455_v43  ;;  %v4475_v26 = vsel %vm4465_vm3, %v4461_v19, 1326507024 }
 0x479   : > { %v4478_v54 = vshll.u32 %v4438_v36, 8  ;;  %v19763_v38 = vadd.f32 %v933_v42, %v23268_v7  ;;  %vm3906_vm5 = vcmp.lt.s32.totalorder %v19748_v51, 2  ;;  %v10597_v8 = vand.u32 3, %v10596_v46 }
 0x47a   : > { %v14784_v44 = vmin.u32 %v4393_v3, %v19751_v35  ;;  %v4466_v17 = vsel %vm4462_vm2, %v4446_v39, %v4449_v58  ;;  %v4468_v1 = vsel %vm4464_vm1, %v4452_v41, %v4467_v32  ;;  %vm3904_vm6 = vweird.f32 %v19429_v6  ;;  %v23271_v6 = vld [vmem:[#allocation40_spill] sm:$0xff] }
 0x47b   : > { %v4413_v15 = vsub.s32 4, %v4389_v55  ;;  %v4476_v24 = vsel %vm4464_vm1, %v4458_v9, %v4475_v26  ;;  %v19771_v57 = vmul.u32.u64.low %v4478_v54, %v4473_v53  ;;  %v19772_v56 = vmul.u32.u64.high %v4478_v54, %v4473_v53, %v19771_v57 }
 0x47c   : > { %vm3907_vm7 = vcmp.eq.s32.totalorder %v19748_v51, 0  ;;  %vm3910_vm8 = vcmp.eq.s32.totalorder %v19748_v51, 2  ;;  %v4395_v42 = vclz %v14784_v44  ;;  %v4477_v36 = vsel %vm4463_vm0, %v4474_v29, %v4476_v24 }
 0x47d   : > { %vm19780_vm9 = vcmp.le.f32.partialorder %v4327_v11, 0.7853982  ;;  %v4469_v48 = vsel %vm4463_vm0, %v4466_v17, %v4468_v1  ;;  %v19785_v27 = vmul.u32.u64.low %v4478_v54, %v4477_v36  ;;  %v19786_v33 = vmul.u32.u64.high %v4478_v54, %v4477_v36, %v19785_v27 }
 0x47e   : > { %v4124_v10 = vand.u32 2139095040, %v19763_v38  ;;  %v15619_v0 = vpop.eup %15618  ;;  %vm10598_vm10 = vcmp.lt.s32.totalorder %v10597_v8, 2  ;;  %vm10599_vm11 = vcmp.eq.s32.totalorder %v10597_v8, 0  ;;  %vm10602_vm12 = vcmp.eq.s32.totalorder %v10597_v8, 2 }
 0x47f   : > { %v14785_v60 = vadd.s32 4294967294, %v4395_v42  ;;  %v15621_v49 = vpop.eup %15620  ;;  %v3911_v21 = vxor.u32 2147483648, %v15619_v0  ;;  %v4383_v11 = vadd.s32 %v19687_v52, %v19699_v61  ;;  %v4414_v58 = vsel %vm4329_vm4, %v4413_v15, %v4389_v55 }
 0x480   : > { %v4121_v34 = vand.u32 2147483647, %v19763_v38  ;;  %v3908_v41 = vxor.u32 2147483648, %v15621_v49  ;;  %v4485_v22 = vmul.u32 %v4478_v54, %v4469_v48  ;;  %v4488_v45 = vadd.s32 1, %v19772_v56 }
 0x481   : > { %vm14786_vm13 = vcmp.lt.s32.totalorder %v14785_v60, 0  ;;  %v3912_v40 = vsel %vm3910_vm8, %v3911_v21, %v15621_v49  ;;  %v10604_v43 = vsel %vm10602_vm12, %v3911_v21, %v15621_v49  ;;  %v4125_v19 = vshrl.u32 %v4124_v10, 23 }
 0x482   : > { %v4398_v9 = vsel %vm14786_vm13, 0, %v14785_v60  ;;  %v3909_v2 = vsel %vm3907_vm7, %v15619_v0, %v3908_v41  ;;  %v10601_v52 = vsel %vm10599_vm11, %v15619_v0, %v3908_v41  ;;  %vm4487_vm14 = vc.u32 %v19786_v33, %v19771_v57 }
 0x483   : > { %v4399_v61 = vsub.s32 32, %v4398_v9  ;;  %v4400_v55 = vshll.u32 %v19751_v35, %v4398_v9  ;;  %v3913_v46 = vsel %vm3906_vm5, %v3909_v2, %v3912_v40  ;;  %v10605_v37 = vsel %vm10598_vm10, %v10601_v52, %v10604_v43 }
 0x484   : > { %v4403_v32 = vsub.s32 4294967266, %v4398_v9  ;;  %v3914_v59 = vsel %vm3904_vm6, nan, %v3913_v46  ;;  %v10606_v3 = vsel %vm3904_vm6, nan, %v10605_v37  ;;  %v4489_v53 = vsel %vm4487_vm14, %v4488_v45, %v19772_v56 }
 0x485   : > { %v4401_v39 = vshrl.u32 %v4383_v11, %v4399_v61  ;;  %v7658_v35 = vmul.f32 %v16714_v50, %v3914_v59  ;;  %v14386_v51 = vmul.f32 %v16721_v62, %v10606_v3  ;;  %v4490_v26 = vadd.s32 %v4489_v53, %v4485_v22 }
 0x486   : > { %v4404_v29 = vadd.s32 127, %v4403_v32  ;;  %v4416_v54 = vsel %vm19780_vm9, 0, %v4414_v58  ;;  %v14775_v7 = vadd.s32 4294967169, %v4125_v19  ;;  %v19817_v15 = vadd.f32 %v19755_v25, %v23271_v6 }
 0x487   : > { %v14450_v8 = vadd.f32 %v14386_v51, %v7658_v35  ;;  %v4402_v44 = vor.u32 %v4401_v39, %v4400_v55  ;;  %v4491_v1 = vadd.s32 536870912, %v4490_v26  ;;  %v4128_v36 = vand.u32 8388607, %v4121_v34 }
 0x488   : > { %v4405_v17 = vshll.u32 %v4404_v29, 23  ;;  %v4131_v24 = vadd.s32 1, %v14775_v7  ;;  %v11116_v48 = vadd.s32 3, %v4416_v54  ;;  %v4227_v21 = vand.u32 2139095040, %v19817_v15 }
 0x489   : > { %14514 = vst [vmem:[%s16934_s6 + $0xd8] sm:$0xff] %v14450_v8  ;;  %v19820_v42 = vshrl.u32 %v4491_v1, 30  ;;  %v4409_v10 = vcvt.s32.f32 %v4402_v44  ;;  %v4129_v58 = vor.u32 8388608, %v4128_v36  ;;  %v19828_v45 = vand.u32 3, %v4416_v54 }
 0x48a   : > { %v4406_v56 = vor.u32 4788187, %v4405_v17  ;;  %vm4132_vm15 = vcmp.gt.s32.totalorder %v4131_v24, 0  ;;  %v19831_v43 = vand.u32 3, %v11116_v48  ;;  %v4486_v9 = vadd.s32 %v19771_v57, %v19786_v33 }
 0x48b   : > { %v4493_v0 = vshll.u32 %v19820_v42, 30  ;;  %v4133_v60 = vsel %vm4132_vm15, %v4131_v24, 0  ;;  %v4224_v2 = vand.u32 2147483647, %v19817_v15  ;;  %v4228_v52 = vshrl.u32 %v4227_v21, 23 }
 0x48c   : > { %v4407_v27 = vand.u32 2147483647, %v4406_v56  ;;  %v4135_v49 = vand.u32 31, %v4133_v60  ;;  %v4516_v46 = vsub.s32 4, %v19820_v42  ;;  %v19841_v37 = vshll.u32 %v4129_v58, 8 }
 0x48d   : > { %v19826_v11 = vsub.s32 %v4490_v26, %v4493_v0  ;;  %v4134_v59 = vshrl.u32 %v4133_v60, 5  ;;  %v14779_v29 = vadd.s32 4294967169, %v4228_v52  ;;  %vm4432_vm2 = vcmp.lt.s32.totalorder %v19594_v13, 0 }
 0x48e   : > { %v4410_v25 = vmul.f32 %v4409_v10, %v4407_v27  ;;  %v4136_v41 = vsub.s32 32, %v4135_v49  ;;  %v4138_v57 = vshll.u32 %v23185_v18, %v4135_v49  ;;  %v4144_v39 = vshll.u32 %v23187_v16, %v4135_v49 }
 0x48f   : > { %v4496_v40 = vsub.s32 0, %v19826_v11  ;;  %v4141_v51 = vshll.u32 %v23186_v5, %v4135_v49  ;;  %v4147_v4 = vshll.u32 %v23188_v47, %v4135_v49  ;;  %v4150_v17 = vshll.u32 %v23189_v63, %v4135_v49 }
 0x490   : > { %v4411_v22 = vxor.u32 2147483648, %v4410_v25  ;;  %v4139_v19 = vshrl.u32 %v23186_v5, %v4136_v41  ;;  %v4142_v33 = vshrl.u32 %v23187_v16, %v4136_v41  ;;  %v4145_v53 = vshrl.u32 %v23188_v47, %v4136_v41 }
 0x491   : > { %v14788_v55 = vmin.u32 %v4496_v40, %v19826_v11  ;;  %v4148_v7 = vshrl.u32 %v23189_v63, %v4136_v41  ;;  %v4137_v8 = vshrl.u32 %v23185_v18, %v4136_v41  ;;  %v4151_v1 = vshrl.u32 %v23191_v28, %v4136_v41 }
 0x492   : > { %v4412_v61 = vsel %vm4329_vm4, %v4411_v22, %v4410_v25  ;;  %v4140_v35 = vor.u32 %v4139_v19, %v4138_v57  ;;  %v4146_v54 = vor.u32 %v4145_v53, %v4144_v39  ;;  %v4143_v44 = vor.u32 %v4142_v33, %v4141_v51 }
 0x493   : > { %v4415_v32 = vsel %vm19780_vm9, %v19578_v30, %v4412_v61  ;;  %v4498_v3 = vclz %v14788_v55  ;;  %v4149_v6 = vor.u32 %v4148_v7, %v4147_v4  ;;  %vm4153_vm1 = vcmp.lt.s32.totalorder %v4134_v59, 1 }
 0x494   : > { %15622 = vcosq.f32 %v4415_v32  ;;  %vm4154_vm0 = vcmp.lt.s32.totalorder %v4134_v59, 2  ;;  %v4152_v56 = vor.u32 %v4151_v1, %v4150_v17  ;;  %vm4155_vm4 = vcmp.lt.s32.totalorder %v4134_v59, 3 }
 0x495   : > { %15624 = vsinq.f32 %v4415_v32  ;;  %v14789_v26 = vadd.s32 4294967294, %v4498_v3  ;;  %vm4156_vm5 = vcmp.lt.s32.totalorder %v4134_v59, 4  ;;  %v4157_v27 = vsel %vm4153_vm1, %v4137_v8, %v4140_v35  ;;  %v841_v32 = vpop.permute.xlu0 %840 }
 0x496   : > { %v4158_v10 = vsel %vm4156_vm5, %v4146_v54, 2102212464  ;;  %vm4425_vm6 = vcmp.eq.s32.totalorder %v19828_v45, 2  ;;  %v4161_v60 = vsel %vm4153_vm1, %v4140_v35, %v4143_v44  ;;  %v4162_v49 = vsel %vm4156_vm5, %v4149_v6, 920167782 }
 0x497   : > { %vm14790_vm3 = vcmp.lt.s32.totalorder %v14789_v26, 0  ;;  %v4165_v21 = vsel %vm4153_vm1, %v4143_v44, %v4146_v54  ;;  %vm4422_vm7 = vcmp.eq.s32.totalorder %v19828_v45, 0  ;;  %vm19862_vm8 = vcmp.le.f32.partialorder %v4430_v31, 0.7853982 }
 0x498   : > { %v4501_v24 = vsel %vm14790_vm3, 0, %v14789_v26  ;;  %v4163_v22 = vsel %vm4155_vm4, %v4146_v54, %v4162_v49  ;;  %v4166_v40 = vsel %vm4156_vm5, %v4152_v56, 1326507024  ;;  %vm4421_vm9 = vcmp.lt.s32.totalorder %v19828_v45, 2 }
 0x499   : > { %v4502_v36 = vsub.s32 32, %v4501_v24  ;;  %v4506_v48 = vsub.s32 4294967266, %v4501_v24  ;;  %v4503_v0 = vshll.u32 %v19826_v11, %v4501_v24  ;;  %vm11118_vm10 = vcmp.lt.s32.totalorder %v19831_v43, 2 }
 0x49a   : > { %v4159_v11 = vsel %vm4155_vm4, %v4143_v44, %v4158_v10  ;;  %v4164_v19 = vsel %vm4154_vm0, %v4161_v60, %v4163_v22  ;;  %v4167_v52 = vsel %vm4155_vm4, %v4149_v6, %v4166_v40  ;;  %v4234_v61 = vadd.s32 1, %v14779_v29 }
 0x49b   : > { %v4504_v58 = vshrl.u32 %v4486_v9, %v4502_v36  ;;  %v4507_v41 = vadd.s32 127, %v4506_v48  ;;  %vm4419_vm11 = vweird.f32 %v19578_v30  ;;  %vm11119_vm12 = vcmp.eq.s32.totalorder %v19831_v43, 0 }
 0x49c   : > { %v4168_v9 = vsel %vm4154_vm0, %v4165_v21, %v4167_v52  ;;  %v19880_v3 = vmul.u32.u64.low %v19841_v37, %v4164_v19  ;;  %v19881_v39 = vmul.u32.u64.high %v19841_v37, %v4164_v19, %v19880_v3  ;;  %vm11122_vm13 = vcmp.eq.s32.totalorder %v19831_v43, 2 }
 0x49d   : > { %v4505_v31 = vor.u32 %v4504_v58, %v4503_v0  ;;  %v4508_v55 = vshll.u32 %v4507_v41, 23  ;;  %v19876_v57 = vmul.u32.u64.low %v19841_v37, %v4168_v9  ;;  %v19877_v33 = vmul.u32.u64.high %v19841_v37, %v4168_v9, %v19876_v57 }
 0x49e   : > { %v4160_v35 = vsel %vm4154_vm0, %v4157_v27, %v4159_v11  ;;  %vm4235_vm14 = vcmp.gt.s32.totalorder %v4234_v61, 0  ;;  %v4517_v29 = vsel %vm4432_vm2, %v4516_v46, %v19820_v42  ;;  %v19893_v26 = vand.u32 8388607, %v4224_v2 }
 0x49f   : > { %v4509_v53 = vor.u32 4788187, %v4508_v55  ;;  %v4236_v54 = vsel %vm4235_vm14, %v4234_v61, 0  ;;  %v939_v4 = vmul.f32 %v16575_v20, %v841_v32  ;;  %v4512_v59 = vcvt.s32.f32 %v4505_v31 }
 0x4a0   : > { %v4238_v17 = vand.u32 31, %v4236_v54  ;;  %v4176_v6 = vmul.u32 %v19841_v37, %v4160_v35  ;;  %vm4178_vm15 = vc.u32 %v19877_v33, %v19880_v3  ;;  %v4179_v42 = vadd.s32 1, %v19881_v39 }
 0x4a1   : > { %v15623_v51 = vpop.eup %15622  ;;  %v4510_v44 = vand.u32 2147483647, %v4509_v53  ;;  %v4519_v27 = vsel %vm19862_vm8, 0, %v4517_v29  ;;  %v19921_v40 = vmul.f32 %v16578_v14, %v841_v32  ;;  %v4237_v61 = vshrl.u32 %v4236_v54, 5 }
 0x4a2   : > { %v15625_v7 = vpop.eup %15624  ;;  %v4426_v8 = vxor.u32 2147483648, %v15623_v51  ;;  %v4239_v36 = vsub.s32 32, %v4238_v17  ;;  %v4180_v10 = vsel %vm4178_vm15, %v4179_v42, %v19881_v39  ;;  %v11220_v30 = vadd.s32 3, %v4519_v27 }
 0x4a3   : > { %v4423_v1 = vxor.u32 2147483648, %v15625_v7  ;;  %v4513_v24 = vmul.f32 %v4512_v59, %v4510_v44  ;;  %v4181_v21 = vadd.s32 %v4180_v10, %v4176_v6  ;;  %v4241_v32 = vshll.u32 %v23185_v18, %v4238_v17 }
 0x4a4   : > { %v4427_v46 = vsel %vm4425_vm6, %v4426_v8, %v15625_v7  ;;  %v11124_v56 = vsel %vm11122_vm13, %v4426_v8, %v15625_v7  ;;  %v4242_v22 = vshrl.u32 %v23186_v5, %v4239_v36  ;;  %v4245_v31 = vshrl.u32 %v23187_v16, %v4239_v36 }
 0x4a5   : > { %v4424_v48 = vsel %vm4422_vm7, %v15623_v51, %v4423_v1  ;;  %v11121_v37 = vsel %vm11119_vm12, %v15623_v51, %v4423_v1  ;;  %v4514_v60 = vxor.u32 2147483648, %v4513_v24  ;;  %v4182_v19 = vadd.s32 536870912, %v4181_v21 }
 0x4a6   : > { %v4428_v0 = vsel %vm4421_vm9, %v4424_v48, %v4427_v46  ;;  %v11125_v49 = vsel %vm11118_vm10, %v11121_v37, %v11124_v56  ;;  %v4244_v57 = vshll.u32 %v23186_v5, %v4238_v17  ;;  %v4247_v39 = vshll.u32 %v23187_v16, %v4238_v17  ;;  %v23274_v56 = vld [vmem:[#allocation45_spill] sm:$0xff] }
 0x4a7   : > { %v4429_v58 = vsel %vm4419_vm11, nan, %v4428_v0  ;;  %v11126_v41 = vsel %vm4419_vm11, nan, %v11125_v49  ;;  %v4515_v45 = vsel %vm4432_vm2, %v4514_v60, %v4513_v24  ;;  %v19931_v9 = vshrl.u32 %v4182_v19, 30 }
 0x4a8   : > { %v7663_v11 = vmul.f32 %v16711_v23, %v4429_v58  ;;  %v14391_v43 = vmul.f32 %v16718_v12, %v11126_v41  ;;  %v4518_v52 = vsel %vm19862_vm8, %v19594_v13, %v4515_v45  ;;  %v4248_v53 = vshrl.u32 %v23188_v47, %v4239_v36 }
 0x4a9   : > { %15626 = vcosq.f32 %v4518_v52  ;;  %v4184_v25 = vshll.u32 %v19931_v9, 30  ;;  %v4243_v35 = vor.u32 %v4242_v22, %v4241_v32  ;;  %v4250_v51 = vshll.u32 %v23188_v47, %v4238_v17 }
 0x4aa   : > { %v14455_v55 = vadd.f32 %v14391_v43, %v7663_v11  ;;  %15628 = vsinq.f32 %v4518_v52  ;;  %v4251_v29 = vshrl.u32 %v23189_v63, %v4239_v36  ;;  %v4246_v54 = vor.u32 %v4245_v31, %v4244_v57 }
 0x4ab   : > { %v4249_v7 = vor.u32 %v4248_v53, %v4247_v39  ;;  %v4253_v8 = vshll.u32 %v23189_v63, %v4238_v17  ;;  %v4254_v44 = vshrl.u32 %v23191_v28, %v4239_v36  ;;  %v19943_v59 = vand.u32 3, %v4519_v27  ;;  %v23275_v39 = vld [vmem:[#allocation46_spill] sm:$0xff] }
 0x4ac   : > { %14519 = vst [vmem:[%s16934_s6 + $0x100] sm:$0xff] %v14455_v55  ;;  %v19945_v1 = vsub.s32 %v4181_v21, %v4184_v25  ;;  %v4232_v6 = vor.u32 8388608, %v19893_v26  ;;  %v4252_v42 = vor.u32 %v4251_v29, %v4250_v51  ;;  %v11221_v46 = vand.u32 3, %v11220_v30 }
 0x4ad   : > { %v4255_v24 = vor.u32 %v4254_v44, %v4253_v8  ;;  %vm4259_vm2 = vcmp.lt.s32.totalorder %v4237_v61, 4  ;;  %v19949_v48 = vadd.f32 %v939_v4, %v23274_v56  ;;  %v4240_v10 = vshrl.u32 %v23185_v18, %v4239_v36 }
 0x4ae   : > { %v4187_v37 = vsub.s32 0, %v19945_v1  ;;  %vm4256_vm3 = vcmp.lt.s32.totalorder %v4237_v61, 1  ;;  %v4261_v17 = vsel %vm4259_vm2, %v4249_v7, 2102212464  ;;  %v4265_v27 = vsel %vm4259_vm2, %v4252_v42, 920167782 }
 0x4af   : > { %v4264_v0 = vsel %vm4256_vm3, %v4243_v35, %v4246_v54  ;;  %v4268_v60 = vsel %vm4256_vm3, %v4246_v54, %v4249_v7  ;;  %v4269_v49 = vsel %vm4259_vm2, %v4255_v24, 1326507024  ;;  %vm4525_vm1 = vcmp.eq.s32.totalorder %v19943_v59, 0 }
 0x4b0   : > { %v14776_v26 = vmin.u32 %v4187_v37, %v19945_v1  ;;  %vm4257_vm0 = vcmp.lt.s32.totalorder %v4237_v61, 2  ;;  %vm4258_vm4 = vcmp.lt.s32.totalorder %v4237_v61, 3  ;;  %v4272_v21 = vshll.u32 %v4232_v6, 8 }
 0x4b1   : > { %vm4524_vm5 = vcmp.lt.s32.totalorder %v19943_v59, 2  ;;  %v4260_v4 = vsel %vm4256_vm3, %v4240_v10, %v4243_v35  ;;  %v4262_v58 = vsel %vm4258_vm4, %v4246_v54, %v4261_v17  ;;  %v4266_v41 = vsel %vm4258_vm4, %v4249_v7, %v4265_v27 }
 0x4b2   : > { %v4270_v22 = vsel %vm4258_vm4, %v4252_v42, %v4269_v49  ;;  %vm4522_vm6 = vweird.f32 %v19594_v13  ;;  %v4189_v36 = vclz %v14776_v26  ;;  %v4267_v45 = vsel %vm4257_vm0, %v4264_v0, %v4266_v41 }
 0x4b3   : > { %v4271_v11 = vsel %vm4257_vm0, %v4268_v60, %v4270_v22  ;;  %v4742_v43 = vand.u32 2139095040, %v19949_v48  ;;  %vm4123_vm7 = vcmp.lt.s32.totalorder %v19763_v38, 0  ;;  %vm4528_vm8 = vcmp.eq.s32.totalorder %v19943_v59, 2 }
 0x4b4   : > { %v19961_v19 = vmul.u32.u64.low %v4272_v21, %v4271_v11  ;;  %v19962_v52 = vmul.u32.u64.high %v4272_v21, %v4271_v11, %v19961_v19  ;;  %v19964_v30 = vmul.u32.u64.low %v4272_v21, %v4267_v45  ;;  %v19965_v31 = vmul.u32.u64.high %v4272_v21, %v4267_v45, %v19964_v30 }
 0x4b5   : > { %vm11222_vm9 = vcmp.lt.s32.totalorder %v11221_v46, 2  ;;  %v14777_v55 = vadd.s32 4294967294, %v4189_v36  ;;  %v4263_v32 = vsel %vm4257_vm0, %v4260_v4, %v4262_v58  ;;  %vm11223_vm10 = vcmp.eq.s32.totalorder %v11221_v46, 0 }
 0x4b6   : > { %v15627_v57 = vpop.eup %15626  ;;  %vm11226_vm11 = vcmp.eq.s32.totalorder %v11221_v46, 2  ;;  %v19972_v53 = vadd.f32 %v19921_v40, %v23275_v39  ;;  %v4739_v25 = vand.u32 2147483647, %v19949_v48  ;;  %v4177_v29 = vadd.s32 %v19880_v3, %v19877_v33 }
 0x4b7   : > { %v15629_v35 = vpop.eup %15628  ;;  %v4529_v51 = vxor.u32 2147483648, %v15627_v57  ;;  %vm14778_vm12 = vcmp.lt.s32.totalorder %v14777_v55, 0  ;;  %v4207_v54 = vsub.s32 4, %v19931_v9  ;;  %v4279_v8 = vmul.u32 %v4272_v21, %v4263_v32 }
 0x4b8   : > { %v4526_v7 = vxor.u32 2147483648, %v15629_v35  ;;  %v4192_v61 = vsel %vm14778_vm12, 0, %v14777_v55  ;;  %v4743_v44 = vshrl.u32 %v4742_v43, 23  ;;  %vm4281_vm13 = vc.u32 %v19962_v52, %v19964_v30 }
 0x4b9   : > { %v4530_v6 = vsel %vm4528_vm8, %v4529_v51, %v15629_v35  ;;  %v11228_v42 = vsel %vm11226_vm11, %v4529_v51, %v15629_v35  ;;  %v4193_v40 = vsub.s32 32, %v4192_v61  ;;  %v4197_v3 = vsub.s32 4294967266, %v4192_v61 }
 0x4ba   : > { %v4527_v24 = vsel %vm4525_vm1, %v15627_v57, %v4526_v7  ;;  %v11225_v33 = vsel %vm11223_vm10, %v15627_v57, %v4526_v7  ;;  %v4282_v56 = vadd.s32 1, %v19965_v31  ;;  %v4194_v17 = vshll.u32 %v19945_v1, %v4192_v61 }
 0x4bb   : > { %v4531_v37 = vsel %vm4524_vm5, %v4527_v24, %v4530_v6  ;;  %v11229_v10 = vsel %vm11222_vm9, %v11225_v33, %v11228_v42  ;;  %v4195_v0 = vshrl.u32 %v4177_v29, %v4193_v40  ;;  %v4198_v49 = vadd.s32 127, %v4197_v3 }
 0x4bc   : > { %v4532_v27 = vsel %vm4522_vm6, nan, %v4531_v37  ;;  %v11230_v60 = vsel %vm4522_vm6, nan, %v11229_v10  ;;  %v4283_v26 = vsel %vm4281_vm13, %v4282_v56, %v19965_v31  ;;  %v4208_v46 = vsel %vm4123_vm7, %v4207_v54, %v19931_v9 }
 0x4bd   : > { %v7664_v21 = vmul.f32 %v16714_v50, %v4532_v27  ;;  %v14392_v59 = vmul.f32 %v16721_v62, %v11230_v60  ;;  %v4284_v1 = vadd.s32 %v4283_v26, %v4279_v8  ;;  %v4196_v4 = vor.u32 %v4195_v0, %v4194_v17 }
 0x4be   : > { %v4199_v58 = vshll.u32 %v4198_v49, 23  ;;  %v14799_v41 = vadd.s32 4294967169, %v4743_v44  ;;  %vm20002_vm14 = vcmp.le.f32.partialorder %v4121_v34, 0.7853982  ;;  %v4845_v45 = vand.u32 2139095040, %v19972_v53 }
 0x4bf   : > { %v14456_v22 = vadd.f32 %v14392_v59, %v7664_v21  ;;  %v4285_v36 = vadd.s32 536870912, %v4284_v1  ;;  %v4210_v43 = vsel %vm20002_vm14, 0, %v4208_v46  ;;  %v4746_v9 = vand.u32 8388607, %v4739_v25 }
 0x4c0   : > { %v4200_v11 = vor.u32 4788187, %v4199_v58  ;;  %v4749_v19 = vadd.s32 1, %v14799_v41  ;;  %v4203_v32 = vcvt.s32.f32 %v4196_v4  ;;  %v10908_v57 = vadd.s32 3, %v4210_v43 }
 0x4c1   : > { %14520 = vst [vmem:[%s16934_s6 + $0x108] sm:$0xff] %v14456_v22  ;;  %v4286_v31 = vshrl.u32 %v4285_v36, 30  ;;  %v4846_v35 = vshrl.u32 %v4845_v45, 23  ;;  %v4747_v29 = vor.u32 8388608, %v4746_v9  ;;  %v4842_v61 = vand.u32 2147483647, %v19972_v53 }
 0x4c2   : > { %v4201_v55 = vand.u32 2147483647, %v4200_v11  ;;  %vm4750_vm15 = vcmp.gt.s32.totalorder %v4749_v19, 0  ;;  %vm4226_vm2 = vcmp.lt.s32.totalorder %v19817_v15, 0  ;;  %v20016_v42 = vand.u32 3, %v4210_v43 }
 0x4c3   : > { %v4287_v34 = vshll.u32 %v4286_v31, 30  ;;  %v4751_v39 = vsel %vm4750_vm15, %v4749_v19, 0  ;;  %v4310_v44 = vsub.s32 4, %v4286_v31  ;;  %v20019_v24 = vand.u32 3, %v10908_v57 }
 0x4c4   : > { %v4204_v51 = vmul.f32 %v4203_v32, %v4201_v55  ;;  %v4753_v54 = vand.u32 31, %v4751_v39  ;;  %v14803_v33 = vadd.s32 4294967169, %v4846_v35  ;;  %v4280_v56 = vadd.s32 %v19964_v30, %v19962_v52 }
 0x4c5   : > { %v20012_v7 = vsub.s32 %v4284_v1, %v4287_v34  ;;  %v20026_v10 = vshll.u32 %v4747_v29, 8  ;;  %v20035_v60 = vand.u32 8388607, %v4842_v61  ;;  %v20039_v52 = vsel %vm4226_vm2, %v4310_v44, %v4286_v31 }
 0x4c6   : > { %v4205_v8 = vxor.u32 2147483648, %v4204_v51  ;;  %v4754_v6 = vsub.s32 32, %v4753_v54  ;;  %v4752_v30 = vshrl.u32 %v4751_v39, 5  ;;  %v4756_v49 = vshll.u32 %v23185_v18, %v4753_v54 }
 0x4c7   : > { %v4290_v40 = vsub.s32 0, %v20012_v7  ;;  %v4759_v21 = vshll.u32 %v23186_v5, %v4753_v54  ;;  %v4852_v59 = vadd.s32 1, %v14803_v33  ;;  %v4762_v4 = vshll.u32 %v23187_v16, %v4753_v54 }
 0x4c8   : > { %v4206_v3 = vsel %vm4123_vm7, %v4205_v8, %v4204_v51  ;;  %v4757_v37 = vshrl.u32 %v23186_v5, %v4754_v6  ;;  %v4760_v27 = vshrl.u32 %v23187_v16, %v4754_v6  ;;  %v4755_v46 = vshrl.u32 %v23185_v18, %v4754_v6 }
 0x4c9   : > { %v4209_v17 = vsel %vm20002_vm14, %v19763_v38, %v4206_v3  ;;  %v14780_v0 = vmin.u32 %v4290_v40, %v20012_v7  ;;  %v4763_v58 = vshrl.u32 %v23188_v47, %v4754_v6  ;;  %v4765_v13 = vshll.u32 %v23188_v47, %v4753_v54 }
 0x4ca   : > { %15630 = vcosq.f32 %v4209_v17  ;;  %v4758_v1 = vor.u32 %v4757_v37, %v4756_v49  ;;  %v4761_v22 = vor.u32 %v4760_v27, %v4759_v21  ;;  %v4766_v36 = vshrl.u32 %v23189_v63, %v4754_v6  ;;  %v20074_v37 = vpop.permute.xlu1 %836 }
 0x4cb   : > { %15632 = vsinq.f32 %v4209_v17  ;;  %v4292_v26 = vclz %v14780_v0  ;;  %v4764_v45 = vor.u32 %v4763_v58, %v4762_v4  ;;  %v4768_v11 = vshll.u32 %v23189_v63, %v4753_v54 }
 0x4cc   : > { %v4769_v43 = vshrl.u32 %v23191_v28, %v4754_v6  ;;  %vm4771_vm3 = vcmp.lt.s32.totalorder %v4752_v30, 1  ;;  %vm20052_vm1 = vcmp.le.f32.partialorder %v4224_v2, 0.7853982  ;;  %v4767_v19 = vor.u32 %v4766_v36, %v4765_v13 }
 0x4cd   : > { %v14781_v41 = vadd.s32 4294967294, %v4292_v26  ;;  %vm4772_vm4 = vcmp.lt.s32.totalorder %v4752_v30, 2  ;;  %vm4774_vm5 = vcmp.lt.s32.totalorder %v4752_v30, 4  ;;  %vm4773_vm6 = vcmp.lt.s32.totalorder %v4752_v30, 3 }
 0x4ce   : > { %v4770_v55 = vor.u32 %v4769_v43, %v4768_v11  ;;  %v4776_v32 = vsel %vm4774_vm5, %v4764_v45, 2102212464  ;;  %vm4219_vm7 = vcmp.eq.s32.totalorder %v20016_v42, 2  ;;  %v4775_v39 = vsel %vm4771_vm3, %v4755_v46, %v4758_v1 }
 0x4cf   : > { %vm14782_vm0 = vcmp.lt.s32.totalorder %v14781_v41, 0  ;;  %v4777_v2 = vsel %vm4773_vm6, %v4761_v22, %v4776_v32  ;;  %vm4216_vm8 = vcmp.eq.s32.totalorder %v20016_v42, 0  ;;  %vm10911_vm9 = vcmp.eq.s32.totalorder %v20019_v24, 0 }
 0x4d0   : > { %v4295_v31 = vsel %vm14782_vm0, 0, %v14781_v41  ;;  %v4779_v51 = vsel %vm4771_vm3, %v4758_v1, %v4761_v22  ;;  %v4780_v29 = vsel %vm4774_vm5, %v4767_v19, 920167782  ;;  %v4783_v54 = vsel %vm4771_vm3, %v4761_v22, %v4764_v45 }
 0x4d1   : > { %v4296_v34 = vsub.s32 32, %v4295_v31  ;;  %v4300_v57 = vsub.s32 4294967266, %v4295_v31  ;;  %v4297_v35 = vshll.u32 %v20012_v7, %v4295_v31  ;;  %vm4215_vm10 = vcmp.lt.s32.totalorder %v20016_v42, 2 }
 0x4d2   : > { %vm10910_vm11 = vcmp.lt.s32.totalorder %v20019_v24, 2  ;;  %v4781_v6 = vsel %vm4773_vm6, %v4764_v45, %v4780_v29  ;;  %v4784_v40 = vsel %vm4774_vm5, %v4770_v55, 1326507024  ;;  %vm4213_vm12 = vweird.f32 %v19763_v38 }
 0x4d3   : > { %v4298_v8 = vshrl.u32 %v4280_v56, %v4296_v34  ;;  %v4301_v44 = vadd.s32 127, %v4300_v57  ;;  %v4778_v7 = vsel %vm4772_vm4, %v4775_v39, %v4777_v2  ;;  %v4782_v33 = vsel %vm4772_vm4, %v4779_v51, %v4781_v6 }
 0x4d4   : > { %v4785_v3 = vsel %vm4773_vm6, %v4767_v19, %v4784_v40  ;;  %vm4853_vm13 = vcmp.gt.s32.totalorder %v4852_v59, 0  ;;  %v20082_v21 = vmul.u32.u64.low %v20026_v10, %v4782_v33  ;;  %v20083_v46 = vmul.u32.u64.high %v20026_v10, %v4782_v33, %v20082_v21 }
 0x4d5   : > { %v4299_v17 = vor.u32 %v4298_v8, %v4297_v35  ;;  %v4302_v56 = vshll.u32 %v4301_v44, 23  ;;  %v4786_v0 = vsel %vm4772_vm4, %v4783_v54, %v4785_v3  ;;  %v4854_v27 = vsel %vm4853_vm13, %v4852_v59, 0 }
 0x4d6   : > { %v20078_v49 = vmul.u32.u64.low %v20026_v10, %v4786_v0  ;;  %v20079_v26 = vmul.u32.u64.high %v20026_v10, %v4786_v0, %v20078_v49  ;;  %vm10914_vm14 = vcmp.eq.s32.totalorder %v20019_v24, 2  ;;  %v4856_v58 = vand.u32 31, %v4854_v27 }
 0x4d7   : > { %v15631_v1 = vpop.eup %15630  ;;  %v4303_v4 = vor.u32 4788187, %v4302_v56  ;;  %v937_v41 = vmul.f32 %v16575_v20, %v20074_v37  ;;  %v4313_v59 = vsel %vm20052_vm1, 0, %v20039_v52  ;;  %v4794_v13 = vmul.u32 %v20026_v10, %v4778_v7 }
 0x4d8   : > { %v15633_v30 = vpop.eup %15632  ;;  %v4220_v22 = vxor.u32 2147483648, %v15631_v1  ;;  %v4850_v36 = vor.u32 8388608, %v20035_v60  ;;  %v4306_v43 = vcvt.s32.f32 %v4299_v17  ;;  %v4857_v19 = vsub.s32 32, %v4856_v58 }
 0x4d9   : > { %v4217_v45 = vxor.u32 2147483648, %v15633_v30  ;;  %v4304_v11 = vand.u32 2147483647, %v4303_v4  ;;  %vm4796_vm15 = vc.u32 %v20079_v26, %v20082_v21  ;;  %v20098_v32 = vshrl.u32 %v4854_v27, 5 }
 0x4da   : > { %v4221_v31 = vsel %vm4219_vm7, %v4220_v22, %v15633_v30  ;;  %v10916_v55 = vsel %vm10914_vm14, %v4220_v22, %v15633_v30  ;;  %v4797_v60 = vadd.s32 1, %v20083_v46  ;;  %v4859_v2 = vshll.u32 %v23185_v18, %v4856_v58 }
 0x4db   : > { %v4218_v52 = vsel %vm4216_vm8, %v15631_v1, %v4217_v45  ;;  %v4307_v34 = vmul.f32 %v4306_v43, %v4304_v11  ;;  %v10913_v10 = vsel %vm10911_vm9, %v15631_v1, %v4217_v45  ;;  %v4860_v35 = vshrl.u32 %v23186_v5, %v4857_v19  ;;  %v23280_v45 = vld [vmem:[#allocation43_spill] sm:$0xff] }
 0x4dc   : > { %v4222_v57 = vsel %vm4215_vm10, %v4218_v52, %v4221_v31  ;;  %v10917_v39 = vsel %vm10910_vm11, %v10913_v10, %v10916_v55  ;;  %v4798_v8 = vsel %vm4796_vm15, %v4797_v60, %v20083_v46  ;;  %v4862_v7 = vshll.u32 %v23186_v5, %v4856_v58 }
 0x4dd   : > { %v4223_v51 = vsel %vm4213_vm12, nan, %v4222_v57  ;;  %v4308_v29 = vxor.u32 2147483648, %v4307_v34  ;;  %v10918_v54 = vsel %vm4213_vm12, nan, %v10917_v39  ;;  %v4799_v24 = vadd.s32 %v4798_v8, %v4794_v13 }
 0x4de   : > { %v7661_v44 = vmul.f32 %v16711_v23, %v4223_v51  ;;  %v14389_v42 = vmul.f32 %v16718_v12, %v10918_v54  ;;  %v4861_v6 = vor.u32 %v4860_v35, %v4859_v2  ;;  %v4863_v33 = vshrl.u32 %v23187_v16, %v4857_v19 }
 0x4df   : > { %v4309_v40 = vsel %vm4226_vm2, %v4308_v29, %v4307_v34  ;;  %v4865_v3 = vshll.u32 %v23187_v16, %v4856_v58  ;;  %v4800_v56 = vadd.s32 536870912, %v4799_v24  ;;  %v4866_v0 = vshrl.u32 %v23188_v47, %v4857_v19 }
 0x4e0   : > { %v4312_v38 = vsel %vm20052_vm1, %v19817_v15, %v4309_v40  ;;  %v14453_v17 = vadd.f32 %v14389_v42, %v7661_v44  ;;  %v4864_v27 = vor.u32 %v4863_v33, %v4862_v7  ;;  %v4868_v49 = vshll.u32 %v23188_v47, %v4856_v58 }
 0x4e1   : > { %15634 = vcosq.f32 %v4312_v38  ;;  %v4869_v46 = vshrl.u32 %v23189_v63, %v4857_v19  ;;  %v4801_v1 = vshrl.u32 %v4800_v56, 30  ;;  %v4867_v4 = vor.u32 %v4866_v0, %v4865_v3 }
 0x4e2   : > { %15636 = vsinq.f32 %v4312_v38  ;;  %14517 = vst [vmem:[%s16934_s6 + $0xf0] sm:$0xff] %v14453_v17  ;;  %v20130_v30 = vshll.u32 %v4850_v36, 8  ;;  %v4871_v9 = vshll.u32 %v23189_v63, %v4856_v58  ;;  %v4872_v13 = vshrl.u32 %v23191_v28, %v4857_v19 }
 0x4e3   : > { %v4870_v22 = vor.u32 %v4869_v46, %v4868_v49  ;;  %v20135_v11 = vadd.f32 %v937_v41, %v23280_v45  ;;  %v11012_v43 = vadd.s32 3, %v4313_v59  ;;  %v4802_v31 = vshll.u32 %v4801_v1, 30 }
 0x4e4   : > { %vm4874_vm2 = vcmp.lt.s32.totalorder %v20098_v32, 1  ;;  %vm4877_vm3 = vcmp.lt.s32.totalorder %v20098_v32, 4  ;;  %v4858_v55 = vshrl.u32 %v23185_v18, %v4857_v19  ;;  %v4873_v52 = vor.u32 %v4872_v13, %v4871_v9 }
 0x4e5   : > { %v4879_v36 = vsel %vm4877_vm3, %v4867_v4, 2102212464  ;;  %v4882_v58 = vsel %vm4874_vm2, %v4861_v6, %v4864_v27  ;;  %v4317_v34 = vand.u32 3, %v4313_v59  ;;  %v20144_v10 = vsub.s32 %v4799_v24, %v4802_v31 }
 0x4e6   : > { %vm4876_vm1 = vcmp.lt.s32.totalorder %v20098_v32, 3  ;;  %v4883_v41 = vsel %vm4877_vm3, %v4870_v22, 920167782  ;;  %vm4875_vm0 = vcmp.lt.s32.totalorder %v20098_v32, 2  ;;  %v4878_v19 = vsel %vm4874_vm2, %v4858_v55, %v4861_v6 }
 0x4e7   : > { %v4880_v60 = vsel %vm4876_vm1, %v4864_v27, %v4879_v36  ;;  %v4884_v57 = vsel %vm4876_vm1, %v4867_v4, %v4883_v41  ;;  %v4805_v39 = vsub.s32 0, %v20144_v10  ;;  %v4886_v59 = vsel %vm4874_vm2, %v4864_v27, %v4867_v4 }
 0x4e8   : > { %v4885_v2 = vsel %vm4875_vm0, %v4882_v58, %v4884_v57  ;;  %v4887_v35 = vsel %vm4877_vm3, %v4873_v52, 1326507024  ;;  %v11013_v51 = vand.u32 3, %v11012_v43  ;;  %vm4741_vm4 = vcmp.lt.s32.totalorder %v19949_v48, 0 }
 0x4e9   : > { %v4888_v29 = vsel %vm4876_vm1, %v4870_v22, %v4887_v35  ;;  %v20160_v54 = vmul.u32.u64.low %v20130_v30, %v4885_v2  ;;  %v20161_v8 = vmul.u32.u64.high %v20130_v30, %v4885_v2, %v20160_v54  ;;  %v14800_v44 = vmin.u32 %v4805_v39, %v20144_v10  ;;  %v23283_v35 = vld [vmem:[#allocation44_spill] sm:$0xff] }
 0x4ea   : > { %v938_v42 = vmul.f32 %v16578_v14, %v20074_v37  ;;  %vm4316_vm5 = vweird.f32 %v19817_v15  ;;  %vm4318_vm6 = vcmp.lt.s32.totalorder %v4317_v34, 2  ;;  %v4825_v24 = vsub.s32 4, %v4801_v1 }
 0x4eb   : > { %v4881_v6 = vsel %vm4875_vm0, %v4878_v19, %v4880_v60  ;;  %v4889_v40 = vsel %vm4875_vm0, %v4886_v59, %v4888_v29  ;;  %v4807_v7 = vclz %v14800_v44  ;;  %v4536_v38 = vand.u32 2139095040, %v20135_v11 }
 0x4ec   : > { %v20174_v33 = vmul.u32.u64.low %v20130_v30, %v4889_v40  ;;  %v20175_v3 = vmul.u32.u64.high %v20130_v30, %v4889_v40, %v20174_v33  ;;  %vm4319_vm7 = vcmp.eq.s32.totalorder %v4317_v34, 0  ;;  %vm4322_vm8 = vcmp.eq.s32.totalorder %v4317_v34, 2 }
 0x4ed   : > { %vm11014_vm9 = vcmp.lt.s32.totalorder %v11013_v51, 2  ;;  %vm20180_vm10 = vcmp.le.f32.partialorder %v4739_v25, 0.7853982  ;;  %v4900_v17 = vadd.s32 1, %v20161_v8  ;;  %vm11015_vm11 = vcmp.eq.s32.totalorder %v11013_v51, 0 }
 0x4ee   : > { %v15635_v32 = vpop.eup %15634  ;;  %vm11018_vm12 = vcmp.eq.s32.totalorder %v11013_v51, 2  ;;  %v14801_v56 = vadd.s32 4294967294, %v4807_v7  ;;  %v4533_v0 = vand.u32 2147483647, %v20135_v11  ;;  %v4795_v46 = vadd.s32 %v20082_v21, %v20079_v26 }
 0x4ef   : > { %v15637_v27 = vpop.eup %15636  ;;  %v4323_v49 = vxor.u32 2147483648, %v15635_v32  ;;  %v4826_v4 = vsel %vm4741_vm4, %v4825_v24, %v4801_v1  ;;  %v4897_v25 = vmul.u32 %v20130_v30, %v4881_v6  ;;  %vm4899_vm14 = vc.u32 %v20175_v3, %v20160_v54 }
 0x4f0   : > { %v4320_v22 = vxor.u32 2147483648, %v15637_v27  ;;  %vm14802_vm13 = vcmp.lt.s32.totalorder %v14801_v56, 0  ;;  %v4537_v9 = vshrl.u32 %v4536_v38, 23  ;;  %v4901_v31 = vsel %vm4899_vm14, %v4900_v17, %v20161_v8 }
 0x4f1   : > { %v4324_v13 = vsel %vm4322_vm8, %v4323_v49, %v15637_v27  ;;  %v11020_v45 = vsel %vm11018_vm12, %v4323_v49, %v15637_v27  ;;  %v4810_v43 = vsel %vm14802_vm13, 0, %v14801_v56  ;;  %v4902_v58 = vadd.s32 %v4901_v31, %v4897_v25 }
 0x4f2   : > { %v4321_v55 = vsel %vm4319_vm7, %v15635_v32, %v4320_v22  ;;  %v11017_v26 = vsel %vm11015_vm11, %v15635_v32, %v4320_v22  ;;  %v4811_v21 = vsub.s32 32, %v4810_v43  ;;  %v4812_v1 = vshll.u32 %v20144_v10, %v4810_v43 }
 0x4f3   : > { %v4325_v30 = vsel %vm4318_vm6, %v4321_v55, %v4324_v13  ;;  %v11021_v52 = vsel %vm11014_vm9, %v11017_v26, %v11020_v45  ;;  %v4815_v36 = vsub.s32 4294967266, %v4810_v43  ;;  %v14791_v57 = vadd.s32 4294967169, %v4537_v9 }
 0x4f4   : > { %v4326_v41 = vsel %vm4316_vm5, nan, %v4325_v30  ;;  %v11022_v19 = vsel %vm4316_vm5, nan, %v11021_v52  ;;  %v4813_v60 = vshrl.u32 %v4795_v46, %v4811_v21  ;;  %v4903_v34 = vadd.s32 536870912, %v4902_v58 }
 0x4f5   : > { %v7662_v39 = vmul.f32 %v16714_v50, %v4326_v41  ;;  %v14390_v2 = vmul.f32 %v16721_v62, %v11022_v19  ;;  %v4816_v10 = vadd.s32 127, %v4815_v36  ;;  %v4828_v59 = vsel %vm20180_vm10, 0, %v4826_v4 }
 0x4f6   : > { %v20209_v51 = vadd.f32 %v938_v42, %v23283_v35  ;;  %v4540_v29 = vand.u32 8388607, %v4533_v0  ;;  %v4543_v15 = vadd.s32 1, %v14791_v57  ;;  %v4814_v44 = vor.u32 %v4813_v60, %v4812_v1 }
 0x4f7   : > { %v14454_v8 = vadd.f32 %v14390_v2, %v7662_v39  ;;  %v4817_v24 = vshll.u32 %v4816_v10, 23  ;;  %v4904_v6 = vshrl.u32 %v4903_v34, 30  ;;  %v11532_v38 = vadd.s32 3, %v4828_v59 }
 0x4f8   : > { %vm4544_vm15 = vcmp.gt.s32.totalorder %v4543_v15, 0  ;;  %v4541_v17 = vor.u32 8388608, %v4540_v29  ;;  %v4821_v27 = vcvt.s32.f32 %v4814_v44  ;;  %v4636_v49 = vand.u32 2147483647, %v20209_v51 }
 0x4f9   : > { %14518 = vst [vmem:[%s16934_s6 + $0xf8] sm:$0xff] %v14454_v8  ;;  %v4818_v40 = vor.u32 4788187, %v4817_v24  ;;  %v4905_v7 = vshll.u32 %v4904_v6, 30  ;;  %v4545_v33 = vsel %vm4544_vm15, %v4543_v15, 0  ;;  %vm4844_vm2 = vcmp.lt.s32.totalorder %v19972_v53, 0 }
 0x4fa   : > { %v4547_v32 = vand.u32 31, %v4545_v33  ;;  %v20218_v25 = vand.u32 3, %v4828_v59  ;;  %v4639_v9 = vand.u32 2139095040, %v20209_v51  ;;  %v4898_v13 = vadd.s32 %v20160_v54, %v20175_v3 }
 0x4fb   : > { %v4819_v56 = vand.u32 2147483647, %v4818_v40  ;;  %v20214_v42 = vsub.s32 %v4902_v58, %v4905_v7  ;;  %v20224_v45 = vand.u32 3, %v11532_v38  ;;  %v20229_v21 = vshll.u32 %v4541_v17, 8 }
 0x4fc   : > { %v4548_v46 = vsub.s32 32, %v4547_v32  ;;  %v20233_v1 = vand.u32 8388607, %v4636_v49  ;;  %v4928_v30 = vsub.s32 4, %v4904_v6  ;;  %v4546_v52 = vshrl.u32 %v4545_v33, 5 }
 0x4fd   : > { %v4822_v4 = vmul.f32 %v4821_v27, %v4819_v56  ;;  %v4908_v22 = vsub.s32 0, %v20214_v42  ;;  %v4550_v36 = vshll.u32 %v23185_v18, %v4547_v32  ;;  %v4553_v54 = vshll.u32 %v23186_v5, %v4547_v32 }
 0x4fe   : > { %v4551_v43 = vshrl.u32 %v23186_v5, %v4548_v46  ;;  %v4554_v31 = vshrl.u32 %v23187_v16, %v4548_v46  ;;  %v4557_v41 = vshrl.u32 %v23188_v47, %v4548_v46  ;;  %v4640_v19 = vshrl.u32 %v4639_v9, 23 }
 0x4ff   : > { %v4823_v55 = vxor.u32 2147483648, %v4822_v4  ;;  %v14804_v26 = vmin.u32 %v4908_v22, %v20214_v42  ;;  %v4556_v2 = vshll.u32 %v23187_v16, %v4547_v32  ;;  %v4559_v34 = vshll.u32 %v23188_v47, %v4547_v32 }
 0x500   : > { %v4552_v57 = vor.u32 %v4551_v43, %v4550_v36  ;;  %v4555_v39 = vor.u32 %v4554_v31, %v4553_v54  ;;  %v4560_v59 = vshrl.u32 %v23189_v63, %v4548_v46  ;;  %v4562_v29 = vshll.u32 %v23189_v63, %v4547_v32 }
 0x501   : > { %v4824_v3 = vsel %vm4741_vm4, %v4823_v55, %v4822_v4  ;;  %v4910_v58 = vclz %v14804_v26  ;;  %v4558_v35 = vor.u32 %v4557_v41, %v4556_v2  ;;  %v4563_v15 = vshrl.u32 %v23191_v28, %v4548_v46 }
 0x502   : > { %v4827_v60 = vsel %vm20180_vm10, %v19949_v48, %v4824_v3  ;;  %v4929_v37 = vsel %vm4844_vm2, %v4928_v30, %v4904_v6  ;;  %v4549_v8 = vshrl.u32 %v23185_v18, %v4548_v46  ;;  %v4561_v44 = vor.u32 %v4560_v59, %v4559_v34 }
 0x503   : > { %15638 = vcosq.f32 %v4827_v60  ;;  %v14805_v10 = vadd.s32 4294967294, %v4910_v58  ;;  %vm20253_vm1 = vcmp.le.f32.partialorder %v4842_v61, 0.7853982  ;;  %v4564_v7 = vor.u32 %v4563_v15, %v4562_v29 }
 0x504   : > { %15640 = vsinq.f32 %v4827_v60  ;;  %vm4565_vm0 = vcmp.lt.s32.totalorder %v4546_v52, 1  ;;  %vm4566_vm4 = vcmp.lt.s32.totalorder %v4546_v52, 2  ;;  %vm4567_vm5 = vcmp.lt.s32.totalorder %v4546_v52, 3 }
 0x505   : > { %vm14806_vm3 = vcmp.lt.s32.totalorder %v14805_v10, 0  ;;  %vm4568_vm6 = vcmp.lt.s32.totalorder %v4546_v52, 4  ;;  %v4573_v32 = vsel %vm4565_vm0, %v4552_v57, %v4555_v39  ;;  %v4577_v4 = vsel %vm4565_vm0, %v4555_v39, %v4558_v35 }
 0x506   : > { %v4913_v40 = vsel %vm14806_vm3, 0, %v14805_v10  ;;  %v4570_v6 = vsel %vm4568_vm6, %v4558_v35, 2102212464  ;;  %v4574_v56 = vsel %vm4568_vm6, %v4561_v44, 920167782  ;;  %v4569_v22 = vsel %vm4565_vm0, %v4549_v8, %v4552_v57 }
 0x507   : > { %v4914_v33 = vsub.s32 32, %v4913_v40  ;;  %v4918_v38 = vsub.s32 4294967266, %v4913_v40  ;;  %v4915_v17 = vshll.u32 %v20214_v42, %v4913_v40  ;;  %v4575_v61 = vsel %vm4567_vm5, %v4558_v35, %v4574_v56 }
 0x508   : > { %v4576_v9 = vsel %vm4566_vm4, %v4573_v32, %v4575_v61  ;;  %v4578_v43 = vsel %vm4568_vm6, %v4564_v7, 1326507024  ;;  %v14795_v31 = vadd.s32 4294967169, %v4640_v19  ;;  %vm4834_vm7 = vcmp.eq.s32.totalorder %v20218_v25, 0 }
 0x509   : > { %v4916_v27 = vshrl.u32 %v4898_v13, %v4914_v33  ;;  %v4919_v46 = vadd.s32 127, %v4918_v38  ;;  %v4571_v30 = vsel %vm4567_vm5, %v4555_v39, %v4570_v6  ;;  %v4579_v42 = vsel %vm4567_vm5, %v4561_v44, %v4578_v43 }
 0x50a   : > { %vm4833_vm8 = vcmp.lt.s32.totalorder %v20218_v25, 2  ;;  %v4580_v13 = vsel %vm4566_vm4, %v4577_v4, %v4579_v42  ;;  %v20266_v36 = vmul.u32.u64.low %v20229_v21, %v4576_v9  ;;  %v20267_v54 = vmul.u32.u64.high %v20229_v21, %v4576_v9, %v20266_v36 }
 0x50b   : > { %v4917_v55 = vor.u32 %v4916_v27, %v4915_v17  ;;  %v4920_v26 = vshll.u32 %v4919_v46, 23  ;;  %v4646_v3 = vadd.s32 1, %v14795_v31  ;;  %vm4831_vm9 = vweird.f32 %v19949_v48 }
 0x50c   : > { %vm4837_vm10 = vcmp.eq.s32.totalorder %v20218_v25, 2  ;;  %v20273_v41 = vmul.u32.u64.low %v20229_v21, %v4580_v13  ;;  %v20274_v19 = vmul.u32.u64.high %v20229_v21, %v4580_v13, %v20273_v41  ;;  %vm11534_vm11 = vcmp.lt.s32.totalorder %v20224_v45, 2 }
 0x50d   : > { %v4921_v58 = vor.u32 4788187, %v4920_v26  ;;  %vm11535_vm12 = vcmp.eq.s32.totalorder %v20224_v45, 0  ;;  %v4572_v60 = vsel %vm4566_vm4, %v4569_v22, %v4571_v30  ;;  %vm4647_vm13 = vcmp.gt.s32.totalorder %v4646_v3, 0 }
 0x50e   : > { %v4924_v39 = vcvt.s32.f32 %v4917_v55  ;;  %v4931_v2 = vsel %vm20253_vm1, 0, %v4929_v37  ;;  %v4648_v10 = vsel %vm4647_vm13, %v4646_v3, 0  ;;  %vm11538_vm14 = vcmp.eq.s32.totalorder %v20224_v45, 2 }
 0x50f   : > { %v4922_v57 = vand.u32 2147483647, %v4921_v58  ;;  %v4591_v59 = vadd.s32 1, %v20267_v54  ;;  %v4644_v35 = vor.u32 8388608, %v20233_v1  ;;  %v4650_v29 = vand.u32 31, %v4648_v10 }
 0x510   : > { %v15639_v34 = vpop.eup %15638  ;;  %v4588_v52 = vmul.u32 %v20229_v21, %v4572_v60  ;;  %vm4590_vm15 = vc.u32 %v20274_v19, %v20266_v36  ;;  %v20287_v7 = vand.u32 3, %v4931_v2  ;;  %v11636_v56 = vadd.s32 3, %v4931_v2 }
 0x511   : > { %v15641_v15 = vpop.eup %15640  ;;  %v4838_v8 = vxor.u32 2147483648, %v15639_v34  ;;  %v4925_v44 = vmul.f32 %v4924_v39, %v4922_v57  ;;  %v4592_v37 = vsel %vm4590_vm15, %v4591_v59, %v20267_v54  ;;  %v4651_v33 = vsub.s32 32, %v4650_v29  ;;  %v849_v39 = vpop.permute.xlu0 %848 }
 0x512   : > { %v4835_v40 = vxor.u32 2147483648, %v15641_v15  ;;  %v4593_v6 = vadd.s32 %v4592_v37, %v4588_v52  ;;  %v20296_v27 = vshrl.u32 %v4648_v10, 5  ;;  %v4653_v30 = vshll.u32 %v23185_v18, %v4650_v29 }
 0x513   : > { %v4839_v38 = vsel %vm4837_vm10, %v4838_v8, %v15641_v15  ;;  %v4926_v17 = vxor.u32 2147483648, %v4925_v44  ;;  %v11540_v1 = vsel %vm11538_vm14, %v4838_v8, %v15641_v15  ;;  %v4654_v25 = vshrl.u32 %v23186_v5, %v4651_v33 }
 0x514   : > { %v4836_v32 = vsel %vm4834_vm7, %v15639_v34, %v4835_v40  ;;  %v11537_v21 = vsel %vm11535_vm12, %v15639_v34, %v4835_v40  ;;  %v4594_v22 = vadd.s32 536870912, %v4593_v6  ;;  %v4656_v42 = vshll.u32 %v23186_v5, %v4650_v29 }
 0x515   : > { %v4840_v46 = vsel %vm4833_vm8, %v4836_v32, %v4839_v38  ;;  %v4927_v61 = vsel %vm4844_vm2, %v4926_v17, %v4925_v44  ;;  %v11541_v4 = vsel %vm11534_vm11, %v11537_v21, %v11540_v1  ;;  %v4657_v24 = vshrl.u32 %v23187_v16, %v4651_v33 }
 0x516   : > { %v4841_v9 = vsel %vm4831_vm9, nan, %v4840_v46  ;;  %v4930_v43 = vsel %vm20253_vm1, %v19972_v53, %v4927_v61  ;;  %v11542_v31 = vsel %vm4831_vm9, nan, %v11541_v4  ;;  %v20314_v26 = vshrl.u32 %v4594_v22, 30 }
 0x517   : > { %15642 = vcosq.f32 %v4930_v43  ;;  %v7667_v55 = vmul.f32 %v16711_v23, %v4841_v9  ;;  %v14395_v45 = vmul.f32 %v16718_v12, %v11542_v31  ;;  %v4659_v54 = vshll.u32 %v23187_v16, %v4650_v29  ;;  %v23286_v9 = vld [vmem:[#allocation48_spill] sm:$0xff] }
 0x518   : > { %15644 = vsinq.f32 %v4930_v43  ;;  %v4596_v48 = vshll.u32 %v20314_v26, 30  ;;  %v4660_v3 = vshrl.u32 %v23188_v47, %v4651_v33  ;;  %v4655_v58 = vor.u32 %v4654_v25, %v4653_v30 }
 0x519   : > { %v14459_v13 = vadd.f32 %v14395_v45, %v7667_v55  ;;  %v4658_v41 = vor.u32 %v4657_v24, %v4656_v42  ;;  %v4662_v60 = vshll.u32 %v23188_v47, %v4650_v29  ;;  %v4663_v57 = vshrl.u32 %v23189_v63, %v4651_v33 }
 0x51a   : > { %v20325_v2 = vsub.s32 %v4593_v6, %v4596_v48  ;;  %v4661_v10 = vor.u32 %v4660_v3, %v4659_v54  ;;  %v4665_v34 = vshll.u32 %v23189_v63, %v4650_v29  ;;  %v4666_v59 = vshrl.u32 %v23191_v28, %v4651_v33  ;;  %v23287_v3 = vld [vmem:[#allocation49_spill] sm:$0xff] }
 0x51b   : > { %14523 = vst [vmem:[%s16934_s6 + $0x120] sm:$0xff] %v14459_v13  ;;  %v11637_v15 = vand.u32 3, %v11636_v56  ;;  %v4664_v8 = vor.u32 %v4663_v57, %v4662_v60  ;;  %v943_v40 = vmul.f32 %v16575_v20, %v849_v39  ;;  %vm4940_vm2 = vcmp.eq.s32.totalorder %v20287_v7, 2 }
 0x51c   : > { %v4599_v44 = vsub.s32 0, %v20325_v2  ;;  %v4667_v52 = vor.u32 %v4666_v59, %v4665_v34  ;;  %vm4668_vm3 = vcmp.lt.s32.totalorder %v20296_v27, 1  ;;  %vm4670_vm1 = vcmp.lt.s32.totalorder %v20296_v27, 3 }
 0x51d   : > { %v20334_v37 = vshll.u32 %v4644_v35, 8  ;;  %v944_v38 = vmul.f32 %v16578_v14, %v849_v39  ;;  %vm4937_vm0 = vcmp.eq.s32.totalorder %v20287_v7, 0  ;;  %vm4671_vm4 = vcmp.lt.s32.totalorder %v20296_v27, 4 }
 0x51e   : > { %v14792_v29 = vmin.u32 %v4599_v44, %v20325_v2  ;;  %v4676_v17 = vsel %vm4668_vm3, %v4655_v58, %v4658_v41  ;;  %v4680_v1 = vsel %vm4668_vm3, %v4658_v41, %v4661_v10  ;;  %vm4936_vm5 = vcmp.lt.s32.totalorder %v20287_v7, 2 }
 0x51f   : > { %vm11638_vm6 = vcmp.lt.s32.totalorder %v11637_v15, 2  ;;  %v4652_v35 = vshrl.u32 %v23185_v18, %v4651_v33  ;;  %v4673_v6 = vsel %vm4671_vm4, %v4661_v10, 2102212464  ;;  %v4677_v32 = vsel %vm4671_vm4, %v4664_v8, 920167782 }
 0x520   : > { %v4681_v21 = vsel %vm4671_vm4, %v4667_v52, 1326507024  ;;  %vm4934_vm7 = vweird.f32 %v19972_v53  ;;  %v4601_v56 = vclz %v14792_v29  ;;  %vm4669_vm8 = vcmp.lt.s32.totalorder %v20296_v27, 2 }
 0x521   : > { %v4678_v46 = vsel %vm4670_vm1, %v4661_v10, %v4677_v32  ;;  %v4682_v61 = vsel %vm4670_vm1, %v4664_v8, %v4681_v21  ;;  %vm4535_vm9 = vcmp.lt.s32.totalorder %v20135_v11, 0  ;;  %v4672_v4 = vsel %vm4668_vm3, %v4652_v35, %v4655_v58 }
 0x522   : > { %v4679_v33 = vsel %vm4669_vm8, %v4676_v17, %v4678_v46  ;;  %v4683_v22 = vsel %vm4669_vm8, %v4680_v1, %v4682_v61  ;;  %v20360_v43 = vadd.f32 %v943_v40, %v23286_v9  ;;  %v14793_v31 = vadd.s32 4294967294, %v4601_v56 }
 0x523   : > { %v4674_v25 = vsel %vm4670_vm1, %v4658_v41, %v4673_v6  ;;  %v20365_v55 = vmul.u32.u64.low %v20334_v37, %v4683_v22  ;;  %v20366_v45 = vmul.u32.u64.high %v20334_v37, %v4683_v22, %v20365_v55  ;;  %vm11639_vm10 = vcmp.eq.s32.totalorder %v11637_v15, 0 }
 0x524   : > { %v15643_v30 = vpop.eup %15642  ;;  %vm11642_vm11 = vcmp.eq.s32.totalorder %v11637_v15, 2  ;;  %v20369_v42 = vmul.u32.u64.low %v20334_v37, %v4679_v33  ;;  %v20370_v24 = vmul.u32.u64.high %v20334_v37, %v4679_v33, %v20369_v42  ;;  %v4589_v54 = vadd.s32 %v20266_v36, %v20274_v19 }
 0x525   : > { %v15645_v13 = vpop.eup %15644  ;;  %v4941_v48 = vxor.u32 2147483648, %v15643_v30  ;;  %vm14794_vm12 = vcmp.lt.s32.totalorder %v14793_v31, 0  ;;  %v20376_v58 = vadd.f32 %v944_v38, %v23287_v3  ;;  %v4619_v57 = vsub.s32 4, %v20314_v26 }
 0x526   : > { %v4938_v41 = vxor.u32 2147483648, %v15645_v13  ;;  %v4604_v60 = vsel %vm14794_vm12, 0, %v14793_v31  ;;  %v4675_v39 = vsel %vm4669_vm8, %v4672_v4, %v4674_v25  ;;  %v5154_v8 = vand.u32 2139095040, %v20360_v43 }
 0x527   : > { %v4942_v10 = vsel %vm4940_vm2, %v4941_v48, %v15645_v13  ;;  %v11644_v34 = vsel %vm11642_vm11, %v4941_v48, %v15645_v13  ;;  %v4605_v59 = vsub.s32 32, %v4604_v60  ;;  %v4606_v44 = vshll.u32 %v20325_v2, %v4604_v60 }
 0x528   : > { %v4939_v36 = vsel %vm4937_vm0, %v15643_v30, %v4938_v41  ;;  %v11641_v19 = vsel %vm11639_vm10, %v15643_v30, %v4938_v41  ;;  %v4609_v52 = vsub.s32 4294967266, %v4604_v60  ;;  %vm4693_vm13 = vc.u32 %v20366_v45, %v20369_v42  ;;  %v845_v41 = vpop.permute.xlu1 %844 }
 0x529   : > { %v4943_v40 = vsel %vm4936_vm5, %v4939_v36, %v4942_v10  ;;  %v11645_v27 = vsel %vm11638_vm6, %v11641_v19, %v11644_v34  ;;  %v4607_v38 = vshrl.u32 %v4589_v54, %v4605_v59  ;;  %v4694_v2 = vadd.s32 1, %v20370_v24 }
 0x52a   : > { %v4944_v29 = vsel %vm4934_vm7, nan, %v4943_v40  ;;  %v11646_v17 = vsel %vm4934_vm7, nan, %v11645_v27  ;;  %v4610_v1 = vadd.s32 127, %v4609_v52  ;;  %v4620_v15 = vsel %vm4535_vm9, %v4619_v57, %v20314_v26 }
 0x52b   : > { %v7668_v35 = vmul.f32 %v16714_v50, %v4944_v29  ;;  %v14396_v7 = vmul.f32 %v16721_v62, %v11646_v17  ;;  %v4691_v6 = vmul.u32 %v20334_v37, %v4675_v39  ;;  %v4608_v32 = vor.u32 %v4607_v38, %v4606_v44 }
 0x52c   : > { %v4611_v21 = vshll.u32 %v4610_v1, 23  ;;  %v4695_v56 = vsel %vm4693_vm13, %v4694_v2, %v20370_v24  ;;  %v5155_v53 = vshrl.u32 %v5154_v8, 23  ;;  %v5151_v4 = vand.u32 2147483647, %v20360_v43 }
 0x52d   : > { %v14460_v46 = vadd.f32 %v14396_v7, %v7668_v35  ;;  %v4696_v61 = vadd.s32 %v4695_v56, %v4691_v6  ;;  %vm20408_vm14 = vcmp.le.f32.partialorder %v4533_v0, 0.7853982  ;;  %v4615_v25 = vcvt.s32.f32 %v4608_v32 }
 0x52e   : > { %v4612_v22 = vor.u32 4788187, %v4611_v21  ;;  %v14815_v9 = vadd.s32 4294967169, %v5155_v53  ;;  %v4622_v26 = vsel %vm20408_vm14, 0, %v4620_v15  ;;  %v5257_v30 = vand.u32 2139095040, %v20376_v58 }
 0x52f   : > { %14524 = vst [vmem:[%s16934_s6 + $0x128] sm:$0xff] %v14460_v46  ;;  %v4697_v37 = vadd.s32 536870912, %v4696_v61  ;;  %v5158_v0 = vand.u32 8388607, %v5151_v4  ;;  %v11324_v54 = vadd.s32 3, %v4622_v26  ;;  %v20427_v19 = vmul.f32 %v16575_v20, %v845_v41 }
 0x530   : > { %v4613_v31 = vand.u32 2147483647, %v4612_v22  ;;  %v5161_v55 = vadd.s32 1, %v14815_v9  ;;  %v5258_v39 = vshrl.u32 %v5257_v30, 23  ;;  %v5254_v59 = vand.u32 2147483647, %v20376_v58 }
 0x531   : > { %v20416_v24 = vshrl.u32 %v4697_v37, 30  ;;  %v5159_v34 = vor.u32 8388608, %v5158_v0  ;;  %v20430_v44 = vmul.f32 %v16578_v14, %v845_v41  ;;  %v20435_v40 = vand.u32 3, %v4622_v26 }
 0x532   : > { %v4616_v13 = vmul.f32 %v4615_v25, %v4613_v31  ;;  %vm5162_vm15 = vcmp.gt.s32.totalorder %v5161_v55, 0  ;;  %v20438_v38 = vand.u32 3, %v11324_v54  ;;  %v4692_v29 = vadd.s32 %v20369_v42, %v20366_v45 }
 0x533   : > { %v4699_v48 = vshll.u32 %v20416_v24, 30  ;;  %v5163_v3 = vsel %vm5162_vm15, %v5161_v55, 0  ;;  %v14819_v1 = vadd.s32 4294967169, %v5258_v39  ;;  %v20444_v35 = vshll.u32 %v5159_v34, 8 }
 0x534   : > { %v4617_v60 = vxor.u32 2147483648, %v4616_v13  ;;  %v5165_v57 = vand.u32 31, %v5163_v3  ;;  %v20448_v7 = vand.u32 8388607, %v5254_v59  ;;  %v4722_v15 = vsub.s32 4, %v20416_v24 }
 0x535   : > { %v20421_v10 = vsub.s32 %v4696_v61, %v4699_v48  ;;  %v5164_v6 = vshrl.u32 %v5163_v3, 5  ;;  %v5264_v22 = vadd.s32 1, %v14819_v1  ;;  %vm4638_vm2 = vcmp.lt.s32.totalorder %v20209_v51, 0 }
 0x536   : > { %v4618_v8 = vsel %vm4535_vm9, %v4617_v60, %v4616_v13  ;;  %v5166_v36 = vsub.s32 32, %v5165_v57  ;;  %v5168_v32 = vshll.u32 %v23185_v18, %v5165_v57  ;;  %v5171_v42 = vshll.u32 %v23186_v5, %v5165_v57 }
 0x537   : > { %v4621_v52 = vsel %vm20408_vm14, %v20135_v11, %v4618_v8  ;;  %v4702_v27 = vsub.s32 0, %v20421_v10  ;;  %v5174_v56 = vshll.u32 %v23187_v16, %v5165_v57  ;;  %v5177_v33 = vshll.u32 %v23188_v47, %v5165_v57 }
 0x538   : > { %15646 = vcosq.f32 %v4621_v52  ;;  %v5169_v17 = vshrl.u32 %v23186_v5, %v5166_v36  ;;  %v5172_v21 = vshrl.u32 %v23187_v16, %v5166_v36  ;;  %v5175_v53 = vshrl.u32 %v23188_v47, %v5166_v36 }
 0x539   : > { %15648 = vsinq.f32 %v4621_v52  ;;  %v14796_v2 = vmin.u32 %v4702_v27, %v20421_v10  ;;  %v5167_v46 = vshrl.u32 %v23185_v18, %v5166_v36  ;;  %v5178_v31 = vshrl.u32 %v23189_v63, %v5166_v36 }
 0x53a   : > { %v5170_v61 = vor.u32 %v5169_v17, %v5168_v32  ;;  %v5173_v26 = vor.u32 %v5172_v21, %v5171_v42  ;;  %v5176_v37 = vor.u32 %v5175_v53, %v5174_v56  ;;  %v5180_v25 = vshll.u32 %v23189_v63, %v5165_v57 }
 0x53b   : > { %v4704_v45 = vclz %v14796_v2  ;;  %v5181_v55 = vshrl.u32 %v23191_v28, %v5166_v36  ;;  %vm5183_vm3 = vcmp.lt.s32.totalorder %v5164_v6, 1  ;;  %vm5184_vm1 = vcmp.lt.s32.totalorder %v5164_v6, 2 }
 0x53c   : > { %vm4631_vm0 = vcmp.eq.s32.totalorder %v20435_v40, 2  ;;  %vm11330_vm5 = vcmp.eq.s32.totalorder %v20438_v38, 2  ;;  %v5179_v30 = vor.u32 %v5178_v31, %v5177_v33  ;;  %vm5185_vm6 = vcmp.lt.s32.totalorder %v5164_v6, 3 }
 0x53d   : > { %v14797_v9 = vadd.s32 4294967294, %v4704_v45  ;;  %vm5186_vm7 = vcmp.lt.s32.totalorder %v5164_v6, 4  ;;  %vm4628_vm8 = vcmp.eq.s32.totalorder %v20435_v40, 0  ;;  %vm11327_vm9 = vcmp.eq.s32.totalorder %v20438_v38, 0 }
 0x53e   : > { %v5182_v13 = vor.u32 %v5181_v55, %v5180_v25  ;;  %v5187_v48 = vsel %vm5183_vm3, %v5167_v46, %v5170_v61  ;;  %v5188_v54 = vsel %vm5186_vm7, %v5176_v37, 2102212464  ;;  %vm4627_vm10 = vcmp.lt.s32.totalorder %v20435_v40, 2 }
 0x53f   : > { %vm14798_vm4 = vcmp.lt.s32.totalorder %v14797_v9, 0  ;;  %vm11326_vm11 = vcmp.lt.s32.totalorder %v20438_v38, 2  ;;  %v5189_v60 = vsel %vm5185_vm6, %v5173_v26, %v5188_v54  ;;  %v5191_v57 = vsel %vm5183_vm3, %v5170_v61, %v5173_v26 }
 0x540   : > { %v4707_v0 = vsel %vm14798_vm4, 0, %v14797_v9  ;;  %vm4625_vm12 = vweird.f32 %v20135_v11  ;;  %v5192_v34 = vsel %vm5186_vm7, %v5179_v30, 920167782  ;;  %v5195_v8 = vsel %vm5183_vm3, %v5173_v26, %v5176_v37 }
 0x541   : > { %v4708_v3 = vsub.s32 32, %v4707_v0  ;;  %v4712_v41 = vsub.s32 4294967266, %v4707_v0  ;;  %v4709_v39 = vshll.u32 %v20421_v10, %v4707_v0  ;;  %v5196_v36 = vsel %vm5186_vm7, %v5182_v13, 1326507024 }
 0x542   : > { %v5193_v17 = vsel %vm5185_vm6, %v5176_v37, %v5192_v34  ;;  %v5197_v1 = vsel %vm5185_vm6, %v5179_v30, %v5196_v36  ;;  %v5190_v2 = vsel %vm5184_vm1, %v5187_v48, %v5189_v60  ;;  %vm5265_vm13 = vcmp.gt.s32.totalorder %v5264_v22, 0 }
 0x543   : > { %v4710_v52 = vshrl.u32 %v4692_v29, %v4708_v3  ;;  %v4713_v27 = vadd.s32 127, %v4712_v41  ;;  %v5194_v32 = vsel %vm5184_vm1, %v5191_v57, %v5193_v17  ;;  %v5198_v21 = vsel %vm5184_vm1, %v5195_v8, %v5197_v1 }
 0x544   : > { %v20483_v56 = vmul.u32.u64.low %v20444_v35, %v5198_v21  ;;  %v20484_v53 = vmul.u32.u64.high %v20444_v35, %v5198_v21, %v20483_v56  ;;  %v20487_v61 = vmul.u32.u64.low %v20444_v35, %v5194_v32  ;;  %v20488_v33 = vmul.u32.u64.high %v20444_v35, %v5194_v32, %v20487_v61 }
 0x545   : > { %v15647_v10 = vpop.eup %15646  ;;  %v4711_v45 = vor.u32 %v4710_v52, %v4709_v39  ;;  %v4714_v42 = vshll.u32 %v4713_v27, 23  ;;  %v5266_v9 = vsel %vm5265_vm13, %v5264_v22, 0  ;;  %vm20493_vm14 = vcmp.le.f32.partialorder %v4636_v49, 0.7853982 }
 0x546   : > { %v15649_v29 = vpop.eup %15648  ;;  %v4632_v46 = vxor.u32 2147483648, %v15647_v10  ;;  %v4723_v31 = vsel %vm4638_vm2, %v4722_v15, %v20416_v24  ;;  %v5262_v25 = vor.u32 8388608, %v20448_v7  ;;  %v5206_v49 = vmul.u32 %v20444_v35, %v5190_v2 }
 0x547   : > { %v4629_v26 = vxor.u32 2147483648, %v15649_v29  ;;  %v4715_v37 = vor.u32 4788187, %v4714_v42  ;;  %v5268_v30 = vand.u32 31, %v5266_v9  ;;  %v4718_v48 = vcvt.s32.f32 %v4711_v45 }
 0x548   : > { %v4633_v55 = vsel %vm4631_vm0, %v4632_v46, %v15649_v29  ;;  %v11332_v22 = vsel %vm11330_vm5, %v4632_v46, %v15649_v29  ;;  %vm5208_vm15 = vc.u32 %v20484_v53, %v20487_v61  ;;  %v5209_v35 = vadd.s32 1, %v20488_v33 }
 0x549   : > { %v4630_v0 = vsel %vm4628_vm8, %v15647_v10, %v4629_v26  ;;  %v4716_v13 = vand.u32 2147483647, %v4715_v37  ;;  %v11329_v54 = vsel %vm11327_vm9, %v15647_v10, %v4629_v26  ;;  %v5269_v57 = vsub.s32 32, %v5268_v30 }
 0x54a   : > { %v4634_v24 = vsel %vm4627_vm10, %v4630_v0, %v4633_v55  ;;  %v11333_v15 = vsel %vm11326_vm11, %v11329_v54, %v11332_v22  ;;  %v5210_v38 = vsel %vm5208_vm15, %v5209_v35, %v20488_v33  ;;  %v20526_v34 = vshrl.u32 %v5266_v9, 5  ;;  %v23292_v0 = vld [vmem:[#allocation47_spill] sm:$0xff] }
 0x54b   : > { %v4635_v3 = vsel %vm4625_vm12, nan, %v4634_v24  ;;  %v4719_v41 = vmul.f32 %v4718_v48, %v4716_v13  ;;  %v11334_v60 = vsel %vm4625_vm12, nan, %v11333_v15  ;;  %v5211_v36 = vadd.s32 %v5210_v38, %v5206_v49 }
 0x54c   : > { %v7665_v39 = vmul.f32 %v16711_v23, %v4635_v3  ;;  %v14393_v40 = vmul.f32 %v16718_v12, %v11334_v60  ;;  %v5271_v52 = vshll.u32 %v23185_v18, %v5268_v30  ;;  %v5272_v27 = vshrl.u32 %v23186_v5, %v5269_v57 }
 0x54d   : > { %v4720_v8 = vxor.u32 2147483648, %v4719_v41  ;;  %v5274_v11 = vshll.u32 %v23186_v5, %v5268_v30  ;;  %v5275_v1 = vshrl.u32 %v23187_v16, %v5269_v57  ;;  %v5277_v2 = vshll.u32 %v23187_v16, %v5268_v30 }
 0x54e   : > { %v14457_v17 = vadd.f32 %v14393_v40, %v7665_v39  ;;  %v5212_v21 = vadd.s32 536870912, %v5211_v36  ;;  %v5273_v10 = vor.u32 %v5272_v27, %v5271_v52  ;;  %v5278_v45 = vshrl.u32 %v23188_v47, %v5269_v57 }
 0x54f   : > { %v4721_v32 = vsel %vm4638_vm2, %v4720_v8, %v4719_v41  ;;  %v5276_v56 = vor.u32 %v5275_v1, %v5274_v11  ;;  %v5280_v29 = vshll.u32 %v23188_v47, %v5268_v30  ;;  %v5281_v46 = vshrl.u32 %v23189_v63, %v5269_v57 }
 0x550   : > { %v4724_v42 = vsel %vm20493_vm14, %v20209_v51, %v4721_v32  ;;  %14521 = vst [vmem:[%s16934_s6 + $0x110] sm:$0xff] %v14457_v17  ;;  %v4725_v33 = vsel %vm20493_vm14, 0, %v4723_v31  ;;  %v5213_v9 = vshrl.u32 %v5212_v21, 30  ;;  %v5279_v26 = vor.u32 %v5278_v45, %v5277_v2 }
 0x551   : > { %15650 = vcosq.f32 %v4724_v42  ;;  %v5282_v37 = vor.u32 %v5281_v46, %v5280_v29  ;;  %v5283_v55 = vshll.u32 %v23189_v63, %v5268_v30  ;;  %v5284_v22 = vshrl.u32 %v23191_v28, %v5269_v57 }
 0x552   : > { %15652 = vsinq.f32 %v4724_v42  ;;  %vm5153_vm2 = vcmp.lt.s32.totalorder %v20360_v43, 0  ;;  %v5214_v49 = vshll.u32 %v5213_v9, 30  ;;  %vm5286_vm3 = vcmp.lt.s32.totalorder %v20526_v34, 1 }
 0x553   : > { %v20550_v13 = vadd.f32 %v20427_v19, %v23292_v0  ;;  %v20552_v6 = vand.u32 3, %v4725_v33  ;;  %v5285_v31 = vor.u32 %v5284_v22, %v5283_v55  ;;  %vm5289_vm1 = vcmp.lt.s32.totalorder %v20526_v34, 4 }
 0x554   : > { %v5294_v48 = vsel %vm5286_vm3, %v5273_v10, %v5276_v56  ;;  %v11428_v30 = vadd.s32 3, %v4725_v33  ;;  %v20557_v54 = vsub.s32 %v5211_v36, %v5214_v49  ;;  %vm5288_vm0 = vcmp.lt.s32.totalorder %v20526_v34, 3 }
 0x555   : > { %v5295_v24 = vsel %vm5289_vm1, %v5282_v37, 920167782  ;;  %vm5287_vm4 = vcmp.lt.s32.totalorder %v20526_v34, 2  ;;  %v5291_v15 = vsel %vm5289_vm1, %v5279_v26, 2102212464  ;;  %v5302_v35 = vshll.u32 %v5262_v25, 8 }
 0x556   : > { %v5296_v19 = vsel %vm5288_vm0, %v5279_v26, %v5295_v24  ;;  %v5217_v3 = vsub.s32 0, %v20557_v54  ;;  %v5237_v41 = vsub.s32 4, %v5213_v9  ;;  %v5270_v60 = vshrl.u32 %v23185_v18, %v5269_v57 }
 0x557   : > { %v5297_v39 = vsel %vm5287_vm4, %v5294_v48, %v5296_v19  ;;  %v5298_v40 = vsel %vm5286_vm3, %v5276_v56, %v5279_v26  ;;  %v5299_v38 = vsel %vm5289_vm1, %v5285_v31, 1326507024  ;;  %v11429_v52 = vand.u32 3, %v11428_v30 }
 0x558   : > { %v20571_v8 = vmul.u32.u64.low %v5302_v35, %v5297_v39  ;;  %v20572_v36 = vmul.u32.u64.high %v5302_v35, %v5297_v39, %v20571_v8  ;;  %v14816_v7 = vmin.u32 %v5217_v3, %v20557_v54  ;;  %v5290_v25 = vsel %vm5286_vm3, %v5270_v60, %v5273_v10 }
 0x559   : > { %v5292_v57 = vsel %vm5288_vm0, %v5276_v56, %v5291_v15  ;;  %vm20582_vm5 = vcmp.le.f32.partialorder %v5151_v4, 0.7853982  ;;  %v5300_v17 = vsel %vm5288_vm0, %v5282_v37, %v5299_v38  ;;  %v4945_v11 = vand.u32 2147483647, %v20550_v13 }
 0x55a   : > { %v4948_v1 = vand.u32 2139095040, %v20550_v13  ;;  %vm4728_vm6 = vweird.f32 %v20209_v51  ;;  %vm4730_vm7 = vcmp.lt.s32.totalorder %v20552_v6, 2  ;;  %vm4731_vm8 = vcmp.eq.s32.totalorder %v20552_v6, 0 }
 0x55b   : > { %v5219_v2 = vclz %v14816_v7  ;;  %v5301_v4 = vsel %vm5287_vm4, %v5298_v40, %v5300_v17  ;;  %v5238_v32 = vsel %vm5153_vm2, %v5237_v41, %v5213_v9  ;;  %v5293_v21 = vsel %vm5287_vm4, %v5290_v25, %v5292_v57 }
 0x55c   : > { %v20599_v10 = vmul.u32.u64.low %v5302_v35, %v5301_v4  ;;  %v20600_v45 = vmul.u32.u64.high %v5302_v35, %v5301_v4, %v20599_v10  ;;  %vm4734_vm9 = vcmp.eq.s32.totalorder %v20552_v6, 2  ;;  %vm11430_vm10 = vcmp.lt.s32.totalorder %v11429_v52, 2 }
 0x55d   : > { %v14817_v42 = vadd.s32 4294967294, %v5219_v2  ;;  %v4949_v56 = vshrl.u32 %v4948_v1, 23  ;;  %vm11431_vm11 = vcmp.eq.s32.totalorder %v11429_v52, 0  ;;  %vm11434_vm12 = vcmp.eq.s32.totalorder %v11429_v52, 2  ;;  %v23295_v1 = vld [vmem:[#allocation9_spill] sm:$0xff] }
 0x55e   : > { %v15651_v29 = vpop.eup %15650  ;;  %v5207_v46 = vadd.s32 %v20487_v61, %v20484_v53  ;;  %v5312_v33 = vadd.s32 1, %v20572_v36  ;;  %v5240_v34 = vsel %vm20582_vm5, 0, %v5238_v32  ;;  %v5309_v37 = vmul.u32 %v5302_v35, %v5293_v21 }
 0x55f   : > { %v15653_v9 = vpop.eup %15652  ;;  %v4735_v26 = vxor.u32 2147483648, %v15651_v29  ;;  %vm14818_vm13 = vcmp.lt.s32.totalorder %v14817_v42, 0  ;;  %vm5311_vm14 = vc.u32 %v20600_v45, %v20571_v8  ;;  %v14807_v49 = vadd.s32 4294967169, %v4949_v56 }
 0x560   : > { %v4732_v55 = vxor.u32 2147483648, %v15653_v9  ;;  %v5222_v22 = vsel %vm14818_vm13, 0, %v14817_v42  ;;  %v5313_v15 = vsel %vm5311_vm14, %v5312_v33, %v20572_v36  ;;  %v4952_v6 = vand.u32 8388607, %v4945_v11 }
 0x561   : > { %v4736_v0 = vsel %vm4734_vm9, %v4735_v26, %v15653_v9  ;;  %v11436_v31 = vsel %vm11434_vm12, %v4735_v26, %v15653_v9  ;;  %v5223_v53 = vsub.s32 32, %v5222_v22  ;;  %v5224_v61 = vshll.u32 %v20557_v54, %v5222_v22 }
 0x562   : > { %v4733_v48 = vsel %vm4731_vm8, %v15651_v29, %v4732_v55  ;;  %v11433_v30 = vsel %vm11431_vm11, %v15651_v29, %v4732_v55  ;;  %v5227_v24 = vsub.s32 4294967266, %v5222_v22  ;;  %v5314_v41 = vadd.s32 %v5313_v15, %v5309_v37 }
 0x563   : > { %v4737_v19 = vsel %vm4730_vm7, %v4733_v48, %v4736_v0  ;;  %v11437_v35 = vsel %vm11430_vm10, %v11433_v30, %v11436_v31  ;;  %v5225_v3 = vshrl.u32 %v5207_v46, %v5223_v53  ;;  %v4955_v40 = vadd.s32 1, %v14807_v49 }
 0x564   : > { %v4738_v60 = vsel %vm4728_vm6, nan, %v4737_v19  ;;  %v11438_v54 = vsel %vm4728_vm6, nan, %v11437_v35  ;;  %v5228_v39 = vadd.s32 127, %v5227_v24  ;;  %v5315_v7 = vadd.s32 536870912, %v5314_v41 }
 0x565   : > { %v7666_v38 = vmul.f32 %v16714_v50, %v4738_v60  ;;  %v14394_v36 = vmul.f32 %v16721_v62, %v11438_v54  ;;  %v5226_v52 = vor.u32 %v5225_v3, %v5224_v61  ;;  %vm4956_vm15 = vcmp.gt.s32.totalorder %v4955_v40, 0 }
 0x566   : > { %v5229_v25 = vshll.u32 %v5228_v39, 23  ;;  %v20628_v17 = vshrl.u32 %v5315_v7, 30  ;;  %v20632_v51 = vadd.f32 %v20430_v44, %v23295_v1  ;;  %v4957_v2 = vsel %vm4956_vm15, %v4955_v40, 0 }
 0x567   : > { %v14458_v57 = vadd.f32 %v14394_v36, %v7666_v38  ;;  %v11948_v32 = vadd.s32 3, %v5240_v34  ;;  %v4959_v21 = vand.u32 31, %v4957_v2  ;;  %v4953_v42 = vor.u32 8388608, %v4952_v6 }
 0x568   : > { %v5230_v4 = vor.u32 4788187, %v5229_v25  ;;  %v5317_v10 = vshll.u32 %v20628_v17, 30  ;;  %v5233_v29 = vcvt.s32.f32 %v5226_v52  ;;  %v5051_v9 = vand.u32 2139095040, %v20632_v51 }
 0x569   : > { %14522 = vst [vmem:[%s16934_s6 + $0x118] sm:$0xff] %v14458_v57  ;;  %v4960_v46 = vsub.s32 32, %v4959_v21  ;;  %v20639_v37 = vand.u32 3, %v5240_v34  ;;  %v20641_v44 = vand.u32 3, %v11948_v32  ;;  %v5310_v55 = vadd.s32 %v20571_v8, %v20600_v45 }
 0x56a   : > { %v5231_v56 = vand.u32 2147483647, %v5230_v4  ;;  %v20636_v33 = vsub.s32 %v5314_v41, %v5317_v10  ;;  %v20647_v0 = vshll.u32 %v4953_v42, 8  ;;  %v4958_v30 = vshrl.u32 %v4957_v2, 5 }
 0x56b   : > { %v4963_v49 = vshrl.u32 %v23186_v5, %v4960_v46  ;;  %v4966_v53 = vshrl.u32 %v23187_v16, %v4960_v46  ;;  %v4969_v61 = vshrl.u32 %v23188_v47, %v4960_v46  ;;  %v4972_v48 = vshrl.u32 %v23189_v63, %v4960_v46 }
 0x56c   : > { %v5234_v26 = vmul.f32 %v5233_v29, %v5231_v56  ;;  %v5320_v22 = vsub.s32 0, %v20636_v33  ;;  %v4968_v24 = vshll.u32 %v23187_v16, %v4959_v21  ;;  %v5052_v15 = vshrl.u32 %v5051_v9, 23 }
 0x56d   : > { %v4962_v45 = vshll.u32 %v23185_v18, %v4959_v21  ;;  %v4965_v19 = vshll.u32 %v23186_v5, %v4959_v21  ;;  %v4971_v35 = vshll.u32 %v23188_v47, %v4959_v21  ;;  %v5340_v60 = vsub.s32 4, %v20628_v17 }
 0x56e   : > { %v5235_v31 = vxor.u32 2147483648, %v5234_v26  ;;  %v14820_v34 = vmin.u32 %v5320_v22, %v20636_v33  ;;  %v4970_v54 = vor.u32 %v4969_v61, %v4968_v24  ;;  %v4974_v7 = vshll.u32 %v23189_v63, %v4959_v21 }
 0x56f   : > { %v4964_v39 = vor.u32 %v4963_v49, %v4962_v45  ;;  %v4967_v40 = vor.u32 %v4966_v53, %v4965_v19  ;;  %v4973_v38 = vor.u32 %v4972_v48, %v4971_v35  ;;  %v4975_v6 = vshrl.u32 %v23191_v28, %v4960_v46 }
 0x570   : > { %v5236_v8 = vsel %vm5153_vm2, %v5235_v31, %v5234_v26  ;;  %v5322_v41 = vclz %v14820_v34  ;;  %v4961_v52 = vshrl.u32 %v23185_v18, %v4960_v46  ;;  %vm4977_vm2 = vcmp.lt.s32.totalorder %v4958_v30, 1 }
 0x571   : > { %v5239_v3 = vsel %vm20582_vm5, %v20360_v43, %v5236_v8  ;;  %vm4978_vm3 = vcmp.lt.s32.totalorder %v4958_v30, 2  ;;  %vm4980_vm1 = vcmp.lt.s32.totalorder %v4958_v30, 4  ;;  %vm5256_vm0 = vcmp.lt.s32.totalorder %v20376_v58, 0 }
 0x572   : > { %15654 = vcosq.f32 %v5239_v3  ;;  %v14821_v36 = vadd.s32 4294967294, %v5322_v41  ;;  %v4976_v27 = vor.u32 %v4975_v6, %v4974_v7  ;;  %vm4979_vm5 = vcmp.lt.s32.totalorder %v4958_v30, 3 }
 0x573   : > { %15656 = vsinq.f32 %v5239_v3  ;;  %v4982_v25 = vsel %vm4980_vm1, %v4970_v54, 2102212464  ;;  %v4981_v1 = vsel %vm4977_vm2, %v4961_v52, %v4964_v39  ;;  %v4985_v2 = vsel %vm4977_vm2, %v4964_v39, %v4967_v40 }
 0x574   : > { %vm14822_vm4 = vcmp.lt.s32.totalorder %v14821_v36, 0  ;;  %v4986_v4 = vsel %vm4980_vm1, %v4973_v38, 920167782  ;;  %v4983_v10 = vsel %vm4979_vm5, %v4967_v40, %v4982_v25  ;;  %v4989_v42 = vsel %vm4977_vm2, %v4967_v40, %v4970_v54 }
 0x575   : > { %v5325_v57 = vsel %vm14822_vm4, 0, %v14821_v36  ;;  %vm20672_vm6 = vcmp.le.f32.partialorder %v5254_v59, 0.7853982  ;;  %v4987_v46 = vsel %vm4979_vm5, %v4970_v54, %v4986_v4  ;;  %v4990_v9 = vsel %vm4980_vm1, %v4976_v27, 1326507024 }
 0x576   : > { %v5326_v32 = vsub.s32 32, %v5325_v57  ;;  %v5330_v21 = vsub.s32 4294967266, %v5325_v57  ;;  %v5327_v29 = vshll.u32 %v20636_v33, %v5325_v57  ;;  %v14811_v26 = vadd.s32 4294967169, %v5052_v15 }
 0x577   : > { %v4988_v31 = vsel %vm4978_vm3, %v4985_v2, %v4987_v46  ;;  %v4991_v53 = vsel %vm4979_vm5, %v4973_v38, %v4990_v9  ;;  %v4984_v61 = vsel %vm4978_vm3, %v4981_v1, %v4983_v10  ;;  %vm5243_vm7 = vweird.f32 %v20360_v43 }
 0x578   : > { %v5328_v22 = vshrl.u32 %v5310_v55, %v5326_v32  ;;  %v5331_v49 = vadd.s32 127, %v5330_v21  ;;  %v4992_v59 = vsel %vm4978_vm3, %v4989_v42, %v4991_v53  ;;  %vm5245_vm8 = vcmp.lt.s32.totalorder %v20639_v37, 2 }
 0x579   : > { %v20684_v48 = vmul.u32.u64.low %v20647_v0, %v4988_v31  ;;  %v20685_v34 = vmul.u32.u64.high %v20647_v0, %v4988_v31, %v20684_v48  ;;  %v20689_v8 = vmul.u32.u64.low %v20647_v0, %v4992_v59  ;;  %v20690_v15 = vmul.u32.u64.high %v20647_v0, %v4992_v59, %v20689_v8 }
 0x57a   : > { %v5329_v33 = vor.u32 %v5328_v22, %v5327_v29  ;;  %v5332_v24 = vshll.u32 %v5331_v49, 23  ;;  %vm5246_vm9 = vcmp.eq.s32.totalorder %v20639_v37, 0  ;;  %vm5249_vm10 = vcmp.eq.s32.totalorder %v20639_v37, 2 }
 0x57b   : > { %v5058_v55 = vadd.s32 1, %v14811_v26  ;;  %vm11950_vm11 = vcmp.lt.s32.totalorder %v20641_v44, 2  ;;  %vm11951_vm12 = vcmp.eq.s32.totalorder %v20641_v44, 0  ;;  %v5048_v45 = vand.u32 2147483647, %v20632_v51 }
 0x57c   : > { %v5333_v30 = vor.u32 4788187, %v5332_v24  ;;  %v5341_v19 = vsel %vm5256_vm0, %v5340_v60, %v20628_v17  ;;  %v5000_v35 = vmul.u32 %v20647_v0, %v4984_v61  ;;  %v5003_v3 = vadd.s32 1, %v20685_v34 }
 0x57d   : > { %vm5059_vm13 = vcmp.gt.s32.totalorder %v5058_v55, 0  ;;  %v5336_v39 = vcvt.s32.f32 %v5329_v33  ;;  %vm5002_vm14 = vc.u32 %v20690_v15, %v20684_v48  ;;  %vm11954_vm15 = vcmp.eq.s32.totalorder %v20641_v44, 2 }
 0x57e   : > { %v5334_v54 = vand.u32 2147483647, %v5333_v30  ;;  %v5060_v40 = vsel %vm5059_vm13, %v5058_v55, 0  ;;  %v5004_v7 = vsel %vm5002_vm14, %v5003_v3, %v20685_v34  ;;  %v5343_v0 = vsel %vm20672_vm6, 0, %v5341_v19 }
 0x57f   : > { %v15655_v41 = vpop.eup %15654  ;;  %v5062_v6 = vand.u32 31, %v5060_v40  ;;  %v5005_v52 = vadd.s32 %v5004_v7, %v5000_v35  ;;  %v5055_v57 = vand.u32 8388607, %v5048_v45  ;;  %v20720_v42 = vand.u32 3, %v5343_v0 }
 0x580   : > { %v15657_v38 = vpop.eup %15656  ;;  %v5250_v36 = vxor.u32 2147483648, %v15655_v41  ;;  %v5337_v60 = vmul.f32 %v5336_v39, %v5334_v54  ;;  %v12052_v46 = vadd.s32 3, %v5343_v0  ;;  %v20744_v8 = vshrl.u32 %v5060_v40, 5  ;;  %v857_v54 = vpop.permute.xlu0 %856 }
 0x581   : > { %v5247_v17 = vxor.u32 2147483648, %v15657_v38  ;;  %v5063_v1 = vsub.s32 32, %v5062_v6  ;;  %v5006_v21 = vadd.s32 536870912, %v5005_v52  ;;  %v5056_v59 = vor.u32 8388608, %v5055_v57 }
 0x582   : > { %v5251_v27 = vsel %vm5249_vm10, %v5250_v36, %v15657_v38  ;;  %v11956_v25 = vsel %vm11954_vm15, %v5250_v36, %v15657_v38  ;;  %v5338_v4 = vxor.u32 2147483648, %v5337_v60  ;;  %v5065_v43 = vshll.u32 %v23185_v18, %v5062_v6 }
 0x583   : > { %v5248_v2 = vsel %vm5246_vm9, %v15655_v41, %v5247_v17  ;;  %v11953_v32 = vsel %vm11951_vm12, %v15655_v41, %v5247_v17  ;;  %v20730_v49 = vshrl.u32 %v5006_v21, 30  ;;  %v5066_v53 = vshrl.u32 %v23186_v5, %v5063_v1 }
 0x584   : > { %v5252_v10 = vsel %vm5245_vm8, %v5248_v2, %v5251_v27  ;;  %v11957_v29 = vsel %vm11950_vm11, %v11953_v32, %v11956_v25  ;;  %v5339_v26 = vsel %vm5256_vm0, %v5338_v4, %v5337_v60  ;;  %v5068_v33 = vshll.u32 %v23186_v5, %v5062_v6 }
 0x585   : > { %v5253_v9 = vsel %vm5243_vm7, nan, %v5252_v10  ;;  %v11958_v22 = vsel %vm5243_vm7, nan, %v11957_v29  ;;  %v5342_v37 = vsel %vm20672_vm6, %v20376_v58, %v5339_v26  ;;  %v5008_v61 = vshll.u32 %v20730_v49, 30 }
 0x586   : > { %v7671_v44 = vmul.f32 %v16711_v23, %v5253_v9  ;;  %v14399_v31 = vmul.f32 %v16718_v12, %v11958_v22  ;;  %15658 = vcosq.f32 %v5342_v37  ;;  %v5069_v56 = vshrl.u32 %v23187_v16, %v5063_v1 }
 0x587   : > { %15660 = vsinq.f32 %v5342_v37  ;;  %v20742_v24 = vsub.s32 %v5005_v52, %v5008_v61  ;;  %v5071_v55 = vshll.u32 %v23187_v16, %v5062_v6  ;;  %v5072_v30 = vshrl.u32 %v23188_v47, %v5063_v1 }
 0x588   : > { %v14463_v34 = vadd.f32 %v14399_v31, %v7671_v44  ;;  %v5067_v19 = vor.u32 %v5066_v53, %v5065_v43  ;;  %v5070_v35 = vor.u32 %v5069_v56, %v5068_v33  ;;  %v5074_v3 = vshll.u32 %v23188_v47, %v5062_v6  ;;  %v23298_v33 = vld [vmem:[#allocation50_spill] sm:$0xff] }
 0x589   : > { %v5075_v41 = vshrl.u32 %v23189_v63, %v5063_v1  ;;  %v20751_v39 = vand.u32 3, %v12052_v46  ;;  %v5011_v38 = vsub.s32 0, %v20742_v24  ;;  %v5073_v36 = vor.u32 %v5072_v30, %v5071_v55 }
 0x58a   : > { %14527 = vst [vmem:[%s16934_s6 + $0x140] sm:$0xff] %v14463_v34  ;;  %v5078_v40 = vshrl.u32 %v23191_v28, %v5063_v1  ;;  %v5077_v17 = vshll.u32 %v23189_v63, %v5062_v6  ;;  %vm5080_vm2 = vcmp.lt.s32.totalorder %v20744_v8, 1  ;;  %v20758_v0 = vshll.u32 %v5056_v59, 8 }
 0x58b   : > { %v5076_v7 = vor.u32 %v5075_v41, %v5074_v3  ;;  %v14808_v60 = vmin.u32 %v5011_v38, %v20742_v24  ;;  %v947_v52 = vmul.f32 %v16575_v20, %v857_v54  ;;  %vm5352_vm3 = vcmp.eq.s32.totalorder %v20720_v42, 2 }
 0x58c   : > { %v5064_v27 = vshrl.u32 %v23185_v18, %v5063_v1  ;;  %v5079_v25 = vor.u32 %v5078_v40, %v5077_v17  ;;  %vm5083_vm1 = vcmp.lt.s32.totalorder %v20744_v8, 4  ;;  %v5088_v57 = vsel %vm5080_vm2, %v5067_v19, %v5070_v35 }
 0x58d   : > { %vm5349_vm0 = vcmp.eq.s32.totalorder %v20720_v42, 0  ;;  %vm12055_vm4 = vcmp.eq.s32.totalorder %v20751_v39, 0  ;;  %v5013_v6 = vclz %v14808_v60  ;;  %vm5082_vm5 = vcmp.lt.s32.totalorder %v20744_v8, 3 }
 0x58e   : > { %v5089_v2 = vsel %vm5083_vm1, %v5076_v7, 920167782  ;;  %v5092_v4 = vsel %vm5080_vm2, %v5070_v35, %v5073_v36  ;;  %vm5348_vm6 = vcmp.lt.s32.totalorder %v20720_v42, 2  ;;  %vm12054_vm7 = vcmp.lt.s32.totalorder %v20751_v39, 2 }
 0x58f   : > { %vm5081_vm8 = vcmp.lt.s32.totalorder %v20744_v8, 2  ;;  %v5085_v1 = vsel %vm5083_vm1, %v5073_v36, 2102212464  ;;  %v5090_v32 = vsel %vm5082_vm5, %v5073_v36, %v5089_v2  ;;  %v5093_v21 = vsel %vm5083_vm1, %v5079_v25, 1326507024 }
 0x590   : > { %vm5346_vm9 = vweird.f32 %v20376_v58  ;;  %vm12058_vm10 = vcmp.eq.s32.totalorder %v20751_v39, 2  ;;  %v14809_v10 = vadd.s32 4294967294, %v5013_v6  ;;  %v5091_v29 = vsel %vm5081_vm8, %v5088_v57, %v5090_v32  ;;  %v23299_v39 = vld [vmem:[#allocation51_spill] sm:$0xff] }
 0x591   : > { %v5094_v46 = vsel %vm5082_vm5, %v5076_v7, %v5093_v21  ;;  %v5084_v9 = vsel %vm5080_vm2, %v5064_v27, %v5067_v19  ;;  %v20787_v22 = vmul.u32.u64.low %v20758_v0, %v5091_v29  ;;  %v20788_v37 = vmul.u32.u64.high %v20758_v0, %v5091_v29, %v20787_v22 }
 0x592   : > { %v5095_v26 = vsel %vm5081_vm8, %v5092_v4, %v5094_v46  ;;  %vm4947_vm11 = vcmp.lt.s32.totalorder %v20550_v13, 0  ;;  %vm14810_vm12 = vcmp.lt.s32.totalorder %v14809_v10, 0  ;;  %v5086_v44 = vsel %vm5082_vm5, %v5070_v35, %v5085_v1 }
 0x593   : > { %v20795_v31 = vmul.u32.u64.low %v20758_v0, %v5095_v26  ;;  %v20796_v53 = vmul.u32.u64.high %v20758_v0, %v5095_v26, %v20795_v31  ;;  %v15659_v61 = vpop.eup %15658  ;;  %v5001_v59 = vadd.s32 %v20684_v48, %v20690_v15  ;;  %v5016_v43 = vsel %vm14810_vm12, 0, %v14809_v10 }
 0x594   : > { %v948_v34 = vmul.f32 %v16578_v14, %v857_v54  ;;  %v20802_v56 = vadd.f32 %v947_v52, %v23298_v33  ;;  %v15661_v55 = vpop.eup %15660  ;;  %v5353_v30 = vxor.u32 2147483648, %v15659_v61  ;;  %v5017_v19 = vsub.s32 32, %v5016_v43 }
 0x595   : > { %v5021_v3 = vsub.s32 4294967266, %v5016_v43  ;;  %v5031_v35 = vsub.s32 4, %v20730_v49  ;;  %v5350_v41 = vxor.u32 2147483648, %v15661_v55  ;;  %v5018_v38 = vshll.u32 %v20742_v24, %v5016_v43 }
 0x596   : > { %v5087_v36 = vsel %vm5081_vm8, %v5084_v9, %v5086_v44  ;;  %v5106_v48 = vadd.s32 1, %v20788_v37  ;;  %v5354_v15 = vsel %vm5352_vm3, %v5353_v30, %v15661_v55  ;;  %v12060_v54 = vsel %vm12058_vm10, %v5353_v30, %v15661_v55 }
 0x597   : > { %v5019_v40 = vshrl.u32 %v5001_v59, %v5017_v19  ;;  %v5022_v7 = vadd.s32 127, %v5021_v3  ;;  %v5351_v17 = vsel %vm5349_vm0, %v15659_v61, %v5350_v41  ;;  %v12057_v60 = vsel %vm12055_vm4, %v15659_v61, %v5350_v41  ;;  %v20852_v3 = vpop.permute.xlu1 %852 }
 0x598   : > { %vm5105_vm13 = vc.u32 %v20796_v53, %v20787_v22  ;;  %v5566_v24 = vand.u32 2139095040, %v20802_v56  ;;  %v5355_v8 = vsel %vm5348_vm6, %v5351_v17, %v5354_v15  ;;  %v12061_v52 = vsel %vm12054_vm7, %v12057_v60, %v12060_v54 }
 0x599   : > { %v5020_v27 = vor.u32 %v5019_v40, %v5018_v38  ;;  %v5023_v25 = vshll.u32 %v5022_v7, 23  ;;  %v5356_v57 = vsel %vm5346_vm9, nan, %v5355_v8  ;;  %v12062_v6 = vsel %vm5346_vm9, nan, %v12061_v52 }
 0x59a   : > { %v5103_v2 = vmul.u32 %v20758_v0, %v5087_v36  ;;  %v5107_v4 = vsel %vm5105_vm13, %v5106_v48, %v20788_v37  ;;  %v7672_v1 = vmul.f32 %v16714_v50, %v5356_v57  ;;  %v14400_v42 = vmul.f32 %v16721_v62, %v12062_v6 }
 0x59b   : > { %v5024_v32 = vor.u32 4788187, %v5023_v25  ;;  %v20833_v21 = vadd.f32 %v948_v34, %v23299_v39  ;;  %v5032_v10 = vsel %vm4947_vm11, %v5031_v35, %v20730_v49  ;;  %v5563_v58 = vand.u32 2147483647, %v20802_v56 }
 0x59c   : > { %v5108_v29 = vadd.s32 %v5107_v4, %v5103_v2  ;;  %v5567_v46 = vshrl.u32 %v5566_v24, 23  ;;  %v14464_v0 = vadd.f32 %v14400_v42, %v7672_v1  ;;  %v5027_v26 = vcvt.s32.f32 %v5020_v27 }
 0x59d   : > { %v5025_v9 = vand.u32 2147483647, %v5024_v32  ;;  %vm20841_vm14 = vcmp.le.f32.partialorder %v4945_v11, 0.7853982  ;;  %v5669_v59 = vand.u32 2139095040, %v20833_v21  ;;  %vm5050_vm2 = vcmp.lt.s32.totalorder %v20632_v51, 0 }
 0x59e   : > { %v5109_v44 = vadd.s32 536870912, %v5108_v29  ;;  %v14831_v31 = vadd.s32 4294967169, %v5567_v46  ;;  %14528 = vst [vmem:[%s16934_s6 + $0x148] sm:$0xff] %v14464_v0  ;;  %v5034_v49 = vsel %vm20841_vm14, 0, %v5032_v10  ;;  %v5570_v34 = vand.u32 8388607, %v5563_v58 }
 0x59f   : > { %v5028_v61 = vmul.f32 %v5027_v26, %v5025_v9  ;;  %v5666_v55 = vand.u32 2147483647, %v20833_v21  ;;  %v11740_v19 = vadd.s32 3, %v5034_v49  ;;  %v5670_v38 = vshrl.u32 %v5669_v59, 23 }
 0x5a0   : > { %v5110_v43 = vshrl.u32 %v5109_v44, 30  ;;  %v5573_v33 = vadd.s32 1, %v14831_v31  ;;  %v5571_v15 = vor.u32 8388608, %v5570_v34  ;;  %v20868_v7 = vmul.f32 %v16575_v20, %v20852_v3 }
 0x5a1   : > { %v5029_v11 = vxor.u32 2147483648, %v5028_v61  ;;  %v20863_v54 = vand.u32 8388607, %v5666_v55  ;;  %v20870_v17 = vand.u32 3, %v5034_v49  ;;  %v20873_v24 = vand.u32 3, %v11740_v19 }
 0x5a2   : > { %v5111_v30 = vshll.u32 %v5110_v43, 30  ;;  %vm5574_vm15 = vcmp.gt.s32.totalorder %v5573_v33, 0  ;;  %v5104_v8 = vadd.s32 %v20787_v22, %v20796_v53  ;;  %v5134_v52 = vsub.s32 4, %v5110_v43 }
 0x5a3   : > { %v5030_v35 = vsel %vm4947_vm11, %v5029_v11, %v5028_v61  ;;  %v5575_v41 = vsel %vm5574_vm15, %v5573_v33, 0  ;;  %v14835_v25 = vadd.s32 4294967169, %v5670_v38  ;;  %v20878_v2 = vshll.u32 %v5571_v15, 8 }
 0x5a4   : > { %v5033_v36 = vsel %vm20841_vm14, %v20550_v13, %v5030_v35  ;;  %v20859_v48 = vsub.s32 %v5108_v29, %v5111_v30  ;;  %v5577_v40 = vand.u32 31, %v5575_v41  ;;  %v5576_v6 = vshrl.u32 %v5575_v41, 5 }
 0x5a5   : > { %15662 = vcosq.f32 %v5033_v36  ;;  %v5674_v4 = vor.u32 8388608, %v20863_v54  ;;  %v20890_v46 = vsel %vm5050_vm2, %v5134_v52, %v5110_v43  ;;  %v5676_v26 = vadd.s32 1, %v14835_v25 }
 0x5a6   : > { %15664 = vsinq.f32 %v5033_v36  ;;  %v5114_v60 = vsub.s32 0, %v20859_v48  ;;  %v5578_v27 = vsub.s32 32, %v5577_v40  ;;  %v5580_v1 = vshll.u32 %v23185_v18, %v5577_v40 }
 0x5a7   : > { %v5583_v32 = vshll.u32 %v23186_v5, %v5577_v40  ;;  %v5586_v22 = vshll.u32 %v23187_v16, %v5577_v40  ;;  %v5589_v9 = vshll.u32 %v23188_v47, %v5577_v40  ;;  %vm5043_vm3 = vcmp.eq.s32.totalorder %v20870_v17, 2 }
 0x5a8   : > { %v14812_v57 = vmin.u32 %v5114_v60, %v20859_v48  ;;  %v5581_v42 = vshrl.u32 %v23186_v5, %v5578_v27  ;;  %v5584_v39 = vshrl.u32 %v23187_v16, %v5578_v27  ;;  %v5587_v53 = vshrl.u32 %v23188_v47, %v5578_v27 }
 0x5a9   : > { %v5590_v29 = vshrl.u32 %v23189_v63, %v5578_v27  ;;  %vm11746_vm1 = vcmp.eq.s32.totalorder %v20873_v24, 2  ;;  %v5579_v44 = vshrl.u32 %v23185_v18, %v5578_v27  ;;  %vm5040_vm0 = vcmp.eq.s32.totalorder %v20870_v17, 0 }
 0x5aa   : > { %v5116_v10 = vclz %v14812_v57  ;;  %v5582_v0 = vor.u32 %v5581_v42, %v5580_v1  ;;  %v5585_v31 = vor.u32 %v5584_v39, %v5583_v32  ;;  %v5588_v61 = vor.u32 %v5587_v53, %v5586_v22 }
 0x5ab   : > { %vm11743_vm4 = vcmp.eq.s32.totalorder %v20873_v24, 0  ;;  %v5591_v49 = vor.u32 %v5590_v29, %v5589_v9  ;;  %v5592_v59 = vshll.u32 %v23189_v63, %v5577_v40  ;;  %v5593_v43 = vshrl.u32 %v23191_v28, %v5578_v27 }
 0x5ac   : > { %v14813_v37 = vadd.s32 4294967294, %v5116_v10  ;;  %vm5595_vm5 = vcmp.lt.s32.totalorder %v5576_v6, 1  ;;  %vm5039_vm6 = vcmp.lt.s32.totalorder %v20870_v17, 2  ;;  %vm11742_vm8 = vcmp.lt.s32.totalorder %v20873_v24, 2 }
 0x5ad   : > { %vm5596_vm9 = vcmp.lt.s32.totalorder %v5576_v6, 2  ;;  %vm5597_vm10 = vcmp.lt.s32.totalorder %v5576_v6, 3  ;;  %vm5598_vm11 = vcmp.lt.s32.totalorder %v5576_v6, 4  ;;  %vm5037_vm12 = vweird.f32 %v20550_v13 }
 0x5ae   : > { %vm14814_vm7 = vcmp.lt.s32.totalorder %v14813_v37, 0  ;;  %v5594_v33 = vor.u32 %v5593_v43, %v5592_v59  ;;  %v5599_v11 = vsel %vm5595_vm5, %v5579_v44, %v5582_v0  ;;  %v5600_v30 = vsel %vm5598_vm11, %v5588_v61, 2102212464 }
 0x5af   : > { %v5119_v34 = vsel %vm14814_vm7, 0, %v14813_v37  ;;  %v5601_v41 = vsel %vm5597_vm10, %v5585_v31, %v5600_v30  ;;  %v5603_v38 = vsel %vm5595_vm5, %v5582_v0, %v5585_v31  ;;  %v5604_v15 = vsel %vm5598_vm11, %v5591_v49, 920167782 }
 0x5b0   : > { %v5120_v19 = vsub.s32 32, %v5119_v34  ;;  %v5124_v35 = vsub.s32 4294967266, %v5119_v34  ;;  %v5121_v36 = vshll.u32 %v20859_v48, %v5119_v34  ;;  %v5607_v40 = vsel %vm5595_vm5, %v5585_v31, %v5588_v61 }
 0x5b1   : > { %v5608_v60 = vsel %vm5598_vm11, %v5594_v33, 1326507024  ;;  %v5605_v57 = vsel %vm5597_vm10, %v5588_v61, %v5604_v15  ;;  %v5602_v39 = vsel %vm5596_vm9, %v5599_v11, %v5601_v41  ;;  %vm5677_vm13 = vcmp.gt.s32.totalorder %v5676_v26, 0  ;;  %v23304_v41 = vld [vmem:[#allocation10_spill] sm:$0xff] }
 0x5b2   : > { %v15663_v52 = vpop.eup %15662  ;;  %v5122_v27 = vshrl.u32 %v5104_v8, %v5120_v19  ;;  %v5125_v25 = vadd.s32 127, %v5124_v35  ;;  %v5609_v1 = vsel %vm5597_vm10, %v5591_v49, %v5608_v60  ;;  %v5606_v10 = vsel %vm5596_vm9, %v5603_v38, %v5605_v57 }
 0x5b3   : > { %v15665_v42 = vpop.eup %15664  ;;  %v5044_v32 = vxor.u32 2147483648, %v15663_v52  ;;  %v5610_v22 = vsel %vm5596_vm9, %v5607_v40, %v5609_v1  ;;  %v20930_v43 = vmul.u32.u64.low %v20878_v2, %v5606_v10  ;;  %v20931_v34 = vmul.u32.u64.high %v20878_v2, %v5606_v10, %v20930_v43 }
 0x5b4   : > { %v5041_v48 = vxor.u32 2147483648, %v15665_v42  ;;  %v5123_v53 = vor.u32 %v5122_v27, %v5121_v36  ;;  %v5126_v29 = vshll.u32 %v5125_v25, 23  ;;  %v5678_v19 = vsel %vm5677_vm13, %v5676_v26, 0 }
 0x5b5   : > { %v5045_v8 = vsel %vm5043_vm3, %v5044_v32, %v15665_v42  ;;  %v11748_v0 = vsel %vm11746_vm1, %v5044_v32, %v15665_v42  ;;  %v20918_v9 = vmul.u32.u64.low %v20878_v2, %v5610_v22  ;;  %v20919_v37 = vmul.u32.u64.high %v20878_v2, %v5610_v22, %v20918_v9 }
 0x5b6   : > { %v5042_v44 = vsel %vm5040_vm0, %v15663_v52, %v5041_v48  ;;  %v5127_v31 = vor.u32 4788187, %v5126_v29  ;;  %v5130_v6 = vcvt.s32.f32 %v5123_v53  ;;  %v11745_v61 = vsel %vm11743_vm4, %v15663_v52, %v5041_v48 }
 0x5b7   : > { %v5046_v49 = vsel %vm5039_vm6, %v5042_v44, %v5045_v8  ;;  %v11749_v59 = vsel %vm11742_vm8, %v11745_v61, %v11748_v0  ;;  %vm20940_vm14 = vcmp.le.f32.partialorder %v5048_v45, 0.7853982  ;;  %v20948_v38 = vadd.f32 %v20868_v7, %v23304_v41 }
 0x5b8   : > { %v5047_v33 = vsel %vm5037_vm12, nan, %v5046_v49  ;;  %v5128_v11 = vand.u32 2147483647, %v5127_v31  ;;  %v11750_v30 = vsel %vm5037_vm12, nan, %v11749_v59  ;;  %vm5620_vm15 = vc.u32 %v20919_v37, %v20930_v43 }
 0x5b9   : > { %v7669_v24 = vmul.f32 %v16711_v23, %v5047_v33  ;;  %v14397_v35 = vmul.f32 %v16718_v12, %v11750_v30  ;;  %v5680_v13 = vand.u32 31, %v5678_v19  ;;  %v20954_v45 = vshll.u32 %v5674_v4, 8 }
 0x5ba   : > { %v5131_v36 = vmul.f32 %v5130_v6, %v5128_v11  ;;  %v5137_v26 = vsel %vm20940_vm14, 0, %v20890_v46  ;;  %v5618_v40 = vmul.u32 %v20878_v2, %v5602_v39  ;;  %v5621_v60 = vadd.s32 1, %v20931_v34 }
 0x5bb   : > { %v14461_v15 = vadd.f32 %v14397_v35, %v7669_v24  ;;  %v5679_v52 = vshrl.u32 %v5678_v19, 5  ;;  %v5681_v27 = vsub.s32 32, %v5680_v13  ;;  %v5683_v25 = vshll.u32 %v23185_v18, %v5680_v13 }
 0x5bc   : > { %v5132_v7 = vxor.u32 2147483648, %v5131_v36  ;;  %v5622_v57 = vsel %vm5620_vm15, %v5621_v60, %v20931_v34  ;;  %v5686_v54 = vshll.u32 %v23186_v5, %v5680_v13  ;;  %v5689_v4 = vshll.u32 %v23187_v16, %v5680_v13 }
 0x5bd   : > { %14525 = vst [vmem:[%s16934_s6 + $0x130] sm:$0xff] %v14461_v15  ;;  %v5692_v1 = vshll.u32 %v23188_v47, %v5680_v13  ;;  %v5623_v2 = vadd.s32 %v5622_v57, %v5618_v40  ;;  %v5684_v42 = vshrl.u32 %v23186_v5, %v5681_v27  ;;  %v5695_v32 = vshll.u32 %v23189_v63, %v5680_v13 }
 0x5be   : > { %v5133_v46 = vsel %vm5050_vm2, %v5132_v7, %v5131_v36  ;;  %v5687_v10 = vshrl.u32 %v23187_v16, %v5681_v27  ;;  %v5690_v22 = vshrl.u32 %v23188_v47, %v5681_v27  ;;  %v5693_v48 = vshrl.u32 %v23189_v63, %v5681_v27 }
 0x5bf   : > { %v5136_v39 = vsel %vm20940_vm14, %v20632_v51, %v5133_v46  ;;  %v5624_v53 = vadd.s32 536870912, %v5623_v2  ;;  %v5685_v29 = vor.u32 %v5684_v42, %v5683_v25  ;;  %v5696_v8 = vshrl.u32 %v23191_v28, %v5681_v27 }
 0x5c0   : > { %15666 = vcosq.f32 %v5136_v39  ;;  %v5688_v0 = vor.u32 %v5687_v10, %v5686_v54  ;;  %v5691_v9 = vor.u32 %v5690_v22, %v5689_v4  ;;  %v5694_v44 = vor.u32 %v5693_v48, %v5692_v1 }
 0x5c1   : > { %15668 = vsinq.f32 %v5136_v39  ;;  %v11844_v31 = vadd.s32 3, %v5137_v26  ;;  %v5625_v6 = vshrl.u32 %v5624_v53, 30  ;;  %v5697_v61 = vor.u32 %v5696_v8, %v5695_v32 }
 0x5c2   : > { %vm5698_vm2 = vcmp.lt.s32.totalorder %v5679_v52, 1  ;;  %v5682_v49 = vshrl.u32 %v23185_v18, %v5681_v27  ;;  %vm5701_vm3 = vcmp.lt.s32.totalorder %v5679_v52, 4  ;;  %v5360_v34 = vand.u32 2139095040, %v20948_v38 }
 0x5c3   : > { %v5706_v59 = vsel %vm5698_vm2, %v5685_v29, %v5688_v0  ;;  %v5626_v33 = vshll.u32 %v5625_v6, 30  ;;  %vm5700_vm1 = vcmp.lt.s32.totalorder %v5679_v52, 3  ;;  %v5703_v11 = vsel %vm5701_vm3, %v5691_v9, 2102212464 }
 0x5c4   : > { %v5707_v30 = vsel %vm5701_vm3, %v5694_v44, 920167782  ;;  %vm5699_vm0 = vcmp.lt.s32.totalorder %v5679_v52, 2  ;;  %v5710_v17 = vsel %vm5698_vm2, %v5688_v0, %v5691_v9  ;;  %v5711_v24 = vsel %vm5701_vm3, %v5697_v61, 1326507024 }
 0x5c5   : > { %v5708_v19 = vsel %vm5700_vm1, %v5691_v9, %v5707_v30  ;;  %v5141_v35 = vand.u32 3, %v5137_v26  ;;  %v20980_v41 = vsub.s32 %v5623_v2, %v5626_v33  ;;  %v5702_v36 = vsel %vm5698_vm2, %v5682_v49, %v5685_v29 }
 0x5c6   : > { %v5709_v13 = vsel %vm5699_vm0, %v5706_v59, %v5708_v19  ;;  %v5704_v15 = vsel %vm5700_vm1, %v5688_v0, %v5703_v11  ;;  %v5712_v40 = vsel %vm5700_vm1, %v5694_v44, %v5711_v24  ;;  %v11845_v57 = vand.u32 3, %v11844_v31 }
 0x5c7   : > { %v20984_v60 = vmul.u32.u64.low %v20954_v45, %v5709_v13  ;;  %v20985_v7 = vmul.u32.u64.high %v20954_v45, %v5709_v13, %v20984_v60  ;;  %v5629_v27 = vsub.s32 0, %v20980_v41  ;;  %v5713_v25 = vsel %vm5699_vm0, %v5710_v17, %v5712_v40 }
 0x5c8   : > { %v20991_v54 = vmul.u32.u64.low %v20954_v45, %v5713_v25  ;;  %v20992_v26 = vmul.u32.u64.high %v20954_v45, %v5713_v25, %v20991_v54  ;;  %v5361_v4 = vshrl.u32 %v5360_v34, 23  ;;  %vm5140_vm4 = vweird.f32 %v20632_v51 }
 0x5c9   : > { %vm5565_vm5 = vcmp.lt.s32.totalorder %v20802_v56, 0  ;;  %v14832_v1 = vmin.u32 %v5629_v27, %v20980_v41  ;;  %v5705_v46 = vsel %vm5699_vm0, %v5702_v36, %v5704_v15  ;;  %vm5142_vm6 = vcmp.lt.s32.totalorder %v5141_v35, 2 }
 0x5ca   : > { %v5649_v2 = vsub.s32 4, %v5625_v6  ;;  %v5724_v42 = vadd.s32 1, %v20985_v7  ;;  %v5357_v32 = vand.u32 2147483647, %v20948_v38  ;;  %vm5143_vm7 = vcmp.eq.s32.totalorder %v5141_v35, 0 }
 0x5cb   : > { %vm5146_vm8 = vcmp.eq.s32.totalorder %v5141_v35, 2  ;;  %v5631_v39 = vclz %v14832_v1  ;;  %v14823_v10 = vadd.s32 4294967169, %v5361_v4  ;;  %vm11846_vm9 = vcmp.lt.s32.totalorder %v11845_v57, 2 }
 0x5cc   : > { %vm11847_vm10 = vcmp.eq.s32.totalorder %v11845_v57, 0  ;;  %v5721_v48 = vmul.u32 %v20954_v45, %v5705_v46  ;;  %vm5723_vm11 = vc.u32 %v20992_v26, %v20984_v60  ;;  %vm11850_vm12 = vcmp.eq.s32.totalorder %v11845_v57, 2 }
 0x5cd   : > { %v15667_v22 = vpop.eup %15666  ;;  %v14833_v29 = vadd.s32 4294967294, %v5631_v39  ;;  %v5725_v8 = vsel %vm5723_vm11, %v5724_v42, %v20985_v7  ;;  %v5619_v9 = vadd.s32 %v20930_v43, %v20919_v37  ;;  %v5650_v44 = vsel %vm5565_vm5, %v5649_v2, %v5625_v6 }
 0x5ce   : > { %v15669_v52 = vpop.eup %15668  ;;  %v5147_v53 = vxor.u32 2147483648, %v15667_v22  ;;  %v5726_v31 = vadd.s32 %v5725_v8, %v5721_v48  ;;  %v5367_v49 = vadd.s32 1, %v14823_v10  ;;  %v5364_v43 = vand.u32 8388607, %v5357_v32  ;;  %v23307_v48 = vld [vmem:[#allocation11_spill] sm:$0xff] }
 0x5cf   : > { %v5144_v0 = vxor.u32 2147483648, %v15669_v52  ;;  %vm14834_vm13 = vcmp.lt.s32.totalorder %v14833_v29, 0  ;;  %vm21027_vm15 = vcmp.le.f32.partialorder %v5563_v58, 0.7853982  ;;  %v946_v54 = vmul.f32 %v16578_v14, %v20852_v3 }
 0x5d0   : > { %v5148_v61 = vsel %vm5146_vm8, %v5147_v53, %v15669_v52  ;;  %v11852_v45 = vsel %vm11850_vm12, %v5147_v53, %v15669_v52  ;;  %v5634_v33 = vsel %vm14834_vm13, 0, %v14833_v29  ;;  %v5727_v11 = vadd.s32 536870912, %v5726_v31 }
 0x5d1   : > { %v5145_v59 = vsel %vm5143_vm7, %v15667_v22, %v5144_v0  ;;  %v11849_v34 = vsel %vm11847_vm10, %v15667_v22, %v5144_v0  ;;  %v5635_v37 = vsub.s32 32, %v5634_v33  ;;  %v5639_v24 = vsub.s32 4294967266, %v5634_v33 }
 0x5d2   : > { %v5149_v30 = vsel %vm5142_vm6, %v5145_v59, %v5148_v61  ;;  %v11853_v19 = vsel %vm11846_vm9, %v11849_v34, %v11852_v45  ;;  %v21019_v36 = vshrl.u32 %v5727_v11, 30  ;;  %vm5368_vm14 = vcmp.gt.s32.totalorder %v5367_v49, 0 }
 0x5d3   : > { %v5150_v6 = vsel %vm5140_vm4, nan, %v5149_v30  ;;  %v11854_v17 = vsel %vm5140_vm4, nan, %v11853_v19  ;;  %v5637_v15 = vshrl.u32 %v5619_v9, %v5635_v37  ;;  %v5636_v40 = vshll.u32 %v20980_v41, %v5634_v33 }
 0x5d4   : > { %v7670_v13 = vmul.f32 %v16714_v50, %v5150_v6  ;;  %v14398_v35 = vmul.f32 %v16721_v62, %v11854_v17  ;;  %v5640_v7 = vadd.s32 127, %v5639_v24  ;;  %v5729_v27 = vshll.u32 %v21019_v36, 30 }
 0x5d5   : > { %v5369_v25 = vsel %vm5368_vm14, %v5367_v49, 0  ;;  %v5638_v1 = vor.u32 %v5637_v15, %v5636_v40  ;;  %v21035_v41 = vsel %vm21027_vm15, 0, %v5650_v44  ;;  %v5365_v22 = vor.u32 8388608, %v5364_v43 }
 0x5d6   : > { %v14462_v57 = vadd.f32 %v14398_v35, %v7670_v13  ;;  %v5371_v4 = vand.u32 31, %v5369_v25  ;;  %v5641_v46 = vshll.u32 %v5640_v7, 23  ;;  %v5730_v2 = vsub.s32 %v5726_v31, %v5729_v27 }
 0x5d7   : > { %v21039_v58 = vadd.s32 3, %v21035_v41  ;;  %v21042_v52 = vadd.f32 %v946_v54, %v23307_v48  ;;  %v5645_v8 = vcvt.s32.f32 %v5638_v1  ;;  %v5722_v0 = vadd.s32 %v20984_v60, %v20992_v26 }
 0x5d8   : > { %14526 = vst [vmem:[%s16934_s6 + $0x138] sm:$0xff] %v14462_v57  ;;  %v5372_v42 = vsub.s32 32, %v5371_v4  ;;  %v5642_v39 = vor.u32 4788187, %v5641_v46  ;;  %v5732_v10 = vsub.s32 0, %v5730_v2  ;;  %v5752_v44 = vsub.s32 4, %v21019_v36 }
 0x5d9   : > { %v5370_v31 = vshrl.u32 %v5369_v25, 5  ;;  %v5374_v61 = vshll.u32 %v23185_v18, %v5371_v4  ;;  %v5377_v45 = vshll.u32 %v23186_v5, %v5371_v4  ;;  %v21052_v33 = vshll.u32 %v5365_v22, 8 }
 0x5da   : > { %v5375_v3 = vshrl.u32 %v23186_v5, %v5372_v42  ;;  %v5378_v53 = vshrl.u32 %v23187_v16, %v5372_v42  ;;  %v5643_v29 = vand.u32 2147483647, %v5642_v39  ;;  %v14836_v9 = vmin.u32 %v5732_v10, %v5730_v2 }
 0x5db   : > { %v5381_v34 = vshrl.u32 %v23188_v47, %v5372_v42  ;;  %v5373_v11 = vshrl.u32 %v23185_v18, %v5372_v42  ;;  %v5380_v60 = vshll.u32 %v23187_v16, %v5371_v4  ;;  %v5383_v43 = vshll.u32 %v23188_v47, %v5371_v4 }
 0x5dc   : > { %v5646_v49 = vmul.f32 %v5645_v8, %v5643_v29  ;;  %v5734_v59 = vclz %v14836_v9  ;;  %v5376_v30 = vor.u32 %v5375_v3, %v5374_v61  ;;  %v5379_v19 = vor.u32 %v5378_v53, %v5377_v45 }
 0x5dd   : > { %v5384_v6 = vshrl.u32 %v23189_v63, %v5372_v42  ;;  %v5382_v17 = vor.u32 %v5381_v34, %v5380_v60  ;;  %v5386_v24 = vshll.u32 %v23189_v63, %v5371_v4  ;;  %v5387_v13 = vshrl.u32 %v23191_v28, %v5372_v42  ;;  %v21083_v34 = vpop.permute.xlu0 %864 }
 0x5de   : > { %v5647_v26 = vxor.u32 2147483648, %v5646_v49  ;;  %v14837_v37 = vadd.s32 4294967294, %v5734_v59  ;;  %vm5389_vm2 = vcmp.lt.s32.totalorder %v5370_v31, 1  ;;  %vm5390_vm1 = vcmp.lt.s32.totalorder %v5370_v31, 2 }
 0x5df   : > { %v5385_v15 = vor.u32 %v5384_v6, %v5383_v43  ;;  %v5388_v27 = vor.u32 %v5387_v13, %v5386_v24  ;;  %vm5391_vm0 = vcmp.lt.s32.totalorder %v5370_v31, 3  ;;  %vm5392_vm4 = vcmp.lt.s32.totalorder %v5370_v31, 4 }
 0x5e0   : > { %v5648_v35 = vsel %vm5565_vm5, %v5647_v26, %v5646_v49  ;;  %vm14838_vm3 = vcmp.lt.s32.totalorder %v14837_v37, 0  ;;  %v5394_v4 = vsel %vm5392_vm4, %v5382_v17, 2102212464  ;;  %v5397_v1 = vsel %vm5389_vm2, %v5376_v30, %v5379_v19 }
 0x5e1   : > { %v5651_v40 = vsel %vm21027_vm15, %v20802_v56, %v5648_v35  ;;  %v5737_v7 = vsel %vm14838_vm3, 0, %v14837_v37  ;;  %v5393_v39 = vsel %vm5389_vm2, %v5373_v11, %v5376_v30  ;;  %v5398_v10 = vsel %vm5392_vm4, %v5385_v15, 920167782 }
 0x5e2   : > { %15670 = vcosq.f32 %v5651_v40  ;;  %v5738_v25 = vsub.s32 32, %v5737_v7  ;;  %v5742_v57 = vsub.s32 4294967266, %v5737_v7  ;;  %v5739_v54 = vshll.u32 %v5730_v2, %v5737_v7 }
 0x5e3   : > { %15672 = vsinq.f32 %v5651_v40  ;;  %v5395_v51 = vsel %vm5391_vm0, %v5379_v19, %v5394_v4  ;;  %v5399_v22 = vsel %vm5391_vm0, %v5382_v17, %v5398_v10  ;;  %v5401_v48 = vsel %vm5389_vm2, %v5379_v19, %v5382_v17 }
 0x5e4   : > { %v5740_v46 = vshrl.u32 %v5722_v0, %v5738_v25  ;;  %v5743_v42 = vadd.s32 127, %v5742_v57  ;;  %v5402_v3 = vsel %vm5392_vm4, %v5388_v27, 1326507024  ;;  %v5400_v8 = vsel %vm5390_vm1, %v5397_v1, %v5399_v22 }
 0x5e5   : > { %v5403_v2 = vsel %vm5391_vm0, %v5385_v15, %v5402_v3  ;;  %v21074_v0 = vmul.u32.u64.low %v21052_v33, %v5400_v8  ;;  %v21075_v61 = vmul.u32.u64.high %v21052_v33, %v5400_v8, %v21074_v0  ;;  %vm5668_vm5 = vcmp.lt.s32.totalorder %v20833_v21, 0 }
 0x5e6   : > { %v5741_v53 = vor.u32 %v5740_v46, %v5739_v54  ;;  %v5744_v29 = vshll.u32 %v5743_v42, 23  ;;  %v5404_v9 = vsel %vm5390_vm1, %v5401_v48, %v5403_v2  ;;  %v5656_v11 = vand.u32 3, %v21035_v41  ;;  %v23310_v42 = vld [vmem:[#allocation52_spill] sm:$0xff] }
 0x5e7   : > { %v21080_v49 = vmul.u32.u64.low %v21052_v33, %v5404_v9  ;;  %v21081_v59 = vmul.u32.u64.high %v21052_v33, %v5404_v9, %v21080_v49  ;;  %v5753_v30 = vsel %vm5668_vm5, %v5752_v44, %v21019_v36  ;;  %v5396_v19 = vsel %vm5390_vm1, %v5393_v39, %v5395_v51 }
 0x5e8   : > { %v5745_v45 = vor.u32 4788187, %v5744_v29  ;;  %v5463_v60 = vand.u32 2139095040, %v21042_v52  ;;  %vm21093_vm6 = vcmp.le.f32.partialorder %v5666_v55, 0.7853982  ;;  %v5748_v43 = vcvt.s32.f32 %v5741_v53 }
 0x5e9   : > { %v12365_v6 = vand.u32 3, %v21039_v58  ;;  %v5415_v41 = vadd.s32 1, %v21075_v61  ;;  %v5460_v17 = vand.u32 2147483647, %v21042_v52  ;;  %v951_v36 = vmul.f32 %v16575_v20, %v21083_v34 }
 0x5ea   : > { %v5746_v37 = vand.u32 2147483647, %v5745_v45  ;;  %v5464_v24 = vshrl.u32 %v5463_v60, 23  ;;  %v5755_v31 = vsel %vm21093_vm6, 0, %v5753_v30  ;;  %v5412_v55 = vmul.u32 %v21052_v33, %v5396_v19 }
 0x5eb   : > { %vm5414_vm7 = vc.u32 %v21081_v59, %v21074_v0  ;;  %vm5657_vm8 = vcmp.lt.s32.totalorder %v5656_v11, 2  ;;  %vm5658_vm9 = vcmp.eq.s32.totalorder %v5656_v11, 0  ;;  %vm5661_vm10 = vcmp.eq.s32.totalorder %v5656_v11, 2 }
 0x5ec   : > { %v5749_v44 = vmul.f32 %v5748_v43, %v5746_v37  ;;  %v5416_v58 = vsel %vm5414_vm7, %v5415_v41, %v21075_v61  ;;  %v14827_v13 = vadd.s32 4294967169, %v5464_v24  ;;  %vm12366_vm11 = vcmp.lt.s32.totalorder %v12365_v6, 2 }
 0x5ed   : > { %v5417_v15 = vadd.s32 %v5416_v58, %v5412_v55  ;;  %vm12367_vm12 = vcmp.eq.s32.totalorder %v12365_v6, 0  ;;  %vm12370_vm13 = vcmp.eq.s32.totalorder %v12365_v6, 2  ;;  %v12468_v7 = vadd.s32 3, %v5755_v31 }
 0x5ee   : > { %v5750_v35 = vxor.u32 2147483648, %v5749_v44  ;;  %v5470_v27 = vadd.s32 1, %v14827_v13  ;;  %v5467_v4 = vand.u32 8388607, %v5460_v17  ;;  %v21116_v39 = vadd.f32 %v951_v36, %v23310_v42 }
 0x5ef   : > { %v15671_v40 = vpop.eup %15670  ;;  %v5418_v54 = vadd.s32 536870912, %v5417_v15  ;;  %vm5655_vm15 = vweird.f32 %v20802_v56  ;;  %v21127_v61 = vand.u32 3, %v5755_v31  ;;  %v21130_v19 = vand.u32 3, %v12468_v7 }
 0x5f0   : > { %v15673_v25 = vpop.eup %15672  ;;  %v5662_v57 = vxor.u32 2147483648, %v15671_v40  ;;  %v5751_v33 = vsel %vm5668_vm5, %v5750_v35, %v5749_v44  ;;  %vm5471_vm14 = vcmp.gt.s32.totalorder %v5470_v27, 0  ;;  %v5468_v56 = vor.u32 8388608, %v5467_v4 }
 0x5f1   : > { %v5659_v1 = vxor.u32 2147483648, %v15673_v25  ;;  %v5754_v46 = vsel %vm21093_vm6, %v20833_v21, %v5751_v33  ;;  %v21119_v22 = vshrl.u32 %v5418_v54, 30  ;;  %v5472_v53 = vsel %vm5471_vm14, %v5470_v27, 0 }
 0x5f2   : > { %v5663_v10 = vsel %vm5661_vm10, %v5662_v57, %v15673_v25  ;;  %15674 = vcosq.f32 %v5754_v46  ;;  %v12372_v51 = vsel %vm12370_vm13, %v5662_v57, %v15673_v25  ;;  %v5474_v49 = vand.u32 31, %v5472_v53 }
 0x5f3   : > { %v5660_v48 = vsel %vm5658_vm9, %v15671_v40, %v5659_v1  ;;  %15676 = vsinq.f32 %v5754_v46  ;;  %v12369_v3 = vsel %vm12367_vm12, %v15671_v40, %v5659_v1  ;;  %v5420_v2 = vshll.u32 %v21119_v22, 30 }
 0x5f4   : > { %v5664_v29 = vsel %vm5657_vm8, %v5660_v48, %v5663_v10  ;;  %v12373_v8 = vsel %vm12366_vm11, %v12369_v3, %v12372_v51  ;;  %v21135_v11 = vshrl.u32 %v5472_v53, 5  ;;  %v5475_v37 = vsub.s32 32, %v5474_v49 }
 0x5f5   : > { %v5665_v9 = vsel %vm5655_vm15, nan, %v5664_v29  ;;  %v12374_v45 = vsel %vm5655_vm15, nan, %v12373_v8  ;;  %v21133_v26 = vsub.s32 %v5417_v15, %v5420_v2  ;;  %v5978_v43 = vand.u32 2139095040, %v21116_v39 }
 0x5f6   : > { %v7675_v30 = vmul.f32 %v16711_v23, %v5665_v9  ;;  %v14403_v60 = vmul.f32 %v16718_v12, %v12374_v45  ;;  %v5477_v24 = vshll.u32 %v23185_v18, %v5474_v49  ;;  %v5480_v36 = vshll.u32 %v23186_v5, %v5474_v49 }
 0x5f7   : > { %v5423_v41 = vsub.s32 0, %v21133_v26  ;;  %vm5764_vm2 = vcmp.eq.s32.totalorder %v21127_v61, 2  ;;  %v5478_v44 = vshrl.u32 %v23186_v5, %v5475_v37  ;;  %v5481_v31 = vshrl.u32 %v23187_v16, %v5475_v37 }
 0x5f8   : > { %v14467_v6 = vadd.f32 %v14403_v60, %v7675_v30  ;;  %v5483_v55 = vshll.u32 %v23187_v16, %v5474_v49  ;;  %v5484_v58 = vshrl.u32 %v23188_v47, %v5475_v37  ;;  %vm5761_vm3 = vcmp.eq.s32.totalorder %v21127_v61, 0 }
 0x5f9   : > { %vm12471_vm1 = vcmp.eq.s32.totalorder %v21130_v19, 0  ;;  %vm12474_vm0 = vcmp.eq.s32.totalorder %v21130_v19, 2  ;;  %v5413_v13 = vadd.s32 %v21074_v0, %v21081_v59  ;;  %v14824_v35 = vmin.u32 %v5423_v41, %v21133_v26 }
 0x5fa   : > { %14531 = vst [vmem:[%s16934_s6 + $0x160] sm:$0xff] %v14467_v6  ;;  %v952_v15 = vmul.f32 %v16578_v14, %v21083_v34  ;;  %vm5760_vm4 = vcmp.lt.s32.totalorder %v21127_v61, 2  ;;  %vm12470_vm5 = vcmp.lt.s32.totalorder %v21130_v19, 2  ;;  %v5479_v40 = vor.u32 %v5478_v44, %v5477_v24 }
 0x5fb   : > { %v5482_v7 = vor.u32 %v5481_v31, %v5480_v36  ;;  %v5485_v27 = vor.u32 %v5484_v58, %v5483_v55  ;;  %v21157_v25 = vshll.u32 %v5468_v56, 8  ;;  %vm5758_vm6 = vweird.f32 %v20833_v21 }
 0x5fc   : > { %v5425_v57 = vclz %v14824_v35  ;;  %v5486_v33 = vshll.u32 %v23188_v47, %v5474_v49  ;;  %v5487_v0 = vshrl.u32 %v23189_v63, %v5475_v37  ;;  %v5490_v59 = vshrl.u32 %v23191_v28, %v5475_v37 }
 0x5fd   : > { %v5476_v34 = vshrl.u32 %v23185_v18, %v5475_v37  ;;  %v5489_v54 = vshll.u32 %v23189_v63, %v5474_v49  ;;  %vm5492_vm7 = vcmp.lt.s32.totalorder %v21135_v11, 1  ;;  %v5979_v4 = vshrl.u32 %v5978_v43, 23 }
 0x5fe   : > { %v14825_v1 = vadd.s32 4294967294, %v5425_v57  ;;  %v5488_v46 = vor.u32 %v5487_v0, %v5486_v33  ;;  %vm5493_vm8 = vcmp.lt.s32.totalorder %v21135_v11, 2  ;;  %vm5495_vm9 = vcmp.lt.s32.totalorder %v21135_v11, 4 }
 0x5ff   : > { %v15675_v42 = vpop.eup %15674  ;;  %v5491_v10 = vor.u32 %v5490_v59, %v5489_v54  ;;  %vm5494_vm10 = vcmp.lt.s32.totalorder %v21135_v11, 3  ;;  %v5496_v51 = vsel %vm5492_vm7, %v5476_v34, %v5479_v40  ;;  %v5497_v48 = vsel %vm5495_vm9, %v5485_v27, 2102212464 }
 0x600   : > { %v15677_v3 = vpop.eup %15676  ;;  %v5765_v53 = vxor.u32 2147483648, %v15675_v42  ;;  %vm14826_vm11 = vcmp.lt.s32.totalorder %v14825_v1, 0  ;;  %v5500_v29 = vsel %vm5492_vm7, %v5479_v40, %v5482_v7  ;;  %v5501_v8 = vsel %vm5495_vm9, %v5488_v46, 920167782 }
 0x601   : > { %v5762_v2 = vxor.u32 2147483648, %v15677_v3  ;;  %v5428_v9 = vsel %vm14826_vm11, 0, %v14825_v1  ;;  %v5502_v45 = vsel %vm5494_vm10, %v5485_v27, %v5501_v8  ;;  %v5504_v49 = vsel %vm5492_vm7, %v5482_v7, %v5485_v27  ;;  %v23311_v1 = vld [vmem:[#allocation53_spill] sm:$0xff] }
 0x602   : > { %v5766_v30 = vsel %vm5764_vm2, %v5765_v53, %v15677_v3  ;;  %v12476_v60 = vsel %vm12474_vm0, %v5765_v53, %v15677_v3  ;;  %v5429_v56 = vsub.s32 32, %v5428_v9  ;;  %v5430_v37 = vshll.u32 %v21133_v26, %v5428_v9 }
 0x603   : > { %v5763_v43 = vsel %vm5761_vm3, %v15675_v42, %v5762_v2  ;;  %v12473_v6 = vsel %vm12471_vm1, %v15675_v42, %v5762_v2  ;;  %v5433_v41 = vsub.s32 4294967266, %v5428_v9  ;;  %v5503_v24 = vsel %vm5493_vm8, %v5500_v29, %v5502_v45 }
 0x604   : > { %v5767_v36 = vsel %vm5760_vm4, %v5763_v43, %v5766_v30  ;;  %v12477_v44 = vsel %vm12470_vm5, %v12473_v6, %v12476_v60  ;;  %v5431_v31 = vshrl.u32 %v5413_v13, %v5429_v56  ;;  %v5505_v26 = vsel %vm5495_vm9, %v5491_v10, 1326507024 }
 0x605   : > { %v5768_v55 = vsel %vm5758_vm6, nan, %v5767_v36  ;;  %v12478_v58 = vsel %vm5758_vm6, nan, %v12477_v44  ;;  %v5434_v35 = vadd.s32 127, %v5433_v41  ;;  %v5506_v40 = vsel %vm5494_vm10, %v5488_v46, %v5505_v26 }
 0x606   : > { %v7676_v61 = vmul.f32 %v16714_v50, %v5768_v55  ;;  %v14404_v19 = vmul.f32 %v16721_v62, %v12478_v58  ;;  %v5498_v13 = vsel %vm5494_vm10, %v5482_v7, %v5497_v48  ;;  %v5507_v27 = vsel %vm5493_vm8, %v5504_v49, %v5506_v40 }
 0x607   : > { %v5432_v57 = vor.u32 %v5431_v31, %v5430_v37  ;;  %v5435_v33 = vshll.u32 %v5434_v35, 23  ;;  %v21211_v21 = vmul.u32.u64.low %v21157_v25, %v5507_v27  ;;  %v21212_v0 = vmul.u32.u64.high %v21157_v25, %v5507_v27, %v21211_v21 }
 0x608   : > { %v14468_v59 = vadd.f32 %v14404_v19, %v7676_v61  ;;  %v21215_v34 = vmul.u32.u64.low %v21157_v25, %v5503_v24  ;;  %v21216_v54 = vmul.u32.u64.high %v21157_v25, %v5503_v24, %v21215_v34  ;;  %v21220_v46 = vadd.f32 %v952_v15, %v23311_v1 }
 0x609   : > { %v5436_v42 = vor.u32 4788187, %v5435_v33  ;;  %v5443_v7 = vsub.s32 4, %v21119_v22  ;;  %v14847_v10 = vadd.s32 4294967169, %v5979_v4  ;;  %v5499_v48 = vsel %vm5493_vm8, %v5496_v51, %v5498_v13 }
 0x60a   : > { %14532 = vst [vmem:[%s16934_s6 + $0x168] sm:$0xff] %v14468_v59  ;;  %v5975_v3 = vand.u32 2147483647, %v21116_v39  ;;  %v5439_v29 = vcvt.s32.f32 %v5432_v57  ;;  %vm5517_vm12 = vc.u32 %v21212_v0, %v21215_v34  ;;  %vm5359_vm13 = vcmp.lt.s32.totalorder %v20948_v38, 0 }
 0x60b   : > { %v5437_v53 = vand.u32 2147483647, %v5436_v42  ;;  %v5518_v15 = vadd.s32 1, %v21216_v54  ;;  %v5985_v8 = vadd.s32 1, %v14847_v10  ;;  %v6081_v2 = vand.u32 2139095040, %v21220_v46 }
 0x60c   : > { %v5444_v11 = vsel %vm5359_vm13, %v5443_v7, %v21119_v22  ;;  %v5515_v4 = vmul.u32 %v21157_v25, %v5499_v48  ;;  %v5982_v45 = vand.u32 8388607, %v5975_v3  ;;  %vm5358_vm15 = vcmp.le.f32.partialorder %v5357_v32, 0.7853982 }
 0x60d   : > { %v5440_v9 = vmul.f32 %v5439_v29, %v5437_v53  ;;  %v5519_v51 = vsel %vm5517_vm12, %v5518_v15, %v21216_v54  ;;  %vm5986_vm14 = vcmp.gt.s32.totalorder %v5985_v8, 0  ;;  %v5446_v56 = vsel %vm5358_vm15, 0, %v5444_v11 }
 0x60e   : > { %v5520_v30 = vadd.s32 %v5519_v51, %v5515_v4  ;;  %v5987_v60 = vsel %vm5986_vm14, %v5985_v8, 0  ;;  %v6082_v43 = vshrl.u32 %v6081_v2, 23  ;;  %v5983_v41 = vor.u32 8388608, %v5982_v45 }
 0x60f   : > { %v5441_v49 = vxor.u32 2147483648, %v5440_v9  ;;  %v5989_v37 = vand.u32 31, %v5987_v60  ;;  %v6078_v36 = vand.u32 2147483647, %v21220_v46  ;;  %v21245_v44 = vand.u32 3, %v5446_v56 }
 0x610   : > { %v5521_v6 = vadd.s32 536870912, %v5520_v30  ;;  %v12156_v31 = vadd.s32 3, %v5446_v56  ;;  %v14851_v58 = vadd.s32 4294967169, %v6082_v43  ;;  %v5988_v54 = vshrl.u32 %v5987_v60, 5 }
 0x611   : > { %v5442_v22 = vsel %vm5359_vm13, %v5441_v49, %v5440_v9  ;;  %v5990_v24 = vsub.s32 32, %v5989_v37  ;;  %v5992_v40 = vshll.u32 %v23185_v18, %v5989_v37  ;;  %v5995_v13 = vshll.u32 %v23186_v5, %v5989_v37 }
 0x612   : > { %v5445_v25 = vsel %vm5358_vm15, %v20948_v38, %v5442_v22  ;;  %v21247_v32 = vshrl.u32 %v5521_v6, 30  ;;  %v5998_v27 = vshll.u32 %v23187_v16, %v5989_v37  ;;  %v6001_v57 = vshll.u32 %v23188_v47, %v5989_v37 }
 0x613   : > { %15678 = vcosq.f32 %v5445_v25  ;;  %v5993_v26 = vshrl.u32 %v23186_v5, %v5990_v24  ;;  %v5996_v55 = vshrl.u32 %v23187_v16, %v5990_v24  ;;  %v5999_v61 = vshrl.u32 %v23188_v47, %v5990_v24 }
 0x614   : > { %15680 = vsinq.f32 %v5445_v25  ;;  %v5523_v35 = vshll.u32 %v21247_v32, 30  ;;  %v6002_v19 = vshrl.u32 %v23189_v63, %v5990_v24  ;;  %v6005_v33 = vshrl.u32 %v23191_v28, %v5990_v24 }
 0x615   : > { %v21261_v59 = vand.u32 3, %v12156_v31  ;;  %v6004_v1 = vshll.u32 %v23189_v63, %v5989_v37  ;;  %v5994_v42 = vor.u32 %v5993_v26, %v5992_v40  ;;  %v5997_v7 = vor.u32 %v5996_v55, %v5995_v13 }
 0x616   : > { %v21259_v21 = vsub.s32 %v5520_v30, %v5523_v35  ;;  %v6000_v10 = vor.u32 %v5999_v61, %v5998_v27  ;;  %v6003_v48 = vor.u32 %v6002_v19, %v6001_v57  ;;  %v6088_v15 = vadd.s32 1, %v14851_v58 }
 0x617   : > { %v6006_v29 = vor.u32 %v6005_v33, %v6004_v1  ;;  %vm5455_vm2 = vcmp.eq.s32.totalorder %v21245_v44, 2  ;;  %v5516_v8 = vadd.s32 %v21215_v34, %v21212_v0  ;;  %v5991_v2 = vshrl.u32 %v23185_v18, %v5990_v24 }
 0x618   : > { %v5526_v53 = vsub.s32 0, %v21259_v21  ;;  %v21269_v9 = vshll.u32 %v5983_v41, 8  ;;  %v21273_v11 = vand.u32 8388607, %v6078_v36  ;;  %vm5452_vm3 = vcmp.eq.s32.totalorder %v21245_v44, 0 }
 0x619   : > { %vm12159_vm1 = vcmp.eq.s32.totalorder %v21261_v59, 0  ;;  %vm6007_vm0 = vcmp.lt.s32.totalorder %v5988_v54, 1  ;;  %vm6009_vm4 = vcmp.lt.s32.totalorder %v5988_v54, 3  ;;  %vm6010_vm5 = vcmp.lt.s32.totalorder %v5988_v54, 4 }
 0x61a   : > { %v14828_v4 = vmin.u32 %v5526_v53, %v21259_v21  ;;  %vm5451_vm6 = vcmp.lt.s32.totalorder %v21245_v44, 2  ;;  %vm12158_vm7 = vcmp.lt.s32.totalorder %v21261_v59, 2  ;;  %v6012_v0 = vsel %vm6010_vm5, %v6000_v10, 2102212464 }
 0x61b   : > { %v6015_v34 = vsel %vm6007_vm0, %v5994_v42, %v5997_v7  ;;  %v6016_v51 = vsel %vm6010_vm5, %v6003_v48, 920167782  ;;  %v6019_v45 = vsel %vm6007_vm0, %v5997_v7, %v6000_v10  ;;  %vm5449_vm8 = vweird.f32 %v20948_v38 }
 0x61c   : > { %v5528_v49 = vclz %v14828_v4  ;;  %v6017_v30 = vsel %vm6009_vm4, %v6000_v10, %v6016_v51  ;;  %v6020_v60 = vsel %vm6010_vm5, %v6006_v29, 1326507024  ;;  %vm6089_vm9 = vcmp.gt.s32.totalorder %v6088_v15, 0  ;;  %v861_v4 = vpop.permute.xlu1 %860 }
 0x61d   : > { %v5546_v56 = vsub.s32 4, %v21247_v32  ;;  %vm12162_vm10 = vcmp.eq.s32.totalorder %v21261_v59, 2  ;;  %vm6008_vm11 = vcmp.lt.s32.totalorder %v5988_v54, 2  ;;  %v6011_v37 = vsel %vm6007_vm0, %v5991_v2, %v5994_v42 }
 0x61e   : > { %v14829_v43 = vadd.s32 4294967294, %v5528_v49  ;;  %v6013_v22 = vsel %vm6009_vm4, %v5997_v7, %v6012_v0  ;;  %v6018_v6 = vsel %vm6008_vm11, %v6015_v34, %v6017_v30  ;;  %v6021_v25 = vsel %vm6009_vm4, %v6003_v48, %v6020_v60 }
 0x61f   : > { %v6022_v24 = vsel %vm6008_vm11, %v6019_v45, %v6021_v25  ;;  %v21292_v31 = vmul.u32.u64.low %v21269_v9, %v6018_v6  ;;  %v21293_v26 = vmul.u32.u64.high %v21269_v9, %v6018_v6, %v21292_v31  ;;  %v6090_v55 = vsel %vm6089_vm9, %v6088_v15, 0 }
 0x620   : > { %v15679_v41 = vpop.eup %15678  ;;  %vm5462_vm12 = vcmp.lt.s32.totalorder %v21042_v52, 0  ;;  %vm14830_vm13 = vcmp.lt.s32.totalorder %v14829_v43, 0  ;;  %v21298_v40 = vmul.u32.u64.low %v21269_v9, %v6022_v24  ;;  %v21299_v61 = vmul.u32.u64.high %v21269_v9, %v6022_v24, %v21298_v40 }
 0x621   : > { %v15681_v58 = vpop.eup %15680  ;;  %v5456_v35 = vxor.u32 2147483648, %v15679_v41  ;;  %v5531_v13 = vsel %vm14830_vm13, 0, %v14829_v43  ;;  %v6014_v27 = vsel %vm6008_vm11, %v6011_v37, %v6013_v22  ;;  %v6092_v57 = vand.u32 31, %v6090_v55 }
 0x622   : > { %v5453_v19 = vxor.u32 2147483648, %v15681_v58  ;;  %v5532_v1 = vsub.s32 32, %v5531_v13  ;;  %v5533_v42 = vshll.u32 %v21259_v21, %v5531_v13  ;;  %v5536_v7 = vsub.s32 4294967266, %v5531_v13 }
 0x623   : > { %v5457_v33 = vsel %vm5455_vm2, %v5456_v35, %v15681_v58  ;;  %v12164_v53 = vsel %vm12162_vm10, %v5456_v35, %v15681_v58  ;;  %v6033_v54 = vadd.s32 1, %v21293_v26  ;;  %v6030_v51 = vmul.u32 %v21269_v9, %v6014_v27 }
 0x624   : > { %v5454_v10 = vsel %vm5452_vm3, %v15679_v41, %v5453_v19  ;;  %v12161_v48 = vsel %vm12159_vm1, %v15679_v41, %v5453_v19  ;;  %v5534_v15 = vshrl.u32 %v5516_v8, %v5532_v1  ;;  %v5537_v2 = vadd.s32 127, %v5536_v7 }
 0x625   : > { %v5458_v29 = vsel %vm5451_vm6, %v5454_v10, %v5457_v33  ;;  %v12165_v21 = vsel %vm12158_vm7, %v12161_v48, %v12164_v53  ;;  %vm6032_vm14 = vc.u32 %v21299_v61, %v21292_v31  ;;  %vm21327_vm15 = vcmp.le.f32.partialorder %v5460_v17, 0.7853982 }
 0x626   : > { %v5459_v0 = vsel %vm5449_vm8, nan, %v5458_v29  ;;  %v12166_v34 = vsel %vm5449_vm8, nan, %v12165_v21  ;;  %v5535_v45 = vor.u32 %v5534_v15, %v5533_v42  ;;  %v5538_v44 = vshll.u32 %v5537_v2, 23  ;;  %v23314_v21 = vld [vmem:[#allocation12_spill] sm:$0xff] }
 0x627   : > { %v7673_v8 = vmul.f32 %v16711_v23, %v5459_v0  ;;  %v14401_v59 = vmul.f32 %v16718_v12, %v12166_v34  ;;  %v6034_v38 = vsel %vm6032_vm14, %v6033_v54, %v21293_v26  ;;  %v6093_v30 = vsub.s32 32, %v6092_v57 }
 0x628   : > { %v949_v9 = vmul.f32 %v16575_v20, %v861_v4  ;;  %v5539_v60 = vor.u32 4788187, %v5538_v44  ;;  %v6035_v43 = vadd.s32 %v6034_v38, %v6030_v51  ;;  %v6086_v22 = vor.u32 8388608, %v21273_v11 }
 0x629   : > { %v14465_v37 = vadd.f32 %v14401_v59, %v7673_v8  ;;  %v5542_v6 = vcvt.s32.f32 %v5535_v45  ;;  %v5547_v25 = vsel %vm5462_vm12, %v5546_v56, %v21247_v32  ;;  %v6091_v41 = vshrl.u32 %v6090_v55, 5 }
 0x62a   : > { %v6096_v17 = vshrl.u32 %v23186_v5, %v6093_v30  ;;  %v5540_v24 = vand.u32 2147483647, %v5539_v60  ;;  %v6036_v58 = vadd.s32 536870912, %v6035_v43  ;;  %v6099_v26 = vshrl.u32 %v23187_v16, %v6093_v30 }
 0x62b   : > { %14529 = vst [vmem:[%s16934_s6 + $0x150] sm:$0xff] %v14465_v37  ;;  %v6102_v35 = vshrl.u32 %v23188_v47, %v6093_v30  ;;  %v6095_v40 = vshll.u32 %v23185_v18, %v6092_v57  ;;  %v6098_v19 = vshll.u32 %v23186_v5, %v6092_v57  ;;  %v6104_v11 = vshll.u32 %v23188_v47, %v6092_v57 }
 0x62c   : > { %v6105_v13 = vshrl.u32 %v23189_v63, %v6093_v30  ;;  %v5543_v27 = vmul.f32 %v5542_v6, %v5540_v24  ;;  %v21345_v32 = vshrl.u32 %v6036_v58, 30  ;;  %v6101_v56 = vshll.u32 %v23187_v16, %v6092_v57 }
 0x62d   : > { %v6108_v55 = vshrl.u32 %v23191_v28, %v6093_v30  ;;  %v6097_v33 = vor.u32 %v6096_v17, %v6095_v40  ;;  %v6107_v42 = vshll.u32 %v23189_v63, %v6092_v57  ;;  %v950_v7 = vmul.f32 %v16578_v14, %v861_v4 }
 0x62e   : > { %v6106_v1 = vor.u32 %v6105_v13, %v6104_v11  ;;  %v5544_v10 = vxor.u32 2147483648, %v5543_v27  ;;  %v6038_v48 = vshll.u32 %v21345_v32, 30  ;;  %v6100_v53 = vor.u32 %v6099_v26, %v6098_v19 }
 0x62f   : > { %v6103_v54 = vor.u32 %v6102_v35, %v6101_v56  ;;  %v5549_v29 = vsel %vm21327_vm15, 0, %v5547_v25  ;;  %v6109_v15 = vor.u32 %v6108_v55, %v6107_v42  ;;  %v6126_v2 = vshll.u32 %v6086_v22, 8  ;;  %v23317_v56 = vld [vmem:[#allocation13_spill] sm:$0xff] }
 0x630   : > { %v21355_v0 = vadd.f32 %v949_v9, %v23314_v21  ;;  %v5545_v34 = vsel %vm5462_vm12, %v5544_v10, %v5543_v27  ;;  %v21359_v51 = vsub.s32 %v6035_v43, %v6038_v48  ;;  %v6094_v57 = vshrl.u32 %v23185_v18, %v6093_v30 }
 0x631   : > { %vm6113_vm2 = vcmp.lt.s32.totalorder %v6091_v41, 4  ;;  %v5548_v4 = vsel %vm21327_vm15, %v21042_v52, %v5545_v34  ;;  %vm6110_vm3 = vcmp.lt.s32.totalorder %v6091_v41, 1  ;;  %vm6112_vm1 = vcmp.lt.s32.totalorder %v6091_v41, 3 }
 0x632   : > { %v6119_v45 = vsel %vm6113_vm2, %v6106_v1, 920167782  ;;  %15682 = vcosq.f32 %v5548_v4  ;;  %v6041_v44 = vsub.s32 0, %v21359_v51  ;;  %v6115_v8 = vsel %vm6113_vm2, %v6103_v54, 2102212464 }
 0x633   : > { %v6118_v59 = vsel %vm6110_vm3, %v6097_v33, %v6100_v53  ;;  %15684 = vsinq.f32 %v5548_v4  ;;  %v6120_v38 = vsel %vm6112_vm1, %v6103_v54, %v6119_v45  ;;  %v6122_v9 = vsel %vm6110_vm3, %v6100_v53, %v6103_v54 }
 0x634   : > { %v6123_v60 = vsel %vm6113_vm2, %v6109_v15, 1326507024  ;;  %v21367_v37 = vand.u32 3, %v5549_v29  ;;  %v12260_v30 = vadd.s32 3, %v5549_v29  ;;  %v14848_v43 = vmin.u32 %v6041_v44, %v21359_v51 }
 0x635   : > { %vm6111_vm0 = vcmp.lt.s32.totalorder %v6091_v41, 2  ;;  %v6114_v49 = vsel %vm6110_vm3, %v6094_v57, %v6097_v33  ;;  %v6116_v22 = vsel %vm6112_vm1, %v6100_v53, %v6115_v8  ;;  %v6124_v25 = vsel %vm6112_vm1, %v6106_v1, %v6123_v60 }
 0x636   : > { %v6121_v6 = vsel %vm6111_vm0, %v6118_v59, %v6120_v38  ;;  %v6043_v17 = vclz %v14848_v43  ;;  %v6125_v24 = vsel %vm6111_vm0, %v6122_v9, %v6124_v25  ;;  %v5772_v19 = vand.u32 2139095040, %v21355_v0 }
 0x637   : > { %v21372_v58 = vmul.u32.u64.low %v6126_v2, %v6121_v6  ;;  %v21373_v26 = vmul.u32.u64.high %v6126_v2, %v6121_v6, %v21372_v58  ;;  %v21376_v35 = vmul.u32.u64.low %v6126_v2, %v6125_v24  ;;  %v21377_v40 = vmul.u32.u64.high %v6126_v2, %v6125_v24, %v21376_v35 }
 0x638   : > { %vm21382_vm4 = vcmp.le.f32.partialorder %v5975_v3, 0.7853982  ;;  %vm5977_vm5 = vcmp.lt.s32.totalorder %v21116_v39, 0  ;;  %v14849_v41 = vadd.s32 4294967294, %v6043_v17  ;;  %v6117_v13 = vsel %vm6111_vm0, %v6114_v49, %v6116_v22 }
 0x639   : > { %v12261_v27 = vand.u32 3, %v12260_v30  ;;  %v21388_v55 = vadd.f32 %v950_v7, %v23317_v56  ;;  %v5769_v33 = vand.u32 2147483647, %v21355_v0  ;;  %v5773_v1 = vshrl.u32 %v5772_v19, 23 }
 0x63a   : > { %vm5555_vm6 = vcmp.eq.s32.totalorder %v21367_v37, 0  ;;  %vm14850_vm7 = vcmp.lt.s32.totalorder %v14849_v41, 0  ;;  %v6061_v42 = vsub.s32 4, %v21345_v32  ;;  %v6136_v3 = vadd.s32 1, %v21373_v26 }
 0x63b   : > { %vm5554_vm8 = vcmp.lt.s32.totalorder %v21367_v37, 2  ;;  %v6046_v10 = vsel %vm14850_vm7, 0, %v14849_v41  ;;  %v6133_v48 = vmul.u32 %v6126_v2, %v6117_v13  ;;  %vm6135_vm9 = vc.u32 %v21377_v40, %v21372_v58 }
 0x63c   : > { %v14839_v53 = vadd.s32 4294967169, %v5773_v1  ;;  %vm5552_vm10 = vweird.f32 %v21042_v52  ;;  %v6031_v7 = vadd.s32 %v21292_v31, %v21299_v61  ;;  %v6047_v54 = vsub.s32 32, %v6046_v10 }
 0x63d   : > { %v6051_v29 = vsub.s32 4294967266, %v6046_v10  ;;  %v6137_v15 = vsel %vm6135_vm9, %v6136_v3, %v21373_v26  ;;  %vm5558_vm11 = vcmp.eq.s32.totalorder %v21367_v37, 2  ;;  %vm12262_vm12 = vcmp.lt.s32.totalorder %v12261_v27, 2 }
 0x63e   : > { %v6138_v21 = vadd.s32 %v6137_v15, %v6133_v48  ;;  %v5779_v34 = vadd.s32 1, %v14839_v53  ;;  %v6048_v2 = vshll.u32 %v21359_v51, %v6046_v10  ;;  %v6049_v57 = vshrl.u32 %v6031_v7, %v6047_v54 }
 0x63f   : > { %v6052_v4 = vadd.s32 127, %v6051_v29  ;;  %v6062_v45 = vsel %vm5977_vm5, %v6061_v42, %v21345_v32  ;;  %v15683_v44 = vpop.eup %15682  ;;  %vm12263_vm13 = vcmp.eq.s32.totalorder %v12261_v27, 0  ;;  %vm12266_vm14 = vcmp.eq.s32.totalorder %v12261_v27, 2 }
 0x640   : > { %v6139_v31 = vadd.s32 536870912, %v6138_v21  ;;  %vm5780_vm15 = vcmp.gt.s32.totalorder %v5779_v34, 0  ;;  %v15685_v61 = vpop.eup %15684  ;;  %v5559_v8 = vxor.u32 2147483648, %v15683_v44  ;;  %v6050_v59 = vor.u32 %v6049_v57, %v6048_v2 }
 0x641   : > { %v6053_v38 = vshll.u32 %v6052_v4, 23  ;;  %v5781_v9 = vsel %vm5780_vm15, %v5779_v34, 0  ;;  %v5556_v60 = vxor.u32 2147483648, %v15685_v61  ;;  %v6064_v51 = vsel %vm21382_vm4, 0, %v6062_v45 }
 0x642   : > { %v21408_v30 = vshrl.u32 %v6139_v31, 30  ;;  %v5783_v43 = vand.u32 31, %v5781_v9  ;;  %v5560_v32 = vsel %vm5558_vm11, %v5559_v8, %v15685_v61  ;;  %v12268_v49 = vsel %vm12266_vm14, %v5559_v8, %v15685_v61 }
 0x643   : > { %v6054_v22 = vor.u32 4788187, %v6053_v38  ;;  %v5776_v6 = vand.u32 8388607, %v5769_v33  ;;  %v5557_v25 = vsel %vm5555_vm6, %v15683_v44, %v5556_v60  ;;  %v12265_v17 = vsel %vm12263_vm13, %v15683_v44, %v5556_v60 }
 0x644   : > { %v6057_v24 = vcvt.s32.f32 %v6050_v59  ;;  %v6141_v26 = vshll.u32 %v21408_v30, 30  ;;  %v5561_v35 = vsel %vm5554_vm8, %v5557_v25, %v5560_v32  ;;  %v12269_v19 = vsel %vm12262_vm12, %v12265_v17, %v12268_v49 }
 0x645   : > { %v6055_v41 = vand.u32 2147483647, %v6054_v22  ;;  %v5784_v13 = vsub.s32 32, %v5783_v43  ;;  %v5562_v56 = vsel %vm5552_vm10, nan, %v5561_v35  ;;  %v12270_v1 = vsel %vm5552_vm10, nan, %v12269_v19 }
 0x646   : > { %v21425_v42 = vsub.s32 %v6138_v21, %v6141_v26  ;;  %v12780_v3 = vadd.s32 3, %v6064_v51  ;;  %v7674_v10 = vmul.f32 %v16714_v50, %v5562_v56  ;;  %v14402_v48 = vmul.f32 %v16721_v62, %v12270_v1 }
 0x647   : > { %v6058_v37 = vmul.f32 %v6057_v24, %v6055_v41  ;;  %v5777_v53 = vor.u32 8388608, %v5776_v6  ;;  %v5787_v29 = vshrl.u32 %v23186_v5, %v5784_v13  ;;  %v21431_v15 = vand.u32 3, %v6064_v51 }
 0x648   : > { %v6144_v27 = vsub.s32 0, %v21425_v42  ;;  %v14466_v7 = vadd.f32 %v14402_v48, %v7674_v10  ;;  %v6134_v52 = vadd.s32 %v21372_v58, %v21377_v40  ;;  %v21436_v34 = vand.u32 3, %v12780_v3 }
 0x649   : > { %v6059_v54 = vxor.u32 2147483648, %v6058_v37  ;;  %v5786_v57 = vshll.u32 %v23185_v18, %v5783_v43  ;;  %v21442_v4 = vshll.u32 %v5777_v53, 8  ;;  %v5875_v45 = vand.u32 2139095040, %v21388_v55 }
 0x64a   : > { %v14852_v21 = vmin.u32 %v6144_v27, %v21425_v42  ;;  %14530 = vst [vmem:[%s16934_s6 + $0x158] sm:$0xff] %v14466_v7  ;;  %v5789_v58 = vshll.u32 %v23186_v5, %v5783_v43  ;;  %v5790_v40 = vshrl.u32 %v23187_v16, %v5784_v13  ;;  %v5782_v61 = vshrl.u32 %v5781_v9, 5 }
 0x64b   : > { %v6060_v2 = vsel %vm5977_vm5, %v6059_v54, %v6058_v37  ;;  %v5788_v8 = vor.u32 %v5787_v29, %v5786_v57  ;;  %v5792_v59 = vshll.u32 %v23187_v16, %v5783_v43  ;;  %v5793_v51 = vshrl.u32 %v23188_v47, %v5784_v13 }
 0x64c   : > { %v6063_v44 = vsel %vm21382_vm4, %v21116_v39, %v6060_v2  ;;  %v6146_v31 = vclz %v14852_v21  ;;  %v5791_v60 = vor.u32 %v5790_v40, %v5789_v58  ;;  %vm6080_vm2 = vcmp.lt.s32.totalorder %v21220_v46, 0 }
 0x64d   : > { %15686 = vcosq.f32 %v6063_v44  ;;  %v5795_v11 = vshll.u32 %v23188_v47, %v5783_v43  ;;  %v5796_v32 = vshrl.u32 %v23189_v63, %v5784_v13  ;;  %v5798_v49 = vshll.u32 %v23189_v63, %v5783_v43 }
 0x64e   : > { %15688 = vsinq.f32 %v6063_v44  ;;  %v14853_v38 = vadd.s32 4294967294, %v6146_v31  ;;  %v5799_v22 = vshrl.u32 %v23191_v28, %v5784_v13  ;;  %v6164_v9 = vsub.s32 4, %v21408_v30 }
 0x64f   : > { %v5785_v6 = vshrl.u32 %v23185_v18, %v5784_v13  ;;  %v5794_v25 = vor.u32 %v5793_v51, %v5792_v59  ;;  %v5797_v24 = vor.u32 %v5796_v32, %v5795_v11  ;;  %vm5801_vm1 = vcmp.lt.s32.totalorder %v5782_v61, 1 }
 0x650   : > { %vm14854_vm3 = vcmp.lt.s32.totalorder %v14853_v38, 0  ;;  %v5800_v26 = vor.u32 %v5799_v22, %v5798_v49  ;;  %vm21461_vm0 = vcmp.le.f32.partialorder %v6078_v36, 0.7853982  ;;  %vm5802_vm4 = vcmp.lt.s32.totalorder %v5782_v61, 2 }
 0x651   : > { %v6149_v17 = vsel %vm14854_vm3, 0, %v14853_v38  ;;  %vm5804_vm5 = vcmp.lt.s32.totalorder %v5782_v61, 4  ;;  %vm5803_vm6 = vcmp.lt.s32.totalorder %v5782_v61, 3  ;;  %v5809_v56 = vsel %vm5801_vm1, %v5788_v8, %v5791_v60 }
 0x652   : > { %v6150_v19 = vsub.s32 32, %v6149_v17  ;;  %v6154_v43 = vsub.s32 4294967266, %v6149_v17  ;;  %v5806_v41 = vsel %vm5804_vm5, %v5794_v25, 2102212464  ;;  %v5810_v13 = vsel %vm5804_vm5, %v5797_v24, 920167782 }
 0x653   : > { %vm6073_vm7 = vcmp.eq.s32.totalorder %v21431_v15, 2  ;;  %v6151_v1 = vshll.u32 %v21425_v42, %v6149_v17  ;;  %v5811_v36 = vsel %vm5803_vm6, %v5794_v25, %v5810_v13  ;;  %vm6070_vm8 = vcmp.eq.s32.totalorder %v21431_v15, 0 }
 0x654   : > { %v6152_v3 = vshrl.u32 %v6134_v52, %v6150_v19  ;;  %v6155_v10 = vadd.s32 127, %v6154_v43  ;;  %v5805_v48 = vsel %vm5801_vm1, %v5785_v6, %v5788_v8  ;;  %v5812_v37 = vsel %vm5802_vm4, %v5809_v56, %v5811_v36 }
 0x655   : > { %v5813_v53 = vsel %vm5801_vm1, %v5791_v60, %v5794_v25  ;;  %v5814_v27 = vsel %vm5804_vm5, %v5800_v26, 1326507024  ;;  %vm6069_vm9 = vcmp.lt.s32.totalorder %v21431_v15, 2  ;;  %v5807_v29 = vsel %vm5803_vm6, %v5791_v60, %v5806_v41 }
 0x656   : > { %v6153_v7 = vor.u32 %v6152_v3, %v6151_v1  ;;  %v6156_v54 = vshll.u32 %v6155_v10, 23  ;;  %v5815_v42 = vsel %vm5803_vm6, %v5797_v24, %v5814_v27  ;;  %vm6067_vm10 = vweird.f32 %v21116_v39 }
 0x657   : > { %v5816_v52 = vsel %vm5802_vm4, %v5813_v53, %v5815_v42  ;;  %v21479_v21 = vmul.u32.u64.low %v21442_v4, %v5812_v37  ;;  %v21480_v2 = vmul.u32.u64.high %v21442_v4, %v5812_v37, %v21479_v21  ;;  %v5876_v57 = vshrl.u32 %v5875_v45, 23  ;;  %v873_v37 = vpop.permute.xlu0 %872 }
 0x658   : > { %v6157_v44 = vor.u32 4788187, %v6156_v54  ;;  %v6165_v31 = vsel %vm6080_vm2, %v6164_v9, %v21408_v30  ;;  %v21487_v58 = vmul.u32.u64.low %v21442_v4, %v5816_v52  ;;  %v21488_v40 = vmul.u32.u64.high %v21442_v4, %v5816_v52, %v21487_v58 }
 0x659   : > { %vm12782_vm11 = vcmp.lt.s32.totalorder %v21436_v34, 2  ;;  %v5808_v8 = vsel %vm5802_vm4, %v5805_v48, %v5807_v29  ;;  %v5872_v59 = vand.u32 2147483647, %v21388_v55  ;;  %v14843_v38 = vadd.s32 4294967169, %v5876_v57 }
 0x65a   : > { %v15687_v60 = vpop.eup %15686  ;;  %v6158_v51 = vand.u32 2147483647, %v6157_v44  ;;  %v6160_v11 = vcvt.s32.f32 %v6153_v7  ;;  %vm12783_vm12 = vcmp.eq.s32.totalorder %v21436_v34, 0  ;;  %vm12786_vm13 = vcmp.eq.s32.totalorder %v21436_v34, 2 }
 0x65b   : > { %v15689_v45 = vpop.eup %15688  ;;  %v6074_v30 = vxor.u32 2147483648, %v15687_v60  ;;  %v6167_v32 = vsel %vm21461_vm0, 0, %v6165_v31  ;;  %v5827_v49 = vadd.s32 1, %v21480_v2  ;;  %v5882_v22 = vadd.s32 1, %v14843_v38 }
 0x65c   : > { %v6071_v61 = vxor.u32 2147483648, %v15689_v45  ;;  %v6161_v9 = vmul.f32 %v6160_v11, %v6158_v51  ;;  %v5824_v6 = vmul.u32 %v21442_v4, %v5808_v8  ;;  %vm5826_vm14 = vc.u32 %v21488_v40, %v21479_v21 }
 0x65d   : > { %v6075_v25 = vsel %vm6073_vm7, %v6074_v30, %v15689_v45  ;;  %v12788_v17 = vsel %vm12786_vm13, %v6074_v30, %v15689_v45  ;;  %v5828_v24 = vsel %vm5826_vm14, %v5827_v49, %v21480_v2  ;;  %vm5883_vm15 = vcmp.gt.s32.totalorder %v5882_v22, 0 }
 0x65e   : > { %v6072_v26 = vsel %vm6070_vm8, %v15687_v60, %v6071_v61  ;;  %v6162_v19 = vxor.u32 2147483648, %v6161_v9  ;;  %v12785_v43 = vsel %vm12783_vm12, %v15687_v60, %v6071_v61  ;;  %v5829_v41 = vadd.s32 %v5828_v24, %v5824_v6 }
 0x65f   : > { %v6076_v4 = vsel %vm6069_vm9, %v6072_v26, %v6075_v25  ;;  %v12789_v56 = vsel %vm12782_vm11, %v12785_v43, %v12788_v17  ;;  %v12884_v13 = vadd.s32 3, %v6167_v32  ;;  %v5884_v1 = vsel %vm5883_vm15, %v5882_v22, 0 }
 0x660   : > { %v6077_v3 = vsel %vm6067_vm10, nan, %v6076_v4  ;;  %v6163_v10 = vsel %vm6080_vm2, %v6162_v19, %v6161_v9  ;;  %v12790_v36 = vsel %vm6067_vm10, nan, %v12789_v56  ;;  %v5830_v48 = vadd.s32 536870912, %v5829_v41 }
 0x661   : > { %v6166_v15 = vsel %vm21461_vm0, %v21220_v46, %v6163_v10  ;;  %v7679_v34 = vmul.f32 %v16711_v23, %v6077_v3  ;;  %v14407_v53 = vmul.f32 %v16718_v12, %v12790_v36  ;;  %v5879_v27 = vand.u32 8388607, %v5872_v59 }
 0x662   : > { %15690 = vcosq.f32 %v6166_v15  ;;  %v21525_v7 = vshrl.u32 %v5830_v48, 30  ;;  %v5886_v54 = vand.u32 31, %v5884_v1  ;;  %v955_v29 = vmul.f32 %v16575_v20, %v873_v37 }
 0x663   : > { %15692 = vsinq.f32 %v6166_v15  ;;  %v14471_v39 = vadd.f32 %v14407_v53, %v7679_v34  ;;  %v21528_v42 = vand.u32 3, %v6167_v32  ;;  %v21530_v52 = vand.u32 3, %v12884_v13  ;;  %v23320_v53 = vld [vmem:[#allocation54_spill] sm:$0xff] }
 0x664   : > { %v5832_v35 = vshll.u32 %v21525_v7, 30  ;;  %v5887_v2 = vsub.s32 32, %v5886_v54  ;;  %v5880_v57 = vor.u32 8388608, %v5879_v27  ;;  %v5885_v44 = vshrl.u32 %v5884_v1, 5 }
 0x665   : > { %14535 = vst [vmem:[%s16934_s6 + $0x180] sm:$0xff] %v14471_v39  ;;  %v5889_v31 = vshll.u32 %v23185_v18, %v5886_v54  ;;  %v956_v58 = vmul.f32 %v16578_v14, %v873_v37  ;;  %v5892_v60 = vshll.u32 %v23186_v5, %v5886_v54  ;;  %v5895_v51 = vshll.u32 %v23187_v16, %v5886_v54 }
 0x666   : > { %v21536_v8 = vsub.s32 %v5829_v41, %v5832_v35  ;;  %v5890_v38 = vshrl.u32 %v23186_v5, %v5887_v2  ;;  %v5893_v11 = vshrl.u32 %v23187_v16, %v5887_v2  ;;  %v5896_v45 = vshrl.u32 %v23188_v47, %v5887_v2 }
 0x667   : > { %v5898_v30 = vshll.u32 %v23188_v47, %v5886_v54  ;;  %v5899_v32 = vshrl.u32 %v23189_v63, %v5887_v2  ;;  %v5901_v61 = vshll.u32 %v23189_v63, %v5886_v54  ;;  %v5902_v9 = vshrl.u32 %v23191_v28, %v5887_v2 }
 0x668   : > { %v5835_v49 = vsub.s32 0, %v21536_v8  ;;  %v5891_v22 = vor.u32 %v5890_v38, %v5889_v31  ;;  %vm6176_vm2 = vcmp.eq.s32.totalorder %v21528_v42, 2  ;;  %vm12890_vm3 = vcmp.eq.s32.totalorder %v21530_v52, 2 }
 0x669   : > { %v5888_v6 = vshrl.u32 %v23185_v18, %v5887_v2  ;;  %v5894_v25 = vor.u32 %v5893_v11, %v5892_v60  ;;  %v5897_v17 = vor.u32 %v5896_v45, %v5895_v51  ;;  %v5900_v24 = vor.u32 %v5899_v32, %v5898_v30 }
 0x66a   : > { %vm6173_vm1 = vcmp.eq.s32.totalorder %v21528_v42, 0  ;;  %vm12887_vm0 = vcmp.eq.s32.totalorder %v21530_v52, 0  ;;  %v14840_v26 = vmin.u32 %v5835_v49, %v21536_v8  ;;  %vm5904_vm4 = vcmp.lt.s32.totalorder %v5885_v44, 1 }
 0x66b   : > { %vm5906_vm5 = vcmp.lt.s32.totalorder %v5885_v44, 3  ;;  %v5920_v19 = vshll.u32 %v5880_v57, 8  ;;  %vm6172_vm6 = vcmp.lt.s32.totalorder %v21528_v42, 2  ;;  %vm12886_vm7 = vcmp.lt.s32.totalorder %v21530_v52, 2 }
 0x66c   : > { %v5903_v43 = vor.u32 %v5902_v9, %v5901_v61  ;;  %vm5907_vm8 = vcmp.lt.s32.totalorder %v5885_v44, 4  ;;  %v5908_v41 = vsel %vm5904_vm4, %v5888_v6, %v5891_v22  ;;  %v5912_v4 = vsel %vm5904_vm4, %v5891_v22, %v5894_v25 }
 0x66d   : > { %vm6170_vm9 = vweird.f32 %v21220_v46  ;;  %v5837_v56 = vclz %v14840_v26  ;;  %v5909_v13 = vsel %vm5907_vm8, %v5897_v17, 2102212464  ;;  %v5913_v1 = vsel %vm5907_vm8, %v5900_v24, 920167782 }
 0x66e   : > { %v5916_v3 = vsel %vm5904_vm4, %v5894_v25, %v5897_v17  ;;  %vm5905_vm10 = vcmp.lt.s32.totalorder %v5885_v44, 2  ;;  %v5910_v10 = vsel %vm5906_vm5, %v5894_v25, %v5909_v13  ;;  %v5914_v36 = vsel %vm5906_vm5, %v5897_v17, %v5913_v1 }
 0x66f   : > { %v5917_v48 = vsel %vm5907_vm8, %v5903_v43, 1326507024  ;;  %v14841_v37 = vadd.s32 4294967294, %v5837_v56  ;;  %v5915_v15 = vsel %vm5905_vm10, %v5912_v4, %v5914_v36  ;;  %v21561_v27 = vadd.f32 %v955_v29, %v23320_v53  ;;  %v15691_v54 = vpop.eup %15690  ;;  %v23321_v29 = vld [vmem:[#allocation18_spill] sm:$0xff] }
 0x670   : > { %v5918_v34 = vsel %vm5906_vm5, %v5900_v24, %v5917_v48  ;;  %v5911_v39 = vsel %vm5905_vm10, %v5908_v41, %v5910_v10  ;;  %v21563_v2 = vmul.u32.u64.low %v5920_v19, %v5915_v15  ;;  %v21564_v57 = vmul.u32.u64.high %v5920_v19, %v5915_v15, %v21563_v2  ;;  %v15693_v31 = vpop.eup %15692 }
 0x671   : > { %v5919_v35 = vsel %vm5905_vm10, %v5916_v3, %v5918_v34  ;;  %v6177_v38 = vxor.u32 2147483648, %v15691_v54  ;;  %vm14842_vm11 = vcmp.lt.s32.totalorder %v14841_v37, 0  ;;  %v6174_v11 = vxor.u32 2147483648, %v15693_v31 }
 0x672   : > { %v21567_v60 = vmul.u32.u64.low %v5920_v19, %v5919_v35  ;;  %v21568_v51 = vmul.u32.u64.high %v5920_v19, %v5919_v35, %v21567_v60  ;;  %v5825_v44 = vadd.s32 %v21479_v21, %v21488_v40  ;;  %v5840_v45 = vsel %vm14842_vm11, 0, %v14841_v37 }
 0x673   : > { %v21573_v30 = vadd.f32 %v956_v58, %v23321_v29  ;;  %v6178_v32 = vsel %vm6176_vm2, %v6177_v38, %v15693_v31  ;;  %v12892_v49 = vsel %vm12890_vm3, %v6177_v38, %v15693_v31  ;;  %v5841_v22 = vsub.s32 32, %v5840_v45  ;;  %v21620_v29 = vpop.permute.xlu1 %868 }
 0x674   : > { %v5927_v61 = vmul.u32 %v5920_v19, %v5911_v39  ;;  %v6175_v9 = vsel %vm6173_vm1, %v15691_v54, %v6174_v11  ;;  %v12889_v6 = vsel %vm12887_vm0, %v15691_v54, %v6174_v11  ;;  %v5845_v25 = vsub.s32 4294967266, %v5840_v45 }
 0x675   : > { %v5930_v21 = vadd.s32 1, %v21564_v57  ;;  %v6179_v40 = vsel %vm6172_vm6, %v6175_v9, %v6178_v32  ;;  %v12893_v58 = vsel %vm12886_vm7, %v12889_v6, %v12892_v49  ;;  %v5842_v17 = vshll.u32 %v21536_v8, %v5840_v45 }
 0x676   : > { %v5843_v24 = vshrl.u32 %v5825_v44, %v5841_v22  ;;  %v6180_v26 = vsel %vm6170_vm9, nan, %v6179_v40  ;;  %v12894_v19 = vsel %vm6170_vm9, nan, %v12893_v58  ;;  %v5846_v43 = vadd.s32 127, %v5845_v25 }
 0x677   : > { %vm5929_vm12 = vc.u32 %v21568_v51, %v21563_v2  ;;  %v7680_v42 = vmul.f32 %v16714_v50, %v6180_v26  ;;  %v14408_v41 = vmul.f32 %v16721_v62, %v12894_v19  ;;  %v5855_v52 = vsub.s32 4, %v21525_v7 }
 0x678   : > { %v5931_v8 = vsel %vm5929_vm12, %v5930_v21, %v21564_v57  ;;  %v5844_v4 = vor.u32 %v5843_v24, %v5842_v17  ;;  %v5847_v56 = vshll.u32 %v5846_v43, 23  ;;  %vm5771_vm13 = vcmp.lt.s32.totalorder %v21355_v0, 0 }
 0x679   : > { %v5932_v13 = vadd.s32 %v5931_v8, %v5927_v61  ;;  %v14472_v1 = vadd.f32 %v14408_v41, %v7680_v42  ;;  %v6390_v10 = vand.u32 2139095040, %v21561_v27  ;;  %v5856_v36 = vsel %vm5771_vm13, %v5855_v52, %v21525_v7 }
 0x67a   : > { %v5848_v46 = vor.u32 4788187, %v5847_v56  ;;  %v6387_v48 = vand.u32 2147483647, %v21561_v27  ;;  %v6490_v37 = vand.u32 2147483647, %v21573_v30  ;;  %v5851_v53 = vcvt.s32.f32 %v5844_v4 }
 0x67b   : > { %v5933_v3 = vadd.s32 536870912, %v5932_v13  ;;  %14536 = vst [vmem:[%s16934_s6 + $0x188] sm:$0xff] %v14472_v1  ;;  %v6493_v15 = vand.u32 2139095040, %v21573_v30  ;;  %v6391_v39 = vshrl.u32 %v6390_v10, 23  ;;  %vm21610_vm14 = vcmp.le.f32.partialorder %v5769_v33, 0.7853982 }
 0x67c   : > { %v5849_v34 = vand.u32 2147483647, %v5848_v46  ;;  %v5858_v60 = vsel %vm21610_vm14, 0, %v5856_v36  ;;  %v6394_v11 = vand.u32 8388607, %v6387_v48  ;;  %vm5874_vm15 = vcmp.lt.s32.totalorder %v21388_v55, 0 }
 0x67d   : > { %v5934_v54 = vshrl.u32 %v5933_v3, 30  ;;  %v6494_v35 = vshrl.u32 %v6493_v15, 23  ;;  %v14863_v7 = vadd.s32 4294967169, %v6391_v39  ;;  %v6497_v45 = vand.u32 8388607, %v6490_v37  ;;  %v23326_v1 = vld [vmem:[#allocation14_spill] sm:$0xff] }
 0x67e   : > { %v5852_v31 = vmul.f32 %v5851_v53, %v5849_v34  ;;  %v12572_v25 = vadd.s32 3, %v5858_v60  ;;  %v953_v21 = vmul.f32 %v16575_v20, %v21620_v29  ;;  %v6395_v58 = vor.u32 8388608, %v6394_v11 }
 0x67f   : > { %v5935_v38 = vshll.u32 %v5934_v54, 30  ;;  %v14867_v44 = vadd.s32 4294967169, %v6494_v35  ;;  %v5958_v49 = vsub.s32 4, %v5934_v54  ;;  %v6397_v22 = vadd.s32 1, %v14863_v7 }
 0x680   : > { %v5853_v32 = vxor.u32 2147483648, %v5852_v31  ;;  %v6498_v17 = vor.u32 8388608, %v6497_v45  ;;  %vm21635_vm3 = vcmp.le.f32.partialorder %v5872_v59, 0.7853982  ;;  %v21642_v43 = vand.u32 3, %v5858_v60 }
 0x681   : > { %v21622_v33 = vsub.s32 %v5932_v13, %v5935_v38  ;;  %v6500_v61 = vadd.s32 1, %v14867_v44  ;;  %vm6398_vm2 = vcmp.gt.s32.totalorder %v6397_v22, 0  ;;  %v5959_v19 = vsel %vm5874_vm15, %v5958_v49, %v5934_v54 }
 0x682   : > { %v5854_v9 = vsel %vm5771_vm13, %v5853_v32, %v5852_v31  ;;  %v6399_v42 = vsel %vm6398_vm2, %v6397_v22, 0  ;;  %v5928_v41 = vadd.s32 %v21563_v2, %v21568_v51  ;;  %v21646_v8 = vand.u32 3, %v12572_v25 }
 0x683   : > { %v5938_v6 = vsub.s32 0, %v21622_v33  ;;  %v5857_v40 = vsel %vm21610_vm14, %v21355_v0, %v5854_v9  ;;  %vm6501_vm1 = vcmp.gt.s32.totalorder %v6500_v61, 0  ;;  %v6401_v59 = vand.u32 31, %v6399_v42 }
 0x684   : > { %15694 = vcosq.f32 %v5857_v40  ;;  %v21650_v4 = vsel %vm21635_vm3, 0, %v5959_v19  ;;  %v21652_v56 = vshll.u32 %v6395_v58, 8  ;;  %v21654_v13 = vshll.u32 %v6498_v17, 8 }
 0x685   : > { %v14844_v26 = vmin.u32 %v5938_v6, %v21622_v33  ;;  %15696 = vsinq.f32 %v5857_v40  ;;  %v21657_v46 = vadd.f32 %v953_v21, %v23326_v1  ;;  %v21659_v10 = vshrl.u32 %v6399_v42, 5 }
 0x686   : > { %v6402_v36 = vsub.s32 32, %v6401_v59  ;;  %v21661_v2 = vsel %vm6501_vm1, %v6500_v61, 0  ;;  %v6404_v51 = vshll.u32 %v23185_v18, %v6401_v59  ;;  %v6407_v15 = vshll.u32 %v23186_v5, %v6401_v59 }
 0x687   : > { %v5940_v52 = vclz %v14844_v26  ;;  %v6410_v34 = vshll.u32 %v23187_v16, %v6401_v59  ;;  %v6413_v53 = vshll.u32 %v23188_v47, %v6401_v59  ;;  %v6416_v35 = vshll.u32 %v23189_v63, %v6401_v59 }
 0x688   : > { %v6405_v54 = vshrl.u32 %v23186_v5, %v6402_v36  ;;  %v6408_v39 = vshrl.u32 %v23187_v16, %v6402_v36  ;;  %vm5867_vm4 = vcmp.eq.s32.totalorder %v21642_v43, 2  ;;  %vm12578_vm5 = vcmp.eq.s32.totalorder %v21646_v8, 2 }
 0x689   : > { %v14845_v3 = vadd.s32 4294967294, %v5940_v52  ;;  %v6411_v31 = vshrl.u32 %v23188_v47, %v6402_v36  ;;  %v6414_v38 = vshrl.u32 %v23189_v63, %v6402_v36  ;;  %v6417_v7 = vshrl.u32 %v23191_v28, %v6402_v36 }
 0x68a   : > { %vm5864_vm6 = vcmp.eq.s32.totalorder %v21642_v43, 0  ;;  %vm12575_vm7 = vcmp.eq.s32.totalorder %v21646_v8, 0  ;;  %v6406_v44 = vor.u32 %v6405_v54, %v6404_v51  ;;  %vm6419_vm8 = vcmp.lt.s32.totalorder %v21659_v10, 1 }
 0x68b   : > { %vm14846_vm0 = vcmp.lt.s32.totalorder %v14845_v3, 0  ;;  %vm5863_vm9 = vcmp.lt.s32.totalorder %v21642_v43, 2  ;;  %vm12574_vm10 = vcmp.lt.s32.totalorder %v21646_v8, 2  ;;  %v6409_v45 = vor.u32 %v6408_v39, %v6407_v15 }
 0x68c   : > { %v5943_v57 = vsel %vm14846_vm0, 0, %v14845_v3  ;;  %v6412_v32 = vor.u32 %v6411_v31, %v6410_v34  ;;  %v6415_v49 = vor.u32 %v6414_v38, %v6413_v53  ;;  %v6418_v22 = vor.u32 %v6417_v7, %v6416_v35 }
 0x68d   : > { %v5944_v60 = vsub.s32 32, %v5943_v57  ;;  %v5948_v11 = vsub.s32 4294967266, %v5943_v57  ;;  %vm5861_vm11 = vweird.f32 %v21355_v0  ;;  %v5945_v61 = vshll.u32 %v21622_v33, %v5943_v57 }
 0x68e   : > { %v6403_v25 = vshrl.u32 %v23185_v18, %v6402_v36  ;;  %vm6420_vm12 = vcmp.lt.s32.totalorder %v21659_v10, 2  ;;  %vm6421_vm13 = vcmp.lt.s32.totalorder %v21659_v10, 3  ;;  %vm6422_vm14 = vcmp.lt.s32.totalorder %v21659_v10, 4 }
 0x68f   : > { %v5946_v9 = vshrl.u32 %v5928_v41, %v5944_v60  ;;  %v5949_v6 = vadd.s32 127, %v5948_v11  ;;  %v6427_v21 = vsel %vm6419_vm8, %v6406_v44, %v6409_v45  ;;  %v6424_v17 = vsel %vm6422_vm14, %v6412_v32, 2102212464 }
 0x690   : > { %v6428_v26 = vsel %vm6422_vm14, %v6415_v49, 920167782  ;;  %v6423_v33 = vsel %vm6419_vm8, %v6403_v25, %v6406_v44  ;;  %v6431_v41 = vsel %vm6419_vm8, %v6409_v45, %v6412_v32  ;;  %v6432_v52 = vsel %vm6422_vm14, %v6418_v22, 1326507024 }
 0x691   : > { %v5947_v40 = vor.u32 %v5946_v9, %v5945_v61  ;;  %v5950_v58 = vshll.u32 %v5949_v6, 23  ;;  %v15695_v19 = vpop.eup %15694  ;;  %v6429_v42 = vsel %vm6421_vm13, %v6412_v32, %v6428_v26  ;;  %v6425_v36 = vsel %vm6421_vm13, %v6409_v45, %v6424_v17 }
 0x692   : > { %v15697_v59 = vpop.eup %15696  ;;  %v5868_v1 = vxor.u32 2147483648, %v15695_v19  ;;  %v6504_v51 = vand.u32 31, %v21661_v2  ;;  %v6430_v53 = vsel %vm6420_vm12, %v6427_v21, %v6429_v42  ;;  %v6433_v54 = vsel %vm6421_vm13, %v6415_v49, %v6432_v52 }
 0x693   : > { %v5951_v3 = vor.u32 4788187, %v5950_v58  ;;  %v5865_v15 = vxor.u32 2147483648, %v15697_v59  ;;  %v5954_v34 = vcvt.s32.f32 %v5947_v40  ;;  %v6434_v31 = vsel %vm6420_vm12, %v6431_v41, %v6433_v54 }
 0x694   : > { %v5869_v39 = vsel %vm5867_vm4, %v5868_v1, %v15697_v59  ;;  %v12580_v57 = vsel %vm12578_vm5, %v5868_v1, %v15697_v59  ;;  %v21712_v60 = vmul.u32.u64.low %v21652_v56, %v6434_v31  ;;  %v21713_v11 = vmul.u32.u64.high %v21652_v56, %v6434_v31, %v21712_v60 }
 0x695   : > { %v5952_v35 = vand.u32 2147483647, %v5951_v3  ;;  %v5866_v38 = vsel %vm5864_vm6, %v15695_v19, %v5865_v15  ;;  %v12577_v7 = vsel %vm12575_vm7, %v15695_v19, %v5865_v15  ;;  %v6505_v49 = vsub.s32 32, %v6504_v51 }
 0x696   : > { %v5870_v44 = vsel %vm5863_vm9, %v5866_v38, %v5869_v39  ;;  %v12581_v32 = vsel %vm12574_vm10, %v12577_v7, %v12580_v57  ;;  %v21724_v9 = vmul.u32.u64.low %v21652_v56, %v6430_v53  ;;  %v21725_v6 = vmul.u32.u64.high %v21652_v56, %v6430_v53, %v21724_v9 }
 0x697   : > { %v5955_v45 = vmul.f32 %v5954_v34, %v5952_v35  ;;  %v5871_v22 = vsel %vm5861_vm11, nan, %v5870_v44  ;;  %v12582_v61 = vsel %vm5861_vm11, nan, %v12581_v32  ;;  %v6426_v8 = vsel %vm6420_vm12, %v6423_v33, %v6425_v36 }
 0x698   : > { %v7677_v43 = vmul.f32 %v16711_v23, %v5871_v22  ;;  %v14405_v21 = vmul.f32 %v16718_v12, %v12582_v61  ;;  %vm6444_vm2 = vc.u32 %v21713_v11, %v21724_v9  ;;  %v6503_v0 = vshrl.u32 %v21661_v2, 5 }
 0x699   : > { %v5956_v25 = vxor.u32 2147483648, %v5955_v45  ;;  %v6507_v40 = vshll.u32 %v23185_v18, %v6504_v51  ;;  %v6508_v58 = vshrl.u32 %v23186_v5, %v6505_v49  ;;  %v6510_v19 = vshll.u32 %v23186_v5, %v6504_v51 }
 0x69a   : > { %v14469_v26 = vadd.f32 %v14405_v21, %v7677_v43  ;;  %v6511_v42 = vshrl.u32 %v23187_v16, %v6505_v49  ;;  %v6442_v33 = vmul.u32 %v21652_v56, %v6426_v8  ;;  %v6445_v2 = vadd.s32 1, %v21725_v6 }
 0x69b   : > { %v5957_v17 = vsel %vm5874_vm15, %v5956_v25, %v5955_v45  ;;  %v6509_v41 = vor.u32 %v6508_v58, %v6507_v40  ;;  %v6513_v59 = vshll.u32 %v23187_v16, %v6504_v51  ;;  %v6514_v1 = vshrl.u32 %v23188_v47, %v6505_v49 }
 0x69c   : > { %v5960_v10 = vsel %vm21635_vm3, %v21388_v55, %v5957_v17  ;;  %14533 = vst [vmem:[%s16934_s6 + $0x170] sm:$0xff] %v14469_v26  ;;  %v6512_v52 = vor.u32 %v6511_v42, %v6510_v19  ;;  %v6446_v3 = vsel %vm6444_vm2, %v6445_v2, %v21725_v6  ;;  %v6516_v24 = vshll.u32 %v23188_v47, %v6504_v51 }
 0x69d   : > { %15698 = vcosq.f32 %v5960_v10  ;;  %v6517_v56 = vshrl.u32 %v23189_v63, %v6505_v49  ;;  %v6447_v36 = vadd.s32 %v6446_v3, %v6442_v33  ;;  %v6515_v15 = vor.u32 %v6514_v1, %v6513_v59 }
 0x69e   : > { %15700 = vsinq.f32 %v5960_v10  ;;  %v6519_v34 = vshll.u32 %v23189_v63, %v6504_v51  ;;  %v6520_v53 = vshrl.u32 %v23191_v28, %v6505_v49  ;;  %v12676_v54 = vadd.s32 3, %v21650_v4 }
 0x69f   : > { %v6506_v39 = vshrl.u32 %v23185_v18, %v6505_v49  ;;  %v6518_v35 = vor.u32 %v6517_v56, %v6516_v24  ;;  %vm6522_vm15 = vcmp.lt.s32.totalorder %v6503_v0, 1  ;;  %v6448_v57 = vadd.s32 536870912, %v6447_v36 }
 0x6a0   : > { %v6521_v31 = vor.u32 %v6520_v53, %v6519_v34  ;;  %vm6524_vm3 = vcmp.lt.s32.totalorder %v6503_v0, 3  ;;  %vm6525_vm1 = vcmp.lt.s32.totalorder %v6503_v0, 4  ;;  %v6530_v7 = vsel %vm6522_vm15, %v6509_v41, %v6512_v52 }
 0x6a1   : > { %v6527_v38 = vsel %vm6525_vm1, %v6515_v15, 2102212464  ;;  %v6531_v60 = vsel %vm6525_vm1, %v6518_v35, 920167782  ;;  %v6534_v44 = vsel %vm6522_vm15, %v6512_v52, %v6515_v15  ;;  %v6449_v45 = vshrl.u32 %v6448_v57, 30 }
 0x6a2   : > { %vm6523_vm0 = vcmp.lt.s32.totalorder %v6503_v0, 2  ;;  %v6532_v51 = vsel %vm6524_vm3, %v6515_v15, %v6531_v60  ;;  %v6535_v32 = vsel %vm6525_vm1, %v6521_v31, 1326507024  ;;  %v5965_v22 = vand.u32 3, %v21650_v4 }
 0x6a3   : > { %v12677_v49 = vand.u32 3, %v12676_v54  ;;  %v6533_v61 = vsel %vm6523_vm0, %v6530_v7, %v6532_v51  ;;  %v6536_v6 = vsel %vm6524_vm3, %v6518_v35, %v6535_v32  ;;  %v6450_v25 = vshll.u32 %v6449_v45, 30 }
 0x6a4   : > { %v6526_v43 = vsel %vm6522_vm15, %v6506_v39, %v6509_v41  ;;  %v6528_v21 = vsel %vm6524_vm3, %v6512_v52, %v6527_v38  ;;  %v6537_v8 = vsel %vm6523_vm0, %v6534_v44, %v6536_v6  ;;  %vm5964_vm4 = vweird.f32 %v21388_v55 }
 0x6a5   : > { %v21767_v40 = vmul.u32.u64.low %v21654_v13, %v6537_v8  ;;  %v21768_v58 = vmul.u32.u64.high %v21654_v13, %v6537_v8, %v21767_v40  ;;  %v21771_v17 = vmul.u32.u64.low %v21654_v13, %v6533_v61  ;;  %v21772_v26 = vmul.u32.u64.high %v21654_v13, %v6533_v61, %v21771_v17 }
 0x6a6   : > { %v21775_v4 = vsub.s32 %v6447_v36, %v6450_v25  ;;  %v6529_v19 = vsel %vm6523_vm0, %v6526_v43, %v6528_v21  ;;  %v954_v42 = vmul.f32 %v16578_v14, %v21620_v29  ;;  %v6184_v0 = vand.u32 2139095040, %v21657_v46 }
 0x6a7   : > { %vm5967_vm5 = vcmp.eq.s32.totalorder %v5965_v22, 0  ;;  %vm6389_vm6 = vcmp.lt.s32.totalorder %v21561_v27, 0  ;;  %v6181_v33 = vand.u32 2147483647, %v21657_v46  ;;  %vm5970_vm7 = vcmp.eq.s32.totalorder %v5965_v22, 2 }
 0x6a8   : > { %v6453_v10 = vsub.s32 0, %v21775_v4  ;;  %vm12679_vm8 = vcmp.eq.s32.totalorder %v12677_v49, 0  ;;  %vm21786_vm9 = vcmp.le.f32.partialorder %v6387_v48, 0.7853982  ;;  %vm6547_vm10 = vc.u32 %v21768_v58, %v21771_v17 }
 0x6a9   : > { %v6548_v29 = vadd.s32 1, %v21772_v26  ;;  %vm12682_vm11 = vcmp.eq.s32.totalorder %v12677_v49, 2  ;;  %v6545_v3 = vmul.u32 %v21654_v13, %v6529_v19  ;;  %v6473_v56 = vsub.s32 4, %v6449_v45 }
 0x6aa   : > { %v15699_v2 = vpop.eup %15698  ;;  %v14864_v1 = vmin.u32 %v6453_v10, %v21775_v4  ;;  %v6185_v48 = vshrl.u32 %v6184_v0, 23  ;;  %vm5966_vm12 = vcmp.lt.s32.totalorder %v5965_v22, 2  ;;  %vm12678_vm13 = vcmp.lt.s32.totalorder %v12677_v49, 2 }
 0x6ab   : > { %v15701_v52 = vpop.eup %15700  ;;  %v5971_v59 = vxor.u32 2147483648, %v15699_v2  ;;  %v6549_v36 = vsel %vm6547_vm10, %v6548_v29, %v21772_v26  ;;  %v6474_v44 = vsel %vm6389_vm6, %v6473_v56, %v6449_v45  ;;  %v6443_v61 = vadd.s32 %v21724_v9, %v21713_v11  ;;  %v23329_v26 = vld [vmem:[#allocation15_spill] sm:$0xff] }
 0x6ac   : > { %v5968_v24 = vxor.u32 2147483648, %v15701_v52  ;;  %v6455_v53 = vclz %v14864_v1  ;;  %v6550_v54 = vadd.s32 %v6549_v36, %v6545_v3  ;;  %v14855_v51 = vadd.s32 4294967169, %v6185_v48 }
 0x6ad   : > { %v5972_v15 = vsel %vm5970_vm7, %v5971_v59, %v15701_v52  ;;  %v12684_v34 = vsel %vm12682_vm11, %v5971_v59, %v15701_v52  ;;  %v6188_v25 = vand.u32 8388607, %v6181_v33  ;;  %v6476_v45 = vsel %vm21786_vm9, 0, %v6474_v44 }
 0x6ae   : > { %v5969_v39 = vsel %vm5967_vm5, %v15699_v2, %v5968_v24  ;;  %v12681_v35 = vsel %vm12679_vm8, %v15699_v2, %v5968_v24  ;;  %v14865_v38 = vadd.s32 4294967294, %v6455_v53  ;;  %v6551_v7 = vadd.s32 536870912, %v6550_v54 }
 0x6af   : > { %v5973_v57 = vsel %vm5966_vm12, %v5969_v39, %v5972_v15  ;;  %v12685_v31 = vsel %vm12678_vm13, %v12681_v35, %v12684_v34  ;;  %v6191_v55 = vadd.s32 1, %v14855_v51  ;;  %v21813_v19 = vadd.f32 %v954_v42, %v23329_v26 }
 0x6b0   : > { %v5974_v13 = vsel %vm5964_vm4, nan, %v5973_v57  ;;  %v12686_v60 = vsel %vm5964_vm4, nan, %v12685_v31  ;;  %vm14866_vm14 = vcmp.lt.s32.totalorder %v14865_v38, 0  ;;  %v6552_v49 = vshrl.u32 %v6551_v7, 30 }
 0x6b1   : > { %v7678_v32 = vmul.f32 %v16714_v50, %v5974_v13  ;;  %v14406_v22 = vmul.f32 %v16721_v62, %v12686_v60  ;;  %v6458_v6 = vsel %vm14866_vm14, 0, %v14865_v38  ;;  %vm6192_vm2 = vcmp.gt.s32.totalorder %v6191_v55, 0 }
 0x6b2   : > { %v6459_v21 = vsub.s32 32, %v6458_v6  ;;  %v6463_v8 = vsub.s32 4294967266, %v6458_v6  ;;  %v6553_v40 = vshll.u32 %v6552_v49, 30  ;;  %v6460_v0 = vshll.u32 %v21775_v4, %v6458_v6 }
 0x6b3   : > { %v14470_v43 = vadd.f32 %v14406_v22, %v7678_v32  ;;  %v6193_v10 = vsel %vm6192_vm2, %v6191_v55, 0  ;;  %v13196_v29 = vadd.s32 3, %v6476_v45  ;;  %v6189_v3 = vor.u32 8388608, %v6188_v25 }
 0x6b4   : > { %v6461_v11 = vshrl.u32 %v6443_v61, %v6459_v21  ;;  %v6464_v9 = vadd.s32 127, %v6463_v8  ;;  %v21817_v2 = vsub.s32 %v6550_v54, %v6553_v40  ;;  %v6195_v52 = vand.u32 31, %v6193_v10 }
 0x6b5   : > { %14534 = vst [vmem:[%s16934_s6 + $0x178] sm:$0xff] %v14470_v43  ;;  %v6576_v56 = vsub.s32 4, %v6552_v49  ;;  %vm6492_vm15 = vcmp.lt.s32.totalorder %v21573_v30, 0  ;;  %v6284_v48 = vand.u32 2147483647, %v21813_v19  ;;  %v6287_v4 = vand.u32 2139095040, %v21813_v19 }
 0x6b6   : > { %v6462_v59 = vor.u32 %v6461_v11, %v6460_v0  ;;  %v6465_v1 = vshll.u32 %v6464_v9, 23  ;;  %v6556_v24 = vsub.s32 0, %v21817_v2  ;;  %v6196_v36 = vsub.s32 32, %v6195_v52 }
 0x6b7   : > { %v21823_v15 = vand.u32 3, %v6476_v45  ;;  %v6546_v34 = vadd.s32 %v21771_v17, %v21768_v58  ;;  %v21828_v54 = vand.u32 3, %v13196_v29  ;;  %v21831_v31 = vshll.u32 %v6189_v3, 8 }
 0x6b8   : > { %v6466_v42 = vor.u32 4788187, %v6465_v1  ;;  %v14868_v53 = vmin.u32 %v6556_v24, %v21817_v2  ;;  %v6469_v35 = vcvt.s32.f32 %v6462_v59  ;;  %v6199_v57 = vshrl.u32 %v23186_v5, %v6196_v36 }
 0x6b9   : > { %v6577_v7 = vsel %vm6492_vm15, %v6576_v56, %v6552_v49  ;;  %v6202_v13 = vshrl.u32 %v23187_v16, %v6196_v36  ;;  %v6205_v60 = vshrl.u32 %v23188_v47, %v6196_v36  ;;  %v6194_v58 = vshrl.u32 %v6193_v10, 5 }
 0x6ba   : > { %v6467_v39 = vand.u32 2147483647, %v6466_v42  ;;  %v6558_v38 = vclz %v14868_v53  ;;  %v6198_v17 = vshll.u32 %v23185_v18, %v6195_v52  ;;  %v6288_v51 = vshrl.u32 %v6287_v4, 23 }
 0x6bb   : > { %vm21840_vm3 = vcmp.le.f32.partialorder %v6490_v37, 0.7853982  ;;  %v6197_v61 = vshrl.u32 %v23185_v18, %v6196_v36  ;;  %v6201_v49 = vshll.u32 %v23186_v5, %v6195_v52  ;;  %v6204_v6 = vshll.u32 %v23187_v16, %v6195_v52 }
 0x6bc   : > { %v6470_v44 = vmul.f32 %v6469_v35, %v6467_v39  ;;  %v14869_v22 = vadd.s32 4294967294, %v6558_v38  ;;  %v6200_v55 = vor.u32 %v6199_v57, %v6198_v17  ;;  %v6207_v43 = vshll.u32 %v23188_v47, %v6195_v52 }
 0x6bd   : > { %v6208_v21 = vshrl.u32 %v23189_v63, %v6196_v36  ;;  %v6203_v8 = vor.u32 %v6202_v13, %v6201_v49  ;;  %v6206_v45 = vor.u32 %v6205_v60, %v6204_v6  ;;  %v6211_v37 = vshrl.u32 %v23191_v28, %v6196_v36 }
 0x6be   : > { %v6471_v25 = vxor.u32 2147483648, %v6470_v44  ;;  %vm14870_vm1 = vcmp.lt.s32.totalorder %v14869_v22, 0  ;;  %v6210_v11 = vshll.u32 %v23189_v63, %v6195_v52  ;;  %vm6213_vm0 = vcmp.lt.s32.totalorder %v6194_v58, 1 }
 0x6bf   : > { %v6561_v26 = vsel %vm14870_vm1, 0, %v14869_v22  ;;  %v6209_v0 = vor.u32 %v6208_v21, %v6207_v43  ;;  %vm6214_vm4 = vcmp.lt.s32.totalorder %v6194_v58, 2  ;;  %vm6216_vm5 = vcmp.lt.s32.totalorder %v6194_v58, 4 }
 0x6c0   : > { %v6472_v40 = vsel %vm6389_vm6, %v6471_v25, %v6470_v44  ;;  %v6562_v10 = vsub.s32 32, %v6561_v26  ;;  %v6566_v29 = vsub.s32 4294967266, %v6561_v26  ;;  %v6563_v59 = vshll.u32 %v21817_v2, %v6561_v26 }
 0x6c1   : > { %v6475_v9 = vsel %vm21786_vm9, %v21561_v27, %v6472_v40  ;;  %v6212_v1 = vor.u32 %v6211_v37, %v6210_v11  ;;  %vm6215_vm6 = vcmp.lt.s32.totalorder %v6194_v58, 3  ;;  %v6218_v56 = vsel %vm6216_vm5, %v6206_v45, 2102212464 }
 0x6c2   : > { %15702 = vcosq.f32 %v6475_v9  ;;  %v6564_v3 = vshrl.u32 %v6546_v34, %v6562_v10  ;;  %v6567_v24 = vadd.s32 127, %v6566_v29  ;;  %v6221_v52 = vsel %vm6213_vm0, %v6200_v55, %v6203_v8 }
 0x6c3   : > { %15704 = vsinq.f32 %v6475_v9  ;;  %v6222_v36 = vsel %vm6216_vm5, %v6209_v0, 920167782  ;;  %v6225_v53 = vsel %vm6213_vm0, %v6203_v8, %v6206_v45  ;;  %v6579_v39 = vsel %vm21840_vm3, 0, %v6577_v7 }
 0x6c4   : > { %v6565_v42 = vor.u32 %v6564_v3, %v6563_v59  ;;  %v6568_v41 = vshll.u32 %v6567_v24, 23  ;;  %v6223_v4 = vsel %vm6215_vm6, %v6206_v45, %v6222_v36  ;;  %v6226_v35 = vsel %vm6216_vm5, %v6212_v1, 1326507024 }
 0x6c5   : > { %v6224_v2 = vsel %vm6214_vm4, %v6221_v52, %v6223_v4  ;;  %v14859_v57 = vadd.s32 4294967169, %v6288_v51  ;;  %v6217_v38 = vsel %vm6213_vm0, %v6197_v61, %v6200_v55  ;;  %v6219_v13 = vsel %vm6215_vm6, %v6203_v8, %v6218_v56 }
 0x6c6   : > { %v6569_v34 = vor.u32 4788187, %v6568_v41  ;;  %v6227_v60 = vsel %vm6215_vm6, %v6209_v0, %v6226_v35  ;;  %v21865_v17 = vmul.u32.u64.low %v21831_v31, %v6224_v2  ;;  %v21866_v22 = vmul.u32.u64.high %v21831_v31, %v6224_v2, %v21865_v17 }
 0x6c7   : > { %v6228_v44 = vsel %vm6214_vm4, %v6225_v53, %v6227_v60  ;;  %v6294_v49 = vadd.s32 1, %v14859_v57  ;;  %v6572_v25 = vcvt.s32.f32 %v6565_v42  ;;  %vm6482_vm7 = vcmp.eq.s32.totalorder %v21823_v15, 0 }
 0x6c8   : > { %v6570_v6 = vand.u32 2147483647, %v6569_v34  ;;  %v21870_v7 = vmul.u32.u64.low %v21831_v31, %v6228_v44  ;;  %v21871_v43 = vmul.u32.u64.high %v21831_v31, %v6228_v44, %v21870_v7  ;;  %v13300_v51 = vadd.s32 3, %v6579_v39 }
 0x6c9   : > { %v6220_v61 = vsel %vm6214_vm4, %v6217_v38, %v6219_v13  ;;  %vm6295_vm8 = vcmp.gt.s32.totalorder %v6294_v49, 0  ;;  %vm6481_vm9 = vcmp.lt.s32.totalorder %v21823_v15, 2  ;;  %vm6485_vm10 = vcmp.eq.s32.totalorder %v21823_v15, 2 }
 0x6ca   : > { %v6573_v55 = vmul.f32 %v6572_v25, %v6570_v6  ;;  %v21879_v21 = vand.u32 8388607, %v6284_v48  ;;  %v6296_v8 = vsel %vm6295_vm8, %v6294_v49, 0  ;;  %vm6479_vm11 = vweird.f32 %v21561_v27  ;;  %v881_v25 = vpop.permute.xlu0 %880 }
 0x6cb   : > { %vm13198_vm12 = vcmp.lt.s32.totalorder %v21828_v54, 2  ;;  %vm13199_vm13 = vcmp.eq.s32.totalorder %v21828_v54, 0  ;;  %v6239_v58 = vadd.s32 1, %v21866_v22  ;;  %v6298_v45 = vand.u32 31, %v6296_v8 }
 0x6cc   : > { %v6574_v37 = vxor.u32 2147483648, %v6573_v55  ;;  %vm13202_vm14 = vcmp.eq.s32.totalorder %v21828_v54, 2  ;;  %v6236_v40 = vmul.u32 %v21831_v31, %v6220_v61  ;;  %vm6238_vm2 = vc.u32 %v21871_v43, %v21865_v17 }
 0x6cd   : > { %v21889_v26 = vand.u32 3, %v6579_v39  ;;  %v21891_v0 = vand.u32 3, %v13300_v51  ;;  %v6240_v11 = vsel %vm6238_vm2, %v6239_v58, %v21866_v22  ;;  %v21894_v9 = vsub.s32 32, %v6298_v45 }
 0x6ce   : > { %v6575_v29 = vsel %vm6492_vm15, %v6574_v37, %v6573_v55  ;;  %v6241_v59 = vadd.s32 %v6240_v11, %v6236_v40  ;;  %v6292_v1 = vor.u32 8388608, %v21879_v21  ;;  %v21899_v3 = vshrl.u32 %v6296_v8, 5 }
 0x6cf   : > { %v15703_v10 = vpop.eup %15702  ;;  %v6578_v56 = vsel %vm21840_vm3, %v21573_v30, %v6575_v29  ;;  %v6301_v52 = vshll.u32 %v23185_v18, %v6298_v45  ;;  %v6304_v36 = vshll.u32 %v23186_v5, %v6298_v45  ;;  %v6302_v4 = vshrl.u32 %v23186_v5, %v21894_v9 }
 0x6d0   : > { %v15705_v31 = vpop.eup %15704  ;;  %v6486_v24 = vxor.u32 2147483648, %v15703_v10  ;;  %15706 = vcosq.f32 %v6578_v56  ;;  %v6242_v41 = vadd.s32 536870912, %v6241_v59  ;;  %v6305_v32 = vshrl.u32 %v23187_v16, %v21894_v9 }
 0x6d1   : > { %v6483_v42 = vxor.u32 2147483648, %v15705_v31  ;;  %15708 = vsinq.f32 %v6578_v56  ;;  %v6307_v34 = vshll.u32 %v23187_v16, %v6298_v45  ;;  %v6308_v60 = vshrl.u32 %v23188_v47, %v21894_v9 }
 0x6d2   : > { %v6487_v53 = vsel %vm6485_vm10, %v6486_v24, %v15705_v31  ;;  %v13204_v39 = vsel %vm13202_vm14, %v6486_v24, %v15705_v31  ;;  %v21918_v57 = vshrl.u32 %v6242_v41, 30  ;;  %v6311_v44 = vshrl.u32 %v23189_v63, %v21894_v9 }
 0x6d3   : > { %v6484_v2 = vsel %vm6482_vm7, %v15703_v10, %v6483_v42  ;;  %v13201_v35 = vsel %vm13199_vm13, %v15703_v10, %v6483_v42  ;;  %v6310_v15 = vshll.u32 %v23188_v47, %v6298_v45  ;;  %v6303_v51 = vor.u32 %v6302_v4, %v6301_v52 }
 0x6d4   : > { %v6488_v38 = vsel %vm6481_vm9, %v6484_v2, %v6487_v53  ;;  %v13205_v13 = vsel %vm13198_vm12, %v13201_v35, %v13204_v39  ;;  %v6244_v6 = vshll.u32 %v21918_v57, 30  ;;  %v6306_v61 = vor.u32 %v6305_v32, %v6304_v36 }
 0x6d5   : > { %v6489_v22 = vsel %vm6479_vm11, nan, %v6488_v38  ;;  %v13206_v49 = vsel %vm6479_vm11, nan, %v13205_v13  ;;  %v6309_v21 = vor.u32 %v6308_v60, %v6307_v34  ;;  %v6313_v8 = vshll.u32 %v23189_v63, %v6298_v45 }
 0x6d6   : > { %v7683_v54 = vmul.f32 %v16711_v23, %v6489_v22  ;;  %v14411_v7 = vmul.f32 %v16718_v12, %v13206_v49  ;;  %v21937_v55 = vsub.s32 %v6241_v59, %v6244_v6  ;;  %v6314_v27 = vshrl.u32 %v23191_v28, %v21894_v9 }
 0x6d7   : > { %v6312_v37 = vor.u32 %v6311_v44, %v6310_v15  ;;  %v959_v40 = vmul.f32 %v16575_v20, %v881_v25  ;;  %vm6585_vm15 = vcmp.eq.s32.totalorder %v21889_v26, 0  ;;  %vm6588_vm3 = vcmp.eq.s32.totalorder %v21889_v26, 2 }
 0x6d8   : > { %v14475_v58 = vadd.f32 %v14411_v7, %v7683_v54  ;;  %v6247_v11 = vsub.s32 0, %v21937_v55  ;;  %v6315_v10 = vor.u32 %v6314_v27, %v6313_v8  ;;  %vm6584_vm1 = vcmp.lt.s32.totalorder %v21889_v26, 2 }
 0x6d9   : > { %vm13302_vm0 = vcmp.lt.s32.totalorder %v21891_v0, 2  ;;  %vm13303_vm4 = vcmp.eq.s32.totalorder %v21891_v0, 0  ;;  %vm13306_vm5 = vcmp.eq.s32.totalorder %v21891_v0, 2  ;;  %vm6316_vm6 = vcmp.lt.s32.totalorder %v21899_v3, 1 }
 0x6da   : > { %14539 = vst [vmem:[%s16934_s6 + $0x1a0] sm:$0xff] %v14475_v58  ;;  %v6332_v45 = vshll.u32 %v6292_v1, 8  ;;  %vm6582_vm7 = vweird.f32 %v21573_v30  ;;  %v14856_v29 = vmin.u32 %v6247_v11, %v21937_v55  ;;  %vm6319_vm8 = vcmp.lt.s32.totalorder %v21899_v3, 4 }
 0x6db   : > { %v6324_v59 = vsel %vm6316_vm6, %v6303_v51, %v6306_v61  ;;  %v6328_v31 = vsel %vm6316_vm6, %v6306_v61, %v6309_v21  ;;  %vm6318_vm9 = vcmp.lt.s32.totalorder %v21899_v3, 3  ;;  %v6325_v24 = vsel %vm6319_vm8, %v6312_v37, 920167782 }
 0x6dc   : > { %v6329_v56 = vsel %vm6319_vm8, %v6315_v10, 1326507024  ;;  %v960_v52 = vmul.f32 %v16578_v14, %v881_v25  ;;  %v6249_v36 = vclz %v14856_v29  ;;  %vm6317_vm10 = vcmp.lt.s32.totalorder %v21899_v3, 2  ;;  %v23333_v3 = vld [vmem:[#allocation56_spill] sm:$0xff] }
 0x6dd   : > { %v6326_v1 = vsel %vm6318_vm9, %v6309_v21, %v6325_v24  ;;  %v6330_v42 = vsel %vm6318_vm9, %v6312_v37, %v6329_v56  ;;  %v15707_v41 = vpop.eup %15706  ;;  %v6300_v4 = vshrl.u32 %v23185_v18, %v21894_v9  ;;  %v6321_v53 = vsel %vm6319_vm8, %v6309_v21, 2102212464 }
 0x6de   : > { %v6327_v39 = vsel %vm6317_vm10, %v6324_v59, %v6326_v1  ;;  %v6331_v32 = vsel %vm6317_vm10, %v6328_v31, %v6330_v42  ;;  %v15709_v2 = vpop.eup %15708  ;;  %v6589_v35 = vxor.u32 2147483648, %v15707_v41  ;;  %v14857_v34 = vadd.s32 4294967294, %v6249_v36 }
 0x6df   : > { %v21972_v38 = vmul.u32.u64.low %v6332_v45, %v6331_v32  ;;  %v21973_v13 = vmul.u32.u64.high %v6332_v45, %v6331_v32, %v21972_v38  ;;  %v6586_v60 = vxor.u32 2147483648, %v15709_v2  ;;  %v6320_v44 = vsel %vm6316_vm6, %v6300_v4, %v6303_v51  ;;  %v23332_v51 = vld [vmem:[#allocation55_spill] sm:$0xff] }
 0x6e0   : > { %v21977_v22 = vmul.u32.u64.low %v6332_v45, %v6327_v39  ;;  %v21978_v49 = vmul.u32.u64.high %v6332_v45, %v6327_v39, %v21977_v22  ;;  %v6590_v9 = vsel %vm6588_vm3, %v6589_v35, %v15709_v2  ;;  %v13308_v6 = vsel %vm13306_vm5, %v6589_v35, %v15709_v2 }
 0x6e1   : > { %vm14858_vm11 = vcmp.lt.s32.totalorder %v14857_v34, 0  ;;  %v6322_v15 = vsel %vm6318_vm9, %v6306_v61, %v6321_v53  ;;  %v6587_v25 = vsel %vm6585_vm15, %v15707_v41, %v6586_v60  ;;  %v13305_v54 = vsel %vm13303_vm4, %v15707_v41, %v6586_v60 }
 0x6e2   : > { %v6252_v7 = vsel %vm14858_vm11, 0, %v14857_v34  ;;  %v21992_v21 = vadd.f32 %v959_v40, %v23332_v51  ;;  %v6591_v8 = vsel %vm6584_vm1, %v6587_v25, %v6590_v9  ;;  %v13309_v27 = vsel %vm13302_vm0, %v13305_v54, %v13308_v6  ;;  %v877_v9 = vpop.permute.xlu1 %876 }
 0x6e3   : > { %v6237_v58 = vadd.s32 %v21865_v17, %v21871_v43  ;;  %v6253_v61 = vsub.s32 32, %v6252_v7  ;;  %v6592_v37 = vsel %vm6582_vm7, nan, %v6591_v8  ;;  %v13310_v11 = vsel %vm6582_vm7, nan, %v13309_v27 }
 0x6e4   : > { %v6257_v10 = vsub.s32 4294967266, %v6252_v7  ;;  %v6323_v40 = vsel %vm6317_vm10, %v6320_v44, %v6322_v15  ;;  %v7684_v26 = vmul.f32 %v16714_v50, %v6592_v37  ;;  %v14412_v0 = vmul.f32 %v16721_v62, %v13310_v11 }
 0x6e5   : > { %v6255_v29 = vshrl.u32 %v6237_v58, %v6253_v61  ;;  %vm6341_vm12 = vc.u32 %v21973_v13, %v21977_v22  ;;  %v6254_v17 = vshll.u32 %v21937_v55, %v6252_v7  ;;  %v6342_v59 = vadd.s32 1, %v21978_v49 }
 0x6e6   : > { %v6258_v43 = vadd.s32 127, %v6257_v10  ;;  %v14476_v30 = vadd.f32 %v14412_v0, %v7684_v26  ;;  %v6267_v31 = vsub.s32 4, %v21918_v57  ;;  %v6339_v24 = vmul.u32 %v6332_v45, %v6323_v40 }
 0x6e7   : > { %v22014_v56 = vadd.f32 %v960_v52, %v23333_v3  ;;  %v6256_v36 = vor.u32 %v6255_v29, %v6254_v17  ;;  %v6343_v42 = vsel %vm6341_vm12, %v6342_v59, %v21978_v49  ;;  %v6802_v41 = vand.u32 2139095040, %v21992_v21 }
 0x6e8   : > { %v6259_v1 = vshll.u32 %v6258_v43, 23  ;;  %14540 = vst [vmem:[%s16934_s6 + $0x1a8] sm:$0xff] %v14476_v30  ;;  %v6344_v4 = vadd.s32 %v6343_v42, %v6339_v24  ;;  %vm6183_vm13 = vcmp.lt.s32.totalorder %v21657_v46, 0  ;;  %v6799_v52 = vand.u32 2147483647, %v21992_v21 }
 0x6e9   : > { %v6803_v53 = vshrl.u32 %v6802_v41, 23  ;;  %v6268_v39 = vsel %vm6183_vm13, %v6267_v31, %v21918_v57  ;;  %v6263_v2 = vcvt.s32.f32 %v6256_v36  ;;  %v6905_v34 = vand.u32 2139095040, %v22014_v56 }
 0x6ea   : > { %v6260_v55 = vor.u32 4788187, %v6259_v1  ;;  %v6345_v45 = vadd.s32 536870912, %v6344_v4  ;;  %vm22027_vm14 = vcmp.le.f32.partialorder %v6181_v33, 0.7853982  ;;  %vm6286_vm2 = vcmp.lt.s32.totalorder %v21813_v19, 0 }
 0x6eb   : > { %v14879_v35 = vadd.s32 4294967169, %v6803_v53  ;;  %v6270_v49 = vsel %vm22027_vm14, 0, %v6268_v39  ;;  %v6806_v15 = vand.u32 8388607, %v6799_v52  ;;  %v6902_v25 = vand.u32 2147483647, %v22014_v56 }
 0x6ec   : > { %v6261_v32 = vand.u32 2147483647, %v6260_v55  ;;  %v6346_v60 = vshrl.u32 %v6345_v45, 30  ;;  %v6906_v33 = vshrl.u32 %v6905_v34, 23  ;;  %v12988_v51 = vadd.s32 3, %v6270_v49 }
 0x6ed   : > { %v6809_v57 = vadd.s32 1, %v14879_v35  ;;  %v22040_v27 = vmul.f32 %v16575_v20, %v877_v9  ;;  %v22044_v61 = vand.u32 3, %v6270_v49  ;;  %v22047_v11 = vmul.f32 %v16578_v14, %v877_v9 }
 0x6ee   : > { %v6264_v44 = vmul.f32 %v6263_v2, %v6261_v32  ;;  %v6347_v6 = vshll.u32 %v6346_v60, 30  ;;  %v6807_v26 = vor.u32 8388608, %v6806_v15  ;;  %v22055_v0 = vand.u32 8388607, %v6902_v25  ;;  %v23338_v15 = vld [vmem:[#allocation16_spill] sm:$0xff] }
 0x6ef   : > { %vm6810_vm15 = vcmp.gt.s32.totalorder %v6809_v57, 0  ;;  %v6370_v29 = vsub.s32 4, %v6346_v60  ;;  %v14883_v43 = vadd.s32 4294967169, %v6906_v33  ;;  %v6340_v59 = vadd.s32 %v21977_v22, %v21973_v13 }
 0x6f0   : > { %v6265_v54 = vxor.u32 2147483648, %v6264_v44  ;;  %v22037_v7 = vsub.s32 %v6344_v4, %v6347_v6  ;;  %v6811_v8 = vsel %vm6810_vm15, %v6809_v57, 0  ;;  %v22060_v31 = vand.u32 3, %v12988_v51 }
 0x6f1   : > { %v6813_v37 = vand.u32 31, %v6811_v8  ;;  %v22062_v24 = vshrl.u32 %v6811_v8, 5  ;;  %v22072_v13 = vsel %vm6286_vm2, %v6370_v29, %v6346_v60  ;;  %v22074_v22 = vshll.u32 %v6807_v26, 8 }
 0x6f2   : > { %v6266_v58 = vsel %vm6183_vm13, %v6265_v54, %v6264_v44  ;;  %v6350_v40 = vsub.s32 0, %v22037_v7  ;;  %v6910_v53 = vor.u32 8388608, %v22055_v0  ;;  %v6912_v39 = vadd.s32 1, %v14883_v43 }
 0x6f3   : > { %v6269_v10 = vsel %vm22027_vm14, %v21657_v46, %v6266_v58  ;;  %v6814_v17 = vsub.s32 32, %v6813_v37  ;;  %v6816_v3 = vshll.u32 %v23185_v18, %v6813_v37  ;;  %v6819_v1 = vshll.u32 %v23186_v5, %v6813_v37 }
 0x6f4   : > { %15710 = vcosq.f32 %v6269_v10  ;;  %v14860_v30 = vmin.u32 %v6350_v40, %v22037_v7  ;;  %v6822_v4 = vshll.u32 %v23187_v16, %v6813_v37  ;;  %v6825_v34 = vshll.u32 %v23188_v47, %v6813_v37 }
 0x6f5   : > { %15712 = vsinq.f32 %v6269_v10  ;;  %v6817_v36 = vshrl.u32 %v23186_v5, %v6814_v17  ;;  %v6820_v41 = vshrl.u32 %v23187_v16, %v6814_v17  ;;  %v6823_v55 = vshrl.u32 %v23188_v47, %v6814_v17 }
 0x6f6   : > { %v6352_v42 = vclz %v14860_v30  ;;  %v6826_v38 = vshrl.u32 %v23189_v63, %v6814_v17  ;;  %v6828_v44 = vshll.u32 %v23189_v63, %v6813_v37  ;;  %v6829_v49 = vshrl.u32 %v23191_v28, %v6814_v17 }
 0x6f7   : > { %v6818_v32 = vor.u32 %v6817_v36, %v6816_v3  ;;  %v6821_v2 = vor.u32 %v6820_v41, %v6819_v1  ;;  %v6824_v35 = vor.u32 %v6823_v55, %v6822_v4  ;;  %vm6279_vm3 = vcmp.eq.s32.totalorder %v22044_v61, 2 }
 0x6f8   : > { %v14861_v45 = vadd.s32 4294967294, %v6352_v42  ;;  %vm12994_vm0 = vcmp.eq.s32.totalorder %v22060_v31, 2  ;;  %v6815_v60 = vshrl.u32 %v23185_v18, %v6814_v17  ;;  %vm6831_vm4 = vcmp.lt.s32.totalorder %v22062_v24, 1 }
 0x6f9   : > { %vm6832_vm5 = vcmp.lt.s32.totalorder %v22062_v24, 2  ;;  %vm6276_vm6 = vcmp.eq.s32.totalorder %v22044_v61, 0  ;;  %vm12991_vm7 = vcmp.eq.s32.totalorder %v22060_v31, 0  ;;  %v6827_v9 = vor.u32 %v6826_v38, %v6825_v34 }
 0x6fa   : > { %vm14862_vm1 = vcmp.lt.s32.totalorder %v14861_v45, 0  ;;  %v6830_v6 = vor.u32 %v6829_v49, %v6828_v44  ;;  %vm6834_vm8 = vcmp.lt.s32.totalorder %v22062_v24, 4  ;;  %vm6275_vm9 = vcmp.lt.s32.totalorder %v22044_v61, 2 }
 0x6fb   : > { %v6355_v57 = vsel %vm14862_vm1, 0, %v14861_v45  ;;  %vm22092_vm10 = vcmp.le.f32.partialorder %v6284_v48, 0.7853982  ;;  %vm12990_vm11 = vcmp.lt.s32.totalorder %v22060_v31, 2  ;;  %vm6833_vm12 = vcmp.lt.s32.totalorder %v22062_v24, 3 }
 0x6fc   : > { %v6356_v54 = vsub.s32 32, %v6355_v57  ;;  %v6360_v33 = vsub.s32 4294967266, %v6355_v57  ;;  %v6836_v51 = vsel %vm6834_vm8, %v6824_v35, 2102212464  ;;  %vm6273_vm13 = vweird.f32 %v21657_v46 }
 0x6fd   : > { %v6357_v8 = vshll.u32 %v22037_v7, %v6355_v57  ;;  %v6835_v58 = vsel %vm6831_vm4, %v6815_v60, %v6818_v32  ;;  %v6839_v48 = vsel %vm6831_vm4, %v6818_v32, %v6821_v2  ;;  %v6840_v37 = vsel %vm6834_vm8, %v6827_v9, 920167782 }
 0x6fe   : > { %v6358_v10 = vshrl.u32 %v6340_v59, %v6356_v54  ;;  %v6361_v40 = vadd.s32 127, %v6360_v33  ;;  %v6841_v26 = vsel %vm6833_vm12, %v6824_v35, %v6840_v37  ;;  %v6843_v29 = vsel %vm6831_vm4, %v6821_v2, %v6824_v35 }
 0x6ff   : > { %v6837_v7 = vsel %vm6833_vm12, %v6821_v2, %v6836_v51  ;;  %v6842_v17 = vsel %vm6832_vm5, %v6839_v48, %v6841_v26  ;;  %v6844_v43 = vsel %vm6834_vm8, %v6830_v6, 1326507024  ;;  %vm6913_vm14 = vcmp.gt.s32.totalorder %v6912_v39, 0 }
 0x700   : > { %v6359_v3 = vor.u32 %v6358_v10, %v6357_v8  ;;  %v6362_v59 = vshll.u32 %v6361_v40, 23  ;;  %v6845_v36 = vsel %vm6833_vm12, %v6827_v9, %v6844_v43  ;;  %v6914_v1 = vsel %vm6913_vm14, %v6912_v39, 0 }
 0x701   : > { %v15711_v30 = vpop.eup %15710  ;;  %v6846_v4 = vsel %vm6832_vm5, %v6843_v29, %v6845_v36  ;;  %v22123_v55 = vmul.u32.u64.low %v22074_v22, %v6842_v17  ;;  %v22124_v45 = vmul.u32.u64.high %v22074_v22, %v6842_v17, %v22123_v55  ;;  %v6838_v34 = vsel %vm6832_vm5, %v6835_v58, %v6837_v7 }
 0x702   : > { %v15713_v42 = vpop.eup %15712  ;;  %v6280_v41 = vxor.u32 2147483648, %v15711_v30  ;;  %v6363_v2 = vor.u32 4788187, %v6362_v59  ;;  %v6366_v35 = vcvt.s32.f32 %v6359_v3  ;;  %v6916_v6 = vand.u32 31, %v6914_v1 }
 0x703   : > { %v6277_v32 = vxor.u32 2147483648, %v15713_v42  ;;  %v22134_v44 = vmul.u32.u64.low %v22074_v22, %v6846_v4  ;;  %v22135_v49 = vmul.u32.u64.high %v22074_v22, %v6846_v4, %v22134_v44  ;;  %v6373_v54 = vsel %vm22092_vm10, 0, %v22072_v13 }
 0x704   : > { %v6281_v38 = vsel %vm6279_vm3, %v6280_v41, %v15713_v42  ;;  %v12996_v39 = vsel %vm12994_vm0, %v6280_v41, %v15713_v42  ;;  %v6364_v57 = vand.u32 2147483647, %v6363_v2  ;;  %v6857_v51 = vadd.s32 1, %v22124_v45 }
 0x705   : > { %v6278_v60 = vsel %vm6276_vm6, %v15711_v30, %v6277_v32  ;;  %v12993_v9 = vsel %vm12991_vm7, %v15711_v30, %v6277_v32  ;;  %v6917_v37 = vsub.s32 32, %v6916_v6  ;;  %v6854_v13 = vmul.u32 %v22074_v22, %v6838_v34 }
 0x706   : > { %v6282_v24 = vsel %vm6275_vm9, %v6278_v60, %v6281_v38  ;;  %v12997_v33 = vsel %vm12990_vm11, %v12993_v9, %v12996_v39  ;;  %v6367_v58 = vmul.f32 %v6366_v35, %v6364_v57  ;;  %vm6856_vm15 = vc.u32 %v22135_v49, %v22123_v55 }
 0x707   : > { %v6283_v8 = vsel %vm6273_vm13, nan, %v6282_v24  ;;  %v12998_v48 = vsel %vm6273_vm13, nan, %v12997_v33  ;;  %v6858_v40 = vsel %vm6856_vm15, %v6857_v51, %v22124_v45  ;;  %v22159_v26 = vshrl.u32 %v6914_v1, 5 }
 0x708   : > { %v7681_v61 = vmul.f32 %v16711_v23, %v6283_v8  ;;  %v14409_v10 = vmul.f32 %v16718_v12, %v12998_v48  ;;  %v6368_v31 = vxor.u32 2147483648, %v6367_v58  ;;  %v6919_v29 = vshll.u32 %v23185_v18, %v6916_v6 }
 0x709   : > { %v6859_v7 = vadd.s32 %v6858_v40, %v6854_v13  ;;  %v6920_v17 = vshrl.u32 %v23186_v5, %v6917_v37  ;;  %v6922_v43 = vshll.u32 %v23186_v5, %v6916_v6  ;;  %v6923_v22 = vshrl.u32 %v23187_v16, %v6917_v37 }
 0x70a   : > { %v14473_v46 = vadd.f32 %v14409_v10, %v7681_v61  ;;  %v6369_v30 = vsel %vm6286_vm2, %v6368_v31, %v6367_v58  ;;  %v6925_v3 = vshll.u32 %v23187_v16, %v6916_v6  ;;  %v6926_v59 = vshrl.u32 %v23188_v47, %v6917_v37 }
 0x70b   : > { %v6372_v36 = vsel %vm22092_vm10, %v21813_v19, %v6369_v30  ;;  %v6860_v1 = vadd.s32 536870912, %v6859_v7  ;;  %v6921_v42 = vor.u32 %v6920_v17, %v6919_v29  ;;  %v6928_v41 = vshll.u32 %v23188_v47, %v6916_v6 }
 0x70c   : > { %14537 = vst [vmem:[%s16934_s6 + $0x190] sm:$0xff] %v14473_v46  ;;  %15714 = vcosq.f32 %v6372_v36  ;;  %v6924_v4 = vor.u32 %v6923_v22, %v6922_v43  ;;  %v6927_v45 = vor.u32 %v6926_v59, %v6925_v3  ;;  %v6929_v32 = vshrl.u32 %v23189_v63, %v6917_v37 }
 0x70d   : > { %15716 = vsinq.f32 %v6372_v36  ;;  %v6861_v2 = vshrl.u32 %v6860_v1, 30  ;;  %v6931_v35 = vshll.u32 %v23189_v63, %v6916_v6  ;;  %v6932_v34 = vshrl.u32 %v23191_v28, %v6917_v37 }
 0x70e   : > { %v13092_v38 = vadd.s32 3, %v6373_v54  ;;  %v6930_v39 = vor.u32 %v6929_v32, %v6928_v41  ;;  %vm6934_vm2 = vcmp.lt.s32.totalorder %v22159_v26, 1  ;;  %v22180_v44 = vadd.f32 %v22040_v27, %v23338_v15 }
 0x70f   : > { %v6862_v60 = vshll.u32 %v6861_v2, 30  ;;  %v6918_v57 = vshrl.u32 %v23185_v18, %v6917_v37  ;;  %v6933_v9 = vor.u32 %v6932_v34, %v6931_v35  ;;  %vm6937_vm3 = vcmp.lt.s32.totalorder %v22159_v26, 4 }
 0x710   : > { %vm6935_vm1 = vcmp.lt.s32.totalorder %v22159_v26, 2  ;;  %vm6936_vm0 = vcmp.lt.s32.totalorder %v22159_v26, 3  ;;  %v6942_v6 = vsel %vm6934_vm2, %v6921_v42, %v6924_v4  ;;  %v6943_v24 = vsel %vm6937_vm3, %v6930_v39, 920167782 }
 0x711   : > { %v22188_v33 = vsub.s32 %v6859_v7, %v6862_v60  ;;  %v6939_v51 = vsel %vm6937_vm3, %v6927_v45, 2102212464  ;;  %v6944_v8 = vsel %vm6936_vm0, %v6927_v45, %v6943_v24  ;;  %v6946_v27 = vsel %vm6934_vm2, %v6924_v4, %v6927_v45 }
 0x712   : > { %v6377_v58 = vand.u32 3, %v6373_v54  ;;  %v6945_v48 = vsel %vm6935_vm1, %v6942_v6, %v6944_v8  ;;  %v6947_v37 = vsel %vm6937_vm3, %v6933_v9, 1326507024  ;;  %v6950_v61 = vshll.u32 %v6910_v53, 8  ;;  %v23339_v53 = vld [vmem:[#allocation17_spill] sm:$0xff] }
 0x713   : > { %v13093_v10 = vand.u32 3, %v13092_v38  ;;  %v6865_v13 = vsub.s32 0, %v22188_v33  ;;  %v6938_v31 = vsel %vm6934_vm2, %v6918_v57, %v6921_v42  ;;  %v6948_v40 = vsel %vm6936_vm0, %v6930_v39, %v6947_v37 }
 0x714   : > { %v6940_v29 = vsel %vm6936_vm0, %v6924_v4, %v6939_v51  ;;  %v6949_v46 = vsel %vm6935_vm1, %v6946_v27, %v6948_v40  ;;  %v22201_v7 = vmul.u32.u64.low %v6950_v61, %v6945_v48  ;;  %v22202_v54 = vmul.u32.u64.high %v6950_v61, %v6945_v48, %v22201_v7 }
 0x715   : > { %vm6801_vm4 = vcmp.lt.s32.totalorder %v21992_v21, 0  ;;  %v14880_v0 = vmin.u32 %v6865_v13, %v22188_v33  ;;  %v22209_v17 = vadd.f32 %v22047_v11, %v23339_v53  ;;  %v6593_v43 = vand.u32 2147483647, %v22180_v44 }
 0x716   : > { %vm6376_vm5 = vweird.f32 %v21813_v19  ;;  %v6885_v30 = vsub.s32 4, %v6861_v2  ;;  %v22213_v22 = vmul.u32.u64.low %v6950_v61, %v6949_v46  ;;  %v22214_v3 = vmul.u32.u64.high %v6950_v61, %v6949_v46, %v22213_v22 }
 0x717   : > { %v6596_v59 = vand.u32 2139095040, %v22180_v44  ;;  %vm6378_vm6 = vcmp.lt.s32.totalorder %v6377_v58, 2  ;;  %vm6379_vm7 = vcmp.eq.s32.totalorder %v6377_v58, 0  ;;  %v6867_v36 = vclz %v14880_v0 }
 0x718   : > { %v6941_v1 = vsel %vm6935_vm1, %v6938_v31, %v6940_v29  ;;  %vm6382_vm8 = vcmp.eq.s32.totalorder %v6377_v58, 2  ;;  %vm13094_vm9 = vcmp.lt.s32.totalorder %v13093_v10, 2  ;;  %vm13095_vm10 = vcmp.eq.s32.totalorder %v13093_v10, 0 }
 0x719   : > { %v6960_v11 = vadd.s32 1, %v22202_v54  ;;  %v15715_v42 = vpop.eup %15714  ;;  %vm13098_vm11 = vcmp.eq.s32.totalorder %v13093_v10, 2  ;;  %v6855_v41 = vadd.s32 %v22123_v55, %v22135_v49  ;;  %v14881_v4 = vadd.s32 4294967294, %v6867_v36 }
 0x71a   : > { %v6597_v45 = vshrl.u32 %v6596_v59, 23  ;;  %v15717_v32 = vpop.eup %15716  ;;  %v6383_v35 = vxor.u32 2147483648, %v15715_v42  ;;  %v6886_v34 = vsel %vm6801_vm4, %v6885_v30, %v6861_v2  ;;  %v6957_v38 = vmul.u32 %v6950_v61, %v6941_v1 }
 0x71b   : > { %vm6959_vm12 = vc.u32 %v22214_v3, %v22201_v7  ;;  %v6380_v26 = vxor.u32 2147483648, %v15717_v32  ;;  %vm14882_vm13 = vcmp.lt.s32.totalorder %v14881_v4, 0  ;;  %vm22241_vm14 = vcmp.le.f32.partialorder %v6799_v52, 0.7853982 }
 0x71c   : > { %v6961_v39 = vsel %vm6959_vm12, %v6960_v11, %v22202_v54  ;;  %v14871_v15 = vadd.s32 4294967169, %v6597_v45  ;;  %v6384_v60 = vsel %vm6382_vm8, %v6383_v35, %v15717_v32  ;;  %v13100_v57 = vsel %vm13098_vm11, %v6383_v35, %v15717_v32 }
 0x71d   : > { %v6870_v55 = vsel %vm14882_vm13, 0, %v14881_v4  ;;  %v6962_v49 = vadd.s32 %v6961_v39, %v6957_v38  ;;  %v6381_v9 = vsel %vm6379_vm7, %v15715_v42, %v6380_v26  ;;  %v13097_v6 = vsel %vm13095_vm10, %v15715_v42, %v6380_v26 }
 0x71e   : > { %v6871_v24 = vsub.s32 32, %v6870_v55  ;;  %v6872_v2 = vshll.u32 %v22188_v33, %v6870_v55  ;;  %v6385_v51 = vsel %vm6378_vm6, %v6381_v9, %v6384_v60  ;;  %v13101_v8 = vsel %vm13094_vm9, %v13097_v6, %v13100_v57 }
 0x71f   : > { %v6875_v27 = vsub.s32 4294967266, %v6870_v55  ;;  %v6963_v48 = vadd.s32 536870912, %v6962_v49  ;;  %v6386_v37 = vsel %vm6376_vm5, nan, %v6385_v51  ;;  %v13102_v61 = vsel %vm6376_vm5, nan, %v13101_v8 }
 0x720   : > { %v6873_v13 = vshrl.u32 %v6855_v41, %v6871_v24  ;;  %v6603_v31 = vadd.s32 1, %v14871_v15  ;;  %v7682_v40 = vmul.f32 %v16714_v50, %v6386_v37  ;;  %v14410_v29 = vmul.f32 %v16721_v62, %v13102_v61 }
 0x721   : > { %v6876_v33 = vadd.s32 127, %v6875_v27  ;;  %v6964_v58 = vshrl.u32 %v6963_v48, 30  ;;  %v6600_v46 = vand.u32 8388607, %v6593_v43  ;;  %v6888_v30 = vsel %vm22241_vm14, 0, %v6886_v34 }
 0x722   : > { %vm6604_vm15 = vcmp.gt.s32.totalorder %v6603_v31, 0  ;;  %v14474_v19 = vadd.f32 %v14410_v29, %v7682_v40  ;;  %v6874_v54 = vor.u32 %v6873_v13, %v6872_v2  ;;  %v6699_v59 = vand.u32 2139095040, %v22209_v17 }
 0x723   : > { %v6877_v0 = vshll.u32 %v6876_v33, 23  ;;  %v6965_v53 = vshll.u32 %v6964_v58, 30  ;;  %v6605_v22 = vsel %vm6604_vm15, %v6603_v31, 0  ;;  %vm6904_vm2 = vcmp.lt.s32.totalorder %v22014_v56, 0 }
 0x724   : > { %14538 = vst [vmem:[%s16934_s6 + $0x198] sm:$0xff] %v14474_v19  ;;  %v6601_v1 = vor.u32 8388608, %v6600_v46  ;;  %v6607_v11 = vand.u32 31, %v6605_v22  ;;  %v6881_v41 = vcvt.s32.f32 %v6874_v54  ;;  %v22252_v4 = vand.u32 3, %v6888_v30 }
 0x725   : > { %v6878_v36 = vor.u32 4788187, %v6877_v0  ;;  %v6966_v52 = vsub.s32 %v6962_v49, %v6965_v53  ;;  %v6988_v32 = vsub.s32 4, %v6964_v58  ;;  %v13612_v35 = vadd.s32 3, %v6888_v30 }
 0x726   : > { %v6608_v38 = vsub.s32 32, %v6607_v11  ;;  %v6700_v26 = vshrl.u32 %v6699_v59, 23  ;;  %v6958_v39 = vadd.s32 %v22201_v7, %v22214_v3  ;;  %v6696_v60 = vand.u32 2147483647, %v22209_v17 }
 0x727   : > { %v6879_v42 = vand.u32 2147483647, %v6878_v36  ;;  %v6968_v45 = vsub.s32 0, %v6966_v52  ;;  %v6610_v57 = vshll.u32 %v23185_v18, %v6607_v11  ;;  %v6613_v49 = vshll.u32 %v23186_v5, %v6607_v11 }
 0x728   : > { %v6611_v55 = vshrl.u32 %v23186_v5, %v6608_v38  ;;  %v22260_v9 = vshll.u32 %v6601_v1, 8  ;;  %v6614_v2 = vshrl.u32 %v23187_v16, %v6608_v38  ;;  %v6617_v51 = vshrl.u32 %v23188_v47, %v6608_v38 }
 0x729   : > { %v6882_v34 = vmul.f32 %v6881_v41, %v6879_v42  ;;  %v14884_v15 = vmin.u32 %v6968_v45, %v6966_v52  ;;  %v6989_v7 = vsel %vm6904_vm2, %v6988_v32, %v6964_v58  ;;  %v6606_v3 = vshrl.u32 %v6605_v22, 5 }
 0x72a   : > { %v6616_v8 = vshll.u32 %v23187_v16, %v6607_v11  ;;  %v14875_v27 = vadd.s32 4294967169, %v6700_v26  ;;  %v6612_v61 = vor.u32 %v6611_v55, %v6610_v57  ;;  %v6615_v13 = vor.u32 %v6614_v2, %v6613_v49 }
 0x72b   : > { %v6883_v6 = vxor.u32 2147483648, %v6882_v34  ;;  %v6970_v24 = vclz %v14884_v15  ;;  %v6619_v29 = vshll.u32 %v23188_v47, %v6607_v11  ;;  %v6620_v33 = vshrl.u32 %v23189_v63, %v6608_v38 }
 0x72c   : > { %v6618_v40 = vor.u32 %v6617_v51, %v6616_v8  ;;  %vm22276_vm3 = vcmp.le.f32.partialorder %v6902_v25, 0.7853982  ;;  %v6622_v46 = vshll.u32 %v23189_v63, %v6607_v11  ;;  %v6623_v19 = vshrl.u32 %v23191_v28, %v6608_v38 }
 0x72d   : > { %v6884_v48 = vsel %vm6801_vm4, %v6883_v6, %v6882_v34  ;;  %v14885_v37 = vadd.s32 4294967294, %v6970_v24  ;;  %v6609_v54 = vshrl.u32 %v23185_v18, %v6608_v38  ;;  %v6621_v0 = vor.u32 %v6620_v33, %v6619_v29 }
 0x72e   : > { %v6887_v31 = vsel %vm22241_vm14, %v21992_v21, %v6884_v48  ;;  %v6624_v22 = vor.u32 %v6623_v19, %v6622_v46  ;;  %vm6625_vm0 = vcmp.lt.s32.totalorder %v6606_v3, 1  ;;  %vm6627_vm4 = vcmp.lt.s32.totalorder %v6606_v3, 3 }
 0x72f   : > { %15718 = vcosq.f32 %v6887_v31  ;;  %vm14886_vm1 = vcmp.lt.s32.totalorder %v14885_v37, 0  ;;  %vm6628_vm5 = vcmp.lt.s32.totalorder %v6606_v3, 4  ;;  %v6633_v25 = vsel %vm6625_vm0, %v6612_v61, %v6615_v13 }
 0x730   : > { %15720 = vsinq.f32 %v6887_v31  ;;  %v6973_v10 = vsel %vm14886_vm1, 0, %v14885_v37  ;;  %v6630_v42 = vsel %vm6628_vm5, %v6618_v40, 2102212464  ;;  %v6634_v41 = vsel %vm6628_vm5, %v6621_v0, 920167782 }
 0x731   : > { %v6974_v53 = vsub.s32 32, %v6973_v10  ;;  %v6978_v30 = vsub.s32 4294967266, %v6973_v10  ;;  %v6975_v59 = vshll.u32 %v6966_v52, %v6973_v10  ;;  %vm6626_vm6 = vcmp.lt.s32.totalorder %v6606_v3, 2 }
 0x732   : > { %v6635_v11 = vsel %vm6627_vm4, %v6618_v40, %v6634_v41  ;;  %v6637_v45 = vsel %vm6625_vm0, %v6615_v13, %v6618_v40  ;;  %v6638_v32 = vsel %vm6628_vm5, %v6624_v22, 1326507024  ;;  %v6629_v34 = vsel %vm6625_vm0, %v6609_v54, %v6612_v61 }
 0x733   : > { %v6976_v36 = vshrl.u32 %v6958_v39, %v6974_v53  ;;  %v6979_v1 = vadd.s32 127, %v6978_v30  ;;  %v6636_v15 = vsel %vm6626_vm6, %v6633_v25, %v6635_v11  ;;  %v6631_v57 = vsel %vm6627_vm4, %v6615_v13, %v6630_v42 }
 0x734   : > { %v6639_v52 = vsel %vm6627_vm4, %v6621_v0, %v6638_v32  ;;  %v22288_v55 = vmul.u32.u64.low %v22260_v9, %v6636_v15  ;;  %v22289_v39 = vmul.u32.u64.high %v22260_v9, %v6636_v15, %v22288_v55  ;;  %v13613_v6 = vand.u32 3, %v13612_v35 }
 0x735   : > { %v6977_v26 = vor.u32 %v6976_v36, %v6975_v59  ;;  %v6980_v38 = vshll.u32 %v6979_v1, 23  ;;  %v6640_v24 = vsel %vm6626_vm6, %v6637_v45, %v6639_v52  ;;  %v6706_v2 = vadd.s32 1, %v14875_v27 }
 0x736   : > { %vm6893_vm7 = vcmp.lt.s32.totalorder %v22252_v4, 2  ;;  %vm6894_vm8 = vcmp.eq.s32.totalorder %v22252_v4, 0  ;;  %v6991_v51 = vsel %vm22276_vm3, 0, %v6989_v7  ;;  %vm6891_vm9 = vweird.f32 %v21992_v21 }
 0x737   : > { %v6981_v49 = vor.u32 4788187, %v6980_v38  ;;  %v22298_v8 = vmul.u32.u64.low %v22260_v9, %v6640_v24  ;;  %v22299_v48 = vmul.u32.u64.high %v22260_v9, %v6640_v24, %v22298_v8  ;;  %v6984_v61 = vcvt.s32.f32 %v6977_v26 }
 0x738   : > { %v6632_v35 = vsel %vm6626_vm6, %v6629_v34, %v6631_v57  ;;  %vm6707_vm10 = vcmp.gt.s32.totalorder %v6706_v2, 0  ;;  %vm6897_vm11 = vcmp.eq.s32.totalorder %v22252_v4, 2  ;;  %v6651_v27 = vadd.s32 1, %v22289_v39 }
 0x739   : > { %v6982_v37 = vand.u32 2147483647, %v6981_v49  ;;  %v22307_v13 = vand.u32 8388607, %v6696_v60  ;;  %v6708_v7 = vsel %vm6707_vm10, %v6706_v2, 0  ;;  %vm13614_vm12 = vcmp.lt.s32.totalorder %v13613_v6, 2 }
 0x73a   : > { %v13716_v40 = vadd.s32 3, %v6991_v51  ;;  %v6710_v29 = vand.u32 31, %v6708_v7  ;;  %vm13615_vm13 = vcmp.eq.s32.totalorder %v13613_v6, 0  ;;  %vm13618_vm14 = vcmp.eq.s32.totalorder %v13613_v6, 2 }
 0x73b   : > { %v6985_v31 = vmul.f32 %v6984_v61, %v6982_v37  ;;  %v6648_v3 = vmul.u32 %v22260_v9, %v6632_v35  ;;  %vm6650_vm15 = vc.u32 %v22299_v48, %v22288_v55  ;;  %v22313_v30 = vand.u32 3, %v6991_v51  ;;  %v22350_v61 = vpop.permute.xlu0 %888 }
 0x73c   : > { %v15719_v33 = vpop.eup %15718  ;;  %v6652_v54 = vsel %vm6650_vm15, %v6651_v27, %v22289_v39  ;;  %v6711_v0 = vsub.s32 32, %v6710_v29  ;;  %v6704_v59 = vor.u32 8388608, %v22307_v13  ;;  %v22320_v1 = vand.u32 3, %v13716_v40 }
 0x73d   : > { %v15721_v46 = vpop.eup %15720  ;;  %v6898_v19 = vxor.u32 2147483648, %v15719_v33  ;;  %v6986_v10 = vxor.u32 2147483648, %v6985_v31  ;;  %v6653_v22 = vadd.s32 %v6652_v54, %v6648_v3  ;;  %v22340_v52 = vshrl.u32 %v6708_v7, 5 }
 0x73e   : > { %v6895_v53 = vxor.u32 2147483648, %v15721_v46  ;;  %v6714_v38 = vshrl.u32 %v23186_v5, %v6711_v0  ;;  %v6717_v39 = vshrl.u32 %v23187_v16, %v6711_v0  ;;  %v6713_v6 = vshll.u32 %v23185_v18, %v6710_v29 }
 0x73f   : > { %v6899_v25 = vsel %vm6897_vm11, %v6898_v19, %v15721_v46  ;;  %v6987_v9 = vsel %vm6904_vm2, %v6986_v10, %v6985_v31  ;;  %v13620_v36 = vsel %vm13618_vm14, %v6898_v19, %v15721_v46  ;;  %v6654_v45 = vadd.s32 536870912, %v6653_v22 }
 0x740   : > { %v6896_v42 = vsel %vm6894_vm8, %v15719_v33, %v6895_v53  ;;  %v6990_v41 = vsel %vm22276_vm3, %v22014_v56, %v6987_v9  ;;  %v13617_v11 = vsel %vm13615_vm13, %v15719_v33, %v6895_v53  ;;  %v6716_v24 = vshll.u32 %v23186_v5, %v6710_v29 }
 0x741   : > { %v6900_v32 = vsel %vm6893_vm7, %v6896_v42, %v6899_v25  ;;  %15722 = vcosq.f32 %v6990_v41  ;;  %v13621_v26 = vsel %vm13614_vm12, %v13617_v11, %v13620_v36  ;;  %v22336_v58 = vshrl.u32 %v6654_v45, 30 }
 0x742   : > { %v6901_v34 = vsel %vm6891_vm9, nan, %v6900_v32  ;;  %15724 = vsinq.f32 %v6990_v41  ;;  %v13622_v15 = vsel %vm6891_vm9, nan, %v13621_v26  ;;  %v6720_v21 = vshrl.u32 %v23188_v47, %v6711_v0  ;;  %v23344_v32 = vld [vmem:[#allocation8_spill] sm:$0xff] }
 0x743   : > { %v7687_v57 = vmul.f32 %v16711_v23, %v6901_v34  ;;  %v14415_v4 = vmul.f32 %v16718_v12, %v13622_v15  ;;  %v6656_v49 = vshll.u32 %v22336_v58, 30  ;;  %v6719_v51 = vshll.u32 %v23187_v16, %v6710_v29 }
 0x744   : > { %v6722_v8 = vshll.u32 %v23188_v47, %v6710_v29  ;;  %v6723_v37 = vshrl.u32 %v23189_v63, %v6711_v0  ;;  %v6715_v27 = vor.u32 %v6714_v38, %v6713_v6  ;;  %v6718_v13 = vor.u32 %v6717_v39, %v6716_v24 }
 0x745   : > { %v14479_v2 = vadd.f32 %v14415_v4, %v7687_v57  ;;  %v22352_v35 = vsub.s32 %v6653_v22, %v6656_v49  ;;  %v6721_v7 = vor.u32 %v6720_v21, %v6719_v51  ;;  %v6725_v40 = vshll.u32 %v23189_v63, %v6710_v29 }
 0x746   : > { %v6724_v31 = vor.u32 %v6723_v37, %v6722_v8  ;;  %v6726_v33 = vshrl.u32 %v23191_v28, %v6711_v0  ;;  %vm7000_vm2 = vcmp.eq.s32.totalorder %v22313_v30, 2  ;;  %v963_v46 = vmul.f32 %v16575_v20, %v22350_v61 }
 0x747   : > { %14543 = vst [vmem:[%s16934_s6 + $0x1c0] sm:$0xff] %v14479_v2  ;;  %v6659_v3 = vsub.s32 0, %v22352_v35  ;;  %vm6997_vm3 = vcmp.eq.s32.totalorder %v22313_v30, 0  ;;  %vm13719_vm1 = vcmp.eq.s32.totalorder %v22320_v1, 0  ;;  %v6712_v19 = vshrl.u32 %v23185_v18, %v6711_v0 }
 0x748   : > { %v6727_v10 = vor.u32 %v6726_v33, %v6725_v40  ;;  %vm6728_vm0 = vcmp.lt.s32.totalorder %v22340_v52, 1  ;;  %v22365_v54 = vshll.u32 %v6704_v59, 8  ;;  %vm6996_vm4 = vcmp.lt.s32.totalorder %v22313_v30, 2 }
 0x749   : > { %vm13718_vm5 = vcmp.lt.s32.totalorder %v22320_v1, 2  ;;  %v14872_v29 = vmin.u32 %v6659_v3, %v22352_v35  ;;  %vm6730_vm6 = vcmp.lt.s32.totalorder %v22340_v52, 3  ;;  %vm6731_vm7 = vcmp.lt.s32.totalorder %v22340_v52, 4 }
 0x74a   : > { %v6736_v53 = vsel %vm6728_vm0, %v6715_v27, %v6718_v13  ;;  %vm6994_vm8 = vweird.f32 %v22014_v56  ;;  %v6733_v0 = vsel %vm6731_vm7, %v6721_v7, 2102212464  ;;  %v6737_v22 = vsel %vm6731_vm7, %v6724_v31, 920167782 }
 0x74b   : > { %v6740_v59 = vsel %vm6728_vm0, %v6718_v13, %v6721_v7  ;;  %v6741_v25 = vsel %vm6731_vm7, %v6727_v10, 1326507024  ;;  %v6661_v9 = vclz %v14872_v29  ;;  %vm6729_vm9 = vcmp.lt.s32.totalorder %v22340_v52, 2 }
 0x74c   : > { %v6738_v36 = vsel %vm6730_vm6, %v6721_v7, %v6737_v22  ;;  %v6742_v42 = vsel %vm6730_vm6, %v6724_v31, %v6741_v25  ;;  %vm6595_vm10 = vcmp.lt.s32.totalorder %v22180_v44, 0  ;;  %v6732_v41 = vsel %vm6728_vm0, %v6712_v19, %v6715_v27 }
 0x74d   : > { %v6739_v11 = vsel %vm6729_vm9, %v6736_v53, %v6738_v36  ;;  %v6743_v45 = vsel %vm6729_vm9, %v6740_v59, %v6742_v42  ;;  %v22390_v26 = vadd.f32 %v963_v46, %v23344_v32  ;;  %v14873_v34 = vadd.s32 4294967294, %v6661_v9  ;;  %v23347_v32 = vld [vmem:[#allocation7_spill] sm:$0xff] }
 0x74e   : > { %v15723_v38 = vpop.eup %15722  ;;  %v6734_v15 = vsel %vm6730_vm6, %v6718_v13, %v6733_v0  ;;  %v22395_v57 = vmul.u32.u64.low %v22365_v54, %v6743_v45  ;;  %v22396_v4 = vmul.u32.u64.high %v22365_v54, %v6743_v45, %v22395_v57  ;;  %vm13722_vm11 = vcmp.eq.s32.totalorder %v22320_v1, 2 }
 0x74f   : > { %v15725_v39 = vpop.eup %15724  ;;  %v7001_v49 = vxor.u32 2147483648, %v15723_v38  ;;  %v22400_v6 = vmul.u32.u64.low %v22365_v54, %v6739_v11  ;;  %v22401_v24 = vmul.u32.u64.high %v22365_v54, %v6739_v11, %v22400_v6  ;;  %v6649_v2 = vadd.s32 %v22288_v55, %v22299_v48 }
 0x750   : > { %v6998_v21 = vxor.u32 2147483648, %v15725_v39  ;;  %vm14874_vm12 = vcmp.lt.s32.totalorder %v14873_v34, 0  ;;  %v6679_v51 = vsub.s32 4, %v22336_v58  ;;  %v6735_v13 = vsel %vm6729_vm9, %v6732_v41, %v6734_v15 }
 0x751   : > { %v7002_v8 = vsel %vm7000_vm2, %v7001_v49, %v15725_v39  ;;  %v13724_v37 = vsel %vm13722_vm11, %v7001_v49, %v15725_v39  ;;  %v6664_v27 = vsel %vm14874_vm12, 0, %v14873_v34  ;;  %v7214_v55 = vand.u32 2139095040, %v22390_v26 }
 0x752   : > { %v6999_v7 = vsel %vm6997_vm3, %v15723_v38, %v6998_v21  ;;  %v13721_v31 = vsel %vm13719_vm1, %v15723_v38, %v6998_v21  ;;  %v6665_v40 = vsub.s32 32, %v6664_v27  ;;  %v6666_v3 = vshll.u32 %v22352_v35, %v6664_v27 }
 0x753   : > { %v7003_v48 = vsel %vm6996_vm4, %v6999_v7, %v7002_v8  ;;  %v13725_v33 = vsel %vm13718_vm5, %v13721_v31, %v13724_v37  ;;  %v6669_v46 = vsub.s32 4294967266, %v6664_v27  ;;  %vm6753_vm13 = vc.u32 %v22396_v4, %v22400_v6  ;;  %v22453_v37 = vpop.permute.xlu1 %884 }
 0x754   : > { %v7004_v52 = vsel %vm6994_vm8, nan, %v7003_v48  ;;  %v13726_v19 = vsel %vm6994_vm8, nan, %v13725_v33  ;;  %v6667_v10 = vshrl.u32 %v6649_v2, %v6665_v40  ;;  %v6754_v53 = vadd.s32 1, %v22401_v24 }
 0x755   : > { %v7688_v30 = vmul.f32 %v16714_v50, %v7004_v52  ;;  %v14416_v29 = vmul.f32 %v16721_v62, %v13726_v19  ;;  %v6670_v1 = vadd.s32 127, %v6669_v46  ;;  %v6680_v35 = vsel %vm6595_vm10, %v6679_v51, %v22336_v58 }
 0x756   : > { %v6751_v0 = vmul.u32 %v22365_v54, %v6735_v13  ;;  %v964_v56 = vmul.f32 %v16578_v14, %v22350_v61  ;;  %v7215_v22 = vshrl.u32 %v7214_v55, 23  ;;  %v6668_v25 = vor.u32 %v6667_v10, %v6666_v3 }
 0x757   : > { %v14480_v59 = vadd.f32 %v14416_v29, %v7688_v30  ;;  %v6671_v9 = vshll.u32 %v6670_v1, 23  ;;  %v6755_v36 = vsel %vm6753_vm13, %v6754_v53, %v22401_v24  ;;  %v7211_v41 = vand.u32 2147483647, %v22390_v26 }
 0x758   : > { %v6756_v42 = vadd.s32 %v6755_v36, %v6751_v0  ;;  %v14895_v11 = vadd.s32 4294967169, %v7215_v22  ;;  %vm22441_vm14 = vcmp.le.f32.partialorder %v6593_v43, 0.7853982  ;;  %v22448_v38 = vadd.f32 %v964_v56, %v23347_v32 }
 0x759   : > { %14544 = vst [vmem:[%s16934_s6 + $0x1c8] sm:$0xff] %v14480_v59  ;;  %v6672_v54 = vor.u32 4788187, %v6671_v9  ;;  %v6682_v61 = vsel %vm22441_vm14, 0, %v6680_v35  ;;  %v6675_v57 = vcvt.s32.f32 %v6668_v25  ;;  %v7218_v49 = vand.u32 8388607, %v7211_v41 }
 0x75a   : > { %v6757_v45 = vadd.s32 536870912, %v6756_v42  ;;  %v7221_v34 = vadd.s32 1, %v14895_v11  ;;  %v13404_v24 = vadd.s32 3, %v6682_v61  ;;  %v7317_v8 = vand.u32 2139095040, %v22448_v38 }
 0x75b   : > { %v6673_v15 = vand.u32 2147483647, %v6672_v54  ;;  %vm6698_vm2 = vcmp.lt.s32.totalorder %v22209_v17, 0  ;;  %v7219_v7 = vor.u32 8388608, %v7218_v49  ;;  %v22460_v55 = vand.u32 3, %v6682_v61 }
 0x75c   : > { %v6758_v39 = vshrl.u32 %v6757_v45, 30  ;;  %vm7222_vm15 = vcmp.gt.s32.totalorder %v7221_v34, 0  ;;  %v22462_v48 = vand.u32 3, %v13404_v24  ;;  %v22466_v33 = vmul.f32 %v16575_v20, %v22453_v37 }
 0x75d   : > { %v6676_v43 = vmul.f32 %v6675_v57, %v6673_v15  ;;  %v7223_v21 = vsel %vm7222_vm15, %v7221_v34, 0  ;;  %v6752_v46 = vadd.s32 %v22400_v6, %v22396_v4  ;;  %v7318_v19 = vshrl.u32 %v7317_v8, 23 }
 0x75e   : > { %v6759_v2 = vshll.u32 %v6758_v39, 30  ;;  %v7225_v51 = vand.u32 31, %v7223_v21  ;;  %v6782_v53 = vsub.s32 4, %v6758_v39  ;;  %v22478_v35 = vshll.u32 %v7219_v7, 8 }
 0x75f   : > { %v6677_v27 = vxor.u32 2147483648, %v6676_v43  ;;  %v7224_v0 = vshrl.u32 %v7223_v21, 5  ;;  %v14899_v58 = vadd.s32 4294967169, %v7318_v19  ;;  %vm22490_vm3 = vcmp.le.f32.partialorder %v6696_v60, 0.7853982 }
 0x760   : > { %v22456_v13 = vsub.s32 %v6756_v42, %v6759_v2  ;;  %v7226_v31 = vsub.s32 32, %v7225_v51  ;;  %v7228_v10 = vshll.u32 %v23185_v18, %v7225_v51  ;;  %v7231_v4 = vshll.u32 %v23186_v5, %v7225_v51 }
 0x761   : > { %v6678_v40 = vsel %vm6595_vm10, %v6677_v27, %v6676_v43  ;;  %v7234_v6 = vshll.u32 %v23187_v16, %v7225_v51  ;;  %v7237_v25 = vshll.u32 %v23188_v47, %v7225_v51  ;;  %v7240_v11 = vshll.u32 %v23189_v63, %v7225_v51 }
 0x762   : > { %v6681_v3 = vsel %vm22441_vm14, %v22180_v44, %v6678_v40  ;;  %v6762_v52 = vsub.s32 0, %v22456_v13  ;;  %v7229_v30 = vshrl.u32 %v23186_v5, %v7226_v31  ;;  %v7232_v29 = vshrl.u32 %v23187_v16, %v7226_v31 }
 0x763   : > { %15726 = vcosq.f32 %v6681_v3  ;;  %v7235_v59 = vshrl.u32 %v23188_v47, %v7226_v31  ;;  %v7238_v9 = vshrl.u32 %v23189_v63, %v7226_v31  ;;  %v7227_v36 = vshrl.u32 %v23185_v18, %v7226_v31 }
 0x764   : > { %15728 = vsinq.f32 %v6681_v3  ;;  %v14876_v1 = vmin.u32 %v6762_v52, %v22456_v13  ;;  %v7230_v56 = vor.u32 %v7229_v30, %v7228_v10  ;;  %v7233_v42 = vor.u32 %v7232_v29, %v7231_v4 }
 0x765   : > { %v7236_v61 = vor.u32 %v7235_v59, %v7234_v6  ;;  %v7239_v45 = vor.u32 %v7238_v9, %v7237_v25  ;;  %v7241_v32 = vshrl.u32 %v23191_v28, %v7226_v31  ;;  %v6783_v15 = vsel %vm6698_vm2, %v6782_v53, %v6758_v39 }
 0x766   : > { %v6764_v22 = vclz %v14876_v1  ;;  %vm7243_vm1 = vcmp.lt.s32.totalorder %v7224_v0, 1  ;;  %vm7245_vm0 = vcmp.lt.s32.totalorder %v7224_v0, 3  ;;  %vm7246_vm4 = vcmp.lt.s32.totalorder %v7224_v0, 4 }
 0x767   : > { %vm6691_vm5 = vcmp.eq.s32.totalorder %v22460_v55, 2  ;;  %vm13410_vm7 = vcmp.eq.s32.totalorder %v22462_v48, 2  ;;  %v7242_v57 = vor.u32 %v7241_v32, %v7240_v11  ;;  %v7247_v49 = vsel %vm7243_vm1, %v7227_v36, %v7230_v56 }
 0x768   : > { %v14877_v54 = vadd.s32 4294967294, %v6764_v22  ;;  %v7248_v43 = vsel %vm7246_vm4, %v7236_v61, 2102212464  ;;  %vm6688_vm8 = vcmp.eq.s32.totalorder %v22460_v55, 0  ;;  %vm13407_vm9 = vcmp.eq.s32.totalorder %v22462_v48, 0 }
 0x769   : > { %v7249_v39 = vsel %vm7245_vm0, %v7233_v42, %v7248_v43  ;;  %v7251_v24 = vsel %vm7243_vm1, %v7230_v56, %v7233_v42  ;;  %v7252_v21 = vsel %vm7246_vm4, %v7239_v45, 920167782  ;;  %vm6687_vm10 = vcmp.lt.s32.totalorder %v22460_v55, 2 }
 0x76a   : > { %vm14878_vm6 = vcmp.lt.s32.totalorder %v14877_v54, 0  ;;  %vm13406_vm11 = vcmp.lt.s32.totalorder %v22462_v48, 2  ;;  %vm7244_vm12 = vcmp.lt.s32.totalorder %v7224_v0, 2  ;;  %vm6685_vm13 = vweird.f32 %v22180_v44  ;;  %v23350_v0 = vld [vmem:[#allocation19_spill] sm:$0xff] }
 0x76b   : > { %v6767_v60 = vsel %vm14878_vm6, 0, %v14877_v54  ;;  %v7250_v27 = vsel %vm7244_vm12, %v7247_v49, %v7249_v39  ;;  %v7253_v7 = vsel %vm7245_vm0, %v7236_v61, %v7252_v21  ;;  %v7255_v31 = vsel %vm7243_vm1, %v7233_v42, %v7236_v61 }
 0x76c   : > { %v6768_v2 = vsub.s32 32, %v6767_v60  ;;  %v6769_v51 = vshll.u32 %v22456_v13, %v6767_v60  ;;  %v6772_v8 = vsub.s32 4294967266, %v6767_v60  ;;  %v7256_v40 = vsel %vm7246_vm4, %v7242_v57, 1326507024 }
 0x76d   : > { %v7254_v19 = vsel %vm7244_vm12, %v7251_v24, %v7253_v7  ;;  %v7257_v10 = vsel %vm7245_vm0, %v7239_v45, %v7256_v40  ;;  %v7324_v1 = vadd.s32 1, %v14899_v58  ;;  %v7314_v25 = vand.u32 2147483647, %v22448_v38 }
 0x76e   : > { %v6770_v3 = vshrl.u32 %v6752_v46, %v6768_v2  ;;  %v6773_v52 = vadd.s32 127, %v6772_v8  ;;  %v7258_v30 = vsel %vm7244_vm12, %v7255_v31, %v7257_v10  ;;  %v22525_v9 = vadd.f32 %v22466_v33, %v23350_v0 }
 0x76f   : > { %v22514_v13 = vmul.u32.u64.low %v22478_v35, %v7254_v19  ;;  %v22515_v29 = vmul.u32.u64.high %v22478_v35, %v7254_v19, %v22514_v13  ;;  %v22519_v6 = vmul.u32.u64.low %v22478_v35, %v7258_v30  ;;  %v22520_v22 = vmul.u32.u64.high %v22478_v35, %v7258_v30, %v22519_v6 }
 0x770   : > { %v15727_v53 = vpop.eup %15726  ;;  %v6771_v56 = vor.u32 %v6770_v3, %v6769_v51  ;;  %v6774_v4 = vshll.u32 %v6773_v52, 23  ;;  %vm7325_vm14 = vcmp.gt.s32.totalorder %v7324_v1, 0  ;;  %v6785_v11 = vsel %vm22490_vm3, 0, %v6783_v15 }
 0x771   : > { %v15729_v59 = vpop.eup %15728  ;;  %v6692_v46 = vxor.u32 2147483648, %v15727_v53  ;;  %v7326_v58 = vsel %vm7325_vm14, %v7324_v1, 0  ;;  %v7266_v45 = vmul.u32 %v22478_v35, %v7250_v27  ;;  %v7269_v32 = vadd.s32 1, %v22515_v29 }
 0x772   : > { %v6689_v36 = vxor.u32 2147483648, %v15729_v59  ;;  %v6775_v42 = vor.u32 4788187, %v6774_v4  ;;  %v6778_v49 = vcvt.s32.f32 %v6771_v56  ;;  %vm7268_vm15 = vc.u32 %v22520_v22, %v22514_v13 }
 0x773   : > { %v6693_v54 = vsel %vm6691_vm5, %v6692_v46, %v15729_v59  ;;  %v13412_v61 = vsel %vm13410_vm7, %v6692_v46, %v15729_v59  ;;  %v7328_v35 = vand.u32 31, %v7326_v58  ;;  %v7270_v2 = vsel %vm7268_vm15, %v7269_v32, %v22515_v29 }
 0x774   : > { %v6690_v33 = vsel %vm6688_vm8, %v15727_v53, %v6689_v36  ;;  %v6776_v57 = vand.u32 2147483647, %v6775_v42  ;;  %v13409_v43 = vsel %vm13407_vm9, %v15727_v53, %v6689_v36  ;;  %v7271_v48 = vadd.s32 %v7270_v2, %v7266_v45 }
 0x775   : > { %v6694_v15 = vsel %vm6687_vm10, %v6690_v33, %v6693_v54  ;;  %v13413_v60 = vsel %vm13406_vm11, %v13409_v43, %v13412_v61  ;;  %v7329_v8 = vsub.s32 32, %v7328_v35  ;;  %v13508_v7 = vadd.s32 3, %v6785_v11 }
 0x776   : > { %v6695_v39 = vsel %vm6685_vm13, nan, %v6694_v15  ;;  %v6779_v24 = vmul.f32 %v6778_v49, %v6776_v57  ;;  %v13414_v21 = vsel %vm6685_vm13, nan, %v13413_v60  ;;  %v7321_v31 = vand.u32 8388607, %v7314_v25 }
 0x777   : > { %v7685_v51 = vmul.f32 %v16711_v23, %v6695_v39  ;;  %v14413_v55 = vmul.f32 %v16718_v12, %v13414_v21  ;;  %v7331_v40 = vshll.u32 %v23185_v18, %v7328_v35  ;;  %v7272_v52 = vadd.s32 536870912, %v7271_v48 }
 0x778   : > { %v6780_v27 = vxor.u32 2147483648, %v6779_v24  ;;  %v7332_v44 = vshrl.u32 %v23186_v5, %v7329_v8  ;;  %v7334_v19 = vshll.u32 %v23186_v5, %v7328_v35  ;;  %v7335_v30 = vshrl.u32 %v23187_v16, %v7329_v8 }
 0x779   : > { %v14477_v3 = vadd.f32 %v14413_v55, %v7685_v51  ;;  %v7337_v29 = vshll.u32 %v23187_v16, %v7328_v35  ;;  %v7338_v1 = vshrl.u32 %v23188_v47, %v7329_v8  ;;  %v7273_v56 = vshrl.u32 %v7272_v52, 30 }
 0x77a   : > { %v6781_v10 = vsel %vm6698_vm2, %v6780_v27, %v6779_v24  ;;  %v7340_v4 = vshll.u32 %v23188_v47, %v7328_v35  ;;  %v7341_v6 = vshrl.u32 %v23189_v63, %v7329_v8  ;;  %v7327_v59 = vshrl.u32 %v7326_v58, 5 }
 0x77b   : > { %v6784_v53 = vsel %vm22490_vm3, %v22209_v17, %v6781_v10  ;;  %14541 = vst [vmem:[%s16934_s6 + $0x1b0] sm:$0xff] %v14477_v3  ;;  %v7333_v46 = vor.u32 %v7332_v44, %v7331_v40  ;;  %v7336_v0 = vor.u32 %v7335_v30, %v7334_v19  ;;  %v7274_v36 = vshll.u32 %v7273_v56, 30 }
 0x77c   : > { %15730 = vcosq.f32 %v6784_v53  ;;  %v7339_v42 = vor.u32 %v7338_v1, %v7337_v29  ;;  %v7342_v54 = vor.u32 %v7341_v6, %v7340_v4  ;;  %v7343_v61 = vshll.u32 %v23189_v63, %v7328_v35 }
 0x77d   : > { %15732 = vsinq.f32 %v6784_v53  ;;  %v7344_v45 = vshrl.u32 %v23191_v28, %v7329_v8  ;;  %v7005_v34 = vand.u32 2147483647, %v22525_v9  ;;  %v22571_v32 = vand.u32 3, %v6785_v11 }
 0x77e   : > { %v22573_v33 = vand.u32 3, %v13508_v7  ;;  %v22575_v57 = vsub.s32 %v7271_v48, %v7274_v36  ;;  %v7322_v49 = vor.u32 8388608, %v7321_v31  ;;  %vm7213_vm2 = vcmp.lt.s32.totalorder %v22390_v26, 0 }
 0x77f   : > { %v7345_v58 = vor.u32 %v7344_v45, %v7343_v61  ;;  %vm7346_vm3 = vcmp.lt.s32.totalorder %v7327_v59, 1  ;;  %vm7348_vm1 = vcmp.lt.s32.totalorder %v7327_v59, 3  ;;  %vm7349_vm0 = vcmp.lt.s32.totalorder %v7327_v59, 4 }
 0x780   : > { %v7277_v43 = vsub.s32 0, %v22575_v57  ;;  %v7351_v15 = vsel %vm7349_vm0, %v7339_v42, 2102212464  ;;  %v7354_v60 = vsel %vm7346_vm3, %v7333_v46, %v7336_v0  ;;  %v7355_v35 = vsel %vm7349_vm0, %v7342_v54, 920167782 }
 0x781   : > { %v7330_v39 = vshrl.u32 %v23185_v18, %v7329_v8  ;;  %v7356_v11 = vsel %vm7348_vm1, %v7339_v42, %v7355_v35  ;;  %v7358_v24 = vsel %vm7346_vm3, %v7336_v0, %v7339_v42  ;;  %v7359_v21 = vsel %vm7349_vm0, %v7345_v58, 1326507024 }
 0x782   : > { %v14896_v2 = vmin.u32 %v7277_v43, %v22575_v57  ;;  %v7297_v51 = vsub.s32 4, %v7273_v56  ;;  %vm7347_vm4 = vcmp.lt.s32.totalorder %v7327_v59, 2  ;;  %v7362_v55 = vshll.u32 %v7322_v49, 8 }
 0x783   : > { %v7350_v48 = vsel %vm7346_vm3, %v7330_v39, %v7333_v46  ;;  %v7352_v27 = vsel %vm7348_vm1, %v7336_v0, %v7351_v15  ;;  %v7357_v7 = vsel %vm7347_vm4, %v7354_v60, %v7356_v11  ;;  %v7360_v31 = vsel %vm7348_vm1, %v7342_v54, %v7359_v21 }
 0x784   : > { %v7279_v40 = vclz %v14896_v2  ;;  %v7361_v3 = vsel %vm7347_vm4, %v7358_v24, %v7360_v31  ;;  %v22586_v8 = vmul.u32.u64.low %v7362_v55, %v7357_v7  ;;  %v22587_v52 = vmul.u32.u64.high %v7362_v55, %v7357_v7, %v22586_v8 }
 0x785   : > { %vm6788_vm5 = vweird.f32 %v22209_v17  ;;  %vm6790_vm6 = vcmp.lt.s32.totalorder %v22571_v32, 2  ;;  %v22592_v44 = vmul.u32.u64.low %v7362_v55, %v7361_v3  ;;  %v22593_v19 = vmul.u32.u64.high %v7362_v55, %v7361_v3, %v22592_v44 }
 0x786   : > { %v7008_v10 = vand.u32 2139095040, %v22525_v9  ;;  %vm6791_vm7 = vcmp.eq.s32.totalorder %v22571_v32, 0  ;;  %vm6794_vm8 = vcmp.eq.s32.totalorder %v22571_v32, 2  ;;  %v14897_v30 = vadd.s32 4294967294, %v7279_v40 }
 0x787   : > { %v7353_v29 = vsel %vm7347_vm4, %v7350_v48, %v7352_v27  ;;  %vm13510_vm9 = vcmp.lt.s32.totalorder %v22573_v33, 2  ;;  %vm13511_vm10 = vcmp.eq.s32.totalorder %v22573_v33, 0  ;;  %vm13514_vm11 = vcmp.eq.s32.totalorder %v22573_v33, 2 }
 0x788   : > { %v7009_v1 = vshrl.u32 %v7008_v10, 23  ;;  %v7267_v4 = vadd.s32 %v22514_v13, %v22520_v22  ;;  %vm14898_vm12 = vcmp.lt.s32.totalorder %v14897_v30, 0  ;;  %v7298_v6 = vsel %vm7213_vm2, %v7297_v51, %v7273_v56 }
 0x789   : > { %v15731_v53 = vpop.eup %15730  ;;  %v7372_v46 = vadd.s32 1, %v22587_v52  ;;  %v7282_v36 = vsel %vm14898_vm12, 0, %v14897_v30  ;;  %v7369_v42 = vmul.u32 %v7362_v55, %v7353_v29  ;;  %vm7371_vm13 = vc.u32 %v22593_v19, %v22586_v8 }
 0x78a   : > { %v15733_v0 = vpop.eup %15732  ;;  %v6795_v59 = vxor.u32 2147483648, %v15731_v53  ;;  %v7283_v61 = vsub.s32 32, %v7282_v36  ;;  %v7284_v45 = vshll.u32 %v22575_v57, %v7282_v36  ;;  %v7287_v49 = vsub.s32 4294967266, %v7282_v36 }
 0x78b   : > { %v6792_v54 = vxor.u32 2147483648, %v15733_v0  ;;  %v7373_v56 = vsel %vm7371_vm13, %v7372_v46, %v22587_v52  ;;  %v14887_v58 = vadd.s32 4294967169, %v7009_v1  ;;  %v962_v33 = vmul.f32 %v16578_v14, %v22453_v37 }
 0x78c   : > { %v6796_v13 = vsel %vm6794_vm8, %v6795_v59, %v15733_v0  ;;  %v13516_v22 = vsel %vm13514_vm11, %v6795_v59, %v15733_v0  ;;  %v7285_v60 = vshrl.u32 %v7267_v4, %v7283_v61  ;;  %v7288_v35 = vadd.s32 127, %v7287_v49 }
 0x78d   : > { %v6793_v43 = vsel %vm6791_vm7, %v15731_v53, %v6792_v54  ;;  %v13513_v15 = vsel %vm13511_vm10, %v15731_v53, %v6792_v54  ;;  %v7374_v11 = vadd.s32 %v7373_v56, %v7369_v42  ;;  %v7015_v24 = vadd.s32 1, %v14887_v58 }
 0x78e   : > { %v6797_v57 = vsel %vm6790_vm6, %v6793_v43, %v6796_v13  ;;  %v13517_v39 = vsel %vm13510_vm9, %v13513_v15, %v13516_v22  ;;  %v7286_v51 = vor.u32 %v7285_v60, %v7284_v45  ;;  %v7289_v55 = vshll.u32 %v7288_v35, 23 }
 0x78f   : > { %v6798_v21 = vsel %vm6788_vm5, nan, %v6797_v57  ;;  %v13518_v2 = vsel %vm6788_vm5, nan, %v13517_v39  ;;  %v7375_v32 = vadd.s32 536870912, %v7374_v11  ;;  %vm7016_vm14 = vcmp.gt.s32.totalorder %v7015_v24, 0 }
 0x790   : > { %v7686_v48 = vmul.f32 %v16714_v50, %v6798_v21  ;;  %v14414_v27 = vmul.f32 %v16721_v62, %v13518_v2  ;;  %v7290_v7 = vor.u32 4788187, %v7289_v55  ;;  %v7017_v31 = vsel %vm7016_vm14, %v7015_v24, 0 }
 0x791   : > { %vm22633_vm15 = vcmp.le.f32.partialorder %v7211_v41, 0.7853982  ;;  %v22637_v3 = vshrl.u32 %v7375_v32, 30  ;;  %v7019_v52 = vand.u32 31, %v7017_v31  ;;  %v7293_v10 = vcvt.s32.f32 %v7286_v51  ;;  %v23353_v41 = vld [vmem:[#allocation20_spill] sm:$0xff] }
 0x792   : > { %v14478_v40 = vadd.f32 %v14414_v27, %v7686_v48  ;;  %v7291_v44 = vand.u32 2147483647, %v7290_v7  ;;  %v7300_v30 = vsel %vm22633_vm15, 0, %v7298_v6  ;;  %v7012_v29 = vand.u32 8388607, %v7005_v34 }
 0x793   : > { %v7377_v37 = vshll.u32 %v22637_v3, 30  ;;  %v7020_v1 = vsub.s32 32, %v7019_v52  ;;  %v22646_v4 = vadd.f32 %v962_v33, %v23353_v41  ;;  %v22648_v46 = vand.u32 3, %v7300_v30 }
 0x794   : > { %14542 = vst [vmem:[%s16934_s6 + $0x1b8] sm:$0xff] %v14478_v40  ;;  %v7294_v53 = vmul.f32 %v7293_v10, %v7291_v44  ;;  %v14028_v59 = vadd.s32 3, %v7300_v30  ;;  %v7013_v6 = vor.u32 8388608, %v7012_v29  ;;  %v7018_v49 = vshrl.u32 %v7017_v31, 5 }
 0x795   : > { %v22650_v0 = vsub.s32 %v7374_v11, %v7377_v37  ;;  %v7023_v36 = vshrl.u32 %v23186_v5, %v7020_v1  ;;  %v7026_v54 = vshrl.u32 %v23187_v16, %v7020_v1  ;;  %v7029_v61 = vshrl.u32 %v23188_v47, %v7020_v1 }
 0x796   : > { %v7295_v42 = vxor.u32 2147483648, %v7294_v53  ;;  %v7022_v13 = vshll.u32 %v23185_v18, %v7019_v52  ;;  %v7025_v22 = vshll.u32 %v23186_v5, %v7019_v52  ;;  %v7028_v58 = vshll.u32 %v23187_v16, %v7019_v52 }
 0x797   : > { %v7380_v45 = vsub.s32 0, %v22650_v0  ;;  %v7031_v43 = vshll.u32 %v23188_v47, %v7019_v52  ;;  %v7032_v15 = vshrl.u32 %v23189_v63, %v7020_v1  ;;  %v7111_v39 = vand.u32 2139095040, %v22646_v4 }
 0x798   : > { %v7296_v56 = vsel %vm7213_vm2, %v7295_v42, %v7294_v53  ;;  %v7024_v57 = vor.u32 %v7023_v36, %v7022_v13  ;;  %v7027_v11 = vor.u32 %v7026_v54, %v7025_v22  ;;  %v7030_v24 = vor.u32 %v7029_v61, %v7028_v58 }
 0x799   : > { %v7299_v60 = vsel %vm22633_vm15, %v22390_v26, %v7296_v56  ;;  %v14900_v35 = vmin.u32 %v7380_v45, %v22650_v0  ;;  %v7033_v21 = vor.u32 %v7032_v15, %v7031_v43  ;;  %v7034_v51 = vshll.u32 %v23189_v63, %v7019_v52 }
 0x79a   : > { %15734 = vcosq.f32 %v7299_v60  ;;  %v7035_v55 = vshrl.u32 %v23191_v28, %v7020_v1  ;;  %v7370_v48 = vadd.s32 %v22586_v8, %v22593_v19  ;;  %v22672_v27 = vand.u32 3, %v14028_v59 }
 0x79b   : > { %15736 = vsinq.f32 %v7299_v60  ;;  %v7382_v2 = vclz %v14900_v35  ;;  %v22674_v32 = vshll.u32 %v7013_v6, 8  ;;  %v7108_v7 = vand.u32 2147483647, %v22646_v4 }
 0x79c   : > { %v7400_v31 = vsub.s32 4, %v22637_v3  ;;  %v7036_v40 = vor.u32 %v7035_v55, %v7034_v51  ;;  %vm7037_vm2 = vcmp.lt.s32.totalorder %v7018_v49, 1  ;;  %vm7316_vm3 = vcmp.lt.s32.totalorder %v22448_v38, 0 }
 0x79d   : > { %v14901_v33 = vadd.s32 4294967294, %v7382_v2  ;;  %v7021_v17 = vshrl.u32 %v23185_v18, %v7020_v1  ;;  %vm7039_vm1 = vcmp.lt.s32.totalorder %v7018_v49, 3  ;;  %vm7040_vm0 = vcmp.lt.s32.totalorder %v7018_v49, 4 }
 0x79e   : > { %v7045_v52 = vsel %vm7037_vm2, %v7024_v57, %v7027_v11  ;;  %v7042_v8 = vsel %vm7040_vm0, %v7030_v24, 2102212464  ;;  %v7046_v19 = vsel %vm7040_vm0, %v7033_v21, 920167782  ;;  %v7112_v44 = vshrl.u32 %v7111_v39, 23 }
 0x79f   : > { %vm14902_vm4 = vcmp.lt.s32.totalorder %v14901_v33, 0  ;;  %v7047_v30 = vsel %vm7039_vm1, %v7030_v24, %v7046_v19  ;;  %v7049_v29 = vsel %vm7037_vm2, %v7027_v11, %v7030_v24  ;;  %v7050_v37 = vsel %vm7040_vm0, %v7036_v40, 1326507024 }
 0x7a0   : > { %v7385_v10 = vsel %vm14902_vm4, 0, %v14901_v33  ;;  %vm22685_vm5 = vcmp.le.f32.partialorder %v7314_v25, 0.7853982  ;;  %vm7038_vm6 = vcmp.lt.s32.totalorder %v7018_v49, 2  ;;  %v7041_v59 = vsel %vm7037_vm2, %v7021_v17, %v7024_v57 }
 0x7a1   : > { %v7386_v1 = vsub.s32 32, %v7385_v10  ;;  %v7390_v41 = vsub.s32 4294967266, %v7385_v10  ;;  %vm7306_vm7 = vcmp.eq.s32.totalorder %v22648_v46, 0  ;;  %v7043_v36 = vsel %vm7039_vm1, %v7027_v11, %v7042_v8 }
 0x7a2   : > { %v7048_v42 = vsel %vm7038_vm6, %v7045_v52, %v7047_v30  ;;  %v7051_v6 = vsel %vm7039_vm1, %v7033_v21, %v7050_v37  ;;  %v14891_v54 = vadd.s32 4294967169, %v7112_v44  ;;  %vm7305_vm8 = vcmp.lt.s32.totalorder %v22648_v46, 2 }
 0x7a3   : > { %v7387_v25 = vshll.u32 %v22650_v0, %v7385_v10  ;;  %v7388_v61 = vshrl.u32 %v7370_v48, %v7386_v1  ;;  %v7391_v45 = vadd.s32 127, %v7390_v41  ;;  %v7052_v13 = vsel %vm7038_vm6, %v7049_v29, %v7051_v6 }
 0x7a4   : > { %v22698_v22 = vmul.u32.u64.low %v22674_v32, %v7052_v13  ;;  %v22699_v56 = vmul.u32.u64.high %v22674_v32, %v7052_v13, %v22698_v22  ;;  %v22702_v58 = vmul.u32.u64.low %v22674_v32, %v7048_v42  ;;  %v22703_v43 = vmul.u32.u64.high %v22674_v32, %v7048_v42, %v22702_v58 }
 0x7a5   : > { %v7389_v15 = vor.u32 %v7388_v61, %v7387_v25  ;;  %v7392_v60 = vshll.u32 %v7391_v45, 23  ;;  %v7044_v35 = vsel %vm7038_vm6, %v7041_v59, %v7043_v36  ;;  %v7118_v57 = vadd.s32 1, %v14891_v54 }
 0x7a6   : > { %vm7309_vm9 = vcmp.eq.s32.totalorder %v22648_v46, 2  ;;  %vm14030_vm10 = vcmp.lt.s32.totalorder %v22672_v27, 2  ;;  %vm14031_vm11 = vcmp.eq.s32.totalorder %v22672_v27, 0  ;;  %vm14034_vm12 = vcmp.eq.s32.totalorder %v22672_v27, 2 }
 0x7a7   : > { %v15735_v0 = vpop.eup %15734  ;;  %v7393_v39 = vor.u32 4788187, %v7392_v60  ;;  %v7401_v11 = vsel %vm7316_vm3, %v7400_v31, %v22637_v3  ;;  %v22716_v24 = vand.u32 8388607, %v7108_v7  ;;  %vm7119_vm13 = vcmp.gt.s32.totalorder %v7118_v57, 0 }
 0x7a8   : > { %v15737_v49 = vpop.eup %15736  ;;  %v7310_v21 = vxor.u32 2147483648, %v15735_v0  ;;  %v7060_v2 = vmul.u32 %v22674_v32, %v7044_v35  ;;  %vm7062_vm14 = vc.u32 %v22699_v56, %v22702_v58  ;;  %v7063_v51 = vadd.s32 1, %v22703_v43 }
 0x7a9   : > { %v7307_v55 = vxor.u32 2147483648, %v15737_v49  ;;  %v7394_v48 = vand.u32 2147483647, %v7393_v39  ;;  %v7396_v33 = vcvt.s32.f32 %v7389_v15  ;;  %v7120_v40 = vsel %vm7119_vm13, %v7118_v57, 0 }
 0x7aa   : > { %v7311_v3 = vsel %vm7309_vm9, %v7310_v21, %v15737_v49  ;;  %v7403_v31 = vsel %vm22685_vm5, 0, %v7401_v11  ;;  %v14036_v17 = vsel %vm14034_vm12, %v7310_v21, %v15737_v49  ;;  %v7064_v32 = vsel %vm7062_vm14, %v7063_v51, %v22703_v43 }
 0x7ab   : > { %v7308_v52 = vsel %vm7306_vm7, %v15735_v0, %v7307_v55  ;;  %v7397_v8 = vmul.f32 %v7396_v33, %v7394_v48  ;;  %v14033_v19 = vsel %vm14031_vm11, %v15735_v0, %v7307_v55  ;;  %v7065_v44 = vadd.s32 %v7064_v32, %v7060_v2 }
 0x7ac   : > { %vm7303_vm15 = vweird.f32 %v22390_v26  ;;  %v7312_v10 = vsel %vm7305_vm8, %v7308_v52, %v7311_v3  ;;  %v14037_v30 = vsel %vm14030_vm10, %v14033_v19, %v14036_v17  ;;  %v7122_v29 = vand.u32 31, %v7120_v40  ;;  %v893_v52 = vpop.permute.xlu1 %892 }
 0x7ad   : > { %v7313_v37 = vsel %vm7303_vm15, nan, %v7312_v10  ;;  %v7398_v1 = vxor.u32 2147483648, %v7397_v8  ;;  %v14038_v41 = vsel %vm7303_vm15, nan, %v14037_v30  ;;  %v7066_v59 = vadd.s32 536870912, %v7065_v44 }
 0x7ae   : > { %v22738_v36 = vand.u32 3, %v7403_v31  ;;  %v7691_v42 = vmul.f32 %v16711_v23, %v7313_v37  ;;  %v14419_v6 = vmul.f32 %v16718_v12, %v14038_v41  ;;  %v7123_v54 = vsub.s32 32, %v7122_v29 }
 0x7af   : > { %v7399_v26 = vsel %vm7316_vm3, %v7398_v1, %v7397_v8  ;;  %v14132_v46 = vadd.s32 3, %v7403_v31  ;;  %v22744_v25 = vshrl.u32 %v7066_v59, 30  ;;  %v7116_v27 = vor.u32 8388608, %v22716_v24 }
 0x7b0   : > { %v7402_v61 = vsel %vm22685_vm5, %v22448_v38, %v7399_v26  ;;  %v14483_v45 = vadd.f32 %v14419_v6, %v7691_v42  ;;  %v7121_v13 = vshrl.u32 %v7120_v40, 5  ;;  %v7126_v22 = vshrl.u32 %v23186_v5, %v7123_v54 }
 0x7b1   : > { %15738 = vcosq.f32 %v7402_v61  ;;  %v7068_v43 = vshll.u32 %v22744_v25, 30  ;;  %v7125_v15 = vshll.u32 %v23185_v18, %v7122_v29  ;;  %v7129_v60 = vshrl.u32 %v23187_v16, %v7123_v54 }
 0x7b2   : > { %15740 = vsinq.f32 %v7402_v61  ;;  %14547 = vst [vmem:[%s16934_s6 + $0x1e0] sm:$0xff] %v14483_v45  ;;  %v7128_v35 = vshll.u32 %v23186_v5, %v7122_v29  ;;  %v7131_v57 = vshll.u32 %v23187_v16, %v7122_v29  ;;  %v7132_v53 = vshrl.u32 %v23188_v47, %v7123_v54 }
 0x7b3   : > { %v22758_v0 = vsub.s32 %v7065_v44, %v7068_v43  ;;  %v7127_v39 = vor.u32 %v7126_v22, %v7125_v15  ;;  %v7134_v11 = vshll.u32 %v23188_v47, %v7122_v29  ;;  %v7135_v24 = vshrl.u32 %v23189_v63, %v7123_v54 }
 0x7b4   : > { %v7130_v49 = vor.u32 %v7129_v60, %v7128_v35  ;;  %v7133_v21 = vor.u32 %v7132_v53, %v7131_v57  ;;  %v7137_v2 = vshll.u32 %v23189_v63, %v7122_v29  ;;  %v7138_v51 = vshrl.u32 %v23191_v28, %v7123_v54  ;;  %v23356_v35 = vld [vmem:[#allocation5_spill] sm:$0xff] }
 0x7b5   : > { %v22764_v55 = vand.u32 3, %v14132_v46  ;;  %v7071_v48 = vsub.s32 0, %v22758_v0  ;;  %v7124_v33 = vshrl.u32 %v23185_v18, %v7123_v54  ;;  %v7136_v40 = vor.u32 %v7135_v24, %v7134_v11 }
 0x7b6   : > { %v7139_v3 = vor.u32 %v7138_v51, %v7137_v2  ;;  %vm7140_vm2 = vcmp.lt.s32.totalorder %v7121_v13, 1  ;;  %vm7141_vm3 = vcmp.lt.s32.totalorder %v7121_v13, 2  ;;  %v7156_v31 = vshll.u32 %v7116_v27, 8 }
 0x7b7   : > { %v14888_v17 = vmin.u32 %v7071_v48, %v22758_v0  ;;  %vm7142_vm1 = vcmp.lt.s32.totalorder %v7121_v13, 3  ;;  %vm7143_vm0 = vcmp.lt.s32.totalorder %v7121_v13, 4  ;;  %v7144_v32 = vsel %vm7140_vm2, %v7124_v33, %v7127_v39 }
 0x7b8   : > { %v7145_v8 = vsel %vm7143_vm0, %v7133_v21, 2102212464  ;;  %v7148_v19 = vsel %vm7140_vm2, %v7127_v39, %v7130_v49  ;;  %v7149_v44 = vsel %vm7143_vm0, %v7136_v40, 920167782  ;;  %v7152_v10 = vsel %vm7140_vm2, %v7130_v49, %v7133_v21 }
 0x7b9   : > { %vm7409_vm4 = vcmp.eq.s32.totalorder %v22738_v36, 0  ;;  %v7073_v30 = vclz %v14888_v17  ;;  %v7146_v29 = vsel %vm7142_vm1, %v7130_v49, %v7145_v8  ;;  %v7150_v37 = vsel %vm7142_vm1, %v7133_v21, %v7149_v44 }
 0x7ba   : > { %v7153_v1 = vsel %vm7143_vm0, %v7139_v3, 1326507024  ;;  %vm7408_vm5 = vcmp.lt.s32.totalorder %v22738_v36, 2  ;;  %vm7412_vm6 = vcmp.eq.s32.totalorder %v22738_v36, 2  ;;  %v7151_v41 = vsel %vm7141_vm3, %v7148_v19, %v7150_v37 }
 0x7bb   : > { %v7154_v59 = vsel %vm7142_vm1, %v7136_v40, %v7153_v1  ;;  %v965_v42 = vmul.f32 %v16575_v20, %v893_v52  ;;  %vm7406_vm7 = vweird.f32 %v22448_v38  ;;  %v14889_v6 = vadd.s32 4294967294, %v7073_v30  ;;  %v23357_v40 = vld [vmem:[#allocation6_spill] sm:$0xff] }
 0x7bc   : > { %v7155_v54 = vsel %vm7141_vm3, %v7152_v10, %v7154_v59  ;;  %v22779_v26 = vmul.u32.u64.low %v7156_v31, %v7151_v41  ;;  %v22780_v46 = vmul.u32.u64.high %v7156_v31, %v7151_v41, %v22779_v26  ;;  %vm14134_vm8 = vcmp.lt.s32.totalorder %v22764_v55, 2 }
 0x7bd   : > { %v7147_v27 = vsel %vm7141_vm3, %v7144_v32, %v7146_v29  ;;  %v22785_v61 = vmul.u32.u64.low %v7156_v31, %v7155_v54  ;;  %v22786_v45 = vmul.u32.u64.high %v7156_v31, %v7155_v54, %v22785_v61  ;;  %vm14135_vm9 = vcmp.eq.s32.totalorder %v22764_v55, 0 }
 0x7be   : > { %vm14138_vm10 = vcmp.eq.s32.totalorder %v22764_v55, 2  ;;  %vm14890_vm11 = vcmp.lt.s32.totalorder %v14889_v6, 0  ;;  %v966_v20 = vmul.f32 %v16578_v14, %v893_v52  ;;  %v15739_v22 = vpop.eup %15738  ;;  %v7061_v43 = vadd.s32 %v22702_v58, %v22699_v56 }
 0x7bf   : > { %v7076_v15 = vsel %vm14890_vm11, 0, %v14889_v6  ;;  %v7091_v60 = vsub.s32 4, %v22744_v25  ;;  %v22795_v13 = vadd.f32 %v965_v42, %v23356_v35  ;;  %v15741_v57 = vpop.eup %15740  ;;  %v7413_v53 = vxor.u32 2147483648, %v15739_v22 }
 0x7c0   : > { %v7077_v39 = vsub.s32 32, %v7076_v15  ;;  %v7081_v11 = vsub.s32 4294967266, %v7076_v15  ;;  %v7163_v24 = vmul.u32 %v7156_v31, %v7147_v27  ;;  %v7410_v49 = vxor.u32 2147483648, %v15741_v57 }
 0x7c1   : > { %v7078_v21 = vshll.u32 %v22758_v0, %v7076_v15  ;;  %vm7165_vm12 = vc.u32 %v22786_v45, %v22779_v26  ;;  %v7166_v14 = vadd.s32 1, %v22780_v46  ;;  %v7414_v56 = vsel %vm7412_vm6, %v7413_v53, %v15741_v57 }
 0x7c2   : > { %v14140_v58 = vsel %vm14138_vm10, %v7413_v53, %v15741_v57  ;;  %v7079_v2 = vshrl.u32 %v7061_v43, %v7077_v39  ;;  %v7082_v51 = vadd.s32 127, %v7081_v11  ;;  %v7411_v48 = vsel %vm7409_vm4, %v15739_v22, %v7410_v49 }
 0x7c3   : > { %v14137_v33 = vsel %vm14135_vm9, %v15739_v22, %v7410_v49  ;;  %v7167_v0 = vsel %vm7165_vm12, %v7166_v14, %v22780_v46  ;;  %v22811_v3 = vadd.f32 %v966_v20, %v23357_v40  ;;  %v7415_v31 = vsel %vm7408_vm5, %v7411_v48, %v7414_v56 }
 0x7c4   : > { %v14141_v17 = vsel %vm14134_vm8, %v14137_v33, %v14140_v58  ;;  %v7080_v32 = vor.u32 %v7079_v2, %v7078_v21  ;;  %v7083_v52 = vshll.u32 %v7082_v51, 23  ;;  %v7416_v8 = vsel %vm7406_vm7, nan, %v7415_v31 }
 0x7c5   : > { %v14142_v19 = vsel %vm7406_vm7, nan, %v14141_v17  ;;  %v7168_v44 = vadd.s32 %v7167_v0, %v7163_v24  ;;  %v7420_v10 = vand.u32 2139095040, %v22795_v13  ;;  %v7692_v30 = vmul.f32 %v16714_v50, %v7416_v8 }
 0x7c6   : > { %v14420_v36 = vmul.f32 %v16721_v62, %v14142_v19  ;;  %vm7007_vm13 = vcmp.lt.s32.totalorder %v22525_v9, 0  ;;  %v7084_v55 = vor.u32 4788187, %v7083_v52  ;;  %v7417_v1 = vand.u32 2147483647, %v22795_v13 }
 0x7c7   : > { %v7092_v29 = vsel %vm7007_vm13, %v7091_v60, %v22744_v25  ;;  %v7169_v37 = vadd.s32 536870912, %v7168_v44  ;;  %v7421_v38 = vshrl.u32 %v7420_v10, 23  ;;  %v7087_v42 = vcvt.s32.f32 %v7080_v32 }
 0x7c8   : > { %v14484_v41 = vadd.f32 %v14420_v36, %v7692_v30  ;;  %v7085_v59 = vand.u32 2147483647, %v7084_v55  ;;  %vm22831_vm14 = vcmp.le.f32.partialorder %v7005_v34, 0.7853982  ;;  %v7523_v27 = vand.u32 2139095040, %v22811_v3 }
 0x7c9   : > { %v22835_v54 = vshrl.u32 %v7169_v37, 30  ;;  %v14903_v46 = vadd.s32 4294967169, %v7421_v38  ;;  %v7094_v61 = vsel %vm22831_vm14, 0, %v7092_v29  ;;  %v7424_v22 = vand.u32 8388607, %v7417_v1 }
 0x7ca   : > { %14548 = vst [vmem:[%s16934_s6 + $0x1e8] sm:$0xff] %v14484_v41  ;;  %v7088_v25 = vmul.f32 %v7087_v42, %v7085_v59  ;;  %v7524_v15 = vshrl.u32 %v7523_v27, 23  ;;  %v13820_v35 = vadd.s32 3, %v7094_v61  ;;  %v22852_v14 = vand.u32 3, %v7094_v61 }
 0x7cb   : > { %v7171_v20 = vshll.u32 %v22835_v54, 30  ;;  %v7427_v43 = vadd.s32 1, %v14903_v46  ;;  %v7425_v24 = vor.u32 8388608, %v7424_v22  ;;  %v7164_v2 = vadd.s32 %v22779_v26, %v22786_v45 }
 0x7cc   : > { %v7089_v34 = vxor.u32 2147483648, %v7088_v25  ;;  %v14907_v49 = vadd.s32 4294967169, %v7524_v15  ;;  %v22855_v58 = vand.u32 3, %v13820_v35  ;;  %v7194_v51 = vsub.s32 4, %v22835_v54 }
 0x7cd   : > { %v22844_v60 = vsub.s32 %v7168_v44, %v7171_v20  ;;  %vm7428_vm15 = vcmp.gt.s32.totalorder %v7427_v43, 0  ;;  %v7520_v33 = vand.u32 2147483647, %v22811_v3  ;;  %v22861_v31 = vshll.u32 %v7425_v24, 8 }
 0x7ce   : > { %v7090_v57 = vsel %vm7007_vm13, %v7089_v34, %v7088_v25  ;;  %v7429_v53 = vsel %vm7428_vm15, %v7427_v43, 0  ;;  %v22863_v17 = vadd.s32 1, %v14907_v49  ;;  %vm7103_vm2 = vcmp.eq.s32.totalorder %v22852_v14, 2 }
 0x7cf   : > { %v7093_v39 = vsel %vm22831_vm14, %v22525_v9, %v7090_v57  ;;  %v7174_v11 = vsub.s32 0, %v22844_v60  ;;  %v7431_v21 = vand.u32 31, %v7429_v53  ;;  %v7430_v40 = vshrl.u32 %v7429_v53, 5 }
 0x7d0   : > { %15742 = vcosq.f32 %v7093_v39  ;;  %vm13826_vm1 = vcmp.eq.s32.totalorder %v22855_v58, 2  ;;  %vm7100_vm0 = vcmp.eq.s32.totalorder %v22852_v14, 0  ;;  %vm13823_vm4 = vcmp.eq.s32.totalorder %v22855_v58, 0 }
 0x7d1   : > { %15744 = vsinq.f32 %v7093_v39  ;;  %v14892_v56 = vmin.u32 %v7174_v11, %v22844_v60  ;;  %v7432_v48 = vsub.s32 32, %v7431_v21  ;;  %v7434_v32 = vshll.u32 %v23185_v18, %v7431_v21 }
 0x7d2   : > { %v7437_v52 = vshll.u32 %v23186_v5, %v7431_v21  ;;  %v7440_v8 = vshll.u32 %v23187_v16, %v7431_v21  ;;  %v7443_v19 = vshll.u32 %v23188_v47, %v7431_v21  ;;  %v7446_v55 = vshll.u32 %v23189_v63, %v7431_v21 }
 0x7d3   : > { %v7176_v0 = vclz %v14892_v56  ;;  %v7435_v45 = vshrl.u32 %v23186_v5, %v7432_v48  ;;  %v7438_v44 = vshrl.u32 %v23187_v16, %v7432_v48  ;;  %v7441_v10 = vshrl.u32 %v23188_v47, %v7432_v48 }
 0x7d4   : > { %v7433_v30 = vshrl.u32 %v23185_v18, %v7432_v48  ;;  %v7444_v36 = vshrl.u32 %v23189_v63, %v7432_v48  ;;  %v7447_v29 = vshrl.u32 %v23191_v28, %v7432_v48  ;;  %vm7449_vm5 = vcmp.lt.s32.totalorder %v7430_v40, 1 }
 0x7d5   : > { %v14893_v26 = vadd.s32 4294967294, %v7176_v0  ;;  %v7436_v37 = vor.u32 %v7435_v45, %v7434_v32  ;;  %v7439_v38 = vor.u32 %v7438_v44, %v7437_v52  ;;  %v7442_v41 = vor.u32 %v7441_v10, %v7440_v8 }
 0x7d6   : > { %v7445_v42 = vor.u32 %v7444_v36, %v7443_v19  ;;  %v7448_v6 = vor.u32 %v7447_v29, %v7446_v55  ;;  %vm7099_vm6 = vcmp.lt.s32.totalorder %v22852_v14, 2  ;;  %vm13822_vm7 = vcmp.lt.s32.totalorder %v22855_v58, 2 }
 0x7d7   : > { %vm14894_vm3 = vcmp.lt.s32.totalorder %v14893_v26, 0  ;;  %vm7450_vm8 = vcmp.lt.s32.totalorder %v7430_v40, 2  ;;  %vm7097_vm9 = vweird.f32 %v22525_v9  ;;  %vm7110_vm10 = vcmp.lt.s32.totalorder %v22646_v4, 0 }
 0x7d8   : > { %v7179_v59 = vsel %vm14894_vm3, 0, %v14893_v26  ;;  %vm7451_vm11 = vcmp.lt.s32.totalorder %v7430_v40, 3  ;;  %vm7452_vm12 = vcmp.lt.s32.totalorder %v7430_v40, 4  ;;  %v7453_v61 = vsel %vm7449_vm5, %v7433_v30, %v7436_v37 }
 0x7d9   : > { %v7180_v46 = vsub.s32 32, %v7179_v59  ;;  %v7181_v27 = vshll.u32 %v22844_v60, %v7179_v59  ;;  %v7184_v25 = vsub.s32 4294967266, %v7179_v59  ;;  %v7457_v20 = vsel %vm7449_vm5, %v7436_v37, %v7439_v38 }
 0x7da   : > { %v7454_v34 = vsel %vm7452_vm12, %v7442_v41, 2102212464  ;;  %v7458_v15 = vsel %vm7452_vm12, %v7445_v42, 920167782  ;;  %v7461_v57 = vsel %vm7449_vm5, %v7439_v38, %v7442_v41  ;;  %v7462_v53 = vsel %vm7452_vm12, %v7448_v6, 1326507024 }
 0x7db   : > { %v7182_v22 = vshrl.u32 %v7164_v2, %v7180_v46  ;;  %v7185_v43 = vadd.s32 127, %v7184_v25  ;;  %v7455_v60 = vsel %vm7451_vm11, %v7439_v38, %v7454_v34  ;;  %v7459_v35 = vsel %vm7451_vm11, %v7442_v41, %v7458_v15 }
 0x7dc   : > { %v7460_v49 = vsel %vm7450_vm8, %v7457_v20, %v7459_v35  ;;  %vm7531_vm13 = vcmp.gt.s32.totalorder %v22863_v17, 0  ;;  %v7463_v2 = vsel %vm7451_vm11, %v7445_v42, %v7462_v53  ;;  %v7456_v8 = vsel %vm7450_vm8, %v7453_v61, %v7455_v60 }
 0x7dd   : > { %v15743_v39 = vpop.eup %15742  ;;  %v7183_v11 = vor.u32 %v7182_v22, %v7181_v27  ;;  %v7186_v24 = vshll.u32 %v7185_v43, 23  ;;  %v22894_v48 = vmul.u32.u64.low %v22861_v31, %v7460_v49  ;;  %v22895_v0 = vmul.u32.u64.high %v22861_v31, %v7460_v49, %v22894_v48 }
 0x7de   : > { %v15745_v21 = vpop.eup %15744  ;;  %v7104_v56 = vxor.u32 2147483648, %v15743_v39  ;;  %v7464_v19 = vsel %vm7450_vm8, %v7461_v57, %v7463_v2  ;;  %v7532_v41 = vsel %vm7531_vm13, %v22863_v17, 0  ;;  %v7195_v14 = vsel %vm7110_vm10, %v7194_v51, %v22835_v54 }
 0x7df   : > { %v7101_v32 = vxor.u32 2147483648, %v15745_v21  ;;  %v7187_v52 = vor.u32 4788187, %v7186_v24  ;;  %v22905_v44 = vmul.u32.u64.low %v22861_v31, %v7464_v19  ;;  %v22906_v10 = vmul.u32.u64.high %v22861_v31, %v7464_v19, %v22905_v44 }
 0x7e0   : > { %v7105_v26 = vsel %vm7103_vm2, %v7104_v56, %v15745_v21  ;;  %v13828_v45 = vsel %vm13826_vm1, %v7104_v56, %v15745_v21  ;;  %v7190_v55 = vcvt.s32.f32 %v7183_v11  ;;  %v7475_v38 = vadd.s32 1, %v22895_v0 }
 0x7e1   : > { %v7102_v30 = vsel %vm7100_vm0, %v15743_v39, %v7101_v32  ;;  %v7188_v36 = vand.u32 2147483647, %v7187_v52  ;;  %v13825_v29 = vsel %vm13823_vm4, %v15743_v39, %v7101_v32  ;;  %v7472_v17 = vmul.u32 %v22861_v31, %v7456_v8 }
 0x7e2   : > { %v7106_v40 = vsel %vm7099_vm6, %v7102_v30, %v7105_v26  ;;  %v13829_v37 = vsel %vm13822_vm7, %v13825_v29, %v13828_v45  ;;  %vm7474_vm14 = vc.u32 %v22906_v10, %v22894_v48  ;;  %vm7109_vm15 = vcmp.le.f32.partialorder %v7108_v7, 0.7853982 }
 0x7e3   : > { %v7107_v59 = vsel %vm7097_vm9, nan, %v7106_v40  ;;  %v7191_v42 = vmul.f32 %v7190_v55, %v7188_v36  ;;  %v13830_v58 = vsel %vm7097_vm9, nan, %v13829_v37  ;;  %v7476_v25 = vsel %vm7474_vm14, %v7475_v38, %v22895_v0 }
 0x7e4   : > { %v7689_v6 = vmul.f32 %v16711_v23, %v7107_v59  ;;  %v14417_v46 = vmul.f32 %v16718_v12, %v13830_v58  ;;  %v7534_v54 = vand.u32 31, %v7532_v41  ;;  %v7197_v51 = vsel %vm7109_vm15, 0, %v7195_v14 }
 0x7e5   : > { %v7192_v27 = vxor.u32 2147483648, %v7191_v42  ;;  %v7477_v61 = vadd.s32 %v7476_v25, %v7472_v17  ;;  %v7527_v20 = vand.u32 8388607, %v7520_v33  ;;  %v7533_v31 = vshrl.u32 %v7532_v41, 5 }
 0x7e6   : > { %v14481_v9 = vadd.f32 %v14417_v46, %v7689_v6  ;;  %v7535_v43 = vsub.s32 32, %v7534_v54  ;;  %v7537_v34 = vshll.u32 %v23185_v18, %v7534_v54  ;;  %v7540_v60 = vshll.u32 %v23186_v5, %v7534_v54 }
 0x7e7   : > { %v7193_v22 = vsel %vm7110_vm10, %v7192_v27, %v7191_v42  ;;  %v7478_v7 = vadd.s32 536870912, %v7477_v61  ;;  %v7543_v35 = vshll.u32 %v23187_v16, %v7534_v54  ;;  %v7546_v39 = vshll.u32 %v23188_v47, %v7534_v54 }
 0x7e8   : > { %v7196_v15 = vsel %vm7109_vm15, %v22646_v4, %v7193_v22  ;;  %14545 = vst [vmem:[%s16934_s6 + $0x1d0] sm:$0xff] %v14481_v9  ;;  %v7538_v57 = vshrl.u32 %v23186_v5, %v7535_v43  ;;  %v7541_v53 = vshrl.u32 %v23187_v16, %v7535_v43  ;;  %v7544_v24 = vshrl.u32 %v23188_v47, %v7535_v43 }
 0x7e9   : > { %15746 = vcosq.f32 %v7196_v15  ;;  %v22949_v11 = vshrl.u32 %v7478_v7, 30  ;;  %v7547_v49 = vshrl.u32 %v23189_v63, %v7535_v43  ;;  %v7549_v2 = vshll.u32 %v23189_v63, %v7534_v54 }
 0x7ea   : > { %15748 = vsinq.f32 %v7196_v15  ;;  %v7539_v21 = vor.u32 %v7538_v57, %v7537_v34  ;;  %v7542_v56 = vor.u32 %v7541_v53, %v7540_v60  ;;  %v7550_v0 = vshrl.u32 %v23191_v28, %v7535_v43 }
 0x7eb   : > { %v7480_v32 = vshll.u32 %v22949_v11, 30  ;;  %v7545_v5 = vor.u32 %v7544_v24, %v7543_v35  ;;  %v7548_v52 = vor.u32 %v7547_v49, %v7546_v39  ;;  %vm7552_vm2 = vcmp.lt.s32.totalorder %v7533_v31, 1 }
 0x7ec   : > { %v7528_v16 = vor.u32 8388608, %v7527_v20  ;;  %v7551_v8 = vor.u32 %v7550_v0, %v7549_v2  ;;  %vm7555_vm3 = vcmp.lt.s32.totalorder %v7533_v31, 4  ;;  %v7560_v19 = vsel %vm7552_vm2, %v7539_v21, %v7542_v56 }
 0x7ed   : > { %v13924_v26 = vadd.s32 3, %v7197_v51  ;;  %v7481_v47 = vsub.s32 %v7477_v61, %v7480_v32  ;;  %vm7554_vm1 = vcmp.lt.s32.totalorder %v7533_v31, 3  ;;  %v7561_v45 = vsel %vm7555_vm3, %v7548_v52, 920167782 }
 0x7ee   : > { %vm7553_vm0 = vcmp.lt.s32.totalorder %v7533_v31, 2  ;;  %v7562_v44 = vsel %vm7554_vm1, %v7545_v5, %v7561_v45  ;;  %v7536_v28 = vshrl.u32 %v23185_v18, %v7535_v43  ;;  %v7557_v30 = vsel %vm7555_vm3, %v7545_v5, 2102212464 }
 0x7ef   : > { %v7483_v63 = vsub.s32 0, %v7481_v47  ;;  %v7563_v36 = vsel %vm7553_vm0, %v7560_v19, %v7562_v44  ;;  %v7201_v55 = vand.u32 3, %v7197_v51  ;;  %v7564_v29 = vsel %vm7552_vm2, %v7542_v56, %v7545_v5 }
 0x7f0   : > { %v7565_v40 = vsel %vm7555_vm3, %v7551_v8, 1326507024  ;;  %v7568_v37 = vshll.u32 %v7528_v16, 8  ;;  %v13925_v38 = vand.u32 3, %v13924_v26  ;;  %v7556_v59 = vsel %vm7552_vm2, %v7536_v28, %v7539_v21 }
 0x7f1   : > { %v14904_v41 = vmin.u32 %v7483_v63, %v7481_v47  ;;  %v7558_v42 = vsel %vm7554_vm1, %v7542_v56, %v7557_v30  ;;  %v7566_v14 = vsel %vm7554_vm1, %v7548_v52, %v7565_v40  ;;  %vm7200_vm4 = vweird.f32 %v22646_v4 }
 0x7f2   : > { %v22964_v58 = vmul.u32.u64.low %v7568_v37, %v7563_v36  ;;  %v22965_v6 = vmul.u32.u64.high %v7568_v37, %v7563_v36, %v22964_v58  ;;  %v7567_v46 = vsel %vm7553_vm0, %v7564_v29, %v7566_v14  ;;  %vm7202_vm5 = vcmp.lt.s32.totalorder %v7201_v55, 2 }
 0x7f3   : > { %v7485_v18 = vclz %v14904_v41  ;;  %v22970_v17 = vmul.u32.u64.low %v7568_v37, %v7567_v46  ;;  %v22971_v27 = vmul.u32.u64.high %v7568_v37, %v7567_v46, %v22970_v17  ;;  %vm7203_vm6 = vcmp.eq.s32.totalorder %v7201_v55, 0 }
 0x7f4   : > { %vm7206_vm7 = vcmp.eq.s32.totalorder %v7201_v55, 2  ;;  %v7559_v51 = vsel %vm7553_vm0, %v7556_v59, %v7558_v42  ;;  %vm13926_vm8 = vcmp.lt.s32.totalorder %v13925_v38, 2  ;;  %vm13927_vm9 = vcmp.eq.s32.totalorder %v13925_v38, 0 }
 0x7f5   : > { %v14905_v54 = vadd.s32 4294967294, %v7485_v18  ;;  %vm13930_vm10 = vcmp.eq.s32.totalorder %v13925_v38, 2  ;;  %v7473_v22 = vadd.s32 %v22894_v48, %v22906_v10  ;;  %v7578_v43 = vadd.s32 1, %v22965_v6 }
 0x7f6   : > { %v15747_v25 = vpop.eup %15746  ;;  %v7575_v60 = vmul.u32 %v7568_v37, %v7559_v51  ;;  %vm7577_vm12 = vc.u32 %v22971_v27, %v22964_v58  ;;  %vm7419_vm13 = vcmp.lt.s32.totalorder %v22795_v13, 0  ;;  %v7503_v55 = vsub.s32 4, %v22949_v11 }
 0x7f7   : > { %v15749_v9 = vpop.eup %15748  ;;  %v7207_v61 = vxor.u32 2147483648, %v15747_v25  ;;  %vm14906_vm11 = vcmp.lt.s32.totalorder %v14905_v54, 0  ;;  %v7579_v56 = vsel %vm7577_vm12, %v7578_v43, %v22965_v6  ;;  %vm7418_vm14 = vcmp.le.f32.partialorder %v7417_v1, 0.7853982 }
 0x7f8   : > { %v7204_v20 = vxor.u32 2147483648, %v15749_v9  ;;  %v7488_v7 = vsel %vm14906_vm11, 0, %v14905_v54  ;;  %v7580_v5 = vadd.s32 %v7579_v56, %v7575_v60  ;;  %v7504_v41 = vsel %vm7419_vm13, %v7503_v55, %v22949_v11 }
 0x7f9   : > { %v7208_v34 = vsel %vm7206_vm7, %v7207_v61, %v15749_v9  ;;  %v13932_v15 = vsel %vm13930_vm10, %v7207_v61, %v15749_v9  ;;  %v7489_v57 = vsub.s32 32, %v7488_v7  ;;  %v7490_v53 = vshll.u32 %v7481_v47, %v7488_v7 }
 0x7fa   : > { %v7205_v35 = vsel %vm7203_vm6, %v15747_v25, %v7204_v20  ;;  %v13929_v31 = vsel %vm13927_vm9, %v15747_v25, %v7204_v20  ;;  %v7493_v49 = vsub.s32 4294967266, %v7488_v7  ;;  %v7581_v19 = vadd.s32 536870912, %v7580_v5 }
 0x7fb   : > { %v7209_v39 = vsel %vm7202_vm5, %v7205_v35, %v7208_v34  ;;  %v13933_v24 = vsel %vm13926_vm8, %v13929_v31, %v13932_v15  ;;  %v7491_v21 = vshrl.u32 %v7473_v22, %v7489_v57  ;;  %v7506_v42 = vsel %vm7418_vm14, 0, %v7504_v41 }
 0x7fc   : > { %v7210_v48 = vsel %vm7200_vm4, nan, %v7209_v39  ;;  %v13934_v10 = vsel %vm7200_vm4, nan, %v13933_v24  ;;  %v7494_v32 = vadd.s32 127, %v7493_v49  ;;  %v22990_v47 = vshrl.u32 %v7581_v19, 30 }
 0x7fd   : > { %v7690_v2 = vmul.f32 %v16714_v50, %v7210_v48  ;;  %v14418_v0 = vmul.f32 %v16721_v62, %v13934_v10  ;;  %v7492_v16 = vor.u32 %v7491_v21, %v7490_v53  ;;  %v7576_v6 = vadd.s32 %v22964_v58, %v22971_v27 }
 0x7fe   : > { %v7495_v8 = vshll.u32 %v7494_v32, 23  ;;  %v7583_v44 = vshll.u32 %v22990_v47, 30  ;;  %v14236_v17 = vadd.s32 3, %v7506_v42  ;;  %v7510_v61 = vand.u32 3, %v7506_v42 }
 0x7ff   : > { %v14482_v52 = vadd.f32 %v14418_v0, %v7690_v2  ;;  %v7499_v4 = vcvt.s32.f32 %v7492_v16  ;;  %vm7509_vm6 = vweird.f32 %v22795_v13  ;;  %vm7522_vm7 = vcmp.lt.s32.totalorder %v22811_v3, 0 }
 0x800   : > { %v7496_v26 = vor.u32 4788187, %v7495_v8  ;;  %v7584_v28 = vsub.s32 %v7580_v5, %v7583_v44  ;;  %v14237_v20 = vand.u32 3, %v14236_v17  ;;  %vm7512_vm2 = vcmp.eq.s32.totalorder %v7510_v61, 0 }
 0x801   : > { %14546 = vst [vmem:[%s16934_s6 + $0x1d8] sm:$0xff] %v14482_v52  ;;  %vm7515_vm3 = vcmp.eq.s32.totalorder %v7510_v61, 2  ;;  %vm7511_vm4 = vcmp.lt.s32.totalorder %v7510_v61, 2  ;;  %v7606_v48 = vsub.s32 4, %v22990_v47  ;;  %vm7521_vm8 = vcmp.le.f32.partialorder %v7520_v33, 0.7853982 }
 0x802   : > { %v7497_v45 = vand.u32 2147483647, %v7496_v26  ;;  %v7586_v36 = vsub.s32 0, %v7584_v28  ;;  %vm14242_vm1 = vcmp.eq.s32.totalorder %v14237_v20, 2  ;;  %vm14239_vm0 = vcmp.eq.s32.totalorder %v14237_v20, 0 }
 0x803   : > { %vm14238_vm5 = vcmp.lt.s32.totalorder %v14237_v20, 2  ;;  %v7607_v32 = vsel %vm7522_vm7, %v7606_v48, %v22990_v47 }
 0x804   : > { %v7500_v63 = vmul.f32 %v7499_v4, %v7497_v45  ;;  %v14908_v40 = vmin.u32 %v7586_v36, %v7584_v28  ;;  %v7609_v5 = vsel %vm7521_vm8, 0, %v7607_v32 }
 0x805   : > { %v14340_v52 = vadd.s32 3, %v7609_v5  ;;  %v7613_v16 = vand.u32 3, %v7609_v5 }
 0x806   : > { %v7501_v30 = vxor.u32 2147483648, %v7500_v63  ;;  %v7588_v38 = vclz %v14908_v40 }
 0x807   : > { %v14341_v8 = vand.u32 3, %v14340_v52  ;;  %vm7618_vm9 = vcmp.eq.s32.totalorder %v7613_v16, 2  ;;  %vm7615_vm11 = vcmp.eq.s32.totalorder %v7613_v16, 0 }
 0x808   : > { %v7502_v29 = vsel %vm7419_vm13, %v7501_v30, %v7500_v63  ;;  %v14909_v59 = vadd.s32 4294967294, %v7588_v38  ;;  %vm7614_vm13 = vcmp.lt.s32.totalorder %v7613_v16, 2 }
 0x809   : > { %v7505_v37 = vsel %vm7418_vm14, %v22795_v13, %v7502_v29  ;;  %vm14346_vm10 = vcmp.eq.s32.totalorder %v14341_v8, 2  ;;  %vm14343_vm12 = vcmp.eq.s32.totalorder %v14341_v8, 0  ;;  %vm14342_vm14 = vcmp.lt.s32.totalorder %v14341_v8, 2 }
 0x80a   : > { %15750 = vcosq.f32 %v7505_v37  ;;  %vm14910_vm15 = vcmp.lt.s32.totalorder %v14909_v59, 0 }
 0x80b   : > { %15752 = vsinq.f32 %v7505_v37  ;;  %v7591_v14 = vsel %vm14910_vm15, 0, %v14909_v59  ;;  %vm7612_vm15 = vweird.f32 %v22811_v3 }
 0x80c   : > { %v7592_v18 = vsub.s32 32, %v7591_v14  ;;  %v7596_v46 = vsub.s32 4294967266, %v7591_v14  ;;  %v7593_v1 = vshll.u32 %v7584_v28, %v7591_v14 }
 0x80e   : > { %v7594_v25 = vshrl.u32 %v7576_v6, %v7592_v18  ;;  %v7597_v54 = vadd.s32 127, %v7596_v46 }
 0x810   : > { %v7595_v51 = vor.u32 %v7594_v25, %v7593_v1  ;;  %v7598_v9 = vshll.u32 %v7597_v54, 23 }
 0x812   : > { %v7599_v22 = vor.u32 4788187, %v7598_v9  ;;  %v7602_v7 = vcvt.s32.f32 %v7595_v51 }
 0x814   : > { %v7600_v15 = vand.u32 2147483647, %v7599_v22 }
 0x816   : > { %v7603_v27 = vmul.f32 %v7602_v7, %v7600_v15 }
 0x817   : > { %v15751_v11 = vpop.eup %15750 }
 0x818   : > { %v15753_v43 = vpop.eup %15752  ;;  %v7516_v34 = vxor.u32 2147483648, %v15751_v11  ;;  %v7604_v39 = vxor.u32 2147483648, %v7603_v27 }
 0x819   : > { %v7513_v60 = vxor.u32 2147483648, %v15753_v43 }
 0x81a   : > { %v7517_v58 = vsel %vm7515_vm3, %v7516_v34, %v15753_v43  ;;  %v14244_v35 = vsel %vm14242_vm1, %v7516_v34, %v15753_v43  ;;  %v7605_v21 = vsel %vm7522_vm7, %v7604_v39, %v7603_v27 }
 0x81b   : > { %v7514_v31 = vsel %vm7512_vm2, %v15751_v11, %v7513_v60  ;;  %v14241_v57 = vsel %vm14239_vm0, %v15751_v11, %v7513_v60  ;;  %v7608_v13 = vsel %vm7521_vm8, %v22811_v3, %v7605_v21 }
 0x81c   : > { %v7518_v53 = vsel %vm7511_vm4, %v7514_v31, %v7517_v58  ;;  %v14245_v24 = vsel %vm14238_vm5, %v14241_v57, %v14244_v35  ;;  %15754 = vcosq.f32 %v7608_v13 }
 0x81d   : > { %v7519_v49 = vsel %vm7509_vm6, nan, %v7518_v53  ;;  %v14246_v10 = vsel %vm7509_vm6, nan, %v14245_v24  ;;  %15756 = vsinq.f32 %v7608_v13 }
 0x81e   : > { %v7693_v56 = vmul.f32 %v16711_v23, %v7519_v49  ;;  %v14421_v2 = vmul.f32 %v16718_v12, %v14246_v10 }
 0x820   : > { %v14485_v0 = vadd.f32 %v14421_v2, %v7693_v56 }
 0x822   : > { %14549 = vst [vmem:[%s16934_s6 + $0x1f0] sm:$0xff] %v14485_v0 }
 0x829   : > { %v15755_v19 = vpop.eup %15754 }
 0x82a   : > { %v15757_v26 = vpop.eup %15756  ;;  %v7619_v33 = vxor.u32 2147483648, %v15755_v19 }
 0x82b   : > { %v7616_v23 = vxor.u32 2147483648, %v15757_v26 }
 0x82c   : > { %v7620_v12 = vsel %vm7618_vm9, %v7619_v33, %v15757_v26  ;;  %v14348_v45 = vsel %vm14346_vm10, %v7619_v33, %v15757_v26 }
 0x82d   : > { %v7617_v47 = vsel %vm7615_vm11, %v15755_v19, %v7616_v23  ;;  %v14345_v4 = vsel %vm14343_vm12, %v15755_v19, %v7616_v23 }
 0x82e   : > { %v7621_v44 = vsel %vm7614_vm13, %v7617_v47, %v7620_v12  ;;  %v14349_v63 = vsel %vm14342_vm14, %v14345_v4, %v14348_v45 }
 0x82f   : > { %v7622_v28 = vsel %vm7612_vm15, nan, %v7621_v44  ;;  %v14350_v30 = vsel %vm7612_vm15, nan, %v14349_v63 }
 0x830   : > { %v7694_v36 = vmul.f32 %v16714_v50, %v7622_v28  ;;  %v14422_v55 = vmul.f32 %v16721_v62, %v14350_v30 }
 0x832   : > { %v14486_v3 = vadd.f32 %v14422_v55, %v7694_v36 }
 0x834   : > { %14550 = vst [vmem:[%s16934_s6 + $0x1f8] sm:$0xff] %v14486_v3 }
 0x835   : > { %15771 = shalt.err (!%p15768_p5)
}
 0x836   : > { %s15772_s26 = scalar_lea.hbm %s23019_s18, 8192  ;;  %s15776_s29 = scalar_lea.hbm %s23073_s2, 16384 }
 0x837   : > { %p15773_p6 = scmp.ne.s32.totalorder %s23019_s18, %s15772_s26  ;;  %p15777_p10 = scmp.lt.s32.totalorder %s23019_s18, %s23073_s2 }
 0x838   : > { %p15778_p11 = scmp.lt.s32.totalorder %s15776_s29, %s15772_s26 }
 0x839   : > { %p15774_p7 = pnand %p15773_p6, %p15903_p4 }
 0x83a   : > { %p15779_p12 = por %p15778_p11, %p15777_p10 }
 0x83b   : > { %p15775_p9 = pneg %p15774_p7 }
 0x83d   : > { %p15780_p13 = pnand %p15779_p12, %p15775_p9 }
 0x83f   : > { %15783 = shalt.err (!%p15780_p13)
}
 0x840   : > { %s15846_s4 = smov 256   ;;  %s15847_s5 = smov 16  }
 0x841   : > { %15430 = dma.vmem_to_hbm [thread:$0]  (%p15903_p4), %s23021_s8, 8192, %s23019_s18, %s23026_s12, %s15846_s4, %s15846_s4, %s15847_s5  }
 0x842 PF: > { %p15436_p0 = scmp.ge.s32.totalorder %s15834_s14, 2  ;;  %s14583_s6 = sand.u32 1, %s15814_s9  }
 0x843   : > { %s14584_s7 = scalar_lea.sflag [#allocation3], %s14583_s6 }
 0x844   : > { %p15433_p1 = pnand %p15436_p0, %p15910_p8 }
 0x846   : > { %p15434_p2 = pneg %p15433_p1 }
 0x848   : > { %15809 = dma.done.wait (%p15434_p2), %s14584_s7, 8192  }
 0x849   : > { %15811 = vsyncadd (%p15434_p2), %s14584_s7, 4294959104  ;;  %s15_s14 = sadd.s32 1, %s15834_s14   ;;  %s23360_s9 = smov %s15818_s10 }
 0x84a   : > { %p12_p3 = scmp.ge.s32.totalorder %s15_s14, 4   ;;  %s23361_s10 = smov %s15822_s11 }
 0x84b   : > { %s23362_s11 = smov %s15916_s22  ;;  %s23363_s12 = smov %s15830_s13 }
 0x84c   : > { %s23364_s13 = smov %s23366_s17  ;;  %14 = sbr.rel (!%p12_p3) target bundleno = 4 (0x4), region = 63 }
 0x851   :  { %14589 = vsyncpa [#allocation3], 1 }
 0x852   :  { %14591 = vsyncpa [#allocation3 + $0x1], 1 }

</bundles_post_ra>
